<compile_context>
chip_gen: v7x
topology: tpu7x:2x2x1
jax: 0.10.0
libtpu: 0.0.40
codegen_flags: <defaults>
</compile_context>

<pallas_src>
import jax
import jax.numpy as jnp
from jax.experimental import pallas as pl
from jax.experimental.pallas import tpu as pltpu


# ---------------------------------------------------------------------------
# Pallas kernel: per-mode complex channel mixing
#   out[o, b, m] = sum_i x[i, b, m] * w[i, o, m]        (complex arithmetic,
# carried as separate real / imag float32 planes)
# ---------------------------------------------------------------------------
def _spectral_mix_kernel(xr_ref, xi_ref, wr_ref, wi_ref, or_ref, oi_ref):
    # xr_ref / xi_ref : (Cin, B, m_tile)       batch on sublanes, modes on lanes
    # wr_ref / wi_ref : (Cin, co_tile, m_tile) complex weights (real / imag)
    # or_ref / oi_ref : (co_tile, B, m_tile)
    cin, b, mt = xr_ref.shape
    cot = wr_ref.shape[1]

    # Accumulation loop over Cin: live state is just 2*cot accumulators of
    # shape (B, m_tile) (<= ~half the vreg file for the tile sizes chosen in
    # spectral_mix), instead of materializing (Cin, Cout, M) broadcast products.
    acc_r = [jnp.zeros((b, mt), jnp.float32) for _ in range(cot)]
    acc_i = [jnp.zeros((b, mt), jnp.float32) for _ in range(cot)]

    for i in range(cin):
        xr = xr_ref[i]                      # (B, m_tile) — loaded once per i,
        xi = xi_ref[i]                      # reused for every output channel
        for o in range(cot):
            wr = wr_ref[i, o:o + 1, :]      # (1, m_tile) -> broadcast over B sublanes
            wi = wi_ref[i, o:o + 1, :]
            # (xr + i*xi) * (wr + i*wi)
            acc_r[o] = acc_r[o] + (xr * wr - xi * wi)
            acc_i[o] = acc_i[o] + (xr * wi + xi * wr)

    # Each output plane is written exactly once, as a full-lane store.
    for o in range(cot):
        or_ref[o] = acc_r[o]
        oi_ref[o] = acc_i[o]


def spectral_mix(xr, xi, wr, wi, *, m_tile=None, co_tile=None):
    """out[o,b,m] = sum_i x[i,b,m] * w[i,o,m] (complex, real/imag f32 planes).

    xr, xi : (Cin, B, Mp)      wr, wi : (Cin, Cout, Mp)   with Mp % 128 == 0.
    Returns (out_real, out_imag), each (Cout, B, Mp) float32.
    """
    Cin, B, Mp = xr.shape
    _, Cout, _ = wr.shape
    assert Mp % 128 == 0, "mode axis must be padded to a multiple of 128"

    # Tile heuristics: keep the accumulator set small (vreg-resident) and the
    # per-step VMEM working set a few hundred KiB.
    if m_tile is None:
        m_tile = min(Mp, 256)
    assert Mp % m_tile == 0
    if co_tile is None:
        co_tile = 8 if (Cout % 8 == 0) else Cout
    assert Cout % co_tile == 0

    grid = (Mp // m_tile, Cout // co_tile)   # both axes parallel (megacore)

    # x depends only on the mode-tile axis (outer), so it is not re-fetched
    # across the inner Cout-tile steps.
    x_spec = pl.BlockSpec((Cin, B, m_tile), lambda mt, co: (0, 0, mt))
    w_spec = pl.BlockSpec((Cin, co_tile, m_tile), lambda mt, co: (0, co, mt))
    o_spec = pl.BlockSpec((co_tile, B, m_tile), lambda mt, co: (co, 0, mt))

    # Advisory cost estimate so XLA schedules this next to the FFTs sensibly.
    flops = 8 * B * Cin * Cout * Mp                      # complex mul-add
    bytes_accessed = 4 * 2 * (Cin * B * Mp + Cin * Cout * Mp + Cout * B * Mp)

    # Scoped-VMEM budget from the actual double-buffered tile working set
    # (kept <= 48 MiB so it is valid on v5e/v6e/v7x alike).
    step_bytes = 4 * 2 * 2 * (Cin * B * m_tile
                              + Cin * co_tile * m_tile
                              + co_tile * B * m_tile)
    vmem_limit = int(min(max(4 * step_bytes, 32 * 1024 * 1024), 48 * 1024 * 1024))

    return pl.pallas_call(
        _spectral_mix_kernel,
        out_shape=(jax.ShapeDtypeStruct((Cout, B, Mp), jnp.float32),
                   jax.ShapeDtypeStruct((Cout, B, Mp), jnp.float32)),
        grid=grid,
        in_specs=[x_spec, x_spec, w_spec, w_spec],
        out_specs=(o_spec, o_spec),
        compiler_params=pltpu.CompilerParams(
            dimension_semantics=("parallel", "parallel"),
            vmem_limit_bytes=vmem_limit),
        cost_estimate=pl.CostEstimate(flops=flops, transcendentals=0,
                                      bytes_accessed=bytes_accessed),
    )(xr, xi, wr, wi)


# ---------------------------------------------------------------------------
# SpectralConv3d forward (FFT glue around the Pallas kernel)
# ---------------------------------------------------------------------------
def _pad_last(a, target):
    pad = target - a.shape[-1]
    if pad == 0:
        return a
    return jnp.pad(a, [(0, 0)] * (a.ndim - 1) + [(0, pad)])


def spectral_conv3d(x, w_real, w_imag):
    """Equivalent to the PyTorch SpectralConv3d.forward (single low-freq corner)."""
    B, C, D, H, W = x.shape
    Cin, Cout, m1, m2, m3 = w_real.shape
    # out_ft = zeros_like(x_ft) in the PyTorch module forces in_c == out_c.
    assert Cin == C and Cout == Cin

    x_ft = jnp.fft.rfftn(x, axes=(2, 3, 4))               # (B,C,D,H,W//2+1) c64
    x_low = x_ft[:, :, :m1, :m2, :m3]                     # (B,C,m1,m2,m3)

    M = m1 * m2 * m3
    Mp = -(-M // 128) * 128                               # lane-dense padding

    # Re-layout: (Cin, B, M) — batch on sublanes, flattened modes on lanes.
    xr = jnp.transpose(jnp.real(x_low).reshape(B, C, M), (1, 0, 2)).astype(jnp.float32)
    xi = jnp.transpose(jnp.imag(x_low).reshape(B, C, M), (1, 0, 2)).astype(jnp.float32)
    wr = w_real.reshape(Cin, Cout, M).astype(jnp.float32)
    wi = w_imag.reshape(Cin, Cout, M).astype(jnp.float32)

    xr, xi, wr, wi = [_pad_last(a, Mp) for a in (xr, xi, wr, wi)]

    o_r, o_i = spectral_mix(xr, xi, wr, wi)               # (Cout, B, Mp) x2

    o_r = jnp.transpose(o_r[:, :, :M], (1, 0, 2)).reshape(B, Cout, m1, m2, m3)
    o_i = jnp.transpose(o_i[:, :, :M], (1, 0, 2)).reshape(B, Cout, m1, m2, m3)
    out_low = (o_r + 1j * o_i).astype(jnp.complex64)

    out_ft = jnp.zeros_like(x_ft).at[:, :, :m1, :m2, :m3].set(out_low)
    return jnp.fft.irfftn(out_ft, s=(D, H, W), axes=(2, 3, 4)).astype(x.dtype)


def _spectral_conv3d_ref(x, w_real, w_imag):
    """Pure-JAX reference mirroring the PyTorch SpectralConv3d.forward."""
    B, C, D, H, W = x.shape
    _, _, m1, m2, m3 = w_real.shape
    x_ft = jnp.fft.rfftn(x, axes=(2, 3, 4))
    w = (w_real + 1j * w_imag).astype(jnp.complex64)
    mixed = jnp.einsum('bixyz,ioxyz->boxyz', x_ft[:, :, :m1, :m2, :m3], w)
    out_ft = jnp.zeros_like(x_ft).at[:, :, :m1, :m2, :m3].set(mixed)
    return jnp.fft.irfftn(out_ft, s=(D, H, W), axes=(2, 3, 4)).astype(x.dtype)


# ---------------------------------------------------------------------------
# FNO3D forward (fc0 -> 4 x [spectral + 1x1 conv + relu] -> fc1 -> fc2+sigmoid)
# ---------------------------------------------------------------------------
def fno3d_forward(params, x, spectral_fn):
    # x: (B, D, H, W, in_c + 3)
    h = x @ params['fc0_w'].T + params['fc0_b']            # (B,D,H,W,width)
    h = jnp.transpose(h, (0, 4, 1, 2, 3))                  # (B,width,D,H,W)
    for wr, wi, pw, pb in zip(params['spec_wr'], params['spec_wi'],
                              params['ws_w'], params['ws_b']):
        x1 = spectral_fn(h, wr, wi)
        x2 = jnp.einsum('bcdhw,oc->bodhw', h, pw) + pb[None, :, None, None, None]
        h = jax.nn.relu(x1 + x2)
    h = jnp.transpose(h, (0, 2, 3, 4, 1))                  # (B,D,H,W,width)
    h = jax.nn.relu(h @ params['fc1_w'].T + params['fc1_b'])
    h = h @ params['fc2_w'].T + params['fc2_b']
    return jax.nn.sigmoid(h)


def init_fno3d_params(key, in_c, out_c, width, m1, m2, m3, n_layers=4):
    ks = jax.random.split(key, 4 + 4 * n_layers)
    p = {}
    p['fc0_w'] = 0.1 * jax.random.normal(ks[0], (width, in_c + 3), jnp.float32)
    p['fc0_b'] = jnp.zeros((width,), jnp.float32)
    spec_scale = 1.0 / (width * width)
    p['spec_wr'], p['spec_wi'], p['ws_w'], p['ws_b'] = [], [], [], []
    idx = 1
    for _ in range(n_layers):
        p['spec_wr'].append(spec_scale * jax.random.normal(
            ks[idx], (width, width, m1, m2, m3), jnp.float32)); idx += 1
        p['spec_wi'].append(spec_scale * jax.random.normal(
            ks[idx], (width, width, m1, m2, m3), jnp.float32)); idx += 1
        p['ws_w'].append((width ** -0.5) * jax.random.normal(
            ks[idx], (width, width), jnp.float32)); idx += 1
        p['ws_b'].append(0.01 * jax.random.normal(
            ks[idx], (width,), jnp.float32)); idx += 1
    p['fc1_w'] = 0.1 * jax.random.normal(ks[idx], (128, width), jnp.float32); idx += 1
    p['fc1_b'] = jnp.zeros((128,), jnp.float32)
    p['fc2_w'] = 0.1 * jax.random.normal(ks[idx + 1], (out_c, 128), jnp.float32)
    p['fc2_b'] = jnp.zeros((out_c,), jnp.float32)
    return p


if __name__ == "__main__":
    # Small shapes consistent with the module: FNO3D(m1=4, m2=4, m3=3, width=16)
    B, D, H, W = 2, 8, 8, 8
    in_c, out_c, width = 3, 3, 16
    m1, m2, m3 = 4, 4, 3

    key = jax.random.PRNGKey(0)
    kx, kp, kh = jax.random.split(key, 3)

    x = jax.random.normal(kx, (B, D, H, W, in_c + 3), dtype=jnp.float32)
    params = init_fno3d_params(kp, in_c, out_c, width, m1, m2, m3)

    # Standalone check of the Pallas spectral layer against the pure-JAX ref.
    h = jax.random.normal(kh, (B, width, D, H, W), dtype=jnp.float32)
    s_pl = jax.block_until_ready(
        spectral_conv3d(h, params['spec_wr'][0], params['spec_wi'][0]))
    s_ref = jax.block_until_ready(
        _spectral_conv3d_ref(h, params['spec_wr'][0], params['spec_wi'][0]))
    assert s_pl.shape == (B, width, D, H, W)
    assert jnp.allclose(s_pl, s_ref, atol=1e-4, rtol=1e-4), "spectral conv mismatch"

    # Full FNO3D forward with the Pallas spectral kernel vs. pure-JAX reference.
    fwd = jax.jit(lambda p, a: fno3d_forward(p, a, spectral_conv3d))
    ref = jax.jit(lambda p, a: fno3d_forward(p, a, _spectral_conv3d_ref))

    out = jax.block_until_ready(fwd(params, x))
    out_ref = jax.block_until_ready(ref(params, x))

    assert out.shape == (B, D, H, W, out_c)
    assert jnp.allclose(out, out_ref, atol=1e-4, rtol=1e-4), "FNO3D mismatch"

    print("KERNEL_OK")
</pallas_src>

<mosaic_0001>
module attributes {stable_mosaic.version = 11 : i64} {
  func.func @_spectral_mix_kernel(%arg0: i32, %arg1: i32, %arg2: memref<16x2x128xf32, #tpu.memory_space<vmem>>, %arg3: memref<16x2x128xf32, #tpu.memory_space<vmem>>, %arg4: memref<16x8x128xf32, #tpu.memory_space<vmem>>, %arg5: memref<16x8x128xf32, #tpu.memory_space<vmem>>, %arg6: memref<8x2x128xf32, #tpu.memory_space<vmem>>, %arg7: memref<8x2x128xf32, #tpu.memory_space<vmem>>) attributes {dimension_semantics = [#tpu.dimension_semantics<parallel>, #tpu.dimension_semantics<parallel>], iteration_bounds = array<i64: 1, 2>, scalar_prefetch = 0 : i64, scratch_operands = 0 : i64, tpu.core_type = #tpu.core_type<tc>, window_params = [{transform_indices = @transform_0, window_bounds = array<i64: 16, 2, 128>}, {transform_indices = @transform_1, window_bounds = array<i64: 16, 2, 128>}, {transform_indices = @transform_2, window_bounds = array<i64: 16, 8, 128>}, {transform_indices = @transform_3, window_bounds = array<i64: 16, 8, 128>}, {transform_indices = @transform_4, window_bounds = array<i64: 8, 2, 128>}, {transform_indices = @transform_5, window_bounds = array<i64: 8, 2, 128>}]} {
    %cst = arith.constant 0.000000e+00 : f32
    %0 = vector.broadcast %cst : f32 to vector<2x128xf32>
    %cst_0 = arith.constant 0.000000e+00 : f32
    %1 = vector.broadcast %cst_0 : f32 to vector<2x128xf32>
    %cst_1 = arith.constant 0.000000e+00 : f32
    %2 = vector.broadcast %cst_1 : f32 to vector<2x128xf32>
    %cst_2 = arith.constant 0.000000e+00 : f32
    %3 = vector.broadcast %cst_2 : f32 to vector<2x128xf32>
    %cst_3 = arith.constant 0.000000e+00 : f32
    %4 = vector.broadcast %cst_3 : f32 to vector<2x128xf32>
    %cst_4 = arith.constant 0.000000e+00 : f32
    %5 = vector.broadcast %cst_4 : f32 to vector<2x128xf32>
    %cst_5 = arith.constant 0.000000e+00 : f32
    %6 = vector.broadcast %cst_5 : f32 to vector<2x128xf32>
    %cst_6 = arith.constant 0.000000e+00 : f32
    %7 = vector.broadcast %cst_6 : f32 to vector<2x128xf32>
    %cst_7 = arith.constant 0.000000e+00 : f32
    %8 = vector.broadcast %cst_7 : f32 to vector<2x128xf32>
    %cst_8 = arith.constant 0.000000e+00 : f32
    %9 = vector.broadcast %cst_8 : f32 to vector<2x128xf32>
    %cst_9 = arith.constant 0.000000e+00 : f32
    %10 = vector.broadcast %cst_9 : f32 to vector<2x128xf32>
    %cst_10 = arith.constant 0.000000e+00 : f32
    %11 = vector.broadcast %cst_10 : f32 to vector<2x128xf32>
    %cst_11 = arith.constant 0.000000e+00 : f32
    %12 = vector.broadcast %cst_11 : f32 to vector<2x128xf32>
    %cst_12 = arith.constant 0.000000e+00 : f32
    %13 = vector.broadcast %cst_12 : f32 to vector<2x128xf32>
    %cst_13 = arith.constant 0.000000e+00 : f32
    %14 = vector.broadcast %cst_13 : f32 to vector<2x128xf32>
    %cst_14 = arith.constant 0.000000e+00 : f32
    %15 = vector.broadcast %cst_14 : f32 to vector<2x128xf32>
    %c0 = arith.constant 0 : index
    %c0_15 = arith.constant 0 : index
    %c0_16 = arith.constant 0 : index
    %16 = vector.load %arg2[%c0, %c0_15, %c0_16] : memref<16x2x128xf32, #tpu.memory_space<vmem>>, vector<1x2x128xf32>
    %17 = vector.shape_cast %16 : vector<1x2x128xf32> to vector<2x128xf32>
    %c0_17 = arith.constant 0 : index
    %c0_18 = arith.constant 0 : index
    %c0_19 = arith.constant 0 : index
    %18 = vector.load %arg3[%c0_17, %c0_18, %c0_19] : memref<16x2x128xf32, #tpu.memory_space<vmem>>, vector<1x2x128xf32>
    %19 = vector.shape_cast %18 : vector<1x2x128xf32> to vector<2x128xf32>
    %c0_20 = arith.constant 0 : index
    %c0_21 = arith.constant 0 : index
    %c0_22 = arith.constant 0 : index
    %20 = vector.load %arg4[%c0_20, %c0_21, %c0_22] : memref<16x8x128xf32, #tpu.memory_space<vmem>>, vector<1x1x128xf32>
    %21 = vector.shape_cast %20 : vector<1x1x128xf32> to vector<1x128xf32>
    %c0_23 = arith.constant 0 : index
    %c0_24 = arith.constant 0 : index
    %c0_25 = arith.constant 0 : index
    %22 = vector.load %arg5[%c0_23, %c0_24, %c0_25] : memref<16x8x128xf32, #tpu.memory_space<vmem>>, vector<1x1x128xf32>
    %23 = vector.shape_cast %22 : vector<1x1x128xf32> to vector<1x128xf32>
    %24 = vector.broadcast %21 : vector<1x128xf32> to vector<2x128xf32>
    %25 = arith.mulf %17, %24 : vector<2x128xf32>
    %26 = vector.broadcast %23 : vector<1x128xf32> to vector<2x128xf32>
    %27 = arith.mulf %19, %26 : vector<2x128xf32>
    %28 = arith.subf %25, %27 : vector<2x128xf32>
    %29 = arith.addf %0, %28 : vector<2x128xf32>
    %30 = vector.broadcast %23 : vector<1x128xf32> to vector<2x128xf32>
    %31 = arith.mulf %17, %30 : vector<2x128xf32>
    %32 = vector.broadcast %21 : vector<1x128xf32> to vector<2x128xf32>
    %33 = arith.mulf %19, %32 : vector<2x128xf32>
    %34 = arith.addf %31, %33 : vector<2x128xf32>
    %35 = arith.addf %8, %34 : vector<2x128xf32>
    %c0_26 = arith.constant 0 : index
    %c1 = arith.constant 1 : index
    %c0_27 = arith.constant 0 : index
    %36 = vector.load %arg4[%c0_26, %c1, %c0_27] : memref<16x8x128xf32, #tpu.memory_space<vmem>>, vector<1x1x128xf32>
    %37 = vector.shape_cast %36 : vector<1x1x128xf32> to vector<1x128xf32>
    %c0_28 = arith.constant 0 : index
    %c1_29 = arith.constant 1 : index
    %c0_30 = arith.constant 0 : index
    %38 = vector.load %arg5[%c0_28, %c1_29, %c0_30] : memref<16x8x128xf32, #tpu.memory_space<vmem>>, vector<1x1x128xf32>
    %39 = vector.shape_cast %38 : vector<1x1x128xf32> to vector<1x128xf32>
    %40 = vector.broadcast %37 : vector<1x128xf32> to vector<2x128xf32>
    %41 = arith.mulf %17, %40 : vector<2x128xf32>
    %42 = vector.broadcast %39 : vector<1x128xf32> to vector<2x128xf32>
    %43 = arith.mulf %19, %42 : vector<2x128xf32>
    %44 = arith.subf %41, %43 : vector<2x128xf32>
    %45 = arith.addf %1, %44 : vector<2x128xf32>
    %46 = vector.broadcast %39 : vector<1x128xf32> to vector<2x128xf32>
    %47 = arith.mulf %17, %46 : vector<2x128xf32>
    %48 = vector.broadcast %37 : vector<1x128xf32> to vector<2x128xf32>
    %49 = arith.mulf %19, %48 : vector<2x128xf32>
    %50 = arith.addf %47, %49 : vector<2x128xf32>
    %51 = arith.addf %9, %50 : vector<2x128xf32>
    %c0_31 = arith.constant 0 : index
    %c2 = arith.constant 2 : index
    %c0_32 = arith.constant 0 : index
    %52 = vector.load %arg4[%c0_31, %c2, %c0_32] : memref<16x8x128xf32, #tpu.memory_space<vmem>>, vector<1x1x128xf32>
    %53 = vector.shape_cast %52 : vector<1x1x128xf32> to vector<1x128xf32>
    %c0_33 = arith.constant 0 : index
    %c2_34 = arith.constant 2 : index
    %c0_35 = arith.constant 0 : index
    %54 = vector.load %arg5[%c0_33, %c2_34, %c0_35] : memref<16x8x128xf32, #tpu.memory_space<vmem>>, vector<1x1x128xf32>
    %55 = vector.shape_cast %54 : vector<1x1x128xf32> to vector<1x128xf32>
    %56 = vector.broadcast %53 : vector<1x128xf32> to vector<2x128xf32>
    %57 = arith.mulf %17, %56 : vector<2x128xf32>
    %58 = vector.broadcast %55 : vector<1x128xf32> to vector<2x128xf32>
    %59 = arith.mulf %19, %58 : vector<2x128xf32>
    %60 = arith.subf %57, %59 : vector<2x128xf32>
    %61 = arith.addf %2, %60 : vector<2x128xf32>
    %62 = vector.broadcast %55 : vector<1x128xf32> to vector<2x128xf32>
    %63 = arith.mulf %17, %62 : vector<2x128xf32>
    %64 = vector.broadcast %53 : vector<1x128xf32> to vector<2x128xf32>
    %65 = arith.mulf %19, %64 : vector<2x128xf32>
    %66 = arith.addf %63, %65 : vector<2x128xf32>
    %67 = arith.addf %10, %66 : vector<2x128xf32>
    %c0_36 = arith.constant 0 : index
    %c3 = arith.constant 3 : index
    %c0_37 = arith.constant 0 : index
    %68 = vector.load %arg4[%c0_36, %c3, %c0_37] : memref<16x8x128xf32, #tpu.memory_space<vmem>>, vector<1x1x128xf32>
    %69 = vector.shape_cast %68 : vector<1x1x128xf32> to vector<1x128xf32>
    %c0_38 = arith.constant 0 : index
    %c3_39 = arith.constant 3 : index
    %c0_40 = arith.constant 0 : index
    %70 = vector.load %arg5[%c0_38, %c3_39, %c0_40] : memref<16x8x128xf32, #tpu.memory_space<vmem>>, vector<1x1x128xf32>
    %71 = vector.shape_cast %70 : vector<1x1x128xf32> to vector<1x128xf32>
    %72 = vector.broadcast %69 : vector<1x128xf32> to vector<2x128xf32>
    %73 = arith.mulf %17, %72 : vector<2x128xf32>
    %74 = vector.broadcast %71 : vector<1x128xf32> to vector<2x128xf32>
    %75 = arith.mulf %19, %74 : vector<2x128xf32>
    %76 = arith.subf %73, %75 : vector<2x128xf32>
    %77 = arith.addf %3, %76 : vector<2x128xf32>
    %78 = vector.broadcast %71 : vector<1x128xf32> to vector<2x128xf32>
    %79 = arith.mulf %17, %78 : vector<2x128xf32>
    %80 = vector.broadcast %69 : vector<1x128xf32> to vector<2x128xf32>
    %81 = arith.mulf %19, %80 : vector<2x128xf32>
    %82 = arith.addf %79, %81 : vector<2x128xf32>
    %83 = arith.addf %11, %82 : vector<2x128xf32>
    %c0_41 = arith.constant 0 : index
    %c4 = arith.constant 4 : index
    %c0_42 = arith.constant 0 : index
    %84 = vector.load %arg4[%c0_41, %c4, %c0_42] : memref<16x8x128xf32, #tpu.memory_space<vmem>>, vector<1x1x128xf32>
    %85 = vector.shape_cast %84 : vector<1x1x128xf32> to vector<1x128xf32>
    %c0_43 = arith.constant 0 : index
    %c4_44 = arith.constant 4 : index
    %c0_45 = arith.constant 0 : index
    %86 = vector.load %arg5[%c0_43, %c4_44, %c0_45] : memref<16x8x128xf32, #tpu.memory_space<vmem>>, vector<1x1x128xf32>
    %87 = vector.shape_cast %86 : vector<1x1x128xf32> to vector<1x128xf32>
    %88 = vector.broadcast %85 : vector<1x128xf32> to vector<2x128xf32>
    %89 = arith.mulf %17, %88 : vector<2x128xf32>
    %90 = vector.broadcast %87 : vector<1x128xf32> to vector<2x128xf32>
    %91 = arith.mulf %19, %90 : vector<2x128xf32>
    %92 = arith.subf %89, %91 : vector<2x128xf32>
    %93 = arith.addf %4, %92 : vector<2x128xf32>
    %94 = vector.broadcast %87 : vector<1x128xf32> to vector<2x128xf32>
    %95 = arith.mulf %17, %94 : vector<2x128xf32>
    %96 = vector.broadcast %85 : vector<1x128xf32> to vector<2x128xf32>
    %97 = arith.mulf %19, %96 : vector<2x128xf32>
    %98 = arith.addf %95, %97 : vector<2x128xf32>
    %99 = arith.addf %12, %98 : vector<2x128xf32>
    %c0_46 = arith.constant 0 : index
    %c5 = arith.constant 5 : index
    %c0_47 = arith.constant 0 : index
    %100 = vector.load %arg4[%c0_46, %c5, %c0_47] : memref<16x8x128xf32, #tpu.memory_space<vmem>>, vector<1x1x128xf32>
    %101 = vector.shape_cast %100 : vector<1x1x128xf32> to vector<1x128xf32>
    %c0_48 = arith.constant 0 : index
    %c5_49 = arith.constant 5 : index
    %c0_50 = arith.constant 0 : index
    %102 = vector.load %arg5[%c0_48, %c5_49, %c0_50] : memref<16x8x128xf32, #tpu.memory_space<vmem>>, vector<1x1x128xf32>
    %103 = vector.shape_cast %102 : vector<1x1x128xf32> to vector<1x128xf32>
    %104 = vector.broadcast %101 : vector<1x128xf32> to vector<2x128xf32>
    %105 = arith.mulf %17, %104 : vector<2x128xf32>
    %106 = vector.broadcast %103 : vector<1x128xf32> to vector<2x128xf32>
    %107 = arith.mulf %19, %106 : vector<2x128xf32>
    %108 = arith.subf %105, %107 : vector<2x128xf32>
    %109 = arith.addf %5, %108 : vector<2x128xf32>
    %110 = vector.broadcast %103 : vector<1x128xf32> to vector<2x128xf32>
    %111 = arith.mulf %17, %110 : vector<2x128xf32>
    %112 = vector.broadcast %101 : vector<1x128xf32> to vector<2x128xf32>
    %113 = arith.mulf %19, %112 : vector<2x128xf32>
    %114 = arith.addf %111, %113 : vector<2x128xf32>
    %115 = arith.addf %13, %114 : vector<2x128xf32>
    %c0_51 = arith.constant 0 : index
    %c6 = arith.constant 6 : index
    %c0_52 = arith.constant 0 : index
    %116 = vector.load %arg4[%c0_51, %c6, %c0_52] : memref<16x8x128xf32, #tpu.memory_space<vmem>>, vector<1x1x128xf32>
    %117 = vector.shape_cast %116 : vector<1x1x128xf32> to vector<1x128xf32>
    %c0_53 = arith.constant 0 : index
    %c6_54 = arith.constant 6 : index
    %c0_55 = arith.constant 0 : index
    %118 = vector.load %arg5[%c0_53, %c6_54, %c0_55] : memref<16x8x128xf32, #tpu.memory_space<vmem>>, vector<1x1x128xf32>
    %119 = vector.shape_cast %118 : vector<1x1x128xf32> to vector<1x128xf32>
    %120 = vector.broadcast %117 : vector<1x128xf32> to vector<2x128xf32>
    %121 = arith.mulf %17, %120 : vector<2x128xf32>
    %122 = vector.broadcast %119 : vector<1x128xf32> to vector<2x128xf32>
    %123 = arith.mulf %19, %122 : vector<2x128xf32>
    %124 = arith.subf %121, %123 : vector<2x128xf32>
    %125 = arith.addf %6, %124 : vector<2x128xf32>
    %126 = vector.broadcast %119 : vector<1x128xf32> to vector<2x128xf32>
    %127 = arith.mulf %17, %126 : vector<2x128xf32>
    %128 = vector.broadcast %117 : vector<1x128xf32> to vector<2x128xf32>
    %129 = arith.mulf %19, %128 : vector<2x128xf32>
    %130 = arith.addf %127, %129 : vector<2x128xf32>
    %131 = arith.addf %14, %130 : vector<2x128xf32>
    %c0_56 = arith.constant 0 : index
    %c7 = arith.constant 7 : index
    %c0_57 = arith.constant 0 : index
    %132 = vector.load %arg4[%c0_56, %c7, %c0_57] : memref<16x8x128xf32, #tpu.memory_space<vmem>>, vector<1x1x128xf32>
    %133 = vector.shape_cast %132 : vector<1x1x128xf32> to vector<1x128xf32>
    %c0_58 = arith.constant 0 : index
    %c7_59 = arith.constant 7 : index
    %c0_60 = arith.constant 0 : index
    %134 = vector.load %arg5[%c0_58, %c7_59, %c0_60] : memref<16x8x128xf32, #tpu.memory_space<vmem>>, vector<1x1x128xf32>
    %135 = vector.shape_cast %134 : vector<1x1x128xf32> to vector<1x128xf32>
    %136 = vector.broadcast %133 : vector<1x128xf32> to vector<2x128xf32>
    %137 = arith.mulf %17, %136 : vector<2x128xf32>
    %138 = vector.broadcast %135 : vector<1x128xf32> to vector<2x128xf32>
    %139 = arith.mulf %19, %138 : vector<2x128xf32>
    %140 = arith.subf %137, %139 : vector<2x128xf32>
    %141 = arith.addf %7, %140 : vector<2x128xf32>
    %142 = vector.broadcast %135 : vector<1x128xf32> to vector<2x128xf32>
    %143 = arith.mulf %17, %142 : vector<2x128xf32>
    %144 = vector.broadcast %133 : vector<1x128xf32> to vector<2x128xf32>
    %145 = arith.mulf %19, %144 : vector<2x128xf32>
    %146 = arith.addf %143, %145 : vector<2x128xf32>
    %147 = arith.addf %15, %146 : vector<2x128xf32>
    %c1_61 = arith.constant 1 : index
    %c0_62 = arith.constant 0 : index
    %c0_63 = arith.constant 0 : index
    %148 = vector.load %arg2[%c1_61, %c0_62, %c0_63] : memref<16x2x128xf32, #tpu.memory_space<vmem>>, vector<1x2x128xf32>
    %149 = vector.shape_cast %148 : vector<1x2x128xf32> to vector<2x128xf32>
    %c1_64 = arith.constant 1 : index
    %c0_65 = arith.constant 0 : index
    %c0_66 = arith.constant 0 : index
    %150 = vector.load %arg3[%c1_64, %c0_65, %c0_66] : memref<16x2x128xf32, #tpu.memory_space<vmem>>, vector<1x2x128xf32>
    %151 = vector.shape_cast %150 : vector<1x2x128xf32> to vector<2x128xf32>
    %c1_67 = arith.constant 1 : index
    %c0_68 = arith.constant 0 : index
    %c0_69 = arith.constant 0 : index
    %152 = vector.load %arg4[%c1_67, %c0_68, %c0_69] : memref<16x8x128xf32, #tpu.memory_space<vmem>>, vector<1x1x128xf32>
    %153 = vector.shape_cast %152 : vector<1x1x128xf32> to vector<1x128xf32>
    %c1_70 = arith.constant 1 : index
    %c0_71 = arith.constant 0 : index
    %c0_72 = arith.constant 0 : index
    %154 = vector.load %arg5[%c1_70, %c0_71, %c0_72] : memref<16x8x128xf32, #tpu.memory_space<vmem>>, vector<1x1x128xf32>
    %155 = vector.shape_cast %154 : vector<1x1x128xf32> to vector<1x128xf32>
    %156 = vector.broadcast %153 : vector<1x128xf32> to vector<2x128xf32>
    %157 = arith.mulf %149, %156 : vector<2x128xf32>
    %158 = vector.broadcast %155 : vector<1x128xf32> to vector<2x128xf32>
    %159 = arith.mulf %151, %158 : vector<2x128xf32>
    %160 = arith.subf %157, %159 : vector<2x128xf32>
    %161 = arith.addf %29, %160 : vector<2x128xf32>
    %162 = vector.broadcast %155 : vector<1x128xf32> to vector<2x128xf32>
    %163 = arith.mulf %149, %162 : vector<2x128xf32>
    %164 = vector.broadcast %153 : vector<1x128xf32> to vector<2x128xf32>
    %165 = arith.mulf %151, %164 : vector<2x128xf32>
    %166 = arith.addf %163, %165 : vector<2x128xf32>
    %167 = arith.addf %35, %166 : vector<2x128xf32>
    %c1_73 = arith.constant 1 : index
    %c1_74 = arith.constant 1 : index
    %c0_75 = arith.constant 0 : index
    %168 = vector.load %arg4[%c1_73, %c1_74, %c0_75] : memref<16x8x128xf32, #tpu.memory_space<vmem>>, vector<1x1x128xf32>
    %169 = vector.shape_cast %168 : vector<1x1x128xf32> to vector<1x128xf32>
    %c1_76 = arith.constant 1 : index
    %c1_77 = arith.constant 1 : index
    %c0_78 = arith.constant 0 : index
    %170 = vector.load %arg5[%c1_76, %c1_77, %c0_78] : memref<16x8x128xf32, #tpu.memory_space<vmem>>, vector<1x1x128xf32>
    %171 = vector.shape_cast %170 : vector<1x1x128xf32> to vector<1x128xf32>
    %172 = vector.broadcast %169 : vector<1x128xf32> to vector<2x128xf32>
    %173 = arith.mulf %149, %172 : vector<2x128xf32>
    %174 = vector.broadcast %171 : vector<1x128xf32> to vector<2x128xf32>
    %175 = arith.mulf %151, %174 : vector<2x128xf32>
    %176 = arith.subf %173, %175 : vector<2x128xf32>
    %177 = arith.addf %45, %176 : vector<2x128xf32>
    %178 = vector.broadcast %171 : vector<1x128xf32> to vector<2x128xf32>
    %179 = arith.mulf %149, %178 : vector<2x128xf32>
    %180 = vector.broadcast %169 : vector<1x128xf32> to vector<2x128xf32>
    %181 = arith.mulf %151, %180 : vector<2x128xf32>
    %182 = arith.addf %179, %181 : vector<2x128xf32>
    %183 = arith.addf %51, %182 : vector<2x128xf32>
    %c1_79 = arith.constant 1 : index
    %c2_80 = arith.constant 2 : index
    %c0_81 = arith.constant 0 : index
    %184 = vector.load %arg4[%c1_79, %c2_80, %c0_81] : memref<16x8x128xf32, #tpu.memory_space<vmem>>, vector<1x1x128xf32>
    %185 = vector.shape_cast %184 : vector<1x1x128xf32> to vector<1x128xf32>
    %c1_82 = arith.constant 1 : index
    %c2_83 = arith.constant 2 : index
    %c0_84 = arith.constant 0 : index
    %186 = vector.load %arg5[%c1_82, %c2_83, %c0_84] : memref<16x8x128xf32, #tpu.memory_space<vmem>>, vector<1x1x128xf32>
    %187 = vector.shape_cast %186 : vector<1x1x128xf32> to vector<1x128xf32>
    %188 = vector.broadcast %185 : vector<1x128xf32> to vector<2x128xf32>
    %189 = arith.mulf %149, %188 : vector<2x128xf32>
    %190 = vector.broadcast %187 : vector<1x128xf32> to vector<2x128xf32>
    %191 = arith.mulf %151, %190 : vector<2x128xf32>
    %192 = arith.subf %189, %191 : vector<2x128xf32>
    %193 = arith.addf %61, %192 : vector<2x128xf32>
    %194 = vector.broadcast %187 : vector<1x128xf32> to vector<2x128xf32>
    %195 = arith.mulf %149, %194 : vector<2x128xf32>
    %196 = vector.broadcast %185 : vector<1x128xf32> to vector<2x128xf32>
    %197 = arith.mulf %151, %196 : vector<2x128xf32>
    %198 = arith.addf %195, %197 : vector<2x128xf32>
    %199 = arith.addf %67, %198 : vector<2x128xf32>
    %c1_85 = arith.constant 1 : index
    %c3_86 = arith.constant 3 : index
    %c0_87 = arith.constant 0 : index
    %200 = vector.load %arg4[%c1_85, %c3_86, %c0_87] : memref<16x8x128xf32, #tpu.memory_space<vmem>>, vector<1x1x128xf32>
    %201 = vector.shape_cast %200 : vector<1x1x128xf32> to vector<1x128xf32>
    %c1_88 = arith.constant 1 : index
    %c3_89 = arith.constant 3 : index
    %c0_90 = arith.constant 0 : index
    %202 = vector.load %arg5[%c1_88, %c3_89, %c0_90] : memref<16x8x128xf32, #tpu.memory_space<vmem>>, vector<1x1x128xf32>
    %203 = vector.shape_cast %202 : vector<1x1x128xf32> to vector<1x128xf32>
    %204 = vector.broadcast %201 : vector<1x128xf32> to vector<2x128xf32>
    %205 = arith.mulf %149, %204 : vector<2x128xf32>
    %206 = vector.broadcast %203 : vector<1x128xf32> to vector<2x128xf32>
    %207 = arith.mulf %151, %206 : vector<2x128xf32>
    %208 = arith.subf %205, %207 : vector<2x128xf32>
    %209 = arith.addf %77, %208 : vector<2x128xf32>
    %210 = vector.broadcast %203 : vector<1x128xf32> to vector<2x128xf32>
    %211 = arith.mulf %149, %210 : vector<2x128xf32>
    %212 = vector.broadcast %201 : vector<1x128xf32> to vector<2x128xf32>
    %213 = arith.mulf %151, %212 : vector<2x128xf32>
    %214 = arith.addf %211, %213 : vector<2x128xf32>
    %215 = arith.addf %83, %214 : vector<2x128xf32>
    %c1_91 = arith.constant 1 : index
    %c4_92 = arith.constant 4 : index
    %c0_93 = arith.constant 0 : index
    %216 = vector.load %arg4[%c1_91, %c4_92, %c0_93] : memref<16x8x128xf32, #tpu.memory_space<vmem>>, vector<1x1x128xf32>
    %217 = vector.shape_cast %216 : vector<1x1x128xf32> to vector<1x128xf32>
    %c1_94 = arith.constant 1 : index
    %c4_95 = arith.constant 4 : index
    %c0_96 = arith.constant 0 : index
    %218 = vector.load %arg5[%c1_94, %c4_95, %c0_96] : memref<16x8x128xf32, #tpu.memory_space<vmem>>, vector<1x1x128xf32>
    %219 = vector.shape_cast %218 : vector<1x1x128xf32> to vector<1x128xf32>
    %220 = vector.broadcast %217 : vector<1x128xf32> to vector<2x128xf32>
    %221 = arith.mulf %149, %220 : vector<2x128xf32>
    %222 = vector.broadcast %219 : vector<1x128xf32> to vector<2x128xf32>
    %223 = arith.mulf %151, %222 : vector<2x128xf32>
    %224 = arith.subf %221, %223 : vector<2x128xf32>
    %225 = arith.addf %93, %224 : vector<2x128xf32>
    %226 = vector.broadcast %219 : vector<1x128xf32> to vector<2x128xf32>
    %227 = arith.mulf %149, %226 : vector<2x128xf32>
    %228 = vector.broadcast %217 : vector<1x128xf32> to vector<2x128xf32>
    %229 = arith.mulf %151, %228 : vector<2x128xf32>
    %230 = arith.addf %227, %229 : vector<2x128xf32>
    %231 = arith.addf %99, %230 : vector<2x128xf32>
    %c1_97 = arith.constant 1 : index
    %c5_98 = arith.constant 5 : index
    %c0_99 = arith.constant 0 : index
    %232 = vector.load %arg4[%c1_97, %c5_98, %c0_99] : memref<16x8x128xf32, #tpu.memory_space<vmem>>, vector<1x1x128xf32>
    %233 = vector.shape_cast %232 : vector<1x1x128xf32> to vector<1x128xf32>
    %c1_100 = arith.constant 1 : index
    %c5_101 = arith.constant 5 : index
    %c0_102 = arith.constant 0 : index
    %234 = vector.load %arg5[%c1_100, %c5_101, %c0_102] : memref<16x8x128xf32, #tpu.memory_space<vmem>>, vector<1x1x128xf32>
    %235 = vector.shape_cast %234 : vector<1x1x128xf32> to vector<1x128xf32>
    %236 = vector.broadcast %233 : vector<1x128xf32> to vector<2x128xf32>
    %237 = arith.mulf %149, %236 : vector<2x128xf32>
    %238 = vector.broadcast %235 : vector<1x128xf32> to vector<2x128xf32>
    %239 = arith.mulf %151, %238 : vector<2x128xf32>
    %240 = arith.subf %237, %239 : vector<2x128xf32>
    %241 = arith.addf %109, %240 : vector<2x128xf32>
    %242 = vector.broadcast %235 : vector<1x128xf32> to vector<2x128xf32>
    %243 = arith.mulf %149, %242 : vector<2x128xf32>
    %244 = vector.broadcast %233 : vector<1x128xf32> to vector<2x128xf32>
    %245 = arith.mulf %151, %244 : vector<2x128xf32>
    %246 = arith.addf %243, %245 : vector<2x128xf32>
    %247 = arith.addf %115, %246 : vector<2x128xf32>
    %c1_103 = arith.constant 1 : index
    %c6_104 = arith.constant 6 : index
    %c0_105 = arith.constant 0 : index
    %248 = vector.load %arg4[%c1_103, %c6_104, %c0_105] : memref<16x8x128xf32, #tpu.memory_space<vmem>>, vector<1x1x128xf32>
    %249 = vector.shape_cast %248 : vector<1x1x128xf32> to vector<1x128xf32>
    %c1_106 = arith.constant 1 : index
    %c6_107 = arith.constant 6 : index
    %c0_108 = arith.constant 0 : index
    %250 = vector.load %arg5[%c1_106, %c6_107, %c0_108] : memref<16x8x128xf32, #tpu.memory_space<vmem>>, vector<1x1x128xf32>
    %251 = vector.shape_cast %250 : vector<1x1x128xf32> to vector<1x128xf32>
    %252 = vector.broadcast %249 : vector<1x128xf32> to vector<2x128xf32>
    %253 = arith.mulf %149, %252 : vector<2x128xf32>
    %254 = vector.broadcast %251 : vector<1x128xf32> to vector<2x128xf32>
    %255 = arith.mulf %151, %254 : vector<2x128xf32>
    %256 = arith.subf %253, %255 : vector<2x128xf32>
    %257 = arith.addf %125, %256 : vector<2x128xf32>
    %258 = vector.broadcast %251 : vector<1x128xf32> to vector<2x128xf32>
    %259 = arith.mulf %149, %258 : vector<2x128xf32>
    %260 = vector.broadcast %249 : vector<1x128xf32> to vector<2x128xf32>
    %261 = arith.mulf %151, %260 : vector<2x128xf32>
    %262 = arith.addf %259, %261 : vector<2x128xf32>
    %263 = arith.addf %131, %262 : vector<2x128xf32>
    %c1_109 = arith.constant 1 : index
    %c7_110 = arith.constant 7 : index
    %c0_111 = arith.constant 0 : index
    %264 = vector.load %arg4[%c1_109, %c7_110, %c0_111] : memref<16x8x128xf32, #tpu.memory_space<vmem>>, vector<1x1x128xf32>
    %265 = vector.shape_cast %264 : vector<1x1x128xf32> to vector<1x128xf32>
    %c1_112 = arith.constant 1 : index
    %c7_113 = arith.constant 7 : index
    %c0_114 = arith.constant 0 : index
    %266 = vector.load %arg5[%c1_112, %c7_113, %c0_114] : memref<16x8x128xf32, #tpu.memory_space<vmem>>, vector<1x1x128xf32>
    %267 = vector.shape_cast %266 : vector<1x1x128xf32> to vector<1x128xf32>
    %268 = vector.broadcast %265 : vector<1x128xf32> to vector<2x128xf32>
    %269 = arith.mulf %149, %268 : vector<2x128xf32>
    %270 = vector.broadcast %267 : vector<1x128xf32> to vector<2x128xf32>
    %271 = arith.mulf %151, %270 : vector<2x128xf32>
    %272 = arith.subf %269, %271 : vector<2x128xf32>
    %273 = arith.addf %141, %272 : vector<2x128xf32>
    %274 = vector.broadcast %267 : vector<1x128xf32> to vector<2x128xf32>
    %275 = arith.mulf %149, %274 : vector<2x128xf32>
    %276 = vector.broadcast %265 : vector<1x128xf32> to vector<2x128xf32>
    %277 = arith.mulf %151, %276 : vector<2x128xf32>
    %278 = arith.addf %275, %277 : vector<2x128xf32>
    %279 = arith.addf %147, %278 : vector<2x128xf32>
    %c2_115 = arith.constant 2 : index
    %c0_116 = arith.constant 0 : index
    %c0_117 = arith.constant 0 : index
    %280 = vector.load %arg2[%c2_115, %c0_116, %c0_117] : memref<16x2x128xf32, #tpu.memory_space<vmem>>, vector<1x2x128xf32>
    %281 = vector.shape_cast %280 : vector<1x2x128xf32> to vector<2x128xf32>
    %c2_118 = arith.constant 2 : index
    %c0_119 = arith.constant 0 : index
    %c0_120 = arith.constant 0 : index
    %282 = vector.load %arg3[%c2_118, %c0_119, %c0_120] : memref<16x2x128xf32, #tpu.memory_space<vmem>>, vector<1x2x128xf32>
    %283 = vector.shape_cast %282 : vector<1x2x128xf32> to vector<2x128xf32>
    %c2_121 = arith.constant 2 : index
    %c0_122 = arith.constant 0 : index
    %c0_123 = arith.constant 0 : index
    %284 = vector.load %arg4[%c2_121, %c0_122, %c0_123] : memref<16x8x128xf32, #tpu.memory_space<vmem>>, vector<1x1x128xf32>
    %285 = vector.shape_cast %284 : vector<1x1x128xf32> to vector<1x128xf32>
    %c2_124 = arith.constant 2 : index
    %c0_125 = arith.constant 0 : index
    %c0_126 = arith.constant 0 : index
    %286 = vector.load %arg5[%c2_124, %c0_125, %c0_126] : memref<16x8x128xf32, #tpu.memory_space<vmem>>, vector<1x1x128xf32>
    %287 = vector.shape_cast %286 : vector<1x1x128xf32> to vector<1x128xf32>
    %288 = vector.broadcast %285 : vector<1x128xf32> to vector<2x128xf32>
    %289 = arith.mulf %281, %288 : vector<2x128xf32>
    %290 = vector.broadcast %287 : vector<1x128xf32> to vector<2x128xf32>
    %291 = arith.mulf %283, %290 : vector<2x128xf32>
    %292 = arith.subf %289, %291 : vector<2x128xf32>
    %293 = arith.addf %161, %292 : vector<2x128xf32>
    %294 = vector.broadcast %287 : vector<1x128xf32> to vector<2x128xf32>
    %295 = arith.mulf %281, %294 : vector<2x128xf32>
    %296 = vector.broadcast %285 : vector<1x128xf32> to vector<2x128xf32>
    %297 = arith.mulf %283, %296 : vector<2x128xf32>
    %298 = arith.addf %295, %297 : vector<2x128xf32>
    %299 = arith.addf %167, %298 : vector<2x128xf32>
    %c2_127 = arith.constant 2 : index
    %c1_128 = arith.constant 1 : index
    %c0_129 = arith.constant 0 : index
    %300 = vector.load %arg4[%c2_127, %c1_128, %c0_129] : memref<16x8x128xf32, #tpu.memory_space<vmem>>, vector<1x1x128xf32>
    %301 = vector.shape_cast %300 : vector<1x1x128xf32> to vector<1x128xf32>
    %c2_130 = arith.constant 2 : index
    %c1_131 = arith.constant 1 : index
    %c0_132 = arith.constant 0 : index
    %302 = vector.load %arg5[%c2_130, %c1_131, %c0_132] : memref<16x8x128xf32, #tpu.memory_space<vmem>>, vector<1x1x128xf32>
    %303 = vector.shape_cast %302 : vector<1x1x128xf32> to vector<1x128xf32>
    %304 = vector.broadcast %301 : vector<1x128xf32> to vector<2x128xf32>
    %305 = arith.mulf %281, %304 : vector<2x128xf32>
    %306 = vector.broadcast %303 : vector<1x128xf32> to vector<2x128xf32>
    %307 = arith.mulf %283, %306 : vector<2x128xf32>
    %308 = arith.subf %305, %307 : vector<2x128xf32>
    %309 = arith.addf %177, %308 : vector<2x128xf32>
    %310 = vector.broadcast %303 : vector<1x128xf32> to vector<2x128xf32>
    %311 = arith.mulf %281, %310 : vector<2x128xf32>
    %312 = vector.broadcast %301 : vector<1x128xf32> to vector<2x128xf32>
    %313 = arith.mulf %283, %312 : vector<2x128xf32>
    %314 = arith.addf %311, %313 : vector<2x128xf32>
    %315 = arith.addf %183, %314 : vector<2x128xf32>
    %c2_133 = arith.constant 2 : index
    %c2_134 = arith.constant 2 : index
    %c0_135 = arith.constant 0 : index
    %316 = vector.load %arg4[%c2_133, %c2_134, %c0_135] : memref<16x8x128xf32, #tpu.memory_space<vmem>>, vector<1x1x128xf32>
    %317 = vector.shape_cast %316 : vector<1x1x128xf32> to vector<1x128xf32>
    %c2_136 = arith.constant 2 : index
    %c2_137 = arith.constant 2 : index
    %c0_138 = arith.constant 0 : index
    %318 = vector.load %arg5[%c2_136, %c2_137, %c0_138] : memref<16x8x128xf32, #tpu.memory_space<vmem>>, vector<1x1x128xf32>
    %319 = vector.shape_cast %318 : vector<1x1x128xf32> to vector<1x128xf32>
    %320 = vector.broadcast %317 : vector<1x128xf32> to vector<2x128xf32>
    %321 = arith.mulf %281, %320 : vector<2x128xf32>
    %322 = vector.broadcast %319 : vector<1x128xf32> to vector<2x128xf32>
    %323 = arith.mulf %283, %322 : vector<2x128xf32>
    %324 = arith.subf %321, %323 : vector<2x128xf32>
    %325 = arith.addf %193, %324 : vector<2x128xf32>
    %326 = vector.broadcast %319 : vector<1x128xf32> to vector<2x128xf32>
    %327 = arith.mulf %281, %326 : vector<2x128xf32>
    %328 = vector.broadcast %317 : vector<1x128xf32> to vector<2x128xf32>
    %329 = arith.mulf %283, %328 : vector<2x128xf32>
    %330 = arith.addf %327, %329 : vector<2x128xf32>
    %331 = arith.addf %199, %330 : vector<2x128xf32>
    %c2_139 = arith.constant 2 : index
    %c3_140 = arith.constant 3 : index
    %c0_141 = arith.constant 0 : index
    %332 = vector.load %arg4[%c2_139, %c3_140, %c0_141] : memref<16x8x128xf32, #tpu.memory_space<vmem>>, vector<1x1x128xf32>
    %333 = vector.shape_cast %332 : vector<1x1x128xf32> to vector<1x128xf32>
    %c2_142 = arith.constant 2 : index
    %c3_143 = arith.constant 3 : index
    %c0_144 = arith.constant 0 : index
    %334 = vector.load %arg5[%c2_142, %c3_143, %c0_144] : memref<16x8x128xf32, #tpu.memory_space<vmem>>, vector<1x1x128xf32>
    %335 = vector.shape_cast %334 : vector<1x1x128xf32> to vector<1x128xf32>
    %336 = vector.broadcast %333 : vector<1x128xf32> to vector<2x128xf32>
    %337 = arith.mulf %281, %336 : vector<2x128xf32>
    %338 = vector.broadcast %335 : vector<1x128xf32> to vector<2x128xf32>
    %339 = arith.mulf %283, %338 : vector<2x128xf32>
    %340 = arith.subf %337, %339 : vector<2x128xf32>
    %341 = arith.addf %209, %340 : vector<2x128xf32>
    %342 = vector.broadcast %335 : vector<1x128xf32> to vector<2x128xf32>
    %343 = arith.mulf %281, %342 : vector<2x128xf32>
    %344 = vector.broadcast %333 : vector<1x128xf32> to vector<2x128xf32>
    %345 = arith.mulf %283, %344 : vector<2x128xf32>
    %346 = arith.addf %343, %345 : vector<2x128xf32>
    %347 = arith.addf %215, %346 : vector<2x128xf32>
    %c2_145 = arith.constant 2 : index
    %c4_146 = arith.constant 4 : index
    %c0_147 = arith.constant 0 : index
    %348 = vector.load %arg4[%c2_145, %c4_146, %c0_147] : memref<16x8x128xf32, #tpu.memory_space<vmem>>, vector<1x1x128xf32>
    %349 = vector.shape_cast %348 : vector<1x1x128xf32> to vector<1x128xf32>
    %c2_148 = arith.constant 2 : index
    %c4_149 = arith.constant 4 : index
    %c0_150 = arith.constant 0 : index
    %350 = vector.load %arg5[%c2_148, %c4_149, %c0_150] : memref<16x8x128xf32, #tpu.memory_space<vmem>>, vector<1x1x128xf32>
    %351 = vector.shape_cast %350 : vector<1x1x128xf32> to vector<1x128xf32>
    %352 = vector.broadcast %349 : vector<1x128xf32> to vector<2x128xf32>
    %353 = arith.mulf %281, %352 : vector<2x128xf32>
    %354 = vector.broadcast %351 : vector<1x128xf32> to vector<2x128xf32>
    %355 = arith.mulf %283, %354 : vector<2x128xf32>
    %356 = arith.subf %353, %355 : vector<2x128xf32>
    %357 = arith.addf %225, %356 : vector<2x128xf32>
    %358 = vector.broadcast %351 : vector<1x128xf32> to vector<2x128xf32>
    %359 = arith.mulf %281, %358 : vector<2x128xf32>
    %360 = vector.broadcast %349 : vector<1x128xf32> to vector<2x128xf32>
    %361 = arith.mulf %283, %360 : vector<2x128xf32>
    %362 = arith.addf %359, %361 : vector<2x128xf32>
    %363 = arith.addf %231, %362 : vector<2x128xf32>
    %c2_151 = arith.constant 2 : index
    %c5_152 = arith.constant 5 : index
    %c0_153 = arith.constant 0 : index
    %364 = vector.load %arg4[%c2_151, %c5_152, %c0_153] : memref<16x8x128xf32, #tpu.memory_space<vmem>>, vector<1x1x128xf32>
    %365 = vector.shape_cast %364 : vector<1x1x128xf32> to vector<1x128xf32>
    %c2_154 = arith.constant 2 : index
    %c5_155 = arith.constant 5 : index
    %c0_156 = arith.constant 0 : index
    %366 = vector.load %arg5[%c2_154, %c5_155, %c0_156] : memref<16x8x128xf32, #tpu.memory_space<vmem>>, vector<1x1x128xf32>
    %367 = vector.shape_cast %366 : vector<1x1x128xf32> to vector<1x128xf32>
    %368 = vector.broadcast %365 : vector<1x128xf32> to vector<2x128xf32>
    %369 = arith.mulf %281, %368 : vector<2x128xf32>
    %370 = vector.broadcast %367 : vector<1x128xf32> to vector<2x128xf32>
    %371 = arith.mulf %283, %370 : vector<2x128xf32>
    %372 = arith.subf %369, %371 : vector<2x128xf32>
    %373 = arith.addf %241, %372 : vector<2x128xf32>
    %374 = vector.broadcast %367 : vector<1x128xf32> to vector<2x128xf32>
    %375 = arith.mulf %281, %374 : vector<2x128xf32>
    %376 = vector.broadcast %365 : vector<1x128xf32> to vector<2x128xf32>
    %377 = arith.mulf %283, %376 : vector<2x128xf32>
    %378 = arith.addf %375, %377 : vector<2x128xf32>
    %379 = arith.addf %247, %378 : vector<2x128xf32>
    %c2_157 = arith.constant 2 : index
    %c6_158 = arith.constant 6 : index
    %c0_159 = arith.constant 0 : index
    %380 = vector.load %arg4[%c2_157, %c6_158, %c0_159] : memref<16x8x128xf32, #tpu.memory_space<vmem>>, vector<1x1x128xf32>
    %381 = vector.shape_cast %380 : vector<1x1x128xf32> to vector<1x128xf32>
    %c2_160 = arith.constant 2 : index
    %c6_161 = arith.constant 6 : index
    %c0_162 = arith.constant 0 : index
    %382 = vector.load %arg5[%c2_160, %c6_161, %c0_162] : memref<16x8x128xf32, #tpu.memory_space<vmem>>, vector<1x1x128xf32>
    %383 = vector.shape_cast %382 : vector<1x1x128xf32> to vector<1x128xf32>
    %384 = vector.broadcast %381 : vector<1x128xf32> to vector<2x128xf32>
    %385 = arith.mulf %281, %384 : vector<2x128xf32>
    %386 = vector.broadcast %383 : vector<1x128xf32> to vector<2x128xf32>
    %387 = arith.mulf %283, %386 : vector<2x128xf32>
    %388 = arith.subf %385, %387 : vector<2x128xf32>
    %389 = arith.addf %257, %388 : vector<2x128xf32>
    %390 = vector.broadcast %383 : vector<1x128xf32> to vector<2x128xf32>
    %391 = arith.mulf %281, %390 : vector<2x128xf32>
    %392 = vector.broadcast %381 : vector<1x128xf32> to vector<2x128xf32>
    %393 = arith.mulf %283, %392 : vector<2x128xf32>
    %394 = arith.addf %391, %393 : vector<2x128xf32>
    %395 = arith.addf %263, %394 : vector<2x128xf32>
    %c2_163 = arith.constant 2 : index
    %c7_164 = arith.constant 7 : index
    %c0_165 = arith.constant 0 : index
    %396 = vector.load %arg4[%c2_163, %c7_164, %c0_165] : memref<16x8x128xf32, #tpu.memory_space<vmem>>, vector<1x1x128xf32>
    %397 = vector.shape_cast %396 : vector<1x1x128xf32> to vector<1x128xf32>
    %c2_166 = arith.constant 2 : index
    %c7_167 = arith.constant 7 : index
    %c0_168 = arith.constant 0 : index
    %398 = vector.load %arg5[%c2_166, %c7_167, %c0_168] : memref<16x8x128xf32, #tpu.memory_space<vmem>>, vector<1x1x128xf32>
    %399 = vector.shape_cast %398 : vector<1x1x128xf32> to vector<1x128xf32>
    %400 = vector.broadcast %397 : vector<1x128xf32> to vector<2x128xf32>
    %401 = arith.mulf %281, %400 : vector<2x128xf32>
    %402 = vector.broadcast %399 : vector<1x128xf32> to vector<2x128xf32>
    %403 = arith.mulf %283, %402 : vector<2x128xf32>
    %404 = arith.subf %401, %403 : vector<2x128xf32>
    %405 = arith.addf %273, %404 : vector<2x128xf32>
    %406 = vector.broadcast %399 : vector<1x128xf32> to vector<2x128xf32>
    %407 = arith.mulf %281, %406 : vector<2x128xf32>
    %408 = vector.broadcast %397 : vector<1x128xf32> to vector<2x128xf32>
    %409 = arith.mulf %283, %408 : vector<2x128xf32>
    %410 = arith.addf %407, %409 : vector<2x128xf32>
    %411 = arith.addf %279, %410 : vector<2x128xf32>
    %c3_169 = arith.constant 3 : index
    %c0_170 = arith.constant 0 : index
    %c0_171 = arith.constant 0 : index
    %412 = vector.load %arg2[%c3_169, %c0_170, %c0_171] : memref<16x2x128xf32, #tpu.memory_space<vmem>>, vector<1x2x128xf32>
    %413 = vector.shape_cast %412 : vector<1x2x128xf32> to vector<2x128xf32>
    %c3_172 = arith.constant 3 : index
    %c0_173 = arith.constant 0 : index
    %c0_174 = arith.constant 0 : index
    %414 = vector.load %arg3[%c3_172, %c0_173, %c0_174] : memref<16x2x128xf32, #tpu.memory_space<vmem>>, vector<1x2x128xf32>
    %415 = vector.shape_cast %414 : vector<1x2x128xf32> to vector<2x128xf32>
    %c3_175 = arith.constant 3 : index
    %c0_176 = arith.constant 0 : index
    %c0_177 = arith.constant 0 : index
    %416 = vector.load %arg4[%c3_175, %c0_176, %c0_177] : memref<16x8x128xf32, #tpu.memory_space<vmem>>, vector<1x1x128xf32>
    %417 = vector.shape_cast %416 : vector<1x1x128xf32> to vector<1x128xf32>
    %c3_178 = arith.constant 3 : index
    %c0_179 = arith.constant 0 : index
    %c0_180 = arith.constant 0 : index
    %418 = vector.load %arg5[%c3_178, %c0_179, %c0_180] : memref<16x8x128xf32, #tpu.memory_space<vmem>>, vector<1x1x128xf32>
    %419 = vector.shape_cast %418 : vector<1x1x128xf32> to vector<1x128xf32>
    %420 = vector.broadcast %417 : vector<1x128xf32> to vector<2x128xf32>
    %421 = arith.mulf %413, %420 : vector<2x128xf32>
    %422 = vector.broadcast %419 : vector<1x128xf32> to vector<2x128xf32>
    %423 = arith.mulf %415, %422 : vector<2x128xf32>
    %424 = arith.subf %421, %423 : vector<2x128xf32>
    %425 = arith.addf %293, %424 : vector<2x128xf32>
    %426 = vector.broadcast %419 : vector<1x128xf32> to vector<2x128xf32>
    %427 = arith.mulf %413, %426 : vector<2x128xf32>
    %428 = vector.broadcast %417 : vector<1x128xf32> to vector<2x128xf32>
    %429 = arith.mulf %415, %428 : vector<2x128xf32>
    %430 = arith.addf %427, %429 : vector<2x128xf32>
    %431 = arith.addf %299, %430 : vector<2x128xf32>
    %c3_181 = arith.constant 3 : index
    %c1_182 = arith.constant 1 : index
    %c0_183 = arith.constant 0 : index
    %432 = vector.load %arg4[%c3_181, %c1_182, %c0_183] : memref<16x8x128xf32, #tpu.memory_space<vmem>>, vector<1x1x128xf32>
    %433 = vector.shape_cast %432 : vector<1x1x128xf32> to vector<1x128xf32>
    %c3_184 = arith.constant 3 : index
    %c1_185 = arith.constant 1 : index
    %c0_186 = arith.constant 0 : index
    %434 = vector.load %arg5[%c3_184, %c1_185, %c0_186] : memref<16x8x128xf32, #tpu.memory_space<vmem>>, vector<1x1x128xf32>
    %435 = vector.shape_cast %434 : vector<1x1x128xf32> to vector<1x128xf32>
    %436 = vector.broadcast %433 : vector<1x128xf32> to vector<2x128xf32>
    %437 = arith.mulf %413, %436 : vector<2x128xf32>
    %438 = vector.broadcast %435 : vector<1x128xf32> to vector<2x128xf32>
    %439 = arith.mulf %415, %438 : vector<2x128xf32>
    %440 = arith.subf %437, %439 : vector<2x128xf32>
    %441 = arith.addf %309, %440 : vector<2x128xf32>
    %442 = vector.broadcast %435 : vector<1x128xf32> to vector<2x128xf32>
    %443 = arith.mulf %413, %442 : vector<2x128xf32>
    %444 = vector.broadcast %433 : vector<1x128xf32> to vector<2x128xf32>
    %445 = arith.mulf %415, %444 : vector<2x128xf32>
    %446 = arith.addf %443, %445 : vector<2x128xf32>
    %447 = arith.addf %315, %446 : vector<2x128xf32>
    %c3_187 = arith.constant 3 : index
    %c2_188 = arith.constant 2 : index
    %c0_189 = arith.constant 0 : index
    %448 = vector.load %arg4[%c3_187, %c2_188, %c0_189] : memref<16x8x128xf32, #tpu.memory_space<vmem>>, vector<1x1x128xf32>
    %449 = vector.shape_cast %448 : vector<1x1x128xf32> to vector<1x128xf32>
    %c3_190 = arith.constant 3 : index
    %c2_191 = arith.constant 2 : index
    %c0_192 = arith.constant 0 : index
    %450 = vector.load %arg5[%c3_190, %c2_191, %c0_192] : memref<16x8x128xf32, #tpu.memory_space<vmem>>, vector<1x1x128xf32>
    %451 = vector.shape_cast %450 : vector<1x1x128xf32> to vector<1x128xf32>
    %452 = vector.broadcast %449 : vector<1x128xf32> to vector<2x128xf32>
    %453 = arith.mulf %413, %452 : vector<2x128xf32>
    %454 = vector.broadcast %451 : vector<1x128xf32> to vector<2x128xf32>
    %455 = arith.mulf %415, %454 : vector<2x128xf32>
    %456 = arith.subf %453, %455 : vector<2x128xf32>
    %457 = arith.addf %325, %456 : vector<2x128xf32>
    %458 = vector.broadcast %451 : vector<1x128xf32> to vector<2x128xf32>
    %459 = arith.mulf %413, %458 : vector<2x128xf32>
    %460 = vector.broadcast %449 : vector<1x128xf32> to vector<2x128xf32>
    %461 = arith.mulf %415, %460 : vector<2x128xf32>
    %462 = arith.addf %459, %461 : vector<2x128xf32>
    %463 = arith.addf %331, %462 : vector<2x128xf32>
    %c3_193 = arith.constant 3 : index
    %c3_194 = arith.constant 3 : index
    %c0_195 = arith.constant 0 : index
    %464 = vector.load %arg4[%c3_193, %c3_194, %c0_195] : memref<16x8x128xf32, #tpu.memory_space<vmem>>, vector<1x1x128xf32>
    %465 = vector.shape_cast %464 : vector<1x1x128xf32> to vector<1x128xf32>
    %c3_196 = arith.constant 3 : index
    %c3_197 = arith.constant 3 : index
    %c0_198 = arith.constant 0 : index
    %466 = vector.load %arg5[%c3_196, %c3_197, %c0_198] : memref<16x8x128xf32, #tpu.memory_space<vmem>>, vector<1x1x128xf32>
    %467 = vector.shape_cast %466 : vector<1x1x128xf32> to vector<1x128xf32>
    %468 = vector.broadcast %465 : vector<1x128xf32> to vector<2x128xf32>
    %469 = arith.mulf %413, %468 : vector<2x128xf32>
    %470 = vector.broadcast %467 : vector<1x128xf32> to vector<2x128xf32>
    %471 = arith.mulf %415, %470 : vector<2x128xf32>
    %472 = arith.subf %469, %471 : vector<2x128xf32>
    %473 = arith.addf %341, %472 : vector<2x128xf32>
    %474 = vector.broadcast %467 : vector<1x128xf32> to vector<2x128xf32>
    %475 = arith.mulf %413, %474 : vector<2x128xf32>
    %476 = vector.broadcast %465 : vector<1x128xf32> to vector<2x128xf32>
    %477 = arith.mulf %415, %476 : vector<2x128xf32>
    %478 = arith.addf %475, %477 : vector<2x128xf32>
    %479 = arith.addf %347, %478 : vector<2x128xf32>
    %c3_199 = arith.constant 3 : index
    %c4_200 = arith.constant 4 : index
    %c0_201 = arith.constant 0 : index
    %480 = vector.load %arg4[%c3_199, %c4_200, %c0_201] : memref<16x8x128xf32, #tpu.memory_space<vmem>>, vector<1x1x128xf32>
    %481 = vector.shape_cast %480 : vector<1x1x128xf32> to vector<1x128xf32>
    %c3_202 = arith.constant 3 : index
    %c4_203 = arith.constant 4 : index
    %c0_204 = arith.constant 0 : index
    %482 = vector.load %arg5[%c3_202, %c4_203, %c0_204] : memref<16x8x128xf32, #tpu.memory_space<vmem>>, vector<1x1x128xf32>
    %483 = vector.shape_cast %482 : vector<1x1x128xf32> to vector<1x128xf32>
    %484 = vector.broadcast %481 : vector<1x128xf32> to vector<2x128xf32>
    %485 = arith.mulf %413, %484 : vector<2x128xf32>
    %486 = vector.broadcast %483 : vector<1x128xf32> to vector<2x128xf32>
    %487 = arith.mulf %415, %486 : vector<2x128xf32>
    %488 = arith.subf %485, %487 : vector<2x128xf32>
    %489 = arith.addf %357, %488 : vector<2x128xf32>
    %490 = vector.broadcast %483 : vector<1x128xf32> to vector<2x128xf32>
    %491 = arith.mulf %413, %490 : vector<2x128xf32>
    %492 = vector.broadcast %481 : vector<1x128xf32> to vector<2x128xf32>
    %493 = arith.mulf %415, %492 : vector<2x128xf32>
    %494 = arith.addf %491, %493 : vector<2x128xf32>
    %495 = arith.addf %363, %494 : vector<2x128xf32>
    %c3_205 = arith.constant 3 : index
    %c5_206 = arith.constant 5 : index
    %c0_207 = arith.constant 0 : index
    %496 = vector.load %arg4[%c3_205, %c5_206, %c0_207] : memref<16x8x128xf32, #tpu.memory_space<vmem>>, vector<1x1x128xf32>
    %497 = vector.shape_cast %496 : vector<1x1x128xf32> to vector<1x128xf32>
    %c3_208 = arith.constant 3 : index
    %c5_209 = arith.constant 5 : index
    %c0_210 = arith.constant 0 : index
    %498 = vector.load %arg5[%c3_208, %c5_209, %c0_210] : memref<16x8x128xf32, #tpu.memory_space<vmem>>, vector<1x1x128xf32>
    %499 = vector.shape_cast %498 : vector<1x1x128xf32> to vector<1x128xf32>
    %500 = vector.broadcast %497 : vector<1x128xf32> to vector<2x128xf32>
    %501 = arith.mulf %413, %500 : vector<2x128xf32>
    %502 = vector.broadcast %499 : vector<1x128xf32> to vector<2x128xf32>
    %503 = arith.mulf %415, %502 : vector<2x128xf32>
    %504 = arith.subf %501, %503 : vector<2x128xf32>
    %505 = arith.addf %373, %504 : vector<2x128xf32>
    %506 = vector.broadcast %499 : vector<1x128xf32> to vector<2x128xf32>
    %507 = arith.mulf %413, %506 : vector<2x128xf32>
    %508 = vector.broadcast %497 : vector<1x128xf32> to vector<2x128xf32>
    %509 = arith.mulf %415, %508 : vector<2x128xf32>
    %510 = arith.addf %507, %509 : vector<2x128xf32>
    %511 = arith.addf %379, %510 : vector<2x128xf32>
    %c3_211 = arith.constant 3 : index
    %c6_212 = arith.constant 6 : index
    %c0_213 = arith.constant 0 : index
    %512 = vector.load %arg4[%c3_211, %c6_212, %c0_213] : memref<16x8x128xf32, #tpu.memory_space<vmem>>, vector<1x1x128xf32>
    %513 = vector.shape_cast %512 : vector<1x1x128xf32> to vector<1x128xf32>
    %c3_214 = arith.constant 3 : index
    %c6_215 = arith.constant 6 : index
    %c0_216 = arith.constant 0 : index
    %514 = vector.load %arg5[%c3_214, %c6_215, %c0_216] : memref<16x8x128xf32, #tpu.memory_space<vmem>>, vector<1x1x128xf32>
    %515 = vector.shape_cast %514 : vector<1x1x128xf32> to vector<1x128xf32>
    %516 = vector.broadcast %513 : vector<1x128xf32> to vector<2x128xf32>
    %517 = arith.mulf %413, %516 : vector<2x128xf32>
    %518 = vector.broadcast %515 : vector<1x128xf32> to vector<2x128xf32>
    %519 = arith.mulf %415, %518 : vector<2x128xf32>
    %520 = arith.subf %517, %519 : vector<2x128xf32>
    %521 = arith.addf %389, %520 : vector<2x128xf32>
    %522 = vector.broadcast %515 : vector<1x128xf32> to vector<2x128xf32>
    %523 = arith.mulf %413, %522 : vector<2x128xf32>
    %524 = vector.broadcast %513 : vector<1x128xf32> to vector<2x128xf32>
    %525 = arith.mulf %415, %524 : vector<2x128xf32>
    %526 = arith.addf %523, %525 : vector<2x128xf32>
    %527 = arith.addf %395, %526 : vector<2x128xf32>
    %c3_217 = arith.constant 3 : index
    %c7_218 = arith.constant 7 : index
    %c0_219 = arith.constant 0 : index
    %528 = vector.load %arg4[%c3_217, %c7_218, %c0_219] : memref<16x8x128xf32, #tpu.memory_space<vmem>>, vector<1x1x128xf32>
    %529 = vector.shape_cast %528 : vector<1x1x128xf32> to vector<1x128xf32>
    %c3_220 = arith.constant 3 : index
    %c7_221 = arith.constant 7 : index
    %c0_222 = arith.constant 0 : index
    %530 = vector.load %arg5[%c3_220, %c7_221, %c0_222] : memref<16x8x128xf32, #tpu.memory_space<vmem>>, vector<1x1x128xf32>
    %531 = vector.shape_cast %530 : vector<1x1x128xf32> to vector<1x128xf32>
    %532 = vector.broadcast %529 : vector<1x128xf32> to vector<2x128xf32>
    %533 = arith.mulf %413, %532 : vector<2x128xf32>
    %534 = vector.broadcast %531 : vector<1x128xf32> to vector<2x128xf32>
    %535 = arith.mulf %415, %534 : vector<2x128xf32>
    %536 = arith.subf %533, %535 : vector<2x128xf32>
    %537 = arith.addf %405, %536 : vector<2x128xf32>
    %538 = vector.broadcast %531 : vector<1x128xf32> to vector<2x128xf32>
    %539 = arith.mulf %413, %538 : vector<2x128xf32>
    %540 = vector.broadcast %529 : vector<1x128xf32> to vector<2x128xf32>
    %541 = arith.mulf %415, %540 : vector<2x128xf32>
    %542 = arith.addf %539, %541 : vector<2x128xf32>
    %543 = arith.addf %411, %542 : vector<2x128xf32>
    %c4_223 = arith.constant 4 : index
    %c0_224 = arith.constant 0 : index
    %c0_225 = arith.constant 0 : index
    %544 = vector.load %arg2[%c4_223, %c0_224, %c0_225] : memref<16x2x128xf32, #tpu.memory_space<vmem>>, vector<1x2x128xf32>
    %545 = vector.shape_cast %544 : vector<1x2x128xf32> to vector<2x128xf32>
    %c4_226 = arith.constant 4 : index
    %c0_227 = arith.constant 0 : index
    %c0_228 = arith.constant 0 : index
    %546 = vector.load %arg3[%c4_226, %c0_227, %c0_228] : memref<16x2x128xf32, #tpu.memory_space<vmem>>, vector<1x2x128xf32>
    %547 = vector.shape_cast %546 : vector<1x2x128xf32> to vector<2x128xf32>
    %c4_229 = arith.constant 4 : index
    %c0_230 = arith.constant 0 : index
    %c0_231 = arith.constant 0 : index
    %548 = vector.load %arg4[%c4_229, %c0_230, %c0_231] : memref<16x8x128xf32, #tpu.memory_space<vmem>>, vector<1x1x128xf32>
    %549 = vector.shape_cast %548 : vector<1x1x128xf32> to vector<1x128xf32>
    %c4_232 = arith.constant 4 : index
    %c0_233 = arith.constant 0 : index
    %c0_234 = arith.constant 0 : index
    %550 = vector.load %arg5[%c4_232, %c0_233, %c0_234] : memref<16x8x128xf32, #tpu.memory_space<vmem>>, vector<1x1x128xf32>
    %551 = vector.shape_cast %550 : vector<1x1x128xf32> to vector<1x128xf32>
    %552 = vector.broadcast %549 : vector<1x128xf32> to vector<2x128xf32>
    %553 = arith.mulf %545, %552 : vector<2x128xf32>
    %554 = vector.broadcast %551 : vector<1x128xf32> to vector<2x128xf32>
    %555 = arith.mulf %547, %554 : vector<2x128xf32>
    %556 = arith.subf %553, %555 : vector<2x128xf32>
    %557 = arith.addf %425, %556 : vector<2x128xf32>
    %558 = vector.broadcast %551 : vector<1x128xf32> to vector<2x128xf32>
    %559 = arith.mulf %545, %558 : vector<2x128xf32>
    %560 = vector.broadcast %549 : vector<1x128xf32> to vector<2x128xf32>
    %561 = arith.mulf %547, %560 : vector<2x128xf32>
    %562 = arith.addf %559, %561 : vector<2x128xf32>
    %563 = arith.addf %431, %562 : vector<2x128xf32>
    %c4_235 = arith.constant 4 : index
    %c1_236 = arith.constant 1 : index
    %c0_237 = arith.constant 0 : index
    %564 = vector.load %arg4[%c4_235, %c1_236, %c0_237] : memref<16x8x128xf32, #tpu.memory_space<vmem>>, vector<1x1x128xf32>
    %565 = vector.shape_cast %564 : vector<1x1x128xf32> to vector<1x128xf32>
    %c4_238 = arith.constant 4 : index
    %c1_239 = arith.constant 1 : index
    %c0_240 = arith.constant 0 : index
    %566 = vector.load %arg5[%c4_238, %c1_239, %c0_240] : memref<16x8x128xf32, #tpu.memory_space<vmem>>, vector<1x1x128xf32>
    %567 = vector.shape_cast %566 : vector<1x1x128xf32> to vector<1x128xf32>
    %568 = vector.broadcast %565 : vector<1x128xf32> to vector<2x128xf32>
    %569 = arith.mulf %545, %568 : vector<2x128xf32>
    %570 = vector.broadcast %567 : vector<1x128xf32> to vector<2x128xf32>
    %571 = arith.mulf %547, %570 : vector<2x128xf32>
    %572 = arith.subf %569, %571 : vector<2x128xf32>
    %573 = arith.addf %441, %572 : vector<2x128xf32>
    %574 = vector.broadcast %567 : vector<1x128xf32> to vector<2x128xf32>
    %575 = arith.mulf %545, %574 : vector<2x128xf32>
    %576 = vector.broadcast %565 : vector<1x128xf32> to vector<2x128xf32>
    %577 = arith.mulf %547, %576 : vector<2x128xf32>
    %578 = arith.addf %575, %577 : vector<2x128xf32>
    %579 = arith.addf %447, %578 : vector<2x128xf32>
    %c4_241 = arith.constant 4 : index
    %c2_242 = arith.constant 2 : index
    %c0_243 = arith.constant 0 : index
    %580 = vector.load %arg4[%c4_241, %c2_242, %c0_243] : memref<16x8x128xf32, #tpu.memory_space<vmem>>, vector<1x1x128xf32>
    %581 = vector.shape_cast %580 : vector<1x1x128xf32> to vector<1x128xf32>
    %c4_244 = arith.constant 4 : index
    %c2_245 = arith.constant 2 : index
    %c0_246 = arith.constant 0 : index
    %582 = vector.load %arg5[%c4_244, %c2_245, %c0_246] : memref<16x8x128xf32, #tpu.memory_space<vmem>>, vector<1x1x128xf32>
    %583 = vector.shape_cast %582 : vector<1x1x128xf32> to vector<1x128xf32>
    %584 = vector.broadcast %581 : vector<1x128xf32> to vector<2x128xf32>
    %585 = arith.mulf %545, %584 : vector<2x128xf32>
    %586 = vector.broadcast %583 : vector<1x128xf32> to vector<2x128xf32>
    %587 = arith.mulf %547, %586 : vector<2x128xf32>
    %588 = arith.subf %585, %587 : vector<2x128xf32>
    %589 = arith.addf %457, %588 : vector<2x128xf32>
    %590 = vector.broadcast %583 : vector<1x128xf32> to vector<2x128xf32>
    %591 = arith.mulf %545, %590 : vector<2x128xf32>
    %592 = vector.broadcast %581 : vector<1x128xf32> to vector<2x128xf32>
    %593 = arith.mulf %547, %592 : vector<2x128xf32>
    %594 = arith.addf %591, %593 : vector<2x128xf32>
    %595 = arith.addf %463, %594 : vector<2x128xf32>
    %c4_247 = arith.constant 4 : index
    %c3_248 = arith.constant 3 : index
    %c0_249 = arith.constant 0 : index
    %596 = vector.load %arg4[%c4_247, %c3_248, %c0_249] : memref<16x8x128xf32, #tpu.memory_space<vmem>>, vector<1x1x128xf32>
    %597 = vector.shape_cast %596 : vector<1x1x128xf32> to vector<1x128xf32>
    %c4_250 = arith.constant 4 : index
    %c3_251 = arith.constant 3 : index
    %c0_252 = arith.constant 0 : index
    %598 = vector.load %arg5[%c4_250, %c3_251, %c0_252] : memref<16x8x128xf32, #tpu.memory_space<vmem>>, vector<1x1x128xf32>
    %599 = vector.shape_cast %598 : vector<1x1x128xf32> to vector<1x128xf32>
    %600 = vector.broadcast %597 : vector<1x128xf32> to vector<2x128xf32>
    %601 = arith.mulf %545, %600 : vector<2x128xf32>
    %602 = vector.broadcast %599 : vector<1x128xf32> to vector<2x128xf32>
    %603 = arith.mulf %547, %602 : vector<2x128xf32>
    %604 = arith.subf %601, %603 : vector<2x128xf32>
    %605 = arith.addf %473, %604 : vector<2x128xf32>
    %606 = vector.broadcast %599 : vector<1x128xf32> to vector<2x128xf32>
    %607 = arith.mulf %545, %606 : vector<2x128xf32>
    %608 = vector.broadcast %597 : vector<1x128xf32> to vector<2x128xf32>
    %609 = arith.mulf %547, %608 : vector<2x128xf32>
    %610 = arith.addf %607, %609 : vector<2x128xf32>
    %611 = arith.addf %479, %610 : vector<2x128xf32>
    %c4_253 = arith.constant 4 : index
    %c4_254 = arith.constant 4 : index
    %c0_255 = arith.constant 0 : index
    %612 = vector.load %arg4[%c4_253, %c4_254, %c0_255] : memref<16x8x128xf32, #tpu.memory_space<vmem>>, vector<1x1x128xf32>
    %613 = vector.shape_cast %612 : vector<1x1x128xf32> to vector<1x128xf32>
    %c4_256 = arith.constant 4 : index
    %c4_257 = arith.constant 4 : index
    %c0_258 = arith.constant 0 : index
    %614 = vector.load %arg5[%c4_256, %c4_257, %c0_258] : memref<16x8x128xf32, #tpu.memory_space<vmem>>, vector<1x1x128xf32>
    %615 = vector.shape_cast %614 : vector<1x1x128xf32> to vector<1x128xf32>
    %616 = vector.broadcast %613 : vector<1x128xf32> to vector<2x128xf32>
    %617 = arith.mulf %545, %616 : vector<2x128xf32>
    %618 = vector.broadcast %615 : vector<1x128xf32> to vector<2x128xf32>
    %619 = arith.mulf %547, %618 : vector<2x128xf32>
    %620 = arith.subf %617, %619 : vector<2x128xf32>
    %621 = arith.addf %489, %620 : vector<2x128xf32>
    %622 = vector.broadcast %615 : vector<1x128xf32> to vector<2x128xf32>
    %623 = arith.mulf %545, %622 : vector<2x128xf32>
    %624 = vector.broadcast %613 : vector<1x128xf32> to vector<2x128xf32>
    %625 = arith.mulf %547, %624 : vector<2x128xf32>
    %626 = arith.addf %623, %625 : vector<2x128xf32>
    %627 = arith.addf %495, %626 : vector<2x128xf32>
    %c4_259 = arith.constant 4 : index
    %c5_260 = arith.constant 5 : index
    %c0_261 = arith.constant 0 : index
    %628 = vector.load %arg4[%c4_259, %c5_260, %c0_261] : memref<16x8x128xf32, #tpu.memory_space<vmem>>, vector<1x1x128xf32>
    %629 = vector.shape_cast %628 : vector<1x1x128xf32> to vector<1x128xf32>
    %c4_262 = arith.constant 4 : index
    %c5_263 = arith.constant 5 : index
    %c0_264 = arith.constant 0 : index
    %630 = vector.load %arg5[%c4_262, %c5_263, %c0_264] : memref<16x8x128xf32, #tpu.memory_space<vmem>>, vector<1x1x128xf32>
    %631 = vector.shape_cast %630 : vector<1x1x128xf32> to vector<1x128xf32>
    %632 = vector.broadcast %629 : vector<1x128xf32> to vector<2x128xf32>
    %633 = arith.mulf %545, %632 : vector<2x128xf32>
    %634 = vector.broadcast %631 : vector<1x128xf32> to vector<2x128xf32>
    %635 = arith.mulf %547, %634 : vector<2x128xf32>
    %636 = arith.subf %633, %635 : vector<2x128xf32>
    %637 = arith.addf %505, %636 : vector<2x128xf32>
    %638 = vector.broadcast %631 : vector<1x128xf32> to vector<2x128xf32>
    %639 = arith.mulf %545, %638 : vector<2x128xf32>
    %640 = vector.broadcast %629 : vector<1x128xf32> to vector<2x128xf32>
    %641 = arith.mulf %547, %640 : vector<2x128xf32>
    %642 = arith.addf %639, %641 : vector<2x128xf32>
    %643 = arith.addf %511, %642 : vector<2x128xf32>
    %c4_265 = arith.constant 4 : index
    %c6_266 = arith.constant 6 : index
    %c0_267 = arith.constant 0 : index
    %644 = vector.load %arg4[%c4_265, %c6_266, %c0_267] : memref<16x8x128xf32, #tpu.memory_space<vmem>>, vector<1x1x128xf32>
    %645 = vector.shape_cast %644 : vector<1x1x128xf32> to vector<1x128xf32>
    %c4_268 = arith.constant 4 : index
    %c6_269 = arith.constant 6 : index
    %c0_270 = arith.constant 0 : index
    %646 = vector.load %arg5[%c4_268, %c6_269, %c0_270] : memref<16x8x128xf32, #tpu.memory_space<vmem>>, vector<1x1x128xf32>
    %647 = vector.shape_cast %646 : vector<1x1x128xf32> to vector<1x128xf32>
    %648 = vector.broadcast %645 : vector<1x128xf32> to vector<2x128xf32>
    %649 = arith.mulf %545, %648 : vector<2x128xf32>
    %650 = vector.broadcast %647 : vector<1x128xf32> to vector<2x128xf32>
    %651 = arith.mulf %547, %650 : vector<2x128xf32>
    %652 = arith.subf %649, %651 : vector<2x128xf32>
    %653 = arith.addf %521, %652 : vector<2x128xf32>
    %654 = vector.broadcast %647 : vector<1x128xf32> to vector<2x128xf32>
    %655 = arith.mulf %545, %654 : vector<2x128xf32>
    %656 = vector.broadcast %645 : vector<1x128xf32> to vector<2x128xf32>
    %657 = arith.mulf %547, %656 : vector<2x128xf32>
    %658 = arith.addf %655, %657 : vector<2x128xf32>
    %659 = arith.addf %527, %658 : vector<2x128xf32>
    %c4_271 = arith.constant 4 : index
    %c7_272 = arith.constant 7 : index
    %c0_273 = arith.constant 0 : index
    %660 = vector.load %arg4[%c4_271, %c7_272, %c0_273] : memref<16x8x128xf32, #tpu.memory_space<vmem>>, vector<1x1x128xf32>
    %661 = vector.shape_cast %660 : vector<1x1x128xf32> to vector<1x128xf32>
    %c4_274 = arith.constant 4 : index
    %c7_275 = arith.constant 7 : index
    %c0_276 = arith.constant 0 : index
    %662 = vector.load %arg5[%c4_274, %c7_275, %c0_276] : memref<16x8x128xf32, #tpu.memory_space<vmem>>, vector<1x1x128xf32>
    %663 = vector.shape_cast %662 : vector<1x1x128xf32> to vector<1x128xf32>
    %664 = vector.broadcast %661 : vector<1x128xf32> to vector<2x128xf32>
    %665 = arith.mulf %545, %664 : vector<2x128xf32>
    %666 = vector.broadcast %663 : vector<1x128xf32> to vector<2x128xf32>
    %667 = arith.mulf %547, %666 : vector<2x128xf32>
    %668 = arith.subf %665, %667 : vector<2x128xf32>
    %669 = arith.addf %537, %668 : vector<2x128xf32>
    %670 = vector.broadcast %663 : vector<1x128xf32> to vector<2x128xf32>
    %671 = arith.mulf %545, %670 : vector<2x128xf32>
    %672 = vector.broadcast %661 : vector<1x128xf32> to vector<2x128xf32>
    %673 = arith.mulf %547, %672 : vector<2x128xf32>
    %674 = arith.addf %671, %673 : vector<2x128xf32>
    %675 = arith.addf %543, %674 : vector<2x128xf32>
    %c5_277 = arith.constant 5 : index
    %c0_278 = arith.constant 0 : index
    %c0_279 = arith.constant 0 : index
    %676 = vector.load %arg2[%c5_277, %c0_278, %c0_279] : memref<16x2x128xf32, #tpu.memory_space<vmem>>, vector<1x2x128xf32>
    %677 = vector.shape_cast %676 : vector<1x2x128xf32> to vector<2x128xf32>
    %c5_280 = arith.constant 5 : index
    %c0_281 = arith.constant 0 : index
    %c0_282 = arith.constant 0 : index
    %678 = vector.load %arg3[%c5_280, %c0_281, %c0_282] : memref<16x2x128xf32, #tpu.memory_space<vmem>>, vector<1x2x128xf32>
    %679 = vector.shape_cast %678 : vector<1x2x128xf32> to vector<2x128xf32>
    %c5_283 = arith.constant 5 : index
    %c0_284 = arith.constant 0 : index
    %c0_285 = arith.constant 0 : index
    %680 = vector.load %arg4[%c5_283, %c0_284, %c0_285] : memref<16x8x128xf32, #tpu.memory_space<vmem>>, vector<1x1x128xf32>
    %681 = vector.shape_cast %680 : vector<1x1x128xf32> to vector<1x128xf32>
    %c5_286 = arith.constant 5 : index
    %c0_287 = arith.constant 0 : index
    %c0_288 = arith.constant 0 : index
    %682 = vector.load %arg5[%c5_286, %c0_287, %c0_288] : memref<16x8x128xf32, #tpu.memory_space<vmem>>, vector<1x1x128xf32>
    %683 = vector.shape_cast %682 : vector<1x1x128xf32> to vector<1x128xf32>
    %684 = vector.broadcast %681 : vector<1x128xf32> to vector<2x128xf32>
    %685 = arith.mulf %677, %684 : vector<2x128xf32>
    %686 = vector.broadcast %683 : vector<1x128xf32> to vector<2x128xf32>
    %687 = arith.mulf %679, %686 : vector<2x128xf32>
    %688 = arith.subf %685, %687 : vector<2x128xf32>
    %689 = arith.addf %557, %688 : vector<2x128xf32>
    %690 = vector.broadcast %683 : vector<1x128xf32> to vector<2x128xf32>
    %691 = arith.mulf %677, %690 : vector<2x128xf32>
    %692 = vector.broadcast %681 : vector<1x128xf32> to vector<2x128xf32>
    %693 = arith.mulf %679, %692 : vector<2x128xf32>
    %694 = arith.addf %691, %693 : vector<2x128xf32>
    %695 = arith.addf %563, %694 : vector<2x128xf32>
    %c5_289 = arith.constant 5 : index
    %c1_290 = arith.constant 1 : index
    %c0_291 = arith.constant 0 : index
    %696 = vector.load %arg4[%c5_289, %c1_290, %c0_291] : memref<16x8x128xf32, #tpu.memory_space<vmem>>, vector<1x1x128xf32>
    %697 = vector.shape_cast %696 : vector<1x1x128xf32> to vector<1x128xf32>
    %c5_292 = arith.constant 5 : index
    %c1_293 = arith.constant 1 : index
    %c0_294 = arith.constant 0 : index
    %698 = vector.load %arg5[%c5_292, %c1_293, %c0_294] : memref<16x8x128xf32, #tpu.memory_space<vmem>>, vector<1x1x128xf32>
    %699 = vector.shape_cast %698 : vector<1x1x128xf32> to vector<1x128xf32>
    %700 = vector.broadcast %697 : vector<1x128xf32> to vector<2x128xf32>
    %701 = arith.mulf %677, %700 : vector<2x128xf32>
    %702 = vector.broadcast %699 : vector<1x128xf32> to vector<2x128xf32>
    %703 = arith.mulf %679, %702 : vector<2x128xf32>
    %704 = arith.subf %701, %703 : vector<2x128xf32>
    %705 = arith.addf %573, %704 : vector<2x128xf32>
    %706 = vector.broadcast %699 : vector<1x128xf32> to vector<2x128xf32>
    %707 = arith.mulf %677, %706 : vector<2x128xf32>
    %708 = vector.broadcast %697 : vector<1x128xf32> to vector<2x128xf32>
    %709 = arith.mulf %679, %708 : vector<2x128xf32>
    %710 = arith.addf %707, %709 : vector<2x128xf32>
    %711 = arith.addf %579, %710 : vector<2x128xf32>
    %c5_295 = arith.constant 5 : index
    %c2_296 = arith.constant 2 : index
    %c0_297 = arith.constant 0 : index
    %712 = vector.load %arg4[%c5_295, %c2_296, %c0_297] : memref<16x8x128xf32, #tpu.memory_space<vmem>>, vector<1x1x128xf32>
    %713 = vector.shape_cast %712 : vector<1x1x128xf32> to vector<1x128xf32>
    %c5_298 = arith.constant 5 : index
    %c2_299 = arith.constant 2 : index
    %c0_300 = arith.constant 0 : index
    %714 = vector.load %arg5[%c5_298, %c2_299, %c0_300] : memref<16x8x128xf32, #tpu.memory_space<vmem>>, vector<1x1x128xf32>
    %715 = vector.shape_cast %714 : vector<1x1x128xf32> to vector<1x128xf32>
    %716 = vector.broadcast %713 : vector<1x128xf32> to vector<2x128xf32>
    %717 = arith.mulf %677, %716 : vector<2x128xf32>
    %718 = vector.broadcast %715 : vector<1x128xf32> to vector<2x128xf32>
    %719 = arith.mulf %679, %718 : vector<2x128xf32>
    %720 = arith.subf %717, %719 : vector<2x128xf32>
    %721 = arith.addf %589, %720 : vector<2x128xf32>
    %722 = vector.broadcast %715 : vector<1x128xf32> to vector<2x128xf32>
    %723 = arith.mulf %677, %722 : vector<2x128xf32>
    %724 = vector.broadcast %713 : vector<1x128xf32> to vector<2x128xf32>
    %725 = arith.mulf %679, %724 : vector<2x128xf32>
    %726 = arith.addf %723, %725 : vector<2x128xf32>
    %727 = arith.addf %595, %726 : vector<2x128xf32>
    %c5_301 = arith.constant 5 : index
    %c3_302 = arith.constant 3 : index
    %c0_303 = arith.constant 0 : index
    %728 = vector.load %arg4[%c5_301, %c3_302, %c0_303] : memref<16x8x128xf32, #tpu.memory_space<vmem>>, vector<1x1x128xf32>
    %729 = vector.shape_cast %728 : vector<1x1x128xf32> to vector<1x128xf32>
    %c5_304 = arith.constant 5 : index
    %c3_305 = arith.constant 3 : index
    %c0_306 = arith.constant 0 : index
    %730 = vector.load %arg5[%c5_304, %c3_305, %c0_306] : memref<16x8x128xf32, #tpu.memory_space<vmem>>, vector<1x1x128xf32>
    %731 = vector.shape_cast %730 : vector<1x1x128xf32> to vector<1x128xf32>
    %732 = vector.broadcast %729 : vector<1x128xf32> to vector<2x128xf32>
    %733 = arith.mulf %677, %732 : vector<2x128xf32>
    %734 = vector.broadcast %731 : vector<1x128xf32> to vector<2x128xf32>
    %735 = arith.mulf %679, %734 : vector<2x128xf32>
    %736 = arith.subf %733, %735 : vector<2x128xf32>
    %737 = arith.addf %605, %736 : vector<2x128xf32>
    %738 = vector.broadcast %731 : vector<1x128xf32> to vector<2x128xf32>
    %739 = arith.mulf %677, %738 : vector<2x128xf32>
    %740 = vector.broadcast %729 : vector<1x128xf32> to vector<2x128xf32>
    %741 = arith.mulf %679, %740 : vector<2x128xf32>
    %742 = arith.addf %739, %741 : vector<2x128xf32>
    %743 = arith.addf %611, %742 : vector<2x128xf32>
    %c5_307 = arith.constant 5 : index
    %c4_308 = arith.constant 4 : index
    %c0_309 = arith.constant 0 : index
    %744 = vector.load %arg4[%c5_307, %c4_308, %c0_309] : memref<16x8x128xf32, #tpu.memory_space<vmem>>, vector<1x1x128xf32>
    %745 = vector.shape_cast %744 : vector<1x1x128xf32> to vector<1x128xf32>
    %c5_310 = arith.constant 5 : index
    %c4_311 = arith.constant 4 : index
    %c0_312 = arith.constant 0 : index
    %746 = vector.load %arg5[%c5_310, %c4_311, %c0_312] : memref<16x8x128xf32, #tpu.memory_space<vmem>>, vector<1x1x128xf32>
    %747 = vector.shape_cast %746 : vector<1x1x128xf32> to vector<1x128xf32>
    %748 = vector.broadcast %745 : vector<1x128xf32> to vector<2x128xf32>
    %749 = arith.mulf %677, %748 : vector<2x128xf32>
    %750 = vector.broadcast %747 : vector<1x128xf32> to vector<2x128xf32>
    %751 = arith.mulf %679, %750 : vector<2x128xf32>
    %752 = arith.subf %749, %751 : vector<2x128xf32>
    %753 = arith.addf %621, %752 : vector<2x128xf32>
    %754 = vector.broadcast %747 : vector<1x128xf32> to vector<2x128xf32>
    %755 = arith.mulf %677, %754 : vector<2x128xf32>
    %756 = vector.broadcast %745 : vector<1x128xf32> to vector<2x128xf32>
    %757 = arith.mulf %679, %756 : vector<2x128xf32>
    %758 = arith.addf %755, %757 : vector<2x128xf32>
    %759 = arith.addf %627, %758 : vector<2x128xf32>
    %c5_313 = arith.constant 5 : index
    %c5_314 = arith.constant 5 : index
    %c0_315 = arith.constant 0 : index
    %760 = vector.load %arg4[%c5_313, %c5_314, %c0_315] : memref<16x8x128xf32, #tpu.memory_space<vmem>>, vector<1x1x128xf32>
    %761 = vector.shape_cast %760 : vector<1x1x128xf32> to vector<1x128xf32>
    %c5_316 = arith.constant 5 : index
    %c5_317 = arith.constant 5 : index
    %c0_318 = arith.constant 0 : index
    %762 = vector.load %arg5[%c5_316, %c5_317, %c0_318] : memref<16x8x128xf32, #tpu.memory_space<vmem>>, vector<1x1x128xf32>
    %763 = vector.shape_cast %762 : vector<1x1x128xf32> to vector<1x128xf32>
    %764 = vector.broadcast %761 : vector<1x128xf32> to vector<2x128xf32>
    %765 = arith.mulf %677, %764 : vector<2x128xf32>
    %766 = vector.broadcast %763 : vector<1x128xf32> to vector<2x128xf32>
    %767 = arith.mulf %679, %766 : vector<2x128xf32>
    %768 = arith.subf %765, %767 : vector<2x128xf32>
    %769 = arith.addf %637, %768 : vector<2x128xf32>
    %770 = vector.broadcast %763 : vector<1x128xf32> to vector<2x128xf32>
    %771 = arith.mulf %677, %770 : vector<2x128xf32>
    %772 = vector.broadcast %761 : vector<1x128xf32> to vector<2x128xf32>
    %773 = arith.mulf %679, %772 : vector<2x128xf32>
    %774 = arith.addf %771, %773 : vector<2x128xf32>
    %775 = arith.addf %643, %774 : vector<2x128xf32>
    %c5_319 = arith.constant 5 : index
    %c6_320 = arith.constant 6 : index
    %c0_321 = arith.constant 0 : index
    %776 = vector.load %arg4[%c5_319, %c6_320, %c0_321] : memref<16x8x128xf32, #tpu.memory_space<vmem>>, vector<1x1x128xf32>
    %777 = vector.shape_cast %776 : vector<1x1x128xf32> to vector<1x128xf32>
    %c5_322 = arith.constant 5 : index
    %c6_323 = arith.constant 6 : index
    %c0_324 = arith.constant 0 : index
    %778 = vector.load %arg5[%c5_322, %c6_323, %c0_324] : memref<16x8x128xf32, #tpu.memory_space<vmem>>, vector<1x1x128xf32>
    %779 = vector.shape_cast %778 : vector<1x1x128xf32> to vector<1x128xf32>
    %780 = vector.broadcast %777 : vector<1x128xf32> to vector<2x128xf32>
    %781 = arith.mulf %677, %780 : vector<2x128xf32>
    %782 = vector.broadcast %779 : vector<1x128xf32> to vector<2x128xf32>
    %783 = arith.mulf %679, %782 : vector<2x128xf32>
    %784 = arith.subf %781, %783 : vector<2x128xf32>
    %785 = arith.addf %653, %784 : vector<2x128xf32>
    %786 = vector.broadcast %779 : vector<1x128xf32> to vector<2x128xf32>
    %787 = arith.mulf %677, %786 : vector<2x128xf32>
    %788 = vector.broadcast %777 : vector<1x128xf32> to vector<2x128xf32>
    %789 = arith.mulf %679, %788 : vector<2x128xf32>
    %790 = arith.addf %787, %789 : vector<2x128xf32>
    %791 = arith.addf %659, %790 : vector<2x128xf32>
    %c5_325 = arith.constant 5 : index
    %c7_326 = arith.constant 7 : index
    %c0_327 = arith.constant 0 : index
    %792 = vector.load %arg4[%c5_325, %c7_326, %c0_327] : memref<16x8x128xf32, #tpu.memory_space<vmem>>, vector<1x1x128xf32>
    %793 = vector.shape_cast %792 : vector<1x1x128xf32> to vector<1x128xf32>
    %c5_328 = arith.constant 5 : index
    %c7_329 = arith.constant 7 : index
    %c0_330 = arith.constant 0 : index
    %794 = vector.load %arg5[%c5_328, %c7_329, %c0_330] : memref<16x8x128xf32, #tpu.memory_space<vmem>>, vector<1x1x128xf32>
    %795 = vector.shape_cast %794 : vector<1x1x128xf32> to vector<1x128xf32>
    %796 = vector.broadcast %793 : vector<1x128xf32> to vector<2x128xf32>
    %797 = arith.mulf %677, %796 : vector<2x128xf32>
    %798 = vector.broadcast %795 : vector<1x128xf32> to vector<2x128xf32>
    %799 = arith.mulf %679, %798 : vector<2x128xf32>
    %800 = arith.subf %797, %799 : vector<2x128xf32>
    %801 = arith.addf %669, %800 : vector<2x128xf32>
    %802 = vector.broadcast %795 : vector<1x128xf32> to vector<2x128xf32>
    %803 = arith.mulf %677, %802 : vector<2x128xf32>
    %804 = vector.broadcast %793 : vector<1x128xf32> to vector<2x128xf32>
    %805 = arith.mulf %679, %804 : vector<2x128xf32>
    %806 = arith.addf %803, %805 : vector<2x128xf32>
    %807 = arith.addf %675, %806 : vector<2x128xf32>
    %c6_331 = arith.constant 6 : index
    %c0_332 = arith.constant 0 : index
    %c0_333 = arith.constant 0 : index
    %808 = vector.load %arg2[%c6_331, %c0_332, %c0_333] : memref<16x2x128xf32, #tpu.memory_space<vmem>>, vector<1x2x128xf32>
    %809 = vector.shape_cast %808 : vector<1x2x128xf32> to vector<2x128xf32>
    %c6_334 = arith.constant 6 : index
    %c0_335 = arith.constant 0 : index
    %c0_336 = arith.constant 0 : index
    %810 = vector.load %arg3[%c6_334, %c0_335, %c0_336] : memref<16x2x128xf32, #tpu.memory_space<vmem>>, vector<1x2x128xf32>
    %811 = vector.shape_cast %810 : vector<1x2x128xf32> to vector<2x128xf32>
    %c6_337 = arith.constant 6 : index
    %c0_338 = arith.constant 0 : index
    %c0_339 = arith.constant 0 : index
    %812 = vector.load %arg4[%c6_337, %c0_338, %c0_339] : memref<16x8x128xf32, #tpu.memory_space<vmem>>, vector<1x1x128xf32>
    %813 = vector.shape_cast %812 : vector<1x1x128xf32> to vector<1x128xf32>
    %c6_340 = arith.constant 6 : index
    %c0_341 = arith.constant 0 : index
    %c0_342 = arith.constant 0 : index
    %814 = vector.load %arg5[%c6_340, %c0_341, %c0_342] : memref<16x8x128xf32, #tpu.memory_space<vmem>>, vector<1x1x128xf32>
    %815 = vector.shape_cast %814 : vector<1x1x128xf32> to vector<1x128xf32>
    %816 = vector.broadcast %813 : vector<1x128xf32> to vector<2x128xf32>
    %817 = arith.mulf %809, %816 : vector<2x128xf32>
    %818 = vector.broadcast %815 : vector<1x128xf32> to vector<2x128xf32>
    %819 = arith.mulf %811, %818 : vector<2x128xf32>
    %820 = arith.subf %817, %819 : vector<2x128xf32>
    %821 = arith.addf %689, %820 : vector<2x128xf32>
    %822 = vector.broadcast %815 : vector<1x128xf32> to vector<2x128xf32>
    %823 = arith.mulf %809, %822 : vector<2x128xf32>
    %824 = vector.broadcast %813 : vector<1x128xf32> to vector<2x128xf32>
    %825 = arith.mulf %811, %824 : vector<2x128xf32>
    %826 = arith.addf %823, %825 : vector<2x128xf32>
    %827 = arith.addf %695, %826 : vector<2x128xf32>
    %c6_343 = arith.constant 6 : index
    %c1_344 = arith.constant 1 : index
    %c0_345 = arith.constant 0 : index
    %828 = vector.load %arg4[%c6_343, %c1_344, %c0_345] : memref<16x8x128xf32, #tpu.memory_space<vmem>>, vector<1x1x128xf32>
    %829 = vector.shape_cast %828 : vector<1x1x128xf32> to vector<1x128xf32>
    %c6_346 = arith.constant 6 : index
    %c1_347 = arith.constant 1 : index
    %c0_348 = arith.constant 0 : index
    %830 = vector.load %arg5[%c6_346, %c1_347, %c0_348] : memref<16x8x128xf32, #tpu.memory_space<vmem>>, vector<1x1x128xf32>
    %831 = vector.shape_cast %830 : vector<1x1x128xf32> to vector<1x128xf32>
    %832 = vector.broadcast %829 : vector<1x128xf32> to vector<2x128xf32>
    %833 = arith.mulf %809, %832 : vector<2x128xf32>
    %834 = vector.broadcast %831 : vector<1x128xf32> to vector<2x128xf32>
    %835 = arith.mulf %811, %834 : vector<2x128xf32>
    %836 = arith.subf %833, %835 : vector<2x128xf32>
    %837 = arith.addf %705, %836 : vector<2x128xf32>
    %838 = vector.broadcast %831 : vector<1x128xf32> to vector<2x128xf32>
    %839 = arith.mulf %809, %838 : vector<2x128xf32>
    %840 = vector.broadcast %829 : vector<1x128xf32> to vector<2x128xf32>
    %841 = arith.mulf %811, %840 : vector<2x128xf32>
    %842 = arith.addf %839, %841 : vector<2x128xf32>
    %843 = arith.addf %711, %842 : vector<2x128xf32>
    %c6_349 = arith.constant 6 : index
    %c2_350 = arith.constant 2 : index
    %c0_351 = arith.constant 0 : index
    %844 = vector.load %arg4[%c6_349, %c2_350, %c0_351] : memref<16x8x128xf32, #tpu.memory_space<vmem>>, vector<1x1x128xf32>
    %845 = vector.shape_cast %844 : vector<1x1x128xf32> to vector<1x128xf32>
    %c6_352 = arith.constant 6 : index
    %c2_353 = arith.constant 2 : index
    %c0_354 = arith.constant 0 : index
    %846 = vector.load %arg5[%c6_352, %c2_353, %c0_354] : memref<16x8x128xf32, #tpu.memory_space<vmem>>, vector<1x1x128xf32>
    %847 = vector.shape_cast %846 : vector<1x1x128xf32> to vector<1x128xf32>
    %848 = vector.broadcast %845 : vector<1x128xf32> to vector<2x128xf32>
    %849 = arith.mulf %809, %848 : vector<2x128xf32>
    %850 = vector.broadcast %847 : vector<1x128xf32> to vector<2x128xf32>
    %851 = arith.mulf %811, %850 : vector<2x128xf32>
    %852 = arith.subf %849, %851 : vector<2x128xf32>
    %853 = arith.addf %721, %852 : vector<2x128xf32>
    %854 = vector.broadcast %847 : vector<1x128xf32> to vector<2x128xf32>
    %855 = arith.mulf %809, %854 : vector<2x128xf32>
    %856 = vector.broadcast %845 : vector<1x128xf32> to vector<2x128xf32>
    %857 = arith.mulf %811, %856 : vector<2x128xf32>
    %858 = arith.addf %855, %857 : vector<2x128xf32>
    %859 = arith.addf %727, %858 : vector<2x128xf32>
    %c6_355 = arith.constant 6 : index
    %c3_356 = arith.constant 3 : index
    %c0_357 = arith.constant 0 : index
    %860 = vector.load %arg4[%c6_355, %c3_356, %c0_357] : memref<16x8x128xf32, #tpu.memory_space<vmem>>, vector<1x1x128xf32>
    %861 = vector.shape_cast %860 : vector<1x1x128xf32> to vector<1x128xf32>
    %c6_358 = arith.constant 6 : index
    %c3_359 = arith.constant 3 : index
    %c0_360 = arith.constant 0 : index
    %862 = vector.load %arg5[%c6_358, %c3_359, %c0_360] : memref<16x8x128xf32, #tpu.memory_space<vmem>>, vector<1x1x128xf32>
    %863 = vector.shape_cast %862 : vector<1x1x128xf32> to vector<1x128xf32>
    %864 = vector.broadcast %861 : vector<1x128xf32> to vector<2x128xf32>
    %865 = arith.mulf %809, %864 : vector<2x128xf32>
    %866 = vector.broadcast %863 : vector<1x128xf32> to vector<2x128xf32>
    %867 = arith.mulf %811, %866 : vector<2x128xf32>
    %868 = arith.subf %865, %867 : vector<2x128xf32>
    %869 = arith.addf %737, %868 : vector<2x128xf32>
    %870 = vector.broadcast %863 : vector<1x128xf32> to vector<2x128xf32>
    %871 = arith.mulf %809, %870 : vector<2x128xf32>
    %872 = vector.broadcast %861 : vector<1x128xf32> to vector<2x128xf32>
    %873 = arith.mulf %811, %872 : vector<2x128xf32>
    %874 = arith.addf %871, %873 : vector<2x128xf32>
    %875 = arith.addf %743, %874 : vector<2x128xf32>
    %c6_361 = arith.constant 6 : index
    %c4_362 = arith.constant 4 : index
    %c0_363 = arith.constant 0 : index
    %876 = vector.load %arg4[%c6_361, %c4_362, %c0_363] : memref<16x8x128xf32, #tpu.memory_space<vmem>>, vector<1x1x128xf32>
    %877 = vector.shape_cast %876 : vector<1x1x128xf32> to vector<1x128xf32>
    %c6_364 = arith.constant 6 : index
    %c4_365 = arith.constant 4 : index
    %c0_366 = arith.constant 0 : index
    %878 = vector.load %arg5[%c6_364, %c4_365, %c0_366] : memref<16x8x128xf32, #tpu.memory_space<vmem>>, vector<1x1x128xf32>
    %879 = vector.shape_cast %878 : vector<1x1x128xf32> to vector<1x128xf32>
    %880 = vector.broadcast %877 : vector<1x128xf32> to vector<2x128xf32>
    %881 = arith.mulf %809, %880 : vector<2x128xf32>
    %882 = vector.broadcast %879 : vector<1x128xf32> to vector<2x128xf32>
    %883 = arith.mulf %811, %882 : vector<2x128xf32>
    %884 = arith.subf %881, %883 : vector<2x128xf32>
    %885 = arith.addf %753, %884 : vector<2x128xf32>
    %886 = vector.broadcast %879 : vector<1x128xf32> to vector<2x128xf32>
    %887 = arith.mulf %809, %886 : vector<2x128xf32>
    %888 = vector.broadcast %877 : vector<1x128xf32> to vector<2x128xf32>
    %889 = arith.mulf %811, %888 : vector<2x128xf32>
    %890 = arith.addf %887, %889 : vector<2x128xf32>
    %891 = arith.addf %759, %890 : vector<2x128xf32>
    %c6_367 = arith.constant 6 : index
    %c5_368 = arith.constant 5 : index
    %c0_369 = arith.constant 0 : index
    %892 = vector.load %arg4[%c6_367, %c5_368, %c0_369] : memref<16x8x128xf32, #tpu.memory_space<vmem>>, vector<1x1x128xf32>
    %893 = vector.shape_cast %892 : vector<1x1x128xf32> to vector<1x128xf32>
    %c6_370 = arith.constant 6 : index
    %c5_371 = arith.constant 5 : index
    %c0_372 = arith.constant 0 : index
    %894 = vector.load %arg5[%c6_370, %c5_371, %c0_372] : memref<16x8x128xf32, #tpu.memory_space<vmem>>, vector<1x1x128xf32>
    %895 = vector.shape_cast %894 : vector<1x1x128xf32> to vector<1x128xf32>
    %896 = vector.broadcast %893 : vector<1x128xf32> to vector<2x128xf32>
    %897 = arith.mulf %809, %896 : vector<2x128xf32>
    %898 = vector.broadcast %895 : vector<1x128xf32> to vector<2x128xf32>
    %899 = arith.mulf %811, %898 : vector<2x128xf32>
    %900 = arith.subf %897, %899 : vector<2x128xf32>
    %901 = arith.addf %769, %900 : vector<2x128xf32>
    %902 = vector.broadcast %895 : vector<1x128xf32> to vector<2x128xf32>
    %903 = arith.mulf %809, %902 : vector<2x128xf32>
    %904 = vector.broadcast %893 : vector<1x128xf32> to vector<2x128xf32>
    %905 = arith.mulf %811, %904 : vector<2x128xf32>
    %906 = arith.addf %903, %905 : vector<2x128xf32>
    %907 = arith.addf %775, %906 : vector<2x128xf32>
    %c6_373 = arith.constant 6 : index
    %c6_374 = arith.constant 6 : index
    %c0_375 = arith.constant 0 : index
    %908 = vector.load %arg4[%c6_373, %c6_374, %c0_375] : memref<16x8x128xf32, #tpu.memory_space<vmem>>, vector<1x1x128xf32>
    %909 = vector.shape_cast %908 : vector<1x1x128xf32> to vector<1x128xf32>
    %c6_376 = arith.constant 6 : index
    %c6_377 = arith.constant 6 : index
    %c0_378 = arith.constant 0 : index
    %910 = vector.load %arg5[%c6_376, %c6_377, %c0_378] : memref<16x8x128xf32, #tpu.memory_space<vmem>>, vector<1x1x128xf32>
    %911 = vector.shape_cast %910 : vector<1x1x128xf32> to vector<1x128xf32>
    %912 = vector.broadcast %909 : vector<1x128xf32> to vector<2x128xf32>
    %913 = arith.mulf %809, %912 : vector<2x128xf32>
    %914 = vector.broadcast %911 : vector<1x128xf32> to vector<2x128xf32>
    %915 = arith.mulf %811, %914 : vector<2x128xf32>
    %916 = arith.subf %913, %915 : vector<2x128xf32>
    %917 = arith.addf %785, %916 : vector<2x128xf32>
    %918 = vector.broadcast %911 : vector<1x128xf32> to vector<2x128xf32>
    %919 = arith.mulf %809, %918 : vector<2x128xf32>
    %920 = vector.broadcast %909 : vector<1x128xf32> to vector<2x128xf32>
    %921 = arith.mulf %811, %920 : vector<2x128xf32>
    %922 = arith.addf %919, %921 : vector<2x128xf32>
    %923 = arith.addf %791, %922 : vector<2x128xf32>
    %c6_379 = arith.constant 6 : index
    %c7_380 = arith.constant 7 : index
    %c0_381 = arith.constant 0 : index
    %924 = vector.load %arg4[%c6_379, %c7_380, %c0_381] : memref<16x8x128xf32, #tpu.memory_space<vmem>>, vector<1x1x128xf32>
    %925 = vector.shape_cast %924 : vector<1x1x128xf32> to vector<1x128xf32>
    %c6_382 = arith.constant 6 : index
    %c7_383 = arith.constant 7 : index
    %c0_384 = arith.constant 0 : index
    %926 = vector.load %arg5[%c6_382, %c7_383, %c0_384] : memref<16x8x128xf32, #tpu.memory_space<vmem>>, vector<1x1x128xf32>
    %927 = vector.shape_cast %926 : vector<1x1x128xf32> to vector<1x128xf32>
    %928 = vector.broadcast %925 : vector<1x128xf32> to vector<2x128xf32>
    %929 = arith.mulf %809, %928 : vector<2x128xf32>
    %930 = vector.broadcast %927 : vector<1x128xf32> to vector<2x128xf32>
    %931 = arith.mulf %811, %930 : vector<2x128xf32>
    %932 = arith.subf %929, %931 : vector<2x128xf32>
    %933 = arith.addf %801, %932 : vector<2x128xf32>
    %934 = vector.broadcast %927 : vector<1x128xf32> to vector<2x128xf32>
    %935 = arith.mulf %809, %934 : vector<2x128xf32>
    %936 = vector.broadcast %925 : vector<1x128xf32> to vector<2x128xf32>
    %937 = arith.mulf %811, %936 : vector<2x128xf32>
    %938 = arith.addf %935, %937 : vector<2x128xf32>
    %939 = arith.addf %807, %938 : vector<2x128xf32>
    %c7_385 = arith.constant 7 : index
    %c0_386 = arith.constant 0 : index
    %c0_387 = arith.constant 0 : index
    %940 = vector.load %arg2[%c7_385, %c0_386, %c0_387] : memref<16x2x128xf32, #tpu.memory_space<vmem>>, vector<1x2x128xf32>
    %941 = vector.shape_cast %940 : vector<1x2x128xf32> to vector<2x128xf32>
    %c7_388 = arith.constant 7 : index
    %c0_389 = arith.constant 0 : index
    %c0_390 = arith.constant 0 : index
    %942 = vector.load %arg3[%c7_388, %c0_389, %c0_390] : memref<16x2x128xf32, #tpu.memory_space<vmem>>, vector<1x2x128xf32>
    %943 = vector.shape_cast %942 : vector<1x2x128xf32> to vector<2x128xf32>
    %c7_391 = arith.constant 7 : index
    %c0_392 = arith.constant 0 : index
    %c0_393 = arith.constant 0 : index
    %944 = vector.load %arg4[%c7_391, %c0_392, %c0_393] : memref<16x8x128xf32, #tpu.memory_space<vmem>>, vector<1x1x128xf32>
    %945 = vector.shape_cast %944 : vector<1x1x128xf32> to vector<1x128xf32>
    %c7_394 = arith.constant 7 : index
    %c0_395 = arith.constant 0 : index
    %c0_396 = arith.constant 0 : index
    %946 = vector.load %arg5[%c7_394, %c0_395, %c0_396] : memref<16x8x128xf32, #tpu.memory_space<vmem>>, vector<1x1x128xf32>
    %947 = vector.shape_cast %946 : vector<1x1x128xf32> to vector<1x128xf32>
    %948 = vector.broadcast %945 : vector<1x128xf32> to vector<2x128xf32>
    %949 = arith.mulf %941, %948 : vector<2x128xf32>
    %950 = vector.broadcast %947 : vector<1x128xf32> to vector<2x128xf32>
    %951 = arith.mulf %943, %950 : vector<2x128xf32>
    %952 = arith.subf %949, %951 : vector<2x128xf32>
    %953 = arith.addf %821, %952 : vector<2x128xf32>
    %954 = vector.broadcast %947 : vector<1x128xf32> to vector<2x128xf32>
    %955 = arith.mulf %941, %954 : vector<2x128xf32>
    %956 = vector.broadcast %945 : vector<1x128xf32> to vector<2x128xf32>
    %957 = arith.mulf %943, %956 : vector<2x128xf32>
    %958 = arith.addf %955, %957 : vector<2x128xf32>
    %959 = arith.addf %827, %958 : vector<2x128xf32>
    %c7_397 = arith.constant 7 : index
    %c1_398 = arith.constant 1 : index
    %c0_399 = arith.constant 0 : index
    %960 = vector.load %arg4[%c7_397, %c1_398, %c0_399] : memref<16x8x128xf32, #tpu.memory_space<vmem>>, vector<1x1x128xf32>
    %961 = vector.shape_cast %960 : vector<1x1x128xf32> to vector<1x128xf32>
    %c7_400 = arith.constant 7 : index
    %c1_401 = arith.constant 1 : index
    %c0_402 = arith.constant 0 : index
    %962 = vector.load %arg5[%c7_400, %c1_401, %c0_402] : memref<16x8x128xf32, #tpu.memory_space<vmem>>, vector<1x1x128xf32>
    %963 = vector.shape_cast %962 : vector<1x1x128xf32> to vector<1x128xf32>
    %964 = vector.broadcast %961 : vector<1x128xf32> to vector<2x128xf32>
    %965 = arith.mulf %941, %964 : vector<2x128xf32>
    %966 = vector.broadcast %963 : vector<1x128xf32> to vector<2x128xf32>
    %967 = arith.mulf %943, %966 : vector<2x128xf32>
    %968 = arith.subf %965, %967 : vector<2x128xf32>
    %969 = arith.addf %837, %968 : vector<2x128xf32>
    %970 = vector.broadcast %963 : vector<1x128xf32> to vector<2x128xf32>
    %971 = arith.mulf %941, %970 : vector<2x128xf32>
    %972 = vector.broadcast %961 : vector<1x128xf32> to vector<2x128xf32>
    %973 = arith.mulf %943, %972 : vector<2x128xf32>
    %974 = arith.addf %971, %973 : vector<2x128xf32>
    %975 = arith.addf %843, %974 : vector<2x128xf32>
    %c7_403 = arith.constant 7 : index
    %c2_404 = arith.constant 2 : index
    %c0_405 = arith.constant 0 : index
    %976 = vector.load %arg4[%c7_403, %c2_404, %c0_405] : memref<16x8x128xf32, #tpu.memory_space<vmem>>, vector<1x1x128xf32>
    %977 = vector.shape_cast %976 : vector<1x1x128xf32> to vector<1x128xf32>
    %c7_406 = arith.constant 7 : index
    %c2_407 = arith.constant 2 : index
    %c0_408 = arith.constant 0 : index
    %978 = vector.load %arg5[%c7_406, %c2_407, %c0_408] : memref<16x8x128xf32, #tpu.memory_space<vmem>>, vector<1x1x128xf32>
    %979 = vector.shape_cast %978 : vector<1x1x128xf32> to vector<1x128xf32>
    %980 = vector.broadcast %977 : vector<1x128xf32> to vector<2x128xf32>
    %981 = arith.mulf %941, %980 : vector<2x128xf32>
    %982 = vector.broadcast %979 : vector<1x128xf32> to vector<2x128xf32>
    %983 = arith.mulf %943, %982 : vector<2x128xf32>
    %984 = arith.subf %981, %983 : vector<2x128xf32>
    %985 = arith.addf %853, %984 : vector<2x128xf32>
    %986 = vector.broadcast %979 : vector<1x128xf32> to vector<2x128xf32>
    %987 = arith.mulf %941, %986 : vector<2x128xf32>
    %988 = vector.broadcast %977 : vector<1x128xf32> to vector<2x128xf32>
    %989 = arith.mulf %943, %988 : vector<2x128xf32>
    %990 = arith.addf %987, %989 : vector<2x128xf32>
    %991 = arith.addf %859, %990 : vector<2x128xf32>
    %c7_409 = arith.constant 7 : index
    %c3_410 = arith.constant 3 : index
    %c0_411 = arith.constant 0 : index
    %992 = vector.load %arg4[%c7_409, %c3_410, %c0_411] : memref<16x8x128xf32, #tpu.memory_space<vmem>>, vector<1x1x128xf32>
    %993 = vector.shape_cast %992 : vector<1x1x128xf32> to vector<1x128xf32>
    %c7_412 = arith.constant 7 : index
    %c3_413 = arith.constant 3 : index
    %c0_414 = arith.constant 0 : index
    %994 = vector.load %arg5[%c7_412, %c3_413, %c0_414] : memref<16x8x128xf32, #tpu.memory_space<vmem>>, vector<1x1x128xf32>
    %995 = vector.shape_cast %994 : vector<1x1x128xf32> to vector<1x128xf32>
    %996 = vector.broadcast %993 : vector<1x128xf32> to vector<2x128xf32>
    %997 = arith.mulf %941, %996 : vector<2x128xf32>
    %998 = vector.broadcast %995 : vector<1x128xf32> to vector<2x128xf32>
    %999 = arith.mulf %943, %998 : vector<2x128xf32>
    %1000 = arith.subf %997, %999 : vector<2x128xf32>
    %1001 = arith.addf %869, %1000 : vector<2x128xf32>
    %1002 = vector.broadcast %995 : vector<1x128xf32> to vector<2x128xf32>
    %1003 = arith.mulf %941, %1002 : vector<2x128xf32>
    %1004 = vector.broadcast %993 : vector<1x128xf32> to vector<2x128xf32>
    %1005 = arith.mulf %943, %1004 : vector<2x128xf32>
    %1006 = arith.addf %1003, %1005 : vector<2x128xf32>
    %1007 = arith.addf %875, %1006 : vector<2x128xf32>
    %c7_415 = arith.constant 7 : index
    %c4_416 = arith.constant 4 : index
    %c0_417 = arith.constant 0 : index
    %1008 = vector.load %arg4[%c7_415, %c4_416, %c0_417] : memref<16x8x128xf32, #tpu.memory_space<vmem>>, vector<1x1x128xf32>
    %1009 = vector.shape_cast %1008 : vector<1x1x128xf32> to vector<1x128xf32>
    %c7_418 = arith.constant 7 : index
    %c4_419 = arith.constant 4 : index
    %c0_420 = arith.constant 0 : index
    %1010 = vector.load %arg5[%c7_418, %c4_419, %c0_420] : memref<16x8x128xf32, #tpu.memory_space<vmem>>, vector<1x1x128xf32>
    %1011 = vector.shape_cast %1010 : vector<1x1x128xf32> to vector<1x128xf32>
    %1012 = vector.broadcast %1009 : vector<1x128xf32> to vector<2x128xf32>
    %1013 = arith.mulf %941, %1012 : vector<2x128xf32>
    %1014 = vector.broadcast %1011 : vector<1x128xf32> to vector<2x128xf32>
    %1015 = arith.mulf %943, %1014 : vector<2x128xf32>
    %1016 = arith.subf %1013, %1015 : vector<2x128xf32>
    %1017 = arith.addf %885, %1016 : vector<2x128xf32>
    %1018 = vector.broadcast %1011 : vector<1x128xf32> to vector<2x128xf32>
    %1019 = arith.mulf %941, %1018 : vector<2x128xf32>
    %1020 = vector.broadcast %1009 : vector<1x128xf32> to vector<2x128xf32>
    %1021 = arith.mulf %943, %1020 : vector<2x128xf32>
    %1022 = arith.addf %1019, %1021 : vector<2x128xf32>
    %1023 = arith.addf %891, %1022 : vector<2x128xf32>
    %c7_421 = arith.constant 7 : index
    %c5_422 = arith.constant 5 : index
    %c0_423 = arith.constant 0 : index
    %1024 = vector.load %arg4[%c7_421, %c5_422, %c0_423] : memref<16x8x128xf32, #tpu.memory_space<vmem>>, vector<1x1x128xf32>
    %1025 = vector.shape_cast %1024 : vector<1x1x128xf32> to vector<1x128xf32>
    %c7_424 = arith.constant 7 : index
    %c5_425 = arith.constant 5 : index
    %c0_426 = arith.constant 0 : index
    %1026 = vector.load %arg5[%c7_424, %c5_425, %c0_426] : memref<16x8x128xf32, #tpu.memory_space<vmem>>, vector<1x1x128xf32>
    %1027 = vector.shape_cast %1026 : vector<1x1x128xf32> to vector<1x128xf32>
    %1028 = vector.broadcast %1025 : vector<1x128xf32> to vector<2x128xf32>
    %1029 = arith.mulf %941, %1028 : vector<2x128xf32>
    %1030 = vector.broadcast %1027 : vector<1x128xf32> to vector<2x128xf32>
    %1031 = arith.mulf %943, %1030 : vector<2x128xf32>
    %1032 = arith.subf %1029, %1031 : vector<2x128xf32>
    %1033 = arith.addf %901, %1032 : vector<2x128xf32>
    %1034 = vector.broadcast %1027 : vector<1x128xf32> to vector<2x128xf32>
    %1035 = arith.mulf %941, %1034 : vector<2x128xf32>
    %1036 = vector.broadcast %1025 : vector<1x128xf32> to vector<2x128xf32>
    %1037 = arith.mulf %943, %1036 : vector<2x128xf32>
    %1038 = arith.addf %1035, %1037 : vector<2x128xf32>
    %1039 = arith.addf %907, %1038 : vector<2x128xf32>
    %c7_427 = arith.constant 7 : index
    %c6_428 = arith.constant 6 : index
    %c0_429 = arith.constant 0 : index
    %1040 = vector.load %arg4[%c7_427, %c6_428, %c0_429] : memref<16x8x128xf32, #tpu.memory_space<vmem>>, vector<1x1x128xf32>
    %1041 = vector.shape_cast %1040 : vector<1x1x128xf32> to vector<1x128xf32>
    %c7_430 = arith.constant 7 : index
    %c6_431 = arith.constant 6 : index
    %c0_432 = arith.constant 0 : index
    %1042 = vector.load %arg5[%c7_430, %c6_431, %c0_432] : memref<16x8x128xf32, #tpu.memory_space<vmem>>, vector<1x1x128xf32>
    %1043 = vector.shape_cast %1042 : vector<1x1x128xf32> to vector<1x128xf32>
    %1044 = vector.broadcast %1041 : vector<1x128xf32> to vector<2x128xf32>
    %1045 = arith.mulf %941, %1044 : vector<2x128xf32>
    %1046 = vector.broadcast %1043 : vector<1x128xf32> to vector<2x128xf32>
    %1047 = arith.mulf %943, %1046 : vector<2x128xf32>
    %1048 = arith.subf %1045, %1047 : vector<2x128xf32>
    %1049 = arith.addf %917, %1048 : vector<2x128xf32>
    %1050 = vector.broadcast %1043 : vector<1x128xf32> to vector<2x128xf32>
    %1051 = arith.mulf %941, %1050 : vector<2x128xf32>
    %1052 = vector.broadcast %1041 : vector<1x128xf32> to vector<2x128xf32>
    %1053 = arith.mulf %943, %1052 : vector<2x128xf32>
    %1054 = arith.addf %1051, %1053 : vector<2x128xf32>
    %1055 = arith.addf %923, %1054 : vector<2x128xf32>
    %c7_433 = arith.constant 7 : index
    %c7_434 = arith.constant 7 : index
    %c0_435 = arith.constant 0 : index
    %1056 = vector.load %arg4[%c7_433, %c7_434, %c0_435] : memref<16x8x128xf32, #tpu.memory_space<vmem>>, vector<1x1x128xf32>
    %1057 = vector.shape_cast %1056 : vector<1x1x128xf32> to vector<1x128xf32>
    %c7_436 = arith.constant 7 : index
    %c7_437 = arith.constant 7 : index
    %c0_438 = arith.constant 0 : index
    %1058 = vector.load %arg5[%c7_436, %c7_437, %c0_438] : memref<16x8x128xf32, #tpu.memory_space<vmem>>, vector<1x1x128xf32>
    %1059 = vector.shape_cast %1058 : vector<1x1x128xf32> to vector<1x128xf32>
    %1060 = vector.broadcast %1057 : vector<1x128xf32> to vector<2x128xf32>
    %1061 = arith.mulf %941, %1060 : vector<2x128xf32>
    %1062 = vector.broadcast %1059 : vector<1x128xf32> to vector<2x128xf32>
    %1063 = arith.mulf %943, %1062 : vector<2x128xf32>
    %1064 = arith.subf %1061, %1063 : vector<2x128xf32>
    %1065 = arith.addf %933, %1064 : vector<2x128xf32>
    %1066 = vector.broadcast %1059 : vector<1x128xf32> to vector<2x128xf32>
    %1067 = arith.mulf %941, %1066 : vector<2x128xf32>
    %1068 = vector.broadcast %1057 : vector<1x128xf32> to vector<2x128xf32>
    %1069 = arith.mulf %943, %1068 : vector<2x128xf32>
    %1070 = arith.addf %1067, %1069 : vector<2x128xf32>
    %1071 = arith.addf %939, %1070 : vector<2x128xf32>
    %c8 = arith.constant 8 : index
    %c0_439 = arith.constant 0 : index
    %c0_440 = arith.constant 0 : index
    %1072 = vector.load %arg2[%c8, %c0_439, %c0_440] : memref<16x2x128xf32, #tpu.memory_space<vmem>>, vector<1x2x128xf32>
    %1073 = vector.shape_cast %1072 : vector<1x2x128xf32> to vector<2x128xf32>
    %c8_441 = arith.constant 8 : index
    %c0_442 = arith.constant 0 : index
    %c0_443 = arith.constant 0 : index
    %1074 = vector.load %arg3[%c8_441, %c0_442, %c0_443] : memref<16x2x128xf32, #tpu.memory_space<vmem>>, vector<1x2x128xf32>
    %1075 = vector.shape_cast %1074 : vector<1x2x128xf32> to vector<2x128xf32>
    %c8_444 = arith.constant 8 : index
    %c0_445 = arith.constant 0 : index
    %c0_446 = arith.constant 0 : index
    %1076 = vector.load %arg4[%c8_444, %c0_445, %c0_446] : memref<16x8x128xf32, #tpu.memory_space<vmem>>, vector<1x1x128xf32>
    %1077 = vector.shape_cast %1076 : vector<1x1x128xf32> to vector<1x128xf32>
    %c8_447 = arith.constant 8 : index
    %c0_448 = arith.constant 0 : index
    %c0_449 = arith.constant 0 : index
    %1078 = vector.load %arg5[%c8_447, %c0_448, %c0_449] : memref<16x8x128xf32, #tpu.memory_space<vmem>>, vector<1x1x128xf32>
    %1079 = vector.shape_cast %1078 : vector<1x1x128xf32> to vector<1x128xf32>
    %1080 = vector.broadcast %1077 : vector<1x128xf32> to vector<2x128xf32>
    %1081 = arith.mulf %1073, %1080 : vector<2x128xf32>
    %1082 = vector.broadcast %1079 : vector<1x128xf32> to vector<2x128xf32>
    %1083 = arith.mulf %1075, %1082 : vector<2x128xf32>
    %1084 = arith.subf %1081, %1083 : vector<2x128xf32>
    %1085 = arith.addf %953, %1084 : vector<2x128xf32>
    %1086 = vector.broadcast %1079 : vector<1x128xf32> to vector<2x128xf32>
    %1087 = arith.mulf %1073, %1086 : vector<2x128xf32>
    %1088 = vector.broadcast %1077 : vector<1x128xf32> to vector<2x128xf32>
    %1089 = arith.mulf %1075, %1088 : vector<2x128xf32>
    %1090 = arith.addf %1087, %1089 : vector<2x128xf32>
    %1091 = arith.addf %959, %1090 : vector<2x128xf32>
    %c8_450 = arith.constant 8 : index
    %c1_451 = arith.constant 1 : index
    %c0_452 = arith.constant 0 : index
    %1092 = vector.load %arg4[%c8_450, %c1_451, %c0_452] : memref<16x8x128xf32, #tpu.memory_space<vmem>>, vector<1x1x128xf32>
    %1093 = vector.shape_cast %1092 : vector<1x1x128xf32> to vector<1x128xf32>
    %c8_453 = arith.constant 8 : index
    %c1_454 = arith.constant 1 : index
    %c0_455 = arith.constant 0 : index
    %1094 = vector.load %arg5[%c8_453, %c1_454, %c0_455] : memref<16x8x128xf32, #tpu.memory_space<vmem>>, vector<1x1x128xf32>
    %1095 = vector.shape_cast %1094 : vector<1x1x128xf32> to vector<1x128xf32>
    %1096 = vector.broadcast %1093 : vector<1x128xf32> to vector<2x128xf32>
    %1097 = arith.mulf %1073, %1096 : vector<2x128xf32>
    %1098 = vector.broadcast %1095 : vector<1x128xf32> to vector<2x128xf32>
    %1099 = arith.mulf %1075, %1098 : vector<2x128xf32>
    %1100 = arith.subf %1097, %1099 : vector<2x128xf32>
    %1101 = arith.addf %969, %1100 : vector<2x128xf32>
    %1102 = vector.broadcast %1095 : vector<1x128xf32> to vector<2x128xf32>
    %1103 = arith.mulf %1073, %1102 : vector<2x128xf32>
    %1104 = vector.broadcast %1093 : vector<1x128xf32> to vector<2x128xf32>
    %1105 = arith.mulf %1075, %1104 : vector<2x128xf32>
    %1106 = arith.addf %1103, %1105 : vector<2x128xf32>
    %1107 = arith.addf %975, %1106 : vector<2x128xf32>
    %c8_456 = arith.constant 8 : index
    %c2_457 = arith.constant 2 : index
    %c0_458 = arith.constant 0 : index
    %1108 = vector.load %arg4[%c8_456, %c2_457, %c0_458] : memref<16x8x128xf32, #tpu.memory_space<vmem>>, vector<1x1x128xf32>
    %1109 = vector.shape_cast %1108 : vector<1x1x128xf32> to vector<1x128xf32>
    %c8_459 = arith.constant 8 : index
    %c2_460 = arith.constant 2 : index
    %c0_461 = arith.constant 0 : index
    %1110 = vector.load %arg5[%c8_459, %c2_460, %c0_461] : memref<16x8x128xf32, #tpu.memory_space<vmem>>, vector<1x1x128xf32>
    %1111 = vector.shape_cast %1110 : vector<1x1x128xf32> to vector<1x128xf32>
    %1112 = vector.broadcast %1109 : vector<1x128xf32> to vector<2x128xf32>
    %1113 = arith.mulf %1073, %1112 : vector<2x128xf32>
    %1114 = vector.broadcast %1111 : vector<1x128xf32> to vector<2x128xf32>
    %1115 = arith.mulf %1075, %1114 : vector<2x128xf32>
    %1116 = arith.subf %1113, %1115 : vector<2x128xf32>
    %1117 = arith.addf %985, %1116 : vector<2x128xf32>
    %1118 = vector.broadcast %1111 : vector<1x128xf32> to vector<2x128xf32>
    %1119 = arith.mulf %1073, %1118 : vector<2x128xf32>
    %1120 = vector.broadcast %1109 : vector<1x128xf32> to vector<2x128xf32>
    %1121 = arith.mulf %1075, %1120 : vector<2x128xf32>
    %1122 = arith.addf %1119, %1121 : vector<2x128xf32>
    %1123 = arith.addf %991, %1122 : vector<2x128xf32>
    %c8_462 = arith.constant 8 : index
    %c3_463 = arith.constant 3 : index
    %c0_464 = arith.constant 0 : index
    %1124 = vector.load %arg4[%c8_462, %c3_463, %c0_464] : memref<16x8x128xf32, #tpu.memory_space<vmem>>, vector<1x1x128xf32>
    %1125 = vector.shape_cast %1124 : vector<1x1x128xf32> to vector<1x128xf32>
    %c8_465 = arith.constant 8 : index
    %c3_466 = arith.constant 3 : index
    %c0_467 = arith.constant 0 : index
    %1126 = vector.load %arg5[%c8_465, %c3_466, %c0_467] : memref<16x8x128xf32, #tpu.memory_space<vmem>>, vector<1x1x128xf32>
    %1127 = vector.shape_cast %1126 : vector<1x1x128xf32> to vector<1x128xf32>
    %1128 = vector.broadcast %1125 : vector<1x128xf32> to vector<2x128xf32>
    %1129 = arith.mulf %1073, %1128 : vector<2x128xf32>
    %1130 = vector.broadcast %1127 : vector<1x128xf32> to vector<2x128xf32>
    %1131 = arith.mulf %1075, %1130 : vector<2x128xf32>
    %1132 = arith.subf %1129, %1131 : vector<2x128xf32>
    %1133 = arith.addf %1001, %1132 : vector<2x128xf32>
    %1134 = vector.broadcast %1127 : vector<1x128xf32> to vector<2x128xf32>
    %1135 = arith.mulf %1073, %1134 : vector<2x128xf32>
    %1136 = vector.broadcast %1125 : vector<1x128xf32> to vector<2x128xf32>
    %1137 = arith.mulf %1075, %1136 : vector<2x128xf32>
    %1138 = arith.addf %1135, %1137 : vector<2x128xf32>
    %1139 = arith.addf %1007, %1138 : vector<2x128xf32>
    %c8_468 = arith.constant 8 : index
    %c4_469 = arith.constant 4 : index
    %c0_470 = arith.constant 0 : index
    %1140 = vector.load %arg4[%c8_468, %c4_469, %c0_470] : memref<16x8x128xf32, #tpu.memory_space<vmem>>, vector<1x1x128xf32>
    %1141 = vector.shape_cast %1140 : vector<1x1x128xf32> to vector<1x128xf32>
    %c8_471 = arith.constant 8 : index
    %c4_472 = arith.constant 4 : index
    %c0_473 = arith.constant 0 : index
    %1142 = vector.load %arg5[%c8_471, %c4_472, %c0_473] : memref<16x8x128xf32, #tpu.memory_space<vmem>>, vector<1x1x128xf32>
    %1143 = vector.shape_cast %1142 : vector<1x1x128xf32> to vector<1x128xf32>
    %1144 = vector.broadcast %1141 : vector<1x128xf32> to vector<2x128xf32>
    %1145 = arith.mulf %1073, %1144 : vector<2x128xf32>
    %1146 = vector.broadcast %1143 : vector<1x128xf32> to vector<2x128xf32>
    %1147 = arith.mulf %1075, %1146 : vector<2x128xf32>
    %1148 = arith.subf %1145, %1147 : vector<2x128xf32>
    %1149 = arith.addf %1017, %1148 : vector<2x128xf32>
    %1150 = vector.broadcast %1143 : vector<1x128xf32> to vector<2x128xf32>
    %1151 = arith.mulf %1073, %1150 : vector<2x128xf32>
    %1152 = vector.broadcast %1141 : vector<1x128xf32> to vector<2x128xf32>
    %1153 = arith.mulf %1075, %1152 : vector<2x128xf32>
    %1154 = arith.addf %1151, %1153 : vector<2x128xf32>
    %1155 = arith.addf %1023, %1154 : vector<2x128xf32>
    %c8_474 = arith.constant 8 : index
    %c5_475 = arith.constant 5 : index
    %c0_476 = arith.constant 0 : index
    %1156 = vector.load %arg4[%c8_474, %c5_475, %c0_476] : memref<16x8x128xf32, #tpu.memory_space<vmem>>, vector<1x1x128xf32>
    %1157 = vector.shape_cast %1156 : vector<1x1x128xf32> to vector<1x128xf32>
    %c8_477 = arith.constant 8 : index
    %c5_478 = arith.constant 5 : index
    %c0_479 = arith.constant 0 : index
    %1158 = vector.load %arg5[%c8_477, %c5_478, %c0_479] : memref<16x8x128xf32, #tpu.memory_space<vmem>>, vector<1x1x128xf32>
    %1159 = vector.shape_cast %1158 : vector<1x1x128xf32> to vector<1x128xf32>
    %1160 = vector.broadcast %1157 : vector<1x128xf32> to vector<2x128xf32>
    %1161 = arith.mulf %1073, %1160 : vector<2x128xf32>
    %1162 = vector.broadcast %1159 : vector<1x128xf32> to vector<2x128xf32>
    %1163 = arith.mulf %1075, %1162 : vector<2x128xf32>
    %1164 = arith.subf %1161, %1163 : vector<2x128xf32>
    %1165 = arith.addf %1033, %1164 : vector<2x128xf32>
    %1166 = vector.broadcast %1159 : vector<1x128xf32> to vector<2x128xf32>
    %1167 = arith.mulf %1073, %1166 : vector<2x128xf32>
    %1168 = vector.broadcast %1157 : vector<1x128xf32> to vector<2x128xf32>
    %1169 = arith.mulf %1075, %1168 : vector<2x128xf32>
    %1170 = arith.addf %1167, %1169 : vector<2x128xf32>
    %1171 = arith.addf %1039, %1170 : vector<2x128xf32>
    %c8_480 = arith.constant 8 : index
    %c6_481 = arith.constant 6 : index
    %c0_482 = arith.constant 0 : index
    %1172 = vector.load %arg4[%c8_480, %c6_481, %c0_482] : memref<16x8x128xf32, #tpu.memory_space<vmem>>, vector<1x1x128xf32>
    %1173 = vector.shape_cast %1172 : vector<1x1x128xf32> to vector<1x128xf32>
    %c8_483 = arith.constant 8 : index
    %c6_484 = arith.constant 6 : index
    %c0_485 = arith.constant 0 : index
    %1174 = vector.load %arg5[%c8_483, %c6_484, %c0_485] : memref<16x8x128xf32, #tpu.memory_space<vmem>>, vector<1x1x128xf32>
    %1175 = vector.shape_cast %1174 : vector<1x1x128xf32> to vector<1x128xf32>
    %1176 = vector.broadcast %1173 : vector<1x128xf32> to vector<2x128xf32>
    %1177 = arith.mulf %1073, %1176 : vector<2x128xf32>
    %1178 = vector.broadcast %1175 : vector<1x128xf32> to vector<2x128xf32>
    %1179 = arith.mulf %1075, %1178 : vector<2x128xf32>
    %1180 = arith.subf %1177, %1179 : vector<2x128xf32>
    %1181 = arith.addf %1049, %1180 : vector<2x128xf32>
    %1182 = vector.broadcast %1175 : vector<1x128xf32> to vector<2x128xf32>
    %1183 = arith.mulf %1073, %1182 : vector<2x128xf32>
    %1184 = vector.broadcast %1173 : vector<1x128xf32> to vector<2x128xf32>
    %1185 = arith.mulf %1075, %1184 : vector<2x128xf32>
    %1186 = arith.addf %1183, %1185 : vector<2x128xf32>
    %1187 = arith.addf %1055, %1186 : vector<2x128xf32>
    %c8_486 = arith.constant 8 : index
    %c7_487 = arith.constant 7 : index
    %c0_488 = arith.constant 0 : index
    %1188 = vector.load %arg4[%c8_486, %c7_487, %c0_488] : memref<16x8x128xf32, #tpu.memory_space<vmem>>, vector<1x1x128xf32>
    %1189 = vector.shape_cast %1188 : vector<1x1x128xf32> to vector<1x128xf32>
    %c8_489 = arith.constant 8 : index
    %c7_490 = arith.constant 7 : index
    %c0_491 = arith.constant 0 : index
    %1190 = vector.load %arg5[%c8_489, %c7_490, %c0_491] : memref<16x8x128xf32, #tpu.memory_space<vmem>>, vector<1x1x128xf32>
    %1191 = vector.shape_cast %1190 : vector<1x1x128xf32> to vector<1x128xf32>
    %1192 = vector.broadcast %1189 : vector<1x128xf32> to vector<2x128xf32>
    %1193 = arith.mulf %1073, %1192 : vector<2x128xf32>
    %1194 = vector.broadcast %1191 : vector<1x128xf32> to vector<2x128xf32>
    %1195 = arith.mulf %1075, %1194 : vector<2x128xf32>
    %1196 = arith.subf %1193, %1195 : vector<2x128xf32>
    %1197 = arith.addf %1065, %1196 : vector<2x128xf32>
    %1198 = vector.broadcast %1191 : vector<1x128xf32> to vector<2x128xf32>
    %1199 = arith.mulf %1073, %1198 : vector<2x128xf32>
    %1200 = vector.broadcast %1189 : vector<1x128xf32> to vector<2x128xf32>
    %1201 = arith.mulf %1075, %1200 : vector<2x128xf32>
    %1202 = arith.addf %1199, %1201 : vector<2x128xf32>
    %1203 = arith.addf %1071, %1202 : vector<2x128xf32>
    %c9 = arith.constant 9 : index
    %c0_492 = arith.constant 0 : index
    %c0_493 = arith.constant 0 : index
    %1204 = vector.load %arg2[%c9, %c0_492, %c0_493] : memref<16x2x128xf32, #tpu.memory_space<vmem>>, vector<1x2x128xf32>
    %1205 = vector.shape_cast %1204 : vector<1x2x128xf32> to vector<2x128xf32>
    %c9_494 = arith.constant 9 : index
    %c0_495 = arith.constant 0 : index
    %c0_496 = arith.constant 0 : index
    %1206 = vector.load %arg3[%c9_494, %c0_495, %c0_496] : memref<16x2x128xf32, #tpu.memory_space<vmem>>, vector<1x2x128xf32>
    %1207 = vector.shape_cast %1206 : vector<1x2x128xf32> to vector<2x128xf32>
    %c9_497 = arith.constant 9 : index
    %c0_498 = arith.constant 0 : index
    %c0_499 = arith.constant 0 : index
    %1208 = vector.load %arg4[%c9_497, %c0_498, %c0_499] : memref<16x8x128xf32, #tpu.memory_space<vmem>>, vector<1x1x128xf32>
    %1209 = vector.shape_cast %1208 : vector<1x1x128xf32> to vector<1x128xf32>
    %c9_500 = arith.constant 9 : index
    %c0_501 = arith.constant 0 : index
    %c0_502 = arith.constant 0 : index
    %1210 = vector.load %arg5[%c9_500, %c0_501, %c0_502] : memref<16x8x128xf32, #tpu.memory_space<vmem>>, vector<1x1x128xf32>
    %1211 = vector.shape_cast %1210 : vector<1x1x128xf32> to vector<1x128xf32>
    %1212 = vector.broadcast %1209 : vector<1x128xf32> to vector<2x128xf32>
    %1213 = arith.mulf %1205, %1212 : vector<2x128xf32>
    %1214 = vector.broadcast %1211 : vector<1x128xf32> to vector<2x128xf32>
    %1215 = arith.mulf %1207, %1214 : vector<2x128xf32>
    %1216 = arith.subf %1213, %1215 : vector<2x128xf32>
    %1217 = arith.addf %1085, %1216 : vector<2x128xf32>
    %1218 = vector.broadcast %1211 : vector<1x128xf32> to vector<2x128xf32>
    %1219 = arith.mulf %1205, %1218 : vector<2x128xf32>
    %1220 = vector.broadcast %1209 : vector<1x128xf32> to vector<2x128xf32>
    %1221 = arith.mulf %1207, %1220 : vector<2x128xf32>
    %1222 = arith.addf %1219, %1221 : vector<2x128xf32>
    %1223 = arith.addf %1091, %1222 : vector<2x128xf32>
    %c9_503 = arith.constant 9 : index
    %c1_504 = arith.constant 1 : index
    %c0_505 = arith.constant 0 : index
    %1224 = vector.load %arg4[%c9_503, %c1_504, %c0_505] : memref<16x8x128xf32, #tpu.memory_space<vmem>>, vector<1x1x128xf32>
    %1225 = vector.shape_cast %1224 : vector<1x1x128xf32> to vector<1x128xf32>
    %c9_506 = arith.constant 9 : index
    %c1_507 = arith.constant 1 : index
    %c0_508 = arith.constant 0 : index
    %1226 = vector.load %arg5[%c9_506, %c1_507, %c0_508] : memref<16x8x128xf32, #tpu.memory_space<vmem>>, vector<1x1x128xf32>
    %1227 = vector.shape_cast %1226 : vector<1x1x128xf32> to vector<1x128xf32>
    %1228 = vector.broadcast %1225 : vector<1x128xf32> to vector<2x128xf32>
    %1229 = arith.mulf %1205, %1228 : vector<2x128xf32>
    %1230 = vector.broadcast %1227 : vector<1x128xf32> to vector<2x128xf32>
    %1231 = arith.mulf %1207, %1230 : vector<2x128xf32>
    %1232 = arith.subf %1229, %1231 : vector<2x128xf32>
    %1233 = arith.addf %1101, %1232 : vector<2x128xf32>
    %1234 = vector.broadcast %1227 : vector<1x128xf32> to vector<2x128xf32>
    %1235 = arith.mulf %1205, %1234 : vector<2x128xf32>
    %1236 = vector.broadcast %1225 : vector<1x128xf32> to vector<2x128xf32>
    %1237 = arith.mulf %1207, %1236 : vector<2x128xf32>
    %1238 = arith.addf %1235, %1237 : vector<2x128xf32>
    %1239 = arith.addf %1107, %1238 : vector<2x128xf32>
    %c9_509 = arith.constant 9 : index
    %c2_510 = arith.constant 2 : index
    %c0_511 = arith.constant 0 : index
    %1240 = vector.load %arg4[%c9_509, %c2_510, %c0_511] : memref<16x8x128xf32, #tpu.memory_space<vmem>>, vector<1x1x128xf32>
    %1241 = vector.shape_cast %1240 : vector<1x1x128xf32> to vector<1x128xf32>
    %c9_512 = arith.constant 9 : index
    %c2_513 = arith.constant 2 : index
    %c0_514 = arith.constant 0 : index
    %1242 = vector.load %arg5[%c9_512, %c2_513, %c0_514] : memref<16x8x128xf32, #tpu.memory_space<vmem>>, vector<1x1x128xf32>
    %1243 = vector.shape_cast %1242 : vector<1x1x128xf32> to vector<1x128xf32>
    %1244 = vector.broadcast %1241 : vector<1x128xf32> to vector<2x128xf32>
    %1245 = arith.mulf %1205, %1244 : vector<2x128xf32>
    %1246 = vector.broadcast %1243 : vector<1x128xf32> to vector<2x128xf32>
    %1247 = arith.mulf %1207, %1246 : vector<2x128xf32>
    %1248 = arith.subf %1245, %1247 : vector<2x128xf32>
    %1249 = arith.addf %1117, %1248 : vector<2x128xf32>
    %1250 = vector.broadcast %1243 : vector<1x128xf32> to vector<2x128xf32>
    %1251 = arith.mulf %1205, %1250 : vector<2x128xf32>
    %1252 = vector.broadcast %1241 : vector<1x128xf32> to vector<2x128xf32>
    %1253 = arith.mulf %1207, %1252 : vector<2x128xf32>
    %1254 = arith.addf %1251, %1253 : vector<2x128xf32>
    %1255 = arith.addf %1123, %1254 : vector<2x128xf32>
    %c9_515 = arith.constant 9 : index
    %c3_516 = arith.constant 3 : index
    %c0_517 = arith.constant 0 : index
    %1256 = vector.load %arg4[%c9_515, %c3_516, %c0_517] : memref<16x8x128xf32, #tpu.memory_space<vmem>>, vector<1x1x128xf32>
    %1257 = vector.shape_cast %1256 : vector<1x1x128xf32> to vector<1x128xf32>
    %c9_518 = arith.constant 9 : index
    %c3_519 = arith.constant 3 : index
    %c0_520 = arith.constant 0 : index
    %1258 = vector.load %arg5[%c9_518, %c3_519, %c0_520] : memref<16x8x128xf32, #tpu.memory_space<vmem>>, vector<1x1x128xf32>
    %1259 = vector.shape_cast %1258 : vector<1x1x128xf32> to vector<1x128xf32>
    %1260 = vector.broadcast %1257 : vector<1x128xf32> to vector<2x128xf32>
    %1261 = arith.mulf %1205, %1260 : vector<2x128xf32>
    %1262 = vector.broadcast %1259 : vector<1x128xf32> to vector<2x128xf32>
    %1263 = arith.mulf %1207, %1262 : vector<2x128xf32>
    %1264 = arith.subf %1261, %1263 : vector<2x128xf32>
    %1265 = arith.addf %1133, %1264 : vector<2x128xf32>
    %1266 = vector.broadcast %1259 : vector<1x128xf32> to vector<2x128xf32>
    %1267 = arith.mulf %1205, %1266 : vector<2x128xf32>
    %1268 = vector.broadcast %1257 : vector<1x128xf32> to vector<2x128xf32>
    %1269 = arith.mulf %1207, %1268 : vector<2x128xf32>
    %1270 = arith.addf %1267, %1269 : vector<2x128xf32>
    %1271 = arith.addf %1139, %1270 : vector<2x128xf32>
    %c9_521 = arith.constant 9 : index
    %c4_522 = arith.constant 4 : index
    %c0_523 = arith.constant 0 : index
    %1272 = vector.load %arg4[%c9_521, %c4_522, %c0_523] : memref<16x8x128xf32, #tpu.memory_space<vmem>>, vector<1x1x128xf32>
    %1273 = vector.shape_cast %1272 : vector<1x1x128xf32> to vector<1x128xf32>
    %c9_524 = arith.constant 9 : index
    %c4_525 = arith.constant 4 : index
    %c0_526 = arith.constant 0 : index
    %1274 = vector.load %arg5[%c9_524, %c4_525, %c0_526] : memref<16x8x128xf32, #tpu.memory_space<vmem>>, vector<1x1x128xf32>
    %1275 = vector.shape_cast %1274 : vector<1x1x128xf32> to vector<1x128xf32>
    %1276 = vector.broadcast %1273 : vector<1x128xf32> to vector<2x128xf32>
    %1277 = arith.mulf %1205, %1276 : vector<2x128xf32>
    %1278 = vector.broadcast %1275 : vector<1x128xf32> to vector<2x128xf32>
    %1279 = arith.mulf %1207, %1278 : vector<2x128xf32>
    %1280 = arith.subf %1277, %1279 : vector<2x128xf32>
    %1281 = arith.addf %1149, %1280 : vector<2x128xf32>
    %1282 = vector.broadcast %1275 : vector<1x128xf32> to vector<2x128xf32>
    %1283 = arith.mulf %1205, %1282 : vector<2x128xf32>
    %1284 = vector.broadcast %1273 : vector<1x128xf32> to vector<2x128xf32>
    %1285 = arith.mulf %1207, %1284 : vector<2x128xf32>
    %1286 = arith.addf %1283, %1285 : vector<2x128xf32>
    %1287 = arith.addf %1155, %1286 : vector<2x128xf32>
    %c9_527 = arith.constant 9 : index
    %c5_528 = arith.constant 5 : index
    %c0_529 = arith.constant 0 : index
    %1288 = vector.load %arg4[%c9_527, %c5_528, %c0_529] : memref<16x8x128xf32, #tpu.memory_space<vmem>>, vector<1x1x128xf32>
    %1289 = vector.shape_cast %1288 : vector<1x1x128xf32> to vector<1x128xf32>
    %c9_530 = arith.constant 9 : index
    %c5_531 = arith.constant 5 : index
    %c0_532 = arith.constant 0 : index
    %1290 = vector.load %arg5[%c9_530, %c5_531, %c0_532] : memref<16x8x128xf32, #tpu.memory_space<vmem>>, vector<1x1x128xf32>
    %1291 = vector.shape_cast %1290 : vector<1x1x128xf32> to vector<1x128xf32>
    %1292 = vector.broadcast %1289 : vector<1x128xf32> to vector<2x128xf32>
    %1293 = arith.mulf %1205, %1292 : vector<2x128xf32>
    %1294 = vector.broadcast %1291 : vector<1x128xf32> to vector<2x128xf32>
    %1295 = arith.mulf %1207, %1294 : vector<2x128xf32>
    %1296 = arith.subf %1293, %1295 : vector<2x128xf32>
    %1297 = arith.addf %1165, %1296 : vector<2x128xf32>
    %1298 = vector.broadcast %1291 : vector<1x128xf32> to vector<2x128xf32>
    %1299 = arith.mulf %1205, %1298 : vector<2x128xf32>
    %1300 = vector.broadcast %1289 : vector<1x128xf32> to vector<2x128xf32>
    %1301 = arith.mulf %1207, %1300 : vector<2x128xf32>
    %1302 = arith.addf %1299, %1301 : vector<2x128xf32>
    %1303 = arith.addf %1171, %1302 : vector<2x128xf32>
    %c9_533 = arith.constant 9 : index
    %c6_534 = arith.constant 6 : index
    %c0_535 = arith.constant 0 : index
    %1304 = vector.load %arg4[%c9_533, %c6_534, %c0_535] : memref<16x8x128xf32, #tpu.memory_space<vmem>>, vector<1x1x128xf32>
    %1305 = vector.shape_cast %1304 : vector<1x1x128xf32> to vector<1x128xf32>
    %c9_536 = arith.constant 9 : index
    %c6_537 = arith.constant 6 : index
    %c0_538 = arith.constant 0 : index
    %1306 = vector.load %arg5[%c9_536, %c6_537, %c0_538] : memref<16x8x128xf32, #tpu.memory_space<vmem>>, vector<1x1x128xf32>
    %1307 = vector.shape_cast %1306 : vector<1x1x128xf32> to vector<1x128xf32>
    %1308 = vector.broadcast %1305 : vector<1x128xf32> to vector<2x128xf32>
    %1309 = arith.mulf %1205, %1308 : vector<2x128xf32>
    %1310 = vector.broadcast %1307 : vector<1x128xf32> to vector<2x128xf32>
    %1311 = arith.mulf %1207, %1310 : vector<2x128xf32>
    %1312 = arith.subf %1309, %1311 : vector<2x128xf32>
    %1313 = arith.addf %1181, %1312 : vector<2x128xf32>
    %1314 = vector.broadcast %1307 : vector<1x128xf32> to vector<2x128xf32>
    %1315 = arith.mulf %1205, %1314 : vector<2x128xf32>
    %1316 = vector.broadcast %1305 : vector<1x128xf32> to vector<2x128xf32>
    %1317 = arith.mulf %1207, %1316 : vector<2x128xf32>
    %1318 = arith.addf %1315, %1317 : vector<2x128xf32>
    %1319 = arith.addf %1187, %1318 : vector<2x128xf32>
    %c9_539 = arith.constant 9 : index
    %c7_540 = arith.constant 7 : index
    %c0_541 = arith.constant 0 : index
    %1320 = vector.load %arg4[%c9_539, %c7_540, %c0_541] : memref<16x8x128xf32, #tpu.memory_space<vmem>>, vector<1x1x128xf32>
    %1321 = vector.shape_cast %1320 : vector<1x1x128xf32> to vector<1x128xf32>
    %c9_542 = arith.constant 9 : index
    %c7_543 = arith.constant 7 : index
    %c0_544 = arith.constant 0 : index
    %1322 = vector.load %arg5[%c9_542, %c7_543, %c0_544] : memref<16x8x128xf32, #tpu.memory_space<vmem>>, vector<1x1x128xf32>
    %1323 = vector.shape_cast %1322 : vector<1x1x128xf32> to vector<1x128xf32>
    %1324 = vector.broadcast %1321 : vector<1x128xf32> to vector<2x128xf32>
    %1325 = arith.mulf %1205, %1324 : vector<2x128xf32>
    %1326 = vector.broadcast %1323 : vector<1x128xf32> to vector<2x128xf32>
    %1327 = arith.mulf %1207, %1326 : vector<2x128xf32>
    %1328 = arith.subf %1325, %1327 : vector<2x128xf32>
    %1329 = arith.addf %1197, %1328 : vector<2x128xf32>
    %1330 = vector.broadcast %1323 : vector<1x128xf32> to vector<2x128xf32>
    %1331 = arith.mulf %1205, %1330 : vector<2x128xf32>
    %1332 = vector.broadcast %1321 : vector<1x128xf32> to vector<2x128xf32>
    %1333 = arith.mulf %1207, %1332 : vector<2x128xf32>
    %1334 = arith.addf %1331, %1333 : vector<2x128xf32>
    %1335 = arith.addf %1203, %1334 : vector<2x128xf32>
    %c10 = arith.constant 10 : index
    %c0_545 = arith.constant 0 : index
    %c0_546 = arith.constant 0 : index
    %1336 = vector.load %arg2[%c10, %c0_545, %c0_546] : memref<16x2x128xf32, #tpu.memory_space<vmem>>, vector<1x2x128xf32>
    %1337 = vector.shape_cast %1336 : vector<1x2x128xf32> to vector<2x128xf32>
    %c10_547 = arith.constant 10 : index
    %c0_548 = arith.constant 0 : index
    %c0_549 = arith.constant 0 : index
    %1338 = vector.load %arg3[%c10_547, %c0_548, %c0_549] : memref<16x2x128xf32, #tpu.memory_space<vmem>>, vector<1x2x128xf32>
    %1339 = vector.shape_cast %1338 : vector<1x2x128xf32> to vector<2x128xf32>
    %c10_550 = arith.constant 10 : index
    %c0_551 = arith.constant 0 : index
    %c0_552 = arith.constant 0 : index
    %1340 = vector.load %arg4[%c10_550, %c0_551, %c0_552] : memref<16x8x128xf32, #tpu.memory_space<vmem>>, vector<1x1x128xf32>
    %1341 = vector.shape_cast %1340 : vector<1x1x128xf32> to vector<1x128xf32>
    %c10_553 = arith.constant 10 : index
    %c0_554 = arith.constant 0 : index
    %c0_555 = arith.constant 0 : index
    %1342 = vector.load %arg5[%c10_553, %c0_554, %c0_555] : memref<16x8x128xf32, #tpu.memory_space<vmem>>, vector<1x1x128xf32>
    %1343 = vector.shape_cast %1342 : vector<1x1x128xf32> to vector<1x128xf32>
    %1344 = vector.broadcast %1341 : vector<1x128xf32> to vector<2x128xf32>
    %1345 = arith.mulf %1337, %1344 : vector<2x128xf32>
    %1346 = vector.broadcast %1343 : vector<1x128xf32> to vector<2x128xf32>
    %1347 = arith.mulf %1339, %1346 : vector<2x128xf32>
    %1348 = arith.subf %1345, %1347 : vector<2x128xf32>
    %1349 = arith.addf %1217, %1348 : vector<2x128xf32>
    %1350 = vector.broadcast %1343 : vector<1x128xf32> to vector<2x128xf32>
    %1351 = arith.mulf %1337, %1350 : vector<2x128xf32>
    %1352 = vector.broadcast %1341 : vector<1x128xf32> to vector<2x128xf32>
    %1353 = arith.mulf %1339, %1352 : vector<2x128xf32>
    %1354 = arith.addf %1351, %1353 : vector<2x128xf32>
    %1355 = arith.addf %1223, %1354 : vector<2x128xf32>
    %c10_556 = arith.constant 10 : index
    %c1_557 = arith.constant 1 : index
    %c0_558 = arith.constant 0 : index
    %1356 = vector.load %arg4[%c10_556, %c1_557, %c0_558] : memref<16x8x128xf32, #tpu.memory_space<vmem>>, vector<1x1x128xf32>
    %1357 = vector.shape_cast %1356 : vector<1x1x128xf32> to vector<1x128xf32>
    %c10_559 = arith.constant 10 : index
    %c1_560 = arith.constant 1 : index
    %c0_561 = arith.constant 0 : index
    %1358 = vector.load %arg5[%c10_559, %c1_560, %c0_561] : memref<16x8x128xf32, #tpu.memory_space<vmem>>, vector<1x1x128xf32>
    %1359 = vector.shape_cast %1358 : vector<1x1x128xf32> to vector<1x128xf32>
    %1360 = vector.broadcast %1357 : vector<1x128xf32> to vector<2x128xf32>
    %1361 = arith.mulf %1337, %1360 : vector<2x128xf32>
    %1362 = vector.broadcast %1359 : vector<1x128xf32> to vector<2x128xf32>
    %1363 = arith.mulf %1339, %1362 : vector<2x128xf32>
    %1364 = arith.subf %1361, %1363 : vector<2x128xf32>
    %1365 = arith.addf %1233, %1364 : vector<2x128xf32>
    %1366 = vector.broadcast %1359 : vector<1x128xf32> to vector<2x128xf32>
    %1367 = arith.mulf %1337, %1366 : vector<2x128xf32>
    %1368 = vector.broadcast %1357 : vector<1x128xf32> to vector<2x128xf32>
    %1369 = arith.mulf %1339, %1368 : vector<2x128xf32>
    %1370 = arith.addf %1367, %1369 : vector<2x128xf32>
    %1371 = arith.addf %1239, %1370 : vector<2x128xf32>
    %c10_562 = arith.constant 10 : index
    %c2_563 = arith.constant 2 : index
    %c0_564 = arith.constant 0 : index
    %1372 = vector.load %arg4[%c10_562, %c2_563, %c0_564] : memref<16x8x128xf32, #tpu.memory_space<vmem>>, vector<1x1x128xf32>
    %1373 = vector.shape_cast %1372 : vector<1x1x128xf32> to vector<1x128xf32>
    %c10_565 = arith.constant 10 : index
    %c2_566 = arith.constant 2 : index
    %c0_567 = arith.constant 0 : index
    %1374 = vector.load %arg5[%c10_565, %c2_566, %c0_567] : memref<16x8x128xf32, #tpu.memory_space<vmem>>, vector<1x1x128xf32>
    %1375 = vector.shape_cast %1374 : vector<1x1x128xf32> to vector<1x128xf32>
    %1376 = vector.broadcast %1373 : vector<1x128xf32> to vector<2x128xf32>
    %1377 = arith.mulf %1337, %1376 : vector<2x128xf32>
    %1378 = vector.broadcast %1375 : vector<1x128xf32> to vector<2x128xf32>
    %1379 = arith.mulf %1339, %1378 : vector<2x128xf32>
    %1380 = arith.subf %1377, %1379 : vector<2x128xf32>
    %1381 = arith.addf %1249, %1380 : vector<2x128xf32>
    %1382 = vector.broadcast %1375 : vector<1x128xf32> to vector<2x128xf32>
    %1383 = arith.mulf %1337, %1382 : vector<2x128xf32>
    %1384 = vector.broadcast %1373 : vector<1x128xf32> to vector<2x128xf32>
    %1385 = arith.mulf %1339, %1384 : vector<2x128xf32>
    %1386 = arith.addf %1383, %1385 : vector<2x128xf32>
    %1387 = arith.addf %1255, %1386 : vector<2x128xf32>
    %c10_568 = arith.constant 10 : index
    %c3_569 = arith.constant 3 : index
    %c0_570 = arith.constant 0 : index
    %1388 = vector.load %arg4[%c10_568, %c3_569, %c0_570] : memref<16x8x128xf32, #tpu.memory_space<vmem>>, vector<1x1x128xf32>
    %1389 = vector.shape_cast %1388 : vector<1x1x128xf32> to vector<1x128xf32>
    %c10_571 = arith.constant 10 : index
    %c3_572 = arith.constant 3 : index
    %c0_573 = arith.constant 0 : index
    %1390 = vector.load %arg5[%c10_571, %c3_572, %c0_573] : memref<16x8x128xf32, #tpu.memory_space<vmem>>, vector<1x1x128xf32>
    %1391 = vector.shape_cast %1390 : vector<1x1x128xf32> to vector<1x128xf32>
    %1392 = vector.broadcast %1389 : vector<1x128xf32> to vector<2x128xf32>
    %1393 = arith.mulf %1337, %1392 : vector<2x128xf32>
    %1394 = vector.broadcast %1391 : vector<1x128xf32> to vector<2x128xf32>
    %1395 = arith.mulf %1339, %1394 : vector<2x128xf32>
    %1396 = arith.subf %1393, %1395 : vector<2x128xf32>
    %1397 = arith.addf %1265, %1396 : vector<2x128xf32>
    %1398 = vector.broadcast %1391 : vector<1x128xf32> to vector<2x128xf32>
    %1399 = arith.mulf %1337, %1398 : vector<2x128xf32>
    %1400 = vector.broadcast %1389 : vector<1x128xf32> to vector<2x128xf32>
    %1401 = arith.mulf %1339, %1400 : vector<2x128xf32>
    %1402 = arith.addf %1399, %1401 : vector<2x128xf32>
    %1403 = arith.addf %1271, %1402 : vector<2x128xf32>
    %c10_574 = arith.constant 10 : index
    %c4_575 = arith.constant 4 : index
    %c0_576 = arith.constant 0 : index
    %1404 = vector.load %arg4[%c10_574, %c4_575, %c0_576] : memref<16x8x128xf32, #tpu.memory_space<vmem>>, vector<1x1x128xf32>
    %1405 = vector.shape_cast %1404 : vector<1x1x128xf32> to vector<1x128xf32>
    %c10_577 = arith.constant 10 : index
    %c4_578 = arith.constant 4 : index
    %c0_579 = arith.constant 0 : index
    %1406 = vector.load %arg5[%c10_577, %c4_578, %c0_579] : memref<16x8x128xf32, #tpu.memory_space<vmem>>, vector<1x1x128xf32>
    %1407 = vector.shape_cast %1406 : vector<1x1x128xf32> to vector<1x128xf32>
    %1408 = vector.broadcast %1405 : vector<1x128xf32> to vector<2x128xf32>
    %1409 = arith.mulf %1337, %1408 : vector<2x128xf32>
    %1410 = vector.broadcast %1407 : vector<1x128xf32> to vector<2x128xf32>
    %1411 = arith.mulf %1339, %1410 : vector<2x128xf32>
    %1412 = arith.subf %1409, %1411 : vector<2x128xf32>
    %1413 = arith.addf %1281, %1412 : vector<2x128xf32>
    %1414 = vector.broadcast %1407 : vector<1x128xf32> to vector<2x128xf32>
    %1415 = arith.mulf %1337, %1414 : vector<2x128xf32>
    %1416 = vector.broadcast %1405 : vector<1x128xf32> to vector<2x128xf32>
    %1417 = arith.mulf %1339, %1416 : vector<2x128xf32>
    %1418 = arith.addf %1415, %1417 : vector<2x128xf32>
    %1419 = arith.addf %1287, %1418 : vector<2x128xf32>
    %c10_580 = arith.constant 10 : index
    %c5_581 = arith.constant 5 : index
    %c0_582 = arith.constant 0 : index
    %1420 = vector.load %arg4[%c10_580, %c5_581, %c0_582] : memref<16x8x128xf32, #tpu.memory_space<vmem>>, vector<1x1x128xf32>
    %1421 = vector.shape_cast %1420 : vector<1x1x128xf32> to vector<1x128xf32>
    %c10_583 = arith.constant 10 : index
    %c5_584 = arith.constant 5 : index
    %c0_585 = arith.constant 0 : index
    %1422 = vector.load %arg5[%c10_583, %c5_584, %c0_585] : memref<16x8x128xf32, #tpu.memory_space<vmem>>, vector<1x1x128xf32>
    %1423 = vector.shape_cast %1422 : vector<1x1x128xf32> to vector<1x128xf32>
    %1424 = vector.broadcast %1421 : vector<1x128xf32> to vector<2x128xf32>
    %1425 = arith.mulf %1337, %1424 : vector<2x128xf32>
    %1426 = vector.broadcast %1423 : vector<1x128xf32> to vector<2x128xf32>
    %1427 = arith.mulf %1339, %1426 : vector<2x128xf32>
    %1428 = arith.subf %1425, %1427 : vector<2x128xf32>
    %1429 = arith.addf %1297, %1428 : vector<2x128xf32>
    %1430 = vector.broadcast %1423 : vector<1x128xf32> to vector<2x128xf32>
    %1431 = arith.mulf %1337, %1430 : vector<2x128xf32>
    %1432 = vector.broadcast %1421 : vector<1x128xf32> to vector<2x128xf32>
    %1433 = arith.mulf %1339, %1432 : vector<2x128xf32>
    %1434 = arith.addf %1431, %1433 : vector<2x128xf32>
    %1435 = arith.addf %1303, %1434 : vector<2x128xf32>
    %c10_586 = arith.constant 10 : index
    %c6_587 = arith.constant 6 : index
    %c0_588 = arith.constant 0 : index
    %1436 = vector.load %arg4[%c10_586, %c6_587, %c0_588] : memref<16x8x128xf32, #tpu.memory_space<vmem>>, vector<1x1x128xf32>
    %1437 = vector.shape_cast %1436 : vector<1x1x128xf32> to vector<1x128xf32>
    %c10_589 = arith.constant 10 : index
    %c6_590 = arith.constant 6 : index
    %c0_591 = arith.constant 0 : index
    %1438 = vector.load %arg5[%c10_589, %c6_590, %c0_591] : memref<16x8x128xf32, #tpu.memory_space<vmem>>, vector<1x1x128xf32>
    %1439 = vector.shape_cast %1438 : vector<1x1x128xf32> to vector<1x128xf32>
    %1440 = vector.broadcast %1437 : vector<1x128xf32> to vector<2x128xf32>
    %1441 = arith.mulf %1337, %1440 : vector<2x128xf32>
    %1442 = vector.broadcast %1439 : vector<1x128xf32> to vector<2x128xf32>
    %1443 = arith.mulf %1339, %1442 : vector<2x128xf32>
    %1444 = arith.subf %1441, %1443 : vector<2x128xf32>
    %1445 = arith.addf %1313, %1444 : vector<2x128xf32>
    %1446 = vector.broadcast %1439 : vector<1x128xf32> to vector<2x128xf32>
    %1447 = arith.mulf %1337, %1446 : vector<2x128xf32>
    %1448 = vector.broadcast %1437 : vector<1x128xf32> to vector<2x128xf32>
    %1449 = arith.mulf %1339, %1448 : vector<2x128xf32>
    %1450 = arith.addf %1447, %1449 : vector<2x128xf32>
    %1451 = arith.addf %1319, %1450 : vector<2x128xf32>
    %c10_592 = arith.constant 10 : index
    %c7_593 = arith.constant 7 : index
    %c0_594 = arith.constant 0 : index
    %1452 = vector.load %arg4[%c10_592, %c7_593, %c0_594] : memref<16x8x128xf32, #tpu.memory_space<vmem>>, vector<1x1x128xf32>
    %1453 = vector.shape_cast %1452 : vector<1x1x128xf32> to vector<1x128xf32>
    %c10_595 = arith.constant 10 : index
    %c7_596 = arith.constant 7 : index
    %c0_597 = arith.constant 0 : index
    %1454 = vector.load %arg5[%c10_595, %c7_596, %c0_597] : memref<16x8x128xf32, #tpu.memory_space<vmem>>, vector<1x1x128xf32>
    %1455 = vector.shape_cast %1454 : vector<1x1x128xf32> to vector<1x128xf32>
    %1456 = vector.broadcast %1453 : vector<1x128xf32> to vector<2x128xf32>
    %1457 = arith.mulf %1337, %1456 : vector<2x128xf32>
    %1458 = vector.broadcast %1455 : vector<1x128xf32> to vector<2x128xf32>
    %1459 = arith.mulf %1339, %1458 : vector<2x128xf32>
    %1460 = arith.subf %1457, %1459 : vector<2x128xf32>
    %1461 = arith.addf %1329, %1460 : vector<2x128xf32>
    %1462 = vector.broadcast %1455 : vector<1x128xf32> to vector<2x128xf32>
    %1463 = arith.mulf %1337, %1462 : vector<2x128xf32>
    %1464 = vector.broadcast %1453 : vector<1x128xf32> to vector<2x128xf32>
    %1465 = arith.mulf %1339, %1464 : vector<2x128xf32>
    %1466 = arith.addf %1463, %1465 : vector<2x128xf32>
    %1467 = arith.addf %1335, %1466 : vector<2x128xf32>
    %c11 = arith.constant 11 : index
    %c0_598 = arith.constant 0 : index
    %c0_599 = arith.constant 0 : index
    %1468 = vector.load %arg2[%c11, %c0_598, %c0_599] : memref<16x2x128xf32, #tpu.memory_space<vmem>>, vector<1x2x128xf32>
    %1469 = vector.shape_cast %1468 : vector<1x2x128xf32> to vector<2x128xf32>
    %c11_600 = arith.constant 11 : index
    %c0_601 = arith.constant 0 : index
    %c0_602 = arith.constant 0 : index
    %1470 = vector.load %arg3[%c11_600, %c0_601, %c0_602] : memref<16x2x128xf32, #tpu.memory_space<vmem>>, vector<1x2x128xf32>
    %1471 = vector.shape_cast %1470 : vector<1x2x128xf32> to vector<2x128xf32>
    %c11_603 = arith.constant 11 : index
    %c0_604 = arith.constant 0 : index
    %c0_605 = arith.constant 0 : index
    %1472 = vector.load %arg4[%c11_603, %c0_604, %c0_605] : memref<16x8x128xf32, #tpu.memory_space<vmem>>, vector<1x1x128xf32>
    %1473 = vector.shape_cast %1472 : vector<1x1x128xf32> to vector<1x128xf32>
    %c11_606 = arith.constant 11 : index
    %c0_607 = arith.constant 0 : index
    %c0_608 = arith.constant 0 : index
    %1474 = vector.load %arg5[%c11_606, %c0_607, %c0_608] : memref<16x8x128xf32, #tpu.memory_space<vmem>>, vector<1x1x128xf32>
    %1475 = vector.shape_cast %1474 : vector<1x1x128xf32> to vector<1x128xf32>
    %1476 = vector.broadcast %1473 : vector<1x128xf32> to vector<2x128xf32>
    %1477 = arith.mulf %1469, %1476 : vector<2x128xf32>
    %1478 = vector.broadcast %1475 : vector<1x128xf32> to vector<2x128xf32>
    %1479 = arith.mulf %1471, %1478 : vector<2x128xf32>
    %1480 = arith.subf %1477, %1479 : vector<2x128xf32>
    %1481 = arith.addf %1349, %1480 : vector<2x128xf32>
    %1482 = vector.broadcast %1475 : vector<1x128xf32> to vector<2x128xf32>
    %1483 = arith.mulf %1469, %1482 : vector<2x128xf32>
    %1484 = vector.broadcast %1473 : vector<1x128xf32> to vector<2x128xf32>
    %1485 = arith.mulf %1471, %1484 : vector<2x128xf32>
    %1486 = arith.addf %1483, %1485 : vector<2x128xf32>
    %1487 = arith.addf %1355, %1486 : vector<2x128xf32>
    %c11_609 = arith.constant 11 : index
    %c1_610 = arith.constant 1 : index
    %c0_611 = arith.constant 0 : index
    %1488 = vector.load %arg4[%c11_609, %c1_610, %c0_611] : memref<16x8x128xf32, #tpu.memory_space<vmem>>, vector<1x1x128xf32>
    %1489 = vector.shape_cast %1488 : vector<1x1x128xf32> to vector<1x128xf32>
    %c11_612 = arith.constant 11 : index
    %c1_613 = arith.constant 1 : index
    %c0_614 = arith.constant 0 : index
    %1490 = vector.load %arg5[%c11_612, %c1_613, %c0_614] : memref<16x8x128xf32, #tpu.memory_space<vmem>>, vector<1x1x128xf32>
    %1491 = vector.shape_cast %1490 : vector<1x1x128xf32> to vector<1x128xf32>
    %1492 = vector.broadcast %1489 : vector<1x128xf32> to vector<2x128xf32>
    %1493 = arith.mulf %1469, %1492 : vector<2x128xf32>
    %1494 = vector.broadcast %1491 : vector<1x128xf32> to vector<2x128xf32>
    %1495 = arith.mulf %1471, %1494 : vector<2x128xf32>
    %1496 = arith.subf %1493, %1495 : vector<2x128xf32>
    %1497 = arith.addf %1365, %1496 : vector<2x128xf32>
    %1498 = vector.broadcast %1491 : vector<1x128xf32> to vector<2x128xf32>
    %1499 = arith.mulf %1469, %1498 : vector<2x128xf32>
    %1500 = vector.broadcast %1489 : vector<1x128xf32> to vector<2x128xf32>
    %1501 = arith.mulf %1471, %1500 : vector<2x128xf32>
    %1502 = arith.addf %1499, %1501 : vector<2x128xf32>
    %1503 = arith.addf %1371, %1502 : vector<2x128xf32>
    %c11_615 = arith.constant 11 : index
    %c2_616 = arith.constant 2 : index
    %c0_617 = arith.constant 0 : index
    %1504 = vector.load %arg4[%c11_615, %c2_616, %c0_617] : memref<16x8x128xf32, #tpu.memory_space<vmem>>, vector<1x1x128xf32>
    %1505 = vector.shape_cast %1504 : vector<1x1x128xf32> to vector<1x128xf32>
    %c11_618 = arith.constant 11 : index
    %c2_619 = arith.constant 2 : index
    %c0_620 = arith.constant 0 : index
    %1506 = vector.load %arg5[%c11_618, %c2_619, %c0_620] : memref<16x8x128xf32, #tpu.memory_space<vmem>>, vector<1x1x128xf32>
    %1507 = vector.shape_cast %1506 : vector<1x1x128xf32> to vector<1x128xf32>
    %1508 = vector.broadcast %1505 : vector<1x128xf32> to vector<2x128xf32>
    %1509 = arith.mulf %1469, %1508 : vector<2x128xf32>
    %1510 = vector.broadcast %1507 : vector<1x128xf32> to vector<2x128xf32>
    %1511 = arith.mulf %1471, %1510 : vector<2x128xf32>
    %1512 = arith.subf %1509, %1511 : vector<2x128xf32>
    %1513 = arith.addf %1381, %1512 : vector<2x128xf32>
    %1514 = vector.broadcast %1507 : vector<1x128xf32> to vector<2x128xf32>
    %1515 = arith.mulf %1469, %1514 : vector<2x128xf32>
    %1516 = vector.broadcast %1505 : vector<1x128xf32> to vector<2x128xf32>
    %1517 = arith.mulf %1471, %1516 : vector<2x128xf32>
    %1518 = arith.addf %1515, %1517 : vector<2x128xf32>
    %1519 = arith.addf %1387, %1518 : vector<2x128xf32>
    %c11_621 = arith.constant 11 : index
    %c3_622 = arith.constant 3 : index
    %c0_623 = arith.constant 0 : index
    %1520 = vector.load %arg4[%c11_621, %c3_622, %c0_623] : memref<16x8x128xf32, #tpu.memory_space<vmem>>, vector<1x1x128xf32>
    %1521 = vector.shape_cast %1520 : vector<1x1x128xf32> to vector<1x128xf32>
    %c11_624 = arith.constant 11 : index
    %c3_625 = arith.constant 3 : index
    %c0_626 = arith.constant 0 : index
    %1522 = vector.load %arg5[%c11_624, %c3_625, %c0_626] : memref<16x8x128xf32, #tpu.memory_space<vmem>>, vector<1x1x128xf32>
    %1523 = vector.shape_cast %1522 : vector<1x1x128xf32> to vector<1x128xf32>
    %1524 = vector.broadcast %1521 : vector<1x128xf32> to vector<2x128xf32>
    %1525 = arith.mulf %1469, %1524 : vector<2x128xf32>
    %1526 = vector.broadcast %1523 : vector<1x128xf32> to vector<2x128xf32>
    %1527 = arith.mulf %1471, %1526 : vector<2x128xf32>
    %1528 = arith.subf %1525, %1527 : vector<2x128xf32>
    %1529 = arith.addf %1397, %1528 : vector<2x128xf32>
    %1530 = vector.broadcast %1523 : vector<1x128xf32> to vector<2x128xf32>
    %1531 = arith.mulf %1469, %1530 : vector<2x128xf32>
    %1532 = vector.broadcast %1521 : vector<1x128xf32> to vector<2x128xf32>
    %1533 = arith.mulf %1471, %1532 : vector<2x128xf32>
    %1534 = arith.addf %1531, %1533 : vector<2x128xf32>
    %1535 = arith.addf %1403, %1534 : vector<2x128xf32>
    %c11_627 = arith.constant 11 : index
    %c4_628 = arith.constant 4 : index
    %c0_629 = arith.constant 0 : index
    %1536 = vector.load %arg4[%c11_627, %c4_628, %c0_629] : memref<16x8x128xf32, #tpu.memory_space<vmem>>, vector<1x1x128xf32>
    %1537 = vector.shape_cast %1536 : vector<1x1x128xf32> to vector<1x128xf32>
    %c11_630 = arith.constant 11 : index
    %c4_631 = arith.constant 4 : index
    %c0_632 = arith.constant 0 : index
    %1538 = vector.load %arg5[%c11_630, %c4_631, %c0_632] : memref<16x8x128xf32, #tpu.memory_space<vmem>>, vector<1x1x128xf32>
    %1539 = vector.shape_cast %1538 : vector<1x1x128xf32> to vector<1x128xf32>
    %1540 = vector.broadcast %1537 : vector<1x128xf32> to vector<2x128xf32>
    %1541 = arith.mulf %1469, %1540 : vector<2x128xf32>
    %1542 = vector.broadcast %1539 : vector<1x128xf32> to vector<2x128xf32>
    %1543 = arith.mulf %1471, %1542 : vector<2x128xf32>
    %1544 = arith.subf %1541, %1543 : vector<2x128xf32>
    %1545 = arith.addf %1413, %1544 : vector<2x128xf32>
    %1546 = vector.broadcast %1539 : vector<1x128xf32> to vector<2x128xf32>
    %1547 = arith.mulf %1469, %1546 : vector<2x128xf32>
    %1548 = vector.broadcast %1537 : vector<1x128xf32> to vector<2x128xf32>
    %1549 = arith.mulf %1471, %1548 : vector<2x128xf32>
    %1550 = arith.addf %1547, %1549 : vector<2x128xf32>
    %1551 = arith.addf %1419, %1550 : vector<2x128xf32>
    %c11_633 = arith.constant 11 : index
    %c5_634 = arith.constant 5 : index
    %c0_635 = arith.constant 0 : index
    %1552 = vector.load %arg4[%c11_633, %c5_634, %c0_635] : memref<16x8x128xf32, #tpu.memory_space<vmem>>, vector<1x1x128xf32>
    %1553 = vector.shape_cast %1552 : vector<1x1x128xf32> to vector<1x128xf32>
    %c11_636 = arith.constant 11 : index
    %c5_637 = arith.constant 5 : index
    %c0_638 = arith.constant 0 : index
    %1554 = vector.load %arg5[%c11_636, %c5_637, %c0_638] : memref<16x8x128xf32, #tpu.memory_space<vmem>>, vector<1x1x128xf32>
    %1555 = vector.shape_cast %1554 : vector<1x1x128xf32> to vector<1x128xf32>
    %1556 = vector.broadcast %1553 : vector<1x128xf32> to vector<2x128xf32>
    %1557 = arith.mulf %1469, %1556 : vector<2x128xf32>
    %1558 = vector.broadcast %1555 : vector<1x128xf32> to vector<2x128xf32>
    %1559 = arith.mulf %1471, %1558 : vector<2x128xf32>
    %1560 = arith.subf %1557, %1559 : vector<2x128xf32>
    %1561 = arith.addf %1429, %1560 : vector<2x128xf32>
    %1562 = vector.broadcast %1555 : vector<1x128xf32> to vector<2x128xf32>
    %1563 = arith.mulf %1469, %1562 : vector<2x128xf32>
    %1564 = vector.broadcast %1553 : vector<1x128xf32> to vector<2x128xf32>
    %1565 = arith.mulf %1471, %1564 : vector<2x128xf32>
    %1566 = arith.addf %1563, %1565 : vector<2x128xf32>
    %1567 = arith.addf %1435, %1566 : vector<2x128xf32>
    %c11_639 = arith.constant 11 : index
    %c6_640 = arith.constant 6 : index
    %c0_641 = arith.constant 0 : index
    %1568 = vector.load %arg4[%c11_639, %c6_640, %c0_641] : memref<16x8x128xf32, #tpu.memory_space<vmem>>, vector<1x1x128xf32>
    %1569 = vector.shape_cast %1568 : vector<1x1x128xf32> to vector<1x128xf32>
    %c11_642 = arith.constant 11 : index
    %c6_643 = arith.constant 6 : index
    %c0_644 = arith.constant 0 : index
    %1570 = vector.load %arg5[%c11_642, %c6_643, %c0_644] : memref<16x8x128xf32, #tpu.memory_space<vmem>>, vector<1x1x128xf32>
    %1571 = vector.shape_cast %1570 : vector<1x1x128xf32> to vector<1x128xf32>
    %1572 = vector.broadcast %1569 : vector<1x128xf32> to vector<2x128xf32>
    %1573 = arith.mulf %1469, %1572 : vector<2x128xf32>
    %1574 = vector.broadcast %1571 : vector<1x128xf32> to vector<2x128xf32>
    %1575 = arith.mulf %1471, %1574 : vector<2x128xf32>
    %1576 = arith.subf %1573, %1575 : vector<2x128xf32>
    %1577 = arith.addf %1445, %1576 : vector<2x128xf32>
    %1578 = vector.broadcast %1571 : vector<1x128xf32> to vector<2x128xf32>
    %1579 = arith.mulf %1469, %1578 : vector<2x128xf32>
    %1580 = vector.broadcast %1569 : vector<1x128xf32> to vector<2x128xf32>
    %1581 = arith.mulf %1471, %1580 : vector<2x128xf32>
    %1582 = arith.addf %1579, %1581 : vector<2x128xf32>
    %1583 = arith.addf %1451, %1582 : vector<2x128xf32>
    %c11_645 = arith.constant 11 : index
    %c7_646 = arith.constant 7 : index
    %c0_647 = arith.constant 0 : index
    %1584 = vector.load %arg4[%c11_645, %c7_646, %c0_647] : memref<16x8x128xf32, #tpu.memory_space<vmem>>, vector<1x1x128xf32>
    %1585 = vector.shape_cast %1584 : vector<1x1x128xf32> to vector<1x128xf32>
    %c11_648 = arith.constant 11 : index
    %c7_649 = arith.constant 7 : index
    %c0_650 = arith.constant 0 : index
    %1586 = vector.load %arg5[%c11_648, %c7_649, %c0_650] : memref<16x8x128xf32, #tpu.memory_space<vmem>>, vector<1x1x128xf32>
    %1587 = vector.shape_cast %1586 : vector<1x1x128xf32> to vector<1x128xf32>
    %1588 = vector.broadcast %1585 : vector<1x128xf32> to vector<2x128xf32>
    %1589 = arith.mulf %1469, %1588 : vector<2x128xf32>
    %1590 = vector.broadcast %1587 : vector<1x128xf32> to vector<2x128xf32>
    %1591 = arith.mulf %1471, %1590 : vector<2x128xf32>
    %1592 = arith.subf %1589, %1591 : vector<2x128xf32>
    %1593 = arith.addf %1461, %1592 : vector<2x128xf32>
    %1594 = vector.broadcast %1587 : vector<1x128xf32> to vector<2x128xf32>
    %1595 = arith.mulf %1469, %1594 : vector<2x128xf32>
    %1596 = vector.broadcast %1585 : vector<1x128xf32> to vector<2x128xf32>
    %1597 = arith.mulf %1471, %1596 : vector<2x128xf32>
    %1598 = arith.addf %1595, %1597 : vector<2x128xf32>
    %1599 = arith.addf %1467, %1598 : vector<2x128xf32>
    %c12 = arith.constant 12 : index
    %c0_651 = arith.constant 0 : index
    %c0_652 = arith.constant 0 : index
    %1600 = vector.load %arg2[%c12, %c0_651, %c0_652] : memref<16x2x128xf32, #tpu.memory_space<vmem>>, vector<1x2x128xf32>
    %1601 = vector.shape_cast %1600 : vector<1x2x128xf32> to vector<2x128xf32>
    %c12_653 = arith.constant 12 : index
    %c0_654 = arith.constant 0 : index
    %c0_655 = arith.constant 0 : index
    %1602 = vector.load %arg3[%c12_653, %c0_654, %c0_655] : memref<16x2x128xf32, #tpu.memory_space<vmem>>, vector<1x2x128xf32>
    %1603 = vector.shape_cast %1602 : vector<1x2x128xf32> to vector<2x128xf32>
    %c12_656 = arith.constant 12 : index
    %c0_657 = arith.constant 0 : index
    %c0_658 = arith.constant 0 : index
    %1604 = vector.load %arg4[%c12_656, %c0_657, %c0_658] : memref<16x8x128xf32, #tpu.memory_space<vmem>>, vector<1x1x128xf32>
    %1605 = vector.shape_cast %1604 : vector<1x1x128xf32> to vector<1x128xf32>
    %c12_659 = arith.constant 12 : index
    %c0_660 = arith.constant 0 : index
    %c0_661 = arith.constant 0 : index
    %1606 = vector.load %arg5[%c12_659, %c0_660, %c0_661] : memref<16x8x128xf32, #tpu.memory_space<vmem>>, vector<1x1x128xf32>
    %1607 = vector.shape_cast %1606 : vector<1x1x128xf32> to vector<1x128xf32>
    %1608 = vector.broadcast %1605 : vector<1x128xf32> to vector<2x128xf32>
    %1609 = arith.mulf %1601, %1608 : vector<2x128xf32>
    %1610 = vector.broadcast %1607 : vector<1x128xf32> to vector<2x128xf32>
    %1611 = arith.mulf %1603, %1610 : vector<2x128xf32>
    %1612 = arith.subf %1609, %1611 : vector<2x128xf32>
    %1613 = arith.addf %1481, %1612 : vector<2x128xf32>
    %1614 = vector.broadcast %1607 : vector<1x128xf32> to vector<2x128xf32>
    %1615 = arith.mulf %1601, %1614 : vector<2x128xf32>
    %1616 = vector.broadcast %1605 : vector<1x128xf32> to vector<2x128xf32>
    %1617 = arith.mulf %1603, %1616 : vector<2x128xf32>
    %1618 = arith.addf %1615, %1617 : vector<2x128xf32>
    %1619 = arith.addf %1487, %1618 : vector<2x128xf32>
    %c12_662 = arith.constant 12 : index
    %c1_663 = arith.constant 1 : index
    %c0_664 = arith.constant 0 : index
    %1620 = vector.load %arg4[%c12_662, %c1_663, %c0_664] : memref<16x8x128xf32, #tpu.memory_space<vmem>>, vector<1x1x128xf32>
    %1621 = vector.shape_cast %1620 : vector<1x1x128xf32> to vector<1x128xf32>
    %c12_665 = arith.constant 12 : index
    %c1_666 = arith.constant 1 : index
    %c0_667 = arith.constant 0 : index
    %1622 = vector.load %arg5[%c12_665, %c1_666, %c0_667] : memref<16x8x128xf32, #tpu.memory_space<vmem>>, vector<1x1x128xf32>
    %1623 = vector.shape_cast %1622 : vector<1x1x128xf32> to vector<1x128xf32>
    %1624 = vector.broadcast %1621 : vector<1x128xf32> to vector<2x128xf32>
    %1625 = arith.mulf %1601, %1624 : vector<2x128xf32>
    %1626 = vector.broadcast %1623 : vector<1x128xf32> to vector<2x128xf32>
    %1627 = arith.mulf %1603, %1626 : vector<2x128xf32>
    %1628 = arith.subf %1625, %1627 : vector<2x128xf32>
    %1629 = arith.addf %1497, %1628 : vector<2x128xf32>
    %1630 = vector.broadcast %1623 : vector<1x128xf32> to vector<2x128xf32>
    %1631 = arith.mulf %1601, %1630 : vector<2x128xf32>
    %1632 = vector.broadcast %1621 : vector<1x128xf32> to vector<2x128xf32>
    %1633 = arith.mulf %1603, %1632 : vector<2x128xf32>
    %1634 = arith.addf %1631, %1633 : vector<2x128xf32>
    %1635 = arith.addf %1503, %1634 : vector<2x128xf32>
    %c12_668 = arith.constant 12 : index
    %c2_669 = arith.constant 2 : index
    %c0_670 = arith.constant 0 : index
    %1636 = vector.load %arg4[%c12_668, %c2_669, %c0_670] : memref<16x8x128xf32, #tpu.memory_space<vmem>>, vector<1x1x128xf32>
    %1637 = vector.shape_cast %1636 : vector<1x1x128xf32> to vector<1x128xf32>
    %c12_671 = arith.constant 12 : index
    %c2_672 = arith.constant 2 : index
    %c0_673 = arith.constant 0 : index
    %1638 = vector.load %arg5[%c12_671, %c2_672, %c0_673] : memref<16x8x128xf32, #tpu.memory_space<vmem>>, vector<1x1x128xf32>
    %1639 = vector.shape_cast %1638 : vector<1x1x128xf32> to vector<1x128xf32>
    %1640 = vector.broadcast %1637 : vector<1x128xf32> to vector<2x128xf32>
    %1641 = arith.mulf %1601, %1640 : vector<2x128xf32>
    %1642 = vector.broadcast %1639 : vector<1x128xf32> to vector<2x128xf32>
    %1643 = arith.mulf %1603, %1642 : vector<2x128xf32>
    %1644 = arith.subf %1641, %1643 : vector<2x128xf32>
    %1645 = arith.addf %1513, %1644 : vector<2x128xf32>
    %1646 = vector.broadcast %1639 : vector<1x128xf32> to vector<2x128xf32>
    %1647 = arith.mulf %1601, %1646 : vector<2x128xf32>
    %1648 = vector.broadcast %1637 : vector<1x128xf32> to vector<2x128xf32>
    %1649 = arith.mulf %1603, %1648 : vector<2x128xf32>
    %1650 = arith.addf %1647, %1649 : vector<2x128xf32>
    %1651 = arith.addf %1519, %1650 : vector<2x128xf32>
    %c12_674 = arith.constant 12 : index
    %c3_675 = arith.constant 3 : index
    %c0_676 = arith.constant 0 : index
    %1652 = vector.load %arg4[%c12_674, %c3_675, %c0_676] : memref<16x8x128xf32, #tpu.memory_space<vmem>>, vector<1x1x128xf32>
    %1653 = vector.shape_cast %1652 : vector<1x1x128xf32> to vector<1x128xf32>
    %c12_677 = arith.constant 12 : index
    %c3_678 = arith.constant 3 : index
    %c0_679 = arith.constant 0 : index
    %1654 = vector.load %arg5[%c12_677, %c3_678, %c0_679] : memref<16x8x128xf32, #tpu.memory_space<vmem>>, vector<1x1x128xf32>
    %1655 = vector.shape_cast %1654 : vector<1x1x128xf32> to vector<1x128xf32>
    %1656 = vector.broadcast %1653 : vector<1x128xf32> to vector<2x128xf32>
    %1657 = arith.mulf %1601, %1656 : vector<2x128xf32>
    %1658 = vector.broadcast %1655 : vector<1x128xf32> to vector<2x128xf32>
    %1659 = arith.mulf %1603, %1658 : vector<2x128xf32>
    %1660 = arith.subf %1657, %1659 : vector<2x128xf32>
    %1661 = arith.addf %1529, %1660 : vector<2x128xf32>
    %1662 = vector.broadcast %1655 : vector<1x128xf32> to vector<2x128xf32>
    %1663 = arith.mulf %1601, %1662 : vector<2x128xf32>
    %1664 = vector.broadcast %1653 : vector<1x128xf32> to vector<2x128xf32>
    %1665 = arith.mulf %1603, %1664 : vector<2x128xf32>
    %1666 = arith.addf %1663, %1665 : vector<2x128xf32>
    %1667 = arith.addf %1535, %1666 : vector<2x128xf32>
    %c12_680 = arith.constant 12 : index
    %c4_681 = arith.constant 4 : index
    %c0_682 = arith.constant 0 : index
    %1668 = vector.load %arg4[%c12_680, %c4_681, %c0_682] : memref<16x8x128xf32, #tpu.memory_space<vmem>>, vector<1x1x128xf32>
    %1669 = vector.shape_cast %1668 : vector<1x1x128xf32> to vector<1x128xf32>
    %c12_683 = arith.constant 12 : index
    %c4_684 = arith.constant 4 : index
    %c0_685 = arith.constant 0 : index
    %1670 = vector.load %arg5[%c12_683, %c4_684, %c0_685] : memref<16x8x128xf32, #tpu.memory_space<vmem>>, vector<1x1x128xf32>
    %1671 = vector.shape_cast %1670 : vector<1x1x128xf32> to vector<1x128xf32>
    %1672 = vector.broadcast %1669 : vector<1x128xf32> to vector<2x128xf32>
    %1673 = arith.mulf %1601, %1672 : vector<2x128xf32>
    %1674 = vector.broadcast %1671 : vector<1x128xf32> to vector<2x128xf32>
    %1675 = arith.mulf %1603, %1674 : vector<2x128xf32>
    %1676 = arith.subf %1673, %1675 : vector<2x128xf32>
    %1677 = arith.addf %1545, %1676 : vector<2x128xf32>
    %1678 = vector.broadcast %1671 : vector<1x128xf32> to vector<2x128xf32>
    %1679 = arith.mulf %1601, %1678 : vector<2x128xf32>
    %1680 = vector.broadcast %1669 : vector<1x128xf32> to vector<2x128xf32>
    %1681 = arith.mulf %1603, %1680 : vector<2x128xf32>
    %1682 = arith.addf %1679, %1681 : vector<2x128xf32>
    %1683 = arith.addf %1551, %1682 : vector<2x128xf32>
    %c12_686 = arith.constant 12 : index
    %c5_687 = arith.constant 5 : index
    %c0_688 = arith.constant 0 : index
    %1684 = vector.load %arg4[%c12_686, %c5_687, %c0_688] : memref<16x8x128xf32, #tpu.memory_space<vmem>>, vector<1x1x128xf32>
    %1685 = vector.shape_cast %1684 : vector<1x1x128xf32> to vector<1x128xf32>
    %c12_689 = arith.constant 12 : index
    %c5_690 = arith.constant 5 : index
    %c0_691 = arith.constant 0 : index
    %1686 = vector.load %arg5[%c12_689, %c5_690, %c0_691] : memref<16x8x128xf32, #tpu.memory_space<vmem>>, vector<1x1x128xf32>
    %1687 = vector.shape_cast %1686 : vector<1x1x128xf32> to vector<1x128xf32>
    %1688 = vector.broadcast %1685 : vector<1x128xf32> to vector<2x128xf32>
    %1689 = arith.mulf %1601, %1688 : vector<2x128xf32>
    %1690 = vector.broadcast %1687 : vector<1x128xf32> to vector<2x128xf32>
    %1691 = arith.mulf %1603, %1690 : vector<2x128xf32>
    %1692 = arith.subf %1689, %1691 : vector<2x128xf32>
    %1693 = arith.addf %1561, %1692 : vector<2x128xf32>
    %1694 = vector.broadcast %1687 : vector<1x128xf32> to vector<2x128xf32>
    %1695 = arith.mulf %1601, %1694 : vector<2x128xf32>
    %1696 = vector.broadcast %1685 : vector<1x128xf32> to vector<2x128xf32>
    %1697 = arith.mulf %1603, %1696 : vector<2x128xf32>
    %1698 = arith.addf %1695, %1697 : vector<2x128xf32>
    %1699 = arith.addf %1567, %1698 : vector<2x128xf32>
    %c12_692 = arith.constant 12 : index
    %c6_693 = arith.constant 6 : index
    %c0_694 = arith.constant 0 : index
    %1700 = vector.load %arg4[%c12_692, %c6_693, %c0_694] : memref<16x8x128xf32, #tpu.memory_space<vmem>>, vector<1x1x128xf32>
    %1701 = vector.shape_cast %1700 : vector<1x1x128xf32> to vector<1x128xf32>
    %c12_695 = arith.constant 12 : index
    %c6_696 = arith.constant 6 : index
    %c0_697 = arith.constant 0 : index
    %1702 = vector.load %arg5[%c12_695, %c6_696, %c0_697] : memref<16x8x128xf32, #tpu.memory_space<vmem>>, vector<1x1x128xf32>
    %1703 = vector.shape_cast %1702 : vector<1x1x128xf32> to vector<1x128xf32>
    %1704 = vector.broadcast %1701 : vector<1x128xf32> to vector<2x128xf32>
    %1705 = arith.mulf %1601, %1704 : vector<2x128xf32>
    %1706 = vector.broadcast %1703 : vector<1x128xf32> to vector<2x128xf32>
    %1707 = arith.mulf %1603, %1706 : vector<2x128xf32>
    %1708 = arith.subf %1705, %1707 : vector<2x128xf32>
    %1709 = arith.addf %1577, %1708 : vector<2x128xf32>
    %1710 = vector.broadcast %1703 : vector<1x128xf32> to vector<2x128xf32>
    %1711 = arith.mulf %1601, %1710 : vector<2x128xf32>
    %1712 = vector.broadcast %1701 : vector<1x128xf32> to vector<2x128xf32>
    %1713 = arith.mulf %1603, %1712 : vector<2x128xf32>
    %1714 = arith.addf %1711, %1713 : vector<2x128xf32>
    %1715 = arith.addf %1583, %1714 : vector<2x128xf32>
    %c12_698 = arith.constant 12 : index
    %c7_699 = arith.constant 7 : index
    %c0_700 = arith.constant 0 : index
    %1716 = vector.load %arg4[%c12_698, %c7_699, %c0_700] : memref<16x8x128xf32, #tpu.memory_space<vmem>>, vector<1x1x128xf32>
    %1717 = vector.shape_cast %1716 : vector<1x1x128xf32> to vector<1x128xf32>
    %c12_701 = arith.constant 12 : index
    %c7_702 = arith.constant 7 : index
    %c0_703 = arith.constant 0 : index
    %1718 = vector.load %arg5[%c12_701, %c7_702, %c0_703] : memref<16x8x128xf32, #tpu.memory_space<vmem>>, vector<1x1x128xf32>
    %1719 = vector.shape_cast %1718 : vector<1x1x128xf32> to vector<1x128xf32>
    %1720 = vector.broadcast %1717 : vector<1x128xf32> to vector<2x128xf32>
    %1721 = arith.mulf %1601, %1720 : vector<2x128xf32>
    %1722 = vector.broadcast %1719 : vector<1x128xf32> to vector<2x128xf32>
    %1723 = arith.mulf %1603, %1722 : vector<2x128xf32>
    %1724 = arith.subf %1721, %1723 : vector<2x128xf32>
    %1725 = arith.addf %1593, %1724 : vector<2x128xf32>
    %1726 = vector.broadcast %1719 : vector<1x128xf32> to vector<2x128xf32>
    %1727 = arith.mulf %1601, %1726 : vector<2x128xf32>
    %1728 = vector.broadcast %1717 : vector<1x128xf32> to vector<2x128xf32>
    %1729 = arith.mulf %1603, %1728 : vector<2x128xf32>
    %1730 = arith.addf %1727, %1729 : vector<2x128xf32>
    %1731 = arith.addf %1599, %1730 : vector<2x128xf32>
    %c13 = arith.constant 13 : index
    %c0_704 = arith.constant 0 : index
    %c0_705 = arith.constant 0 : index
    %1732 = vector.load %arg2[%c13, %c0_704, %c0_705] : memref<16x2x128xf32, #tpu.memory_space<vmem>>, vector<1x2x128xf32>
    %1733 = vector.shape_cast %1732 : vector<1x2x128xf32> to vector<2x128xf32>
    %c13_706 = arith.constant 13 : index
    %c0_707 = arith.constant 0 : index
    %c0_708 = arith.constant 0 : index
    %1734 = vector.load %arg3[%c13_706, %c0_707, %c0_708] : memref<16x2x128xf32, #tpu.memory_space<vmem>>, vector<1x2x128xf32>
    %1735 = vector.shape_cast %1734 : vector<1x2x128xf32> to vector<2x128xf32>
    %c13_709 = arith.constant 13 : index
    %c0_710 = arith.constant 0 : index
    %c0_711 = arith.constant 0 : index
    %1736 = vector.load %arg4[%c13_709, %c0_710, %c0_711] : memref<16x8x128xf32, #tpu.memory_space<vmem>>, vector<1x1x128xf32>
    %1737 = vector.shape_cast %1736 : vector<1x1x128xf32> to vector<1x128xf32>
    %c13_712 = arith.constant 13 : index
    %c0_713 = arith.constant 0 : index
    %c0_714 = arith.constant 0 : index
    %1738 = vector.load %arg5[%c13_712, %c0_713, %c0_714] : memref<16x8x128xf32, #tpu.memory_space<vmem>>, vector<1x1x128xf32>
    %1739 = vector.shape_cast %1738 : vector<1x1x128xf32> to vector<1x128xf32>
    %1740 = vector.broadcast %1737 : vector<1x128xf32> to vector<2x128xf32>
    %1741 = arith.mulf %1733, %1740 : vector<2x128xf32>
    %1742 = vector.broadcast %1739 : vector<1x128xf32> to vector<2x128xf32>
    %1743 = arith.mulf %1735, %1742 : vector<2x128xf32>
    %1744 = arith.subf %1741, %1743 : vector<2x128xf32>
    %1745 = arith.addf %1613, %1744 : vector<2x128xf32>
    %1746 = vector.broadcast %1739 : vector<1x128xf32> to vector<2x128xf32>
    %1747 = arith.mulf %1733, %1746 : vector<2x128xf32>
    %1748 = vector.broadcast %1737 : vector<1x128xf32> to vector<2x128xf32>
    %1749 = arith.mulf %1735, %1748 : vector<2x128xf32>
    %1750 = arith.addf %1747, %1749 : vector<2x128xf32>
    %1751 = arith.addf %1619, %1750 : vector<2x128xf32>
    %c13_715 = arith.constant 13 : index
    %c1_716 = arith.constant 1 : index
    %c0_717 = arith.constant 0 : index
    %1752 = vector.load %arg4[%c13_715, %c1_716, %c0_717] : memref<16x8x128xf32, #tpu.memory_space<vmem>>, vector<1x1x128xf32>
    %1753 = vector.shape_cast %1752 : vector<1x1x128xf32> to vector<1x128xf32>
    %c13_718 = arith.constant 13 : index
    %c1_719 = arith.constant 1 : index
    %c0_720 = arith.constant 0 : index
    %1754 = vector.load %arg5[%c13_718, %c1_719, %c0_720] : memref<16x8x128xf32, #tpu.memory_space<vmem>>, vector<1x1x128xf32>
    %1755 = vector.shape_cast %1754 : vector<1x1x128xf32> to vector<1x128xf32>
    %1756 = vector.broadcast %1753 : vector<1x128xf32> to vector<2x128xf32>
    %1757 = arith.mulf %1733, %1756 : vector<2x128xf32>
    %1758 = vector.broadcast %1755 : vector<1x128xf32> to vector<2x128xf32>
    %1759 = arith.mulf %1735, %1758 : vector<2x128xf32>
    %1760 = arith.subf %1757, %1759 : vector<2x128xf32>
    %1761 = arith.addf %1629, %1760 : vector<2x128xf32>
    %1762 = vector.broadcast %1755 : vector<1x128xf32> to vector<2x128xf32>
    %1763 = arith.mulf %1733, %1762 : vector<2x128xf32>
    %1764 = vector.broadcast %1753 : vector<1x128xf32> to vector<2x128xf32>
    %1765 = arith.mulf %1735, %1764 : vector<2x128xf32>
    %1766 = arith.addf %1763, %1765 : vector<2x128xf32>
    %1767 = arith.addf %1635, %1766 : vector<2x128xf32>
    %c13_721 = arith.constant 13 : index
    %c2_722 = arith.constant 2 : index
    %c0_723 = arith.constant 0 : index
    %1768 = vector.load %arg4[%c13_721, %c2_722, %c0_723] : memref<16x8x128xf32, #tpu.memory_space<vmem>>, vector<1x1x128xf32>
    %1769 = vector.shape_cast %1768 : vector<1x1x128xf32> to vector<1x128xf32>
    %c13_724 = arith.constant 13 : index
    %c2_725 = arith.constant 2 : index
    %c0_726 = arith.constant 0 : index
    %1770 = vector.load %arg5[%c13_724, %c2_725, %c0_726] : memref<16x8x128xf32, #tpu.memory_space<vmem>>, vector<1x1x128xf32>
    %1771 = vector.shape_cast %1770 : vector<1x1x128xf32> to vector<1x128xf32>
    %1772 = vector.broadcast %1769 : vector<1x128xf32> to vector<2x128xf32>
    %1773 = arith.mulf %1733, %1772 : vector<2x128xf32>
    %1774 = vector.broadcast %1771 : vector<1x128xf32> to vector<2x128xf32>
    %1775 = arith.mulf %1735, %1774 : vector<2x128xf32>
    %1776 = arith.subf %1773, %1775 : vector<2x128xf32>
    %1777 = arith.addf %1645, %1776 : vector<2x128xf32>
    %1778 = vector.broadcast %1771 : vector<1x128xf32> to vector<2x128xf32>
    %1779 = arith.mulf %1733, %1778 : vector<2x128xf32>
    %1780 = vector.broadcast %1769 : vector<1x128xf32> to vector<2x128xf32>
    %1781 = arith.mulf %1735, %1780 : vector<2x128xf32>
    %1782 = arith.addf %1779, %1781 : vector<2x128xf32>
    %1783 = arith.addf %1651, %1782 : vector<2x128xf32>
    %c13_727 = arith.constant 13 : index
    %c3_728 = arith.constant 3 : index
    %c0_729 = arith.constant 0 : index
    %1784 = vector.load %arg4[%c13_727, %c3_728, %c0_729] : memref<16x8x128xf32, #tpu.memory_space<vmem>>, vector<1x1x128xf32>
    %1785 = vector.shape_cast %1784 : vector<1x1x128xf32> to vector<1x128xf32>
    %c13_730 = arith.constant 13 : index
    %c3_731 = arith.constant 3 : index
    %c0_732 = arith.constant 0 : index
    %1786 = vector.load %arg5[%c13_730, %c3_731, %c0_732] : memref<16x8x128xf32, #tpu.memory_space<vmem>>, vector<1x1x128xf32>
    %1787 = vector.shape_cast %1786 : vector<1x1x128xf32> to vector<1x128xf32>
    %1788 = vector.broadcast %1785 : vector<1x128xf32> to vector<2x128xf32>
    %1789 = arith.mulf %1733, %1788 : vector<2x128xf32>
    %1790 = vector.broadcast %1787 : vector<1x128xf32> to vector<2x128xf32>
    %1791 = arith.mulf %1735, %1790 : vector<2x128xf32>
    %1792 = arith.subf %1789, %1791 : vector<2x128xf32>
    %1793 = arith.addf %1661, %1792 : vector<2x128xf32>
    %1794 = vector.broadcast %1787 : vector<1x128xf32> to vector<2x128xf32>
    %1795 = arith.mulf %1733, %1794 : vector<2x128xf32>
    %1796 = vector.broadcast %1785 : vector<1x128xf32> to vector<2x128xf32>
    %1797 = arith.mulf %1735, %1796 : vector<2x128xf32>
    %1798 = arith.addf %1795, %1797 : vector<2x128xf32>
    %1799 = arith.addf %1667, %1798 : vector<2x128xf32>
    %c13_733 = arith.constant 13 : index
    %c4_734 = arith.constant 4 : index
    %c0_735 = arith.constant 0 : index
    %1800 = vector.load %arg4[%c13_733, %c4_734, %c0_735] : memref<16x8x128xf32, #tpu.memory_space<vmem>>, vector<1x1x128xf32>
    %1801 = vector.shape_cast %1800 : vector<1x1x128xf32> to vector<1x128xf32>
    %c13_736 = arith.constant 13 : index
    %c4_737 = arith.constant 4 : index
    %c0_738 = arith.constant 0 : index
    %1802 = vector.load %arg5[%c13_736, %c4_737, %c0_738] : memref<16x8x128xf32, #tpu.memory_space<vmem>>, vector<1x1x128xf32>
    %1803 = vector.shape_cast %1802 : vector<1x1x128xf32> to vector<1x128xf32>
    %1804 = vector.broadcast %1801 : vector<1x128xf32> to vector<2x128xf32>
    %1805 = arith.mulf %1733, %1804 : vector<2x128xf32>
    %1806 = vector.broadcast %1803 : vector<1x128xf32> to vector<2x128xf32>
    %1807 = arith.mulf %1735, %1806 : vector<2x128xf32>
    %1808 = arith.subf %1805, %1807 : vector<2x128xf32>
    %1809 = arith.addf %1677, %1808 : vector<2x128xf32>
    %1810 = vector.broadcast %1803 : vector<1x128xf32> to vector<2x128xf32>
    %1811 = arith.mulf %1733, %1810 : vector<2x128xf32>
    %1812 = vector.broadcast %1801 : vector<1x128xf32> to vector<2x128xf32>
    %1813 = arith.mulf %1735, %1812 : vector<2x128xf32>
    %1814 = arith.addf %1811, %1813 : vector<2x128xf32>
    %1815 = arith.addf %1683, %1814 : vector<2x128xf32>
    %c13_739 = arith.constant 13 : index
    %c5_740 = arith.constant 5 : index
    %c0_741 = arith.constant 0 : index
    %1816 = vector.load %arg4[%c13_739, %c5_740, %c0_741] : memref<16x8x128xf32, #tpu.memory_space<vmem>>, vector<1x1x128xf32>
    %1817 = vector.shape_cast %1816 : vector<1x1x128xf32> to vector<1x128xf32>
    %c13_742 = arith.constant 13 : index
    %c5_743 = arith.constant 5 : index
    %c0_744 = arith.constant 0 : index
    %1818 = vector.load %arg5[%c13_742, %c5_743, %c0_744] : memref<16x8x128xf32, #tpu.memory_space<vmem>>, vector<1x1x128xf32>
    %1819 = vector.shape_cast %1818 : vector<1x1x128xf32> to vector<1x128xf32>
    %1820 = vector.broadcast %1817 : vector<1x128xf32> to vector<2x128xf32>
    %1821 = arith.mulf %1733, %1820 : vector<2x128xf32>
    %1822 = vector.broadcast %1819 : vector<1x128xf32> to vector<2x128xf32>
    %1823 = arith.mulf %1735, %1822 : vector<2x128xf32>
    %1824 = arith.subf %1821, %1823 : vector<2x128xf32>
    %1825 = arith.addf %1693, %1824 : vector<2x128xf32>
    %1826 = vector.broadcast %1819 : vector<1x128xf32> to vector<2x128xf32>
    %1827 = arith.mulf %1733, %1826 : vector<2x128xf32>
    %1828 = vector.broadcast %1817 : vector<1x128xf32> to vector<2x128xf32>
    %1829 = arith.mulf %1735, %1828 : vector<2x128xf32>
    %1830 = arith.addf %1827, %1829 : vector<2x128xf32>
    %1831 = arith.addf %1699, %1830 : vector<2x128xf32>
    %c13_745 = arith.constant 13 : index
    %c6_746 = arith.constant 6 : index
    %c0_747 = arith.constant 0 : index
    %1832 = vector.load %arg4[%c13_745, %c6_746, %c0_747] : memref<16x8x128xf32, #tpu.memory_space<vmem>>, vector<1x1x128xf32>
    %1833 = vector.shape_cast %1832 : vector<1x1x128xf32> to vector<1x128xf32>
    %c13_748 = arith.constant 13 : index
    %c6_749 = arith.constant 6 : index
    %c0_750 = arith.constant 0 : index
    %1834 = vector.load %arg5[%c13_748, %c6_749, %c0_750] : memref<16x8x128xf32, #tpu.memory_space<vmem>>, vector<1x1x128xf32>
    %1835 = vector.shape_cast %1834 : vector<1x1x128xf32> to vector<1x128xf32>
    %1836 = vector.broadcast %1833 : vector<1x128xf32> to vector<2x128xf32>
    %1837 = arith.mulf %1733, %1836 : vector<2x128xf32>
    %1838 = vector.broadcast %1835 : vector<1x128xf32> to vector<2x128xf32>
    %1839 = arith.mulf %1735, %1838 : vector<2x128xf32>
    %1840 = arith.subf %1837, %1839 : vector<2x128xf32>
    %1841 = arith.addf %1709, %1840 : vector<2x128xf32>
    %1842 = vector.broadcast %1835 : vector<1x128xf32> to vector<2x128xf32>
    %1843 = arith.mulf %1733, %1842 : vector<2x128xf32>
    %1844 = vector.broadcast %1833 : vector<1x128xf32> to vector<2x128xf32>
    %1845 = arith.mulf %1735, %1844 : vector<2x128xf32>
    %1846 = arith.addf %1843, %1845 : vector<2x128xf32>
    %1847 = arith.addf %1715, %1846 : vector<2x128xf32>
    %c13_751 = arith.constant 13 : index
    %c7_752 = arith.constant 7 : index
    %c0_753 = arith.constant 0 : index
    %1848 = vector.load %arg4[%c13_751, %c7_752, %c0_753] : memref<16x8x128xf32, #tpu.memory_space<vmem>>, vector<1x1x128xf32>
    %1849 = vector.shape_cast %1848 : vector<1x1x128xf32> to vector<1x128xf32>
    %c13_754 = arith.constant 13 : index
    %c7_755 = arith.constant 7 : index
    %c0_756 = arith.constant 0 : index
    %1850 = vector.load %arg5[%c13_754, %c7_755, %c0_756] : memref<16x8x128xf32, #tpu.memory_space<vmem>>, vector<1x1x128xf32>
    %1851 = vector.shape_cast %1850 : vector<1x1x128xf32> to vector<1x128xf32>
    %1852 = vector.broadcast %1849 : vector<1x128xf32> to vector<2x128xf32>
    %1853 = arith.mulf %1733, %1852 : vector<2x128xf32>
    %1854 = vector.broadcast %1851 : vector<1x128xf32> to vector<2x128xf32>
    %1855 = arith.mulf %1735, %1854 : vector<2x128xf32>
    %1856 = arith.subf %1853, %1855 : vector<2x128xf32>
    %1857 = arith.addf %1725, %1856 : vector<2x128xf32>
    %1858 = vector.broadcast %1851 : vector<1x128xf32> to vector<2x128xf32>
    %1859 = arith.mulf %1733, %1858 : vector<2x128xf32>
    %1860 = vector.broadcast %1849 : vector<1x128xf32> to vector<2x128xf32>
    %1861 = arith.mulf %1735, %1860 : vector<2x128xf32>
    %1862 = arith.addf %1859, %1861 : vector<2x128xf32>
    %1863 = arith.addf %1731, %1862 : vector<2x128xf32>
    %c14 = arith.constant 14 : index
    %c0_757 = arith.constant 0 : index
    %c0_758 = arith.constant 0 : index
    %1864 = vector.load %arg2[%c14, %c0_757, %c0_758] : memref<16x2x128xf32, #tpu.memory_space<vmem>>, vector<1x2x128xf32>
    %1865 = vector.shape_cast %1864 : vector<1x2x128xf32> to vector<2x128xf32>
    %c14_759 = arith.constant 14 : index
    %c0_760 = arith.constant 0 : index
    %c0_761 = arith.constant 0 : index
    %1866 = vector.load %arg3[%c14_759, %c0_760, %c0_761] : memref<16x2x128xf32, #tpu.memory_space<vmem>>, vector<1x2x128xf32>
    %1867 = vector.shape_cast %1866 : vector<1x2x128xf32> to vector<2x128xf32>
    %c14_762 = arith.constant 14 : index
    %c0_763 = arith.constant 0 : index
    %c0_764 = arith.constant 0 : index
    %1868 = vector.load %arg4[%c14_762, %c0_763, %c0_764] : memref<16x8x128xf32, #tpu.memory_space<vmem>>, vector<1x1x128xf32>
    %1869 = vector.shape_cast %1868 : vector<1x1x128xf32> to vector<1x128xf32>
    %c14_765 = arith.constant 14 : index
    %c0_766 = arith.constant 0 : index
    %c0_767 = arith.constant 0 : index
    %1870 = vector.load %arg5[%c14_765, %c0_766, %c0_767] : memref<16x8x128xf32, #tpu.memory_space<vmem>>, vector<1x1x128xf32>
    %1871 = vector.shape_cast %1870 : vector<1x1x128xf32> to vector<1x128xf32>
    %1872 = vector.broadcast %1869 : vector<1x128xf32> to vector<2x128xf32>
    %1873 = arith.mulf %1865, %1872 : vector<2x128xf32>
    %1874 = vector.broadcast %1871 : vector<1x128xf32> to vector<2x128xf32>
    %1875 = arith.mulf %1867, %1874 : vector<2x128xf32>
    %1876 = arith.subf %1873, %1875 : vector<2x128xf32>
    %1877 = arith.addf %1745, %1876 : vector<2x128xf32>
    %1878 = vector.broadcast %1871 : vector<1x128xf32> to vector<2x128xf32>
    %1879 = arith.mulf %1865, %1878 : vector<2x128xf32>
    %1880 = vector.broadcast %1869 : vector<1x128xf32> to vector<2x128xf32>
    %1881 = arith.mulf %1867, %1880 : vector<2x128xf32>
    %1882 = arith.addf %1879, %1881 : vector<2x128xf32>
    %1883 = arith.addf %1751, %1882 : vector<2x128xf32>
    %c14_768 = arith.constant 14 : index
    %c1_769 = arith.constant 1 : index
    %c0_770 = arith.constant 0 : index
    %1884 = vector.load %arg4[%c14_768, %c1_769, %c0_770] : memref<16x8x128xf32, #tpu.memory_space<vmem>>, vector<1x1x128xf32>
    %1885 = vector.shape_cast %1884 : vector<1x1x128xf32> to vector<1x128xf32>
    %c14_771 = arith.constant 14 : index
    %c1_772 = arith.constant 1 : index
    %c0_773 = arith.constant 0 : index
    %1886 = vector.load %arg5[%c14_771, %c1_772, %c0_773] : memref<16x8x128xf32, #tpu.memory_space<vmem>>, vector<1x1x128xf32>
    %1887 = vector.shape_cast %1886 : vector<1x1x128xf32> to vector<1x128xf32>
    %1888 = vector.broadcast %1885 : vector<1x128xf32> to vector<2x128xf32>
    %1889 = arith.mulf %1865, %1888 : vector<2x128xf32>
    %1890 = vector.broadcast %1887 : vector<1x128xf32> to vector<2x128xf32>
    %1891 = arith.mulf %1867, %1890 : vector<2x128xf32>
    %1892 = arith.subf %1889, %1891 : vector<2x128xf32>
    %1893 = arith.addf %1761, %1892 : vector<2x128xf32>
    %1894 = vector.broadcast %1887 : vector<1x128xf32> to vector<2x128xf32>
    %1895 = arith.mulf %1865, %1894 : vector<2x128xf32>
    %1896 = vector.broadcast %1885 : vector<1x128xf32> to vector<2x128xf32>
    %1897 = arith.mulf %1867, %1896 : vector<2x128xf32>
    %1898 = arith.addf %1895, %1897 : vector<2x128xf32>
    %1899 = arith.addf %1767, %1898 : vector<2x128xf32>
    %c14_774 = arith.constant 14 : index
    %c2_775 = arith.constant 2 : index
    %c0_776 = arith.constant 0 : index
    %1900 = vector.load %arg4[%c14_774, %c2_775, %c0_776] : memref<16x8x128xf32, #tpu.memory_space<vmem>>, vector<1x1x128xf32>
    %1901 = vector.shape_cast %1900 : vector<1x1x128xf32> to vector<1x128xf32>
    %c14_777 = arith.constant 14 : index
    %c2_778 = arith.constant 2 : index
    %c0_779 = arith.constant 0 : index
    %1902 = vector.load %arg5[%c14_777, %c2_778, %c0_779] : memref<16x8x128xf32, #tpu.memory_space<vmem>>, vector<1x1x128xf32>
    %1903 = vector.shape_cast %1902 : vector<1x1x128xf32> to vector<1x128xf32>
    %1904 = vector.broadcast %1901 : vector<1x128xf32> to vector<2x128xf32>
    %1905 = arith.mulf %1865, %1904 : vector<2x128xf32>
    %1906 = vector.broadcast %1903 : vector<1x128xf32> to vector<2x128xf32>
    %1907 = arith.mulf %1867, %1906 : vector<2x128xf32>
    %1908 = arith.subf %1905, %1907 : vector<2x128xf32>
    %1909 = arith.addf %1777, %1908 : vector<2x128xf32>
    %1910 = vector.broadcast %1903 : vector<1x128xf32> to vector<2x128xf32>
    %1911 = arith.mulf %1865, %1910 : vector<2x128xf32>
    %1912 = vector.broadcast %1901 : vector<1x128xf32> to vector<2x128xf32>
    %1913 = arith.mulf %1867, %1912 : vector<2x128xf32>
    %1914 = arith.addf %1911, %1913 : vector<2x128xf32>
    %1915 = arith.addf %1783, %1914 : vector<2x128xf32>
    %c14_780 = arith.constant 14 : index
    %c3_781 = arith.constant 3 : index
    %c0_782 = arith.constant 0 : index
    %1916 = vector.load %arg4[%c14_780, %c3_781, %c0_782] : memref<16x8x128xf32, #tpu.memory_space<vmem>>, vector<1x1x128xf32>
    %1917 = vector.shape_cast %1916 : vector<1x1x128xf32> to vector<1x128xf32>
    %c14_783 = arith.constant 14 : index
    %c3_784 = arith.constant 3 : index
    %c0_785 = arith.constant 0 : index
    %1918 = vector.load %arg5[%c14_783, %c3_784, %c0_785] : memref<16x8x128xf32, #tpu.memory_space<vmem>>, vector<1x1x128xf32>
    %1919 = vector.shape_cast %1918 : vector<1x1x128xf32> to vector<1x128xf32>
    %1920 = vector.broadcast %1917 : vector<1x128xf32> to vector<2x128xf32>
    %1921 = arith.mulf %1865, %1920 : vector<2x128xf32>
    %1922 = vector.broadcast %1919 : vector<1x128xf32> to vector<2x128xf32>
    %1923 = arith.mulf %1867, %1922 : vector<2x128xf32>
    %1924 = arith.subf %1921, %1923 : vector<2x128xf32>
    %1925 = arith.addf %1793, %1924 : vector<2x128xf32>
    %1926 = vector.broadcast %1919 : vector<1x128xf32> to vector<2x128xf32>
    %1927 = arith.mulf %1865, %1926 : vector<2x128xf32>
    %1928 = vector.broadcast %1917 : vector<1x128xf32> to vector<2x128xf32>
    %1929 = arith.mulf %1867, %1928 : vector<2x128xf32>
    %1930 = arith.addf %1927, %1929 : vector<2x128xf32>
    %1931 = arith.addf %1799, %1930 : vector<2x128xf32>
    %c14_786 = arith.constant 14 : index
    %c4_787 = arith.constant 4 : index
    %c0_788 = arith.constant 0 : index
    %1932 = vector.load %arg4[%c14_786, %c4_787, %c0_788] : memref<16x8x128xf32, #tpu.memory_space<vmem>>, vector<1x1x128xf32>
    %1933 = vector.shape_cast %1932 : vector<1x1x128xf32> to vector<1x128xf32>
    %c14_789 = arith.constant 14 : index
    %c4_790 = arith.constant 4 : index
    %c0_791 = arith.constant 0 : index
    %1934 = vector.load %arg5[%c14_789, %c4_790, %c0_791] : memref<16x8x128xf32, #tpu.memory_space<vmem>>, vector<1x1x128xf32>
    %1935 = vector.shape_cast %1934 : vector<1x1x128xf32> to vector<1x128xf32>
    %1936 = vector.broadcast %1933 : vector<1x128xf32> to vector<2x128xf32>
    %1937 = arith.mulf %1865, %1936 : vector<2x128xf32>
    %1938 = vector.broadcast %1935 : vector<1x128xf32> to vector<2x128xf32>
    %1939 = arith.mulf %1867, %1938 : vector<2x128xf32>
    %1940 = arith.subf %1937, %1939 : vector<2x128xf32>
    %1941 = arith.addf %1809, %1940 : vector<2x128xf32>
    %1942 = vector.broadcast %1935 : vector<1x128xf32> to vector<2x128xf32>
    %1943 = arith.mulf %1865, %1942 : vector<2x128xf32>
    %1944 = vector.broadcast %1933 : vector<1x128xf32> to vector<2x128xf32>
    %1945 = arith.mulf %1867, %1944 : vector<2x128xf32>
    %1946 = arith.addf %1943, %1945 : vector<2x128xf32>
    %1947 = arith.addf %1815, %1946 : vector<2x128xf32>
    %c14_792 = arith.constant 14 : index
    %c5_793 = arith.constant 5 : index
    %c0_794 = arith.constant 0 : index
    %1948 = vector.load %arg4[%c14_792, %c5_793, %c0_794] : memref<16x8x128xf32, #tpu.memory_space<vmem>>, vector<1x1x128xf32>
    %1949 = vector.shape_cast %1948 : vector<1x1x128xf32> to vector<1x128xf32>
    %c14_795 = arith.constant 14 : index
    %c5_796 = arith.constant 5 : index
    %c0_797 = arith.constant 0 : index
    %1950 = vector.load %arg5[%c14_795, %c5_796, %c0_797] : memref<16x8x128xf32, #tpu.memory_space<vmem>>, vector<1x1x128xf32>
    %1951 = vector.shape_cast %1950 : vector<1x1x128xf32> to vector<1x128xf32>
    %1952 = vector.broadcast %1949 : vector<1x128xf32> to vector<2x128xf32>
    %1953 = arith.mulf %1865, %1952 : vector<2x128xf32>
    %1954 = vector.broadcast %1951 : vector<1x128xf32> to vector<2x128xf32>
    %1955 = arith.mulf %1867, %1954 : vector<2x128xf32>
    %1956 = arith.subf %1953, %1955 : vector<2x128xf32>
    %1957 = arith.addf %1825, %1956 : vector<2x128xf32>
    %1958 = vector.broadcast %1951 : vector<1x128xf32> to vector<2x128xf32>
    %1959 = arith.mulf %1865, %1958 : vector<2x128xf32>
    %1960 = vector.broadcast %1949 : vector<1x128xf32> to vector<2x128xf32>
    %1961 = arith.mulf %1867, %1960 : vector<2x128xf32>
    %1962 = arith.addf %1959, %1961 : vector<2x128xf32>
    %1963 = arith.addf %1831, %1962 : vector<2x128xf32>
    %c14_798 = arith.constant 14 : index
    %c6_799 = arith.constant 6 : index
    %c0_800 = arith.constant 0 : index
    %1964 = vector.load %arg4[%c14_798, %c6_799, %c0_800] : memref<16x8x128xf32, #tpu.memory_space<vmem>>, vector<1x1x128xf32>
    %1965 = vector.shape_cast %1964 : vector<1x1x128xf32> to vector<1x128xf32>
    %c14_801 = arith.constant 14 : index
    %c6_802 = arith.constant 6 : index
    %c0_803 = arith.constant 0 : index
    %1966 = vector.load %arg5[%c14_801, %c6_802, %c0_803] : memref<16x8x128xf32, #tpu.memory_space<vmem>>, vector<1x1x128xf32>
    %1967 = vector.shape_cast %1966 : vector<1x1x128xf32> to vector<1x128xf32>
    %1968 = vector.broadcast %1965 : vector<1x128xf32> to vector<2x128xf32>
    %1969 = arith.mulf %1865, %1968 : vector<2x128xf32>
    %1970 = vector.broadcast %1967 : vector<1x128xf32> to vector<2x128xf32>
    %1971 = arith.mulf %1867, %1970 : vector<2x128xf32>
    %1972 = arith.subf %1969, %1971 : vector<2x128xf32>
    %1973 = arith.addf %1841, %1972 : vector<2x128xf32>
    %1974 = vector.broadcast %1967 : vector<1x128xf32> to vector<2x128xf32>
    %1975 = arith.mulf %1865, %1974 : vector<2x128xf32>
    %1976 = vector.broadcast %1965 : vector<1x128xf32> to vector<2x128xf32>
    %1977 = arith.mulf %1867, %1976 : vector<2x128xf32>
    %1978 = arith.addf %1975, %1977 : vector<2x128xf32>
    %1979 = arith.addf %1847, %1978 : vector<2x128xf32>
    %c14_804 = arith.constant 14 : index
    %c7_805 = arith.constant 7 : index
    %c0_806 = arith.constant 0 : index
    %1980 = vector.load %arg4[%c14_804, %c7_805, %c0_806] : memref<16x8x128xf32, #tpu.memory_space<vmem>>, vector<1x1x128xf32>
    %1981 = vector.shape_cast %1980 : vector<1x1x128xf32> to vector<1x128xf32>
    %c14_807 = arith.constant 14 : index
    %c7_808 = arith.constant 7 : index
    %c0_809 = arith.constant 0 : index
    %1982 = vector.load %arg5[%c14_807, %c7_808, %c0_809] : memref<16x8x128xf32, #tpu.memory_space<vmem>>, vector<1x1x128xf32>
    %1983 = vector.shape_cast %1982 : vector<1x1x128xf32> to vector<1x128xf32>
    %1984 = vector.broadcast %1981 : vector<1x128xf32> to vector<2x128xf32>
    %1985 = arith.mulf %1865, %1984 : vector<2x128xf32>
    %1986 = vector.broadcast %1983 : vector<1x128xf32> to vector<2x128xf32>
    %1987 = arith.mulf %1867, %1986 : vector<2x128xf32>
    %1988 = arith.subf %1985, %1987 : vector<2x128xf32>
    %1989 = arith.addf %1857, %1988 : vector<2x128xf32>
    %1990 = vector.broadcast %1983 : vector<1x128xf32> to vector<2x128xf32>
    %1991 = arith.mulf %1865, %1990 : vector<2x128xf32>
    %1992 = vector.broadcast %1981 : vector<1x128xf32> to vector<2x128xf32>
    %1993 = arith.mulf %1867, %1992 : vector<2x128xf32>
    %1994 = arith.addf %1991, %1993 : vector<2x128xf32>
    %1995 = arith.addf %1863, %1994 : vector<2x128xf32>
    %c15 = arith.constant 15 : index
    %c0_810 = arith.constant 0 : index
    %c0_811 = arith.constant 0 : index
    %1996 = vector.load %arg2[%c15, %c0_810, %c0_811] : memref<16x2x128xf32, #tpu.memory_space<vmem>>, vector<1x2x128xf32>
    %1997 = vector.shape_cast %1996 : vector<1x2x128xf32> to vector<2x128xf32>
    %c15_812 = arith.constant 15 : index
    %c0_813 = arith.constant 0 : index
    %c0_814 = arith.constant 0 : index
    %1998 = vector.load %arg3[%c15_812, %c0_813, %c0_814] : memref<16x2x128xf32, #tpu.memory_space<vmem>>, vector<1x2x128xf32>
    %1999 = vector.shape_cast %1998 : vector<1x2x128xf32> to vector<2x128xf32>
    %c15_815 = arith.constant 15 : index
    %c0_816 = arith.constant 0 : index
    %c0_817 = arith.constant 0 : index
    %2000 = vector.load %arg4[%c15_815, %c0_816, %c0_817] : memref<16x8x128xf32, #tpu.memory_space<vmem>>, vector<1x1x128xf32>
    %2001 = vector.shape_cast %2000 : vector<1x1x128xf32> to vector<1x128xf32>
    %c15_818 = arith.constant 15 : index
    %c0_819 = arith.constant 0 : index
    %c0_820 = arith.constant 0 : index
    %2002 = vector.load %arg5[%c15_818, %c0_819, %c0_820] : memref<16x8x128xf32, #tpu.memory_space<vmem>>, vector<1x1x128xf32>
    %2003 = vector.shape_cast %2002 : vector<1x1x128xf32> to vector<1x128xf32>
    %2004 = vector.broadcast %2001 : vector<1x128xf32> to vector<2x128xf32>
    %2005 = arith.mulf %1997, %2004 : vector<2x128xf32>
    %2006 = vector.broadcast %2003 : vector<1x128xf32> to vector<2x128xf32>
    %2007 = arith.mulf %1999, %2006 : vector<2x128xf32>
    %2008 = arith.subf %2005, %2007 : vector<2x128xf32>
    %2009 = arith.addf %1877, %2008 : vector<2x128xf32>
    %2010 = vector.broadcast %2003 : vector<1x128xf32> to vector<2x128xf32>
    %2011 = arith.mulf %1997, %2010 : vector<2x128xf32>
    %2012 = vector.broadcast %2001 : vector<1x128xf32> to vector<2x128xf32>
    %2013 = arith.mulf %1999, %2012 : vector<2x128xf32>
    %2014 = arith.addf %2011, %2013 : vector<2x128xf32>
    %2015 = arith.addf %1883, %2014 : vector<2x128xf32>
    %c15_821 = arith.constant 15 : index
    %c1_822 = arith.constant 1 : index
    %c0_823 = arith.constant 0 : index
    %2016 = vector.load %arg4[%c15_821, %c1_822, %c0_823] : memref<16x8x128xf32, #tpu.memory_space<vmem>>, vector<1x1x128xf32>
    %2017 = vector.shape_cast %2016 : vector<1x1x128xf32> to vector<1x128xf32>
    %c15_824 = arith.constant 15 : index
    %c1_825 = arith.constant 1 : index
    %c0_826 = arith.constant 0 : index
    %2018 = vector.load %arg5[%c15_824, %c1_825, %c0_826] : memref<16x8x128xf32, #tpu.memory_space<vmem>>, vector<1x1x128xf32>
    %2019 = vector.shape_cast %2018 : vector<1x1x128xf32> to vector<1x128xf32>
    %2020 = vector.broadcast %2017 : vector<1x128xf32> to vector<2x128xf32>
    %2021 = arith.mulf %1997, %2020 : vector<2x128xf32>
    %2022 = vector.broadcast %2019 : vector<1x128xf32> to vector<2x128xf32>
    %2023 = arith.mulf %1999, %2022 : vector<2x128xf32>
    %2024 = arith.subf %2021, %2023 : vector<2x128xf32>
    %2025 = arith.addf %1893, %2024 : vector<2x128xf32>
    %2026 = vector.broadcast %2019 : vector<1x128xf32> to vector<2x128xf32>
    %2027 = arith.mulf %1997, %2026 : vector<2x128xf32>
    %2028 = vector.broadcast %2017 : vector<1x128xf32> to vector<2x128xf32>
    %2029 = arith.mulf %1999, %2028 : vector<2x128xf32>
    %2030 = arith.addf %2027, %2029 : vector<2x128xf32>
    %2031 = arith.addf %1899, %2030 : vector<2x128xf32>
    %c15_827 = arith.constant 15 : index
    %c2_828 = arith.constant 2 : index
    %c0_829 = arith.constant 0 : index
    %2032 = vector.load %arg4[%c15_827, %c2_828, %c0_829] : memref<16x8x128xf32, #tpu.memory_space<vmem>>, vector<1x1x128xf32>
    %2033 = vector.shape_cast %2032 : vector<1x1x128xf32> to vector<1x128xf32>
    %c15_830 = arith.constant 15 : index
    %c2_831 = arith.constant 2 : index
    %c0_832 = arith.constant 0 : index
    %2034 = vector.load %arg5[%c15_830, %c2_831, %c0_832] : memref<16x8x128xf32, #tpu.memory_space<vmem>>, vector<1x1x128xf32>
    %2035 = vector.shape_cast %2034 : vector<1x1x128xf32> to vector<1x128xf32>
    %2036 = vector.broadcast %2033 : vector<1x128xf32> to vector<2x128xf32>
    %2037 = arith.mulf %1997, %2036 : vector<2x128xf32>
    %2038 = vector.broadcast %2035 : vector<1x128xf32> to vector<2x128xf32>
    %2039 = arith.mulf %1999, %2038 : vector<2x128xf32>
    %2040 = arith.subf %2037, %2039 : vector<2x128xf32>
    %2041 = arith.addf %1909, %2040 : vector<2x128xf32>
    %2042 = vector.broadcast %2035 : vector<1x128xf32> to vector<2x128xf32>
    %2043 = arith.mulf %1997, %2042 : vector<2x128xf32>
    %2044 = vector.broadcast %2033 : vector<1x128xf32> to vector<2x128xf32>
    %2045 = arith.mulf %1999, %2044 : vector<2x128xf32>
    %2046 = arith.addf %2043, %2045 : vector<2x128xf32>
    %2047 = arith.addf %1915, %2046 : vector<2x128xf32>
    %c15_833 = arith.constant 15 : index
    %c3_834 = arith.constant 3 : index
    %c0_835 = arith.constant 0 : index
    %2048 = vector.load %arg4[%c15_833, %c3_834, %c0_835] : memref<16x8x128xf32, #tpu.memory_space<vmem>>, vector<1x1x128xf32>
    %2049 = vector.shape_cast %2048 : vector<1x1x128xf32> to vector<1x128xf32>
    %c15_836 = arith.constant 15 : index
    %c3_837 = arith.constant 3 : index
    %c0_838 = arith.constant 0 : index
    %2050 = vector.load %arg5[%c15_836, %c3_837, %c0_838] : memref<16x8x128xf32, #tpu.memory_space<vmem>>, vector<1x1x128xf32>
    %2051 = vector.shape_cast %2050 : vector<1x1x128xf32> to vector<1x128xf32>
    %2052 = vector.broadcast %2049 : vector<1x128xf32> to vector<2x128xf32>
    %2053 = arith.mulf %1997, %2052 : vector<2x128xf32>
    %2054 = vector.broadcast %2051 : vector<1x128xf32> to vector<2x128xf32>
    %2055 = arith.mulf %1999, %2054 : vector<2x128xf32>
    %2056 = arith.subf %2053, %2055 : vector<2x128xf32>
    %2057 = arith.addf %1925, %2056 : vector<2x128xf32>
    %2058 = vector.broadcast %2051 : vector<1x128xf32> to vector<2x128xf32>
    %2059 = arith.mulf %1997, %2058 : vector<2x128xf32>
    %2060 = vector.broadcast %2049 : vector<1x128xf32> to vector<2x128xf32>
    %2061 = arith.mulf %1999, %2060 : vector<2x128xf32>
    %2062 = arith.addf %2059, %2061 : vector<2x128xf32>
    %2063 = arith.addf %1931, %2062 : vector<2x128xf32>
    %c15_839 = arith.constant 15 : index
    %c4_840 = arith.constant 4 : index
    %c0_841 = arith.constant 0 : index
    %2064 = vector.load %arg4[%c15_839, %c4_840, %c0_841] : memref<16x8x128xf32, #tpu.memory_space<vmem>>, vector<1x1x128xf32>
    %2065 = vector.shape_cast %2064 : vector<1x1x128xf32> to vector<1x128xf32>
    %c15_842 = arith.constant 15 : index
    %c4_843 = arith.constant 4 : index
    %c0_844 = arith.constant 0 : index
    %2066 = vector.load %arg5[%c15_842, %c4_843, %c0_844] : memref<16x8x128xf32, #tpu.memory_space<vmem>>, vector<1x1x128xf32>
    %2067 = vector.shape_cast %2066 : vector<1x1x128xf32> to vector<1x128xf32>
    %2068 = vector.broadcast %2065 : vector<1x128xf32> to vector<2x128xf32>
    %2069 = arith.mulf %1997, %2068 : vector<2x128xf32>
    %2070 = vector.broadcast %2067 : vector<1x128xf32> to vector<2x128xf32>
    %2071 = arith.mulf %1999, %2070 : vector<2x128xf32>
    %2072 = arith.subf %2069, %2071 : vector<2x128xf32>
    %2073 = arith.addf %1941, %2072 : vector<2x128xf32>
    %2074 = vector.broadcast %2067 : vector<1x128xf32> to vector<2x128xf32>
    %2075 = arith.mulf %1997, %2074 : vector<2x128xf32>
    %2076 = vector.broadcast %2065 : vector<1x128xf32> to vector<2x128xf32>
    %2077 = arith.mulf %1999, %2076 : vector<2x128xf32>
    %2078 = arith.addf %2075, %2077 : vector<2x128xf32>
    %2079 = arith.addf %1947, %2078 : vector<2x128xf32>
    %c15_845 = arith.constant 15 : index
    %c5_846 = arith.constant 5 : index
    %c0_847 = arith.constant 0 : index
    %2080 = vector.load %arg4[%c15_845, %c5_846, %c0_847] : memref<16x8x128xf32, #tpu.memory_space<vmem>>, vector<1x1x128xf32>
    %2081 = vector.shape_cast %2080 : vector<1x1x128xf32> to vector<1x128xf32>
    %c15_848 = arith.constant 15 : index
    %c5_849 = arith.constant 5 : index
    %c0_850 = arith.constant 0 : index
    %2082 = vector.load %arg5[%c15_848, %c5_849, %c0_850] : memref<16x8x128xf32, #tpu.memory_space<vmem>>, vector<1x1x128xf32>
    %2083 = vector.shape_cast %2082 : vector<1x1x128xf32> to vector<1x128xf32>
    %2084 = vector.broadcast %2081 : vector<1x128xf32> to vector<2x128xf32>
    %2085 = arith.mulf %1997, %2084 : vector<2x128xf32>
    %2086 = vector.broadcast %2083 : vector<1x128xf32> to vector<2x128xf32>
    %2087 = arith.mulf %1999, %2086 : vector<2x128xf32>
    %2088 = arith.subf %2085, %2087 : vector<2x128xf32>
    %2089 = arith.addf %1957, %2088 : vector<2x128xf32>
    %2090 = vector.broadcast %2083 : vector<1x128xf32> to vector<2x128xf32>
    %2091 = arith.mulf %1997, %2090 : vector<2x128xf32>
    %2092 = vector.broadcast %2081 : vector<1x128xf32> to vector<2x128xf32>
    %2093 = arith.mulf %1999, %2092 : vector<2x128xf32>
    %2094 = arith.addf %2091, %2093 : vector<2x128xf32>
    %2095 = arith.addf %1963, %2094 : vector<2x128xf32>
    %c15_851 = arith.constant 15 : index
    %c6_852 = arith.constant 6 : index
    %c0_853 = arith.constant 0 : index
    %2096 = vector.load %arg4[%c15_851, %c6_852, %c0_853] : memref<16x8x128xf32, #tpu.memory_space<vmem>>, vector<1x1x128xf32>
    %2097 = vector.shape_cast %2096 : vector<1x1x128xf32> to vector<1x128xf32>
    %c15_854 = arith.constant 15 : index
    %c6_855 = arith.constant 6 : index
    %c0_856 = arith.constant 0 : index
    %2098 = vector.load %arg5[%c15_854, %c6_855, %c0_856] : memref<16x8x128xf32, #tpu.memory_space<vmem>>, vector<1x1x128xf32>
    %2099 = vector.shape_cast %2098 : vector<1x1x128xf32> to vector<1x128xf32>
    %2100 = vector.broadcast %2097 : vector<1x128xf32> to vector<2x128xf32>
    %2101 = arith.mulf %1997, %2100 : vector<2x128xf32>
    %2102 = vector.broadcast %2099 : vector<1x128xf32> to vector<2x128xf32>
    %2103 = arith.mulf %1999, %2102 : vector<2x128xf32>
    %2104 = arith.subf %2101, %2103 : vector<2x128xf32>
    %2105 = arith.addf %1973, %2104 : vector<2x128xf32>
    %2106 = vector.broadcast %2099 : vector<1x128xf32> to vector<2x128xf32>
    %2107 = arith.mulf %1997, %2106 : vector<2x128xf32>
    %2108 = vector.broadcast %2097 : vector<1x128xf32> to vector<2x128xf32>
    %2109 = arith.mulf %1999, %2108 : vector<2x128xf32>
    %2110 = arith.addf %2107, %2109 : vector<2x128xf32>
    %2111 = arith.addf %1979, %2110 : vector<2x128xf32>
    %c15_857 = arith.constant 15 : index
    %c7_858 = arith.constant 7 : index
    %c0_859 = arith.constant 0 : index
    %2112 = vector.load %arg4[%c15_857, %c7_858, %c0_859] : memref<16x8x128xf32, #tpu.memory_space<vmem>>, vector<1x1x128xf32>
    %2113 = vector.shape_cast %2112 : vector<1x1x128xf32> to vector<1x128xf32>
    %c15_860 = arith.constant 15 : index
    %c7_861 = arith.constant 7 : index
    %c0_862 = arith.constant 0 : index
    %2114 = vector.load %arg5[%c15_860, %c7_861, %c0_862] : memref<16x8x128xf32, #tpu.memory_space<vmem>>, vector<1x1x128xf32>
    %2115 = vector.shape_cast %2114 : vector<1x1x128xf32> to vector<1x128xf32>
    %2116 = vector.broadcast %2113 : vector<1x128xf32> to vector<2x128xf32>
    %2117 = arith.mulf %1997, %2116 : vector<2x128xf32>
    %2118 = vector.broadcast %2115 : vector<1x128xf32> to vector<2x128xf32>
    %2119 = arith.mulf %1999, %2118 : vector<2x128xf32>
    %2120 = arith.subf %2117, %2119 : vector<2x128xf32>
    %2121 = arith.addf %1989, %2120 : vector<2x128xf32>
    %2122 = vector.broadcast %2115 : vector<1x128xf32> to vector<2x128xf32>
    %2123 = arith.mulf %1997, %2122 : vector<2x128xf32>
    %2124 = vector.broadcast %2113 : vector<1x128xf32> to vector<2x128xf32>
    %2125 = arith.mulf %1999, %2124 : vector<2x128xf32>
    %2126 = arith.addf %2123, %2125 : vector<2x128xf32>
    %2127 = arith.addf %1995, %2126 : vector<2x128xf32>
    %c0_863 = arith.constant 0 : index
    %c0_864 = arith.constant 0 : index
    %c0_865 = arith.constant 0 : index
    %2128 = vector.load %arg6[%c0_863, %c0_864, %c0_865] : memref<8x2x128xf32, #tpu.memory_space<vmem>>, vector<1x2x128xf32>
    %2129 = vector.shape_cast %2128 : vector<1x2x128xf32> to vector<2x128xf32>
    %2130 = vector.shape_cast %2009 : vector<2x128xf32> to vector<1x2x128xf32>
    tpu.vector_store %arg6[%c0_863, %c0_864, %c0_865], %2130 {strides = array<i32>} : memref<8x2x128xf32, #tpu.memory_space<vmem>>, vector<1x2x128xf32>,
    %c0_866 = arith.constant 0 : index
    %c0_867 = arith.constant 0 : index
    %c0_868 = arith.constant 0 : index
    %2131 = vector.load %arg7[%c0_866, %c0_867, %c0_868] : memref<8x2x128xf32, #tpu.memory_space<vmem>>, vector<1x2x128xf32>
    %2132 = vector.shape_cast %2131 : vector<1x2x128xf32> to vector<2x128xf32>
    %2133 = vector.shape_cast %2015 : vector<2x128xf32> to vector<1x2x128xf32>
    tpu.vector_store %arg7[%c0_866, %c0_867, %c0_868], %2133 {strides = array<i32>} : memref<8x2x128xf32, #tpu.memory_space<vmem>>, vector<1x2x128xf32>,
    %c1_869 = arith.constant 1 : index
    %c0_870 = arith.constant 0 : index
    %c0_871 = arith.constant 0 : index
    %2134 = vector.load %arg6[%c1_869, %c0_870, %c0_871] : memref<8x2x128xf32, #tpu.memory_space<vmem>>, vector<1x2x128xf32>
    %2135 = vector.shape_cast %2134 : vector<1x2x128xf32> to vector<2x128xf32>
    %2136 = vector.shape_cast %2025 : vector<2x128xf32> to vector<1x2x128xf32>
    tpu.vector_store %arg6[%c1_869, %c0_870, %c0_871], %2136 {strides = array<i32>} : memref<8x2x128xf32, #tpu.memory_space<vmem>>, vector<1x2x128xf32>,
    %c1_872 = arith.constant 1 : index
    %c0_873 = arith.constant 0 : index
    %c0_874 = arith.constant 0 : index
    %2137 = vector.load %arg7[%c1_872, %c0_873, %c0_874] : memref<8x2x128xf32, #tpu.memory_space<vmem>>, vector<1x2x128xf32>
    %2138 = vector.shape_cast %2137 : vector<1x2x128xf32> to vector<2x128xf32>
    %2139 = vector.shape_cast %2031 : vector<2x128xf32> to vector<1x2x128xf32>
    tpu.vector_store %arg7[%c1_872, %c0_873, %c0_874], %2139 {strides = array<i32>} : memref<8x2x128xf32, #tpu.memory_space<vmem>>, vector<1x2x128xf32>,
    %c2_875 = arith.constant 2 : index
    %c0_876 = arith.constant 0 : index
    %c0_877 = arith.constant 0 : index
    %2140 = vector.load %arg6[%c2_875, %c0_876, %c0_877] : memref<8x2x128xf32, #tpu.memory_space<vmem>>, vector<1x2x128xf32>
    %2141 = vector.shape_cast %2140 : vector<1x2x128xf32> to vector<2x128xf32>
    %2142 = vector.shape_cast %2041 : vector<2x128xf32> to vector<1x2x128xf32>
    tpu.vector_store %arg6[%c2_875, %c0_876, %c0_877], %2142 {strides = array<i32>} : memref<8x2x128xf32, #tpu.memory_space<vmem>>, vector<1x2x128xf32>,
    %c2_878 = arith.constant 2 : index
    %c0_879 = arith.constant 0 : index
    %c0_880 = arith.constant 0 : index
    %2143 = vector.load %arg7[%c2_878, %c0_879, %c0_880] : memref<8x2x128xf32, #tpu.memory_space<vmem>>, vector<1x2x128xf32>
    %2144 = vector.shape_cast %2143 : vector<1x2x128xf32> to vector<2x128xf32>
    %2145 = vector.shape_cast %2047 : vector<2x128xf32> to vector<1x2x128xf32>
    tpu.vector_store %arg7[%c2_878, %c0_879, %c0_880], %2145 {strides = array<i32>} : memref<8x2x128xf32, #tpu.memory_space<vmem>>, vector<1x2x128xf32>,
    %c3_881 = arith.constant 3 : index
    %c0_882 = arith.constant 0 : index
    %c0_883 = arith.constant 0 : index
    %2146 = vector.load %arg6[%c3_881, %c0_882, %c0_883] : memref<8x2x128xf32, #tpu.memory_space<vmem>>, vector<1x2x128xf32>
    %2147 = vector.shape_cast %2146 : vector<1x2x128xf32> to vector<2x128xf32>
    %2148 = vector.shape_cast %2057 : vector<2x128xf32> to vector<1x2x128xf32>
    tpu.vector_store %arg6[%c3_881, %c0_882, %c0_883], %2148 {strides = array<i32>} : memref<8x2x128xf32, #tpu.memory_space<vmem>>, vector<1x2x128xf32>,
    %c3_884 = arith.constant 3 : index
    %c0_885 = arith.constant 0 : index
    %c0_886 = arith.constant 0 : index
    %2149 = vector.load %arg7[%c3_884, %c0_885, %c0_886] : memref<8x2x128xf32, #tpu.memory_space<vmem>>, vector<1x2x128xf32>
    %2150 = vector.shape_cast %2149 : vector<1x2x128xf32> to vector<2x128xf32>
    %2151 = vector.shape_cast %2063 : vector<2x128xf32> to vector<1x2x128xf32>
    tpu.vector_store %arg7[%c3_884, %c0_885, %c0_886], %2151 {strides = array<i32>} : memref<8x2x128xf32, #tpu.memory_space<vmem>>, vector<1x2x128xf32>,
    %c4_887 = arith.constant 4 : index
    %c0_888 = arith.constant 0 : index
    %c0_889 = arith.constant 0 : index
    %2152 = vector.load %arg6[%c4_887, %c0_888, %c0_889] : memref<8x2x128xf32, #tpu.memory_space<vmem>>, vector<1x2x128xf32>
    %2153 = vector.shape_cast %2152 : vector<1x2x128xf32> to vector<2x128xf32>
    %2154 = vector.shape_cast %2073 : vector<2x128xf32> to vector<1x2x128xf32>
    tpu.vector_store %arg6[%c4_887, %c0_888, %c0_889], %2154 {strides = array<i32>} : memref<8x2x128xf32, #tpu.memory_space<vmem>>, vector<1x2x128xf32>,
    %c4_890 = arith.constant 4 : index
    %c0_891 = arith.constant 0 : index
    %c0_892 = arith.constant 0 : index
    %2155 = vector.load %arg7[%c4_890, %c0_891, %c0_892] : memref<8x2x128xf32, #tpu.memory_space<vmem>>, vector<1x2x128xf32>
    %2156 = vector.shape_cast %2155 : vector<1x2x128xf32> to vector<2x128xf32>
    %2157 = vector.shape_cast %2079 : vector<2x128xf32> to vector<1x2x128xf32>
    tpu.vector_store %arg7[%c4_890, %c0_891, %c0_892], %2157 {strides = array<i32>} : memref<8x2x128xf32, #tpu.memory_space<vmem>>, vector<1x2x128xf32>,
    %c5_893 = arith.constant 5 : index
    %c0_894 = arith.constant 0 : index
    %c0_895 = arith.constant 0 : index
    %2158 = vector.load %arg6[%c5_893, %c0_894, %c0_895] : memref<8x2x128xf32, #tpu.memory_space<vmem>>, vector<1x2x128xf32>
    %2159 = vector.shape_cast %2158 : vector<1x2x128xf32> to vector<2x128xf32>
    %2160 = vector.shape_cast %2089 : vector<2x128xf32> to vector<1x2x128xf32>
    tpu.vector_store %arg6[%c5_893, %c0_894, %c0_895], %2160 {strides = array<i32>} : memref<8x2x128xf32, #tpu.memory_space<vmem>>, vector<1x2x128xf32>,
    %c5_896 = arith.constant 5 : index
    %c0_897 = arith.constant 0 : index
    %c0_898 = arith.constant 0 : index
    %2161 = vector.load %arg7[%c5_896, %c0_897, %c0_898] : memref<8x2x128xf32, #tpu.memory_space<vmem>>, vector<1x2x128xf32>
    %2162 = vector.shape_cast %2161 : vector<1x2x128xf32> to vector<2x128xf32>
    %2163 = vector.shape_cast %2095 : vector<2x128xf32> to vector<1x2x128xf32>
    tpu.vector_store %arg7[%c5_896, %c0_897, %c0_898], %2163 {strides = array<i32>} : memref<8x2x128xf32, #tpu.memory_space<vmem>>, vector<1x2x128xf32>,
    %c6_899 = arith.constant 6 : index
    %c0_900 = arith.constant 0 : index
    %c0_901 = arith.constant 0 : index
    %2164 = vector.load %arg6[%c6_899, %c0_900, %c0_901] : memref<8x2x128xf32, #tpu.memory_space<vmem>>, vector<1x2x128xf32>
    %2165 = vector.shape_cast %2164 : vector<1x2x128xf32> to vector<2x128xf32>
    %2166 = vector.shape_cast %2105 : vector<2x128xf32> to vector<1x2x128xf32>
    tpu.vector_store %arg6[%c6_899, %c0_900, %c0_901], %2166 {strides = array<i32>} : memref<8x2x128xf32, #tpu.memory_space<vmem>>, vector<1x2x128xf32>,
    %c6_902 = arith.constant 6 : index
    %c0_903 = arith.constant 0 : index
    %c0_904 = arith.constant 0 : index
    %2167 = vector.load %arg7[%c6_902, %c0_903, %c0_904] : memref<8x2x128xf32, #tpu.memory_space<vmem>>, vector<1x2x128xf32>
    %2168 = vector.shape_cast %2167 : vector<1x2x128xf32> to vector<2x128xf32>
    %2169 = vector.shape_cast %2111 : vector<2x128xf32> to vector<1x2x128xf32>
    tpu.vector_store %arg7[%c6_902, %c0_903, %c0_904], %2169 {strides = array<i32>} : memref<8x2x128xf32, #tpu.memory_space<vmem>>, vector<1x2x128xf32>,
    %c7_905 = arith.constant 7 : index
    %c0_906 = arith.constant 0 : index
    %c0_907 = arith.constant 0 : index
    %2170 = vector.load %arg6[%c7_905, %c0_906, %c0_907] : memref<8x2x128xf32, #tpu.memory_space<vmem>>, vector<1x2x128xf32>
    %2171 = vector.shape_cast %2170 : vector<1x2x128xf32> to vector<2x128xf32>
    %2172 = vector.shape_cast %2121 : vector<2x128xf32> to vector<1x2x128xf32>
    tpu.vector_store %arg6[%c7_905, %c0_906, %c0_907], %2172 {strides = array<i32>} : memref<8x2x128xf32, #tpu.memory_space<vmem>>, vector<1x2x128xf32>,
    %c7_908 = arith.constant 7 : index
    %c0_909 = arith.constant 0 : index
    %c0_910 = arith.constant 0 : index
    %2173 = vector.load %arg7[%c7_908, %c0_909, %c0_910] : memref<8x2x128xf32, #tpu.memory_space<vmem>>, vector<1x2x128xf32>
    %2174 = vector.shape_cast %2173 : vector<1x2x128xf32> to vector<2x128xf32>
    %2175 = vector.shape_cast %2127 : vector<2x128xf32> to vector<1x2x128xf32>
    tpu.vector_store %arg7[%c7_908, %c0_909, %c0_910], %2175 {strides = array<i32>} : memref<8x2x128xf32, #tpu.memory_space<vmem>>, vector<1x2x128xf32>,
    return
  }
  func.func @transform_0(%arg0: i32, %arg1: i32) -> (i32, i32, i32) {
    %c0_i32 = arith.constant 0 : i32
    %c0_i32_0 = arith.constant 0 : i32
    %c0_i32_1 = arith.constant 0 : i32
    return %c0_i32, %c0_i32_0, %arg0 : i32, i32, i32
  }
  func.func @transform_1(%arg0: i32, %arg1: i32) -> (i32, i32, i32) {
    %c0_i32 = arith.constant 0 : i32
    %c0_i32_0 = arith.constant 0 : i32
    %c0_i32_1 = arith.constant 0 : i32
    return %c0_i32, %c0_i32_0, %arg0 : i32, i32, i32
  }
  func.func @transform_2(%arg0: i32, %arg1: i32) -> (i32, i32, i32) {
    %c0_i32 = arith.constant 0 : i32
    %c0_i32_0 = arith.constant 0 : i32
    return %c0_i32, %arg1, %arg0 : i32, i32, i32
  }
  func.func @transform_3(%arg0: i32, %arg1: i32) -> (i32, i32, i32) {
    %c0_i32 = arith.constant 0 : i32
    %c0_i32_0 = arith.constant 0 : i32
    return %c0_i32, %arg1, %arg0 : i32, i32, i32
  }
  func.func @transform_4(%arg0: i32, %arg1: i32) -> (i32, i32, i32) {
    %c0_i32 = arith.constant 0 : i32
    %c0_i32_0 = arith.constant 0 : i32
    return %arg1, %c0_i32, %arg0 : i32, i32, i32
  }
  func.func @transform_5(%arg0: i32, %arg1: i32) -> (i32, i32, i32) {
    %c0_i32 = arith.constant 0 : i32
    %c0_i32_0 = arith.constant 0 : i32
    return %arg1, %c0_i32, %arg0 : i32, i32, i32
  }
}

</mosaic_0001>

<bundles_post_ra>
// kernel: tpu_custom_call.1
= control target key start
LH: loop header
LB: loop body
LE: loop exit
PB: predicated region body
PF: predicated region fallthrough
CT: control target
= control target key end

     0   :  { %s5877_s0 = inlined_call_operand.hbm [shape: f32[16,2,128], index: 0, kind: input, shape index: {}]   ;;  %s5878_s1 = inlined_call_operand.hbm [shape: f32[16,2,128], index: 1, kind: input, shape index: {}]   ;;  %s5879_s2 = inlined_call_operand.hbm [shape: f32[16,16,128], index: 2, kind: input, shape index: {}]   ;;  %s5880_s3 = inlined_call_operand.hbm [shape: f32[16,16,128], index: 3, kind: input, shape index: {}]   ;;  %s5881_s4 = inlined_call_operand.hbm [shape: f32[16,2,128], index: 4, kind: output, shape index: {0}]   ;;  %s5882_s5 = inlined_call_operand.hbm [shape: f32[16,2,128], index: 5, kind: output, shape index: {1}]  }
   0x1   :  { %5898 = sst [smem:[#allocation21_spill]] %s5877_s0 }
   0x2   :  { %5899 = sst [smem:[#allocation22_spill]] %s5879_s2 }
   0x3   :  { %5900 = sst [smem:[#allocation23_spill]] %s5881_s4 }
   0x4   :  { %5901 = sst [smem:[#allocation24_spill]] %s5882_s5 }
   0x5   :  { %11 = vsyncpa [#allocation3], 0 }
   0x6   :  { %12 = vsyncpa [#allocation6], 0 }
   0x7   :  { %13 = vsyncpa [#allocation4], 0 }
   0x8   :  { %15 = vsyncpa [#allocation4 + $0x1], 0 }
   0x9   :  { %16 = vsyncpa [#allocation11], 0 }
   0xa   :  { %18 = vsyncpa [#allocation11 + $0x1], 0  ;;  %s3899_s18 = smov 0   ;;  %s3901_s19 = smov 0  }
   0xb   :  { %s3903_s20 = smov 0   ;;  %s3905_s21 = smov 0  }
   0xc   :  { %s3907_s22 = smov 0   ;;  %s3909_s23 = smov 0  }
   0xd LB: > { %5902 = sst [smem:[#allocation17_spill]] %s3834_s18  ;;  %s3930_s24 = sadd.s32 4294967295, %s3854_s23   ;;  %s3854_s23 = sphi %s3909_s23, %s24_s23   ;;  %s3850_s22 = sphi %s3907_s22, %s5943_s22   ;;  %s3846_s21 = sphi %s3905_s21, %s5942_s21   ;;  %s3842_s20 = sphi %s3903_s20, %s5941_s20   ;;  %s3838_s19 = sphi %s3901_s19, %s5940_s19   ;;  %s3834_s18 = sphi %s3899_s18, %s5939_s18  }
   0xe   : > { %s2980_s25 = sadd.s32 4294967294, %s3854_s23   ;;  %p104_p0 = scmp.ne.s32.totalorder %s3842_s20, %s3838_s19 }
   0xf   : > { %p105_p1 = scmp.eq.s32.totalorder %s3854_s23, 0  ;;  %p110_p2 = scmp.ne.s32.totalorder %s3838_s19, %s3834_s18 }
  0x10   : > { %p5883_p3 = scmp.eq.s32.totalorder %s3930_s24, 0  ;;  %p164_p4 = scmp.eq.s32.totalorder %s3930_s24, 1 }
  0x11   : > { %p3941_p5 = por %p105_p1, %p104_p0  ;;  %p170_p6 = scmp.eq.s32.totalorder %s2980_s25, 1 }
  0x12   : > { %p3947_p7 = por %p5883_p3, %p110_p2  ;;  %p3951_p8 = por %p164_p4, %p104_p0 }
  0x13   : > { %p3955_p9 = por %p170_p6, %p110_p2  ;;  %p2981_p10 = scmp.ge.s32.totalorder %s3854_s23, 1 }
  0x14   : > { %s5904_s28 = scalar_select %p3947_p7, 1, 0 }
  0x15   : > { %s5905_s29 = scalar_select %p3951_p8, 1, 0 }
  0x16   : > { %s5906_s30 = scalar_select %p3955_p9, 1, 0 }
  0x17   : > { %p205_p11 = scmp.lt.s32.totalorder %s3854_s23, 3  ;;  %s3856_s7 = smov [#allocation2]  }
  0x18   : > { %5907 = sst [smem:[#allocation18_spill]] %s5906_s30  ;;  %s219_s8 = sshll.u32 %s3856_s7, 4  ;;  %s3965_s8 = int_to_ptr.vmem [resolvable:$true] %s219_s8 }
  0x19   : > { %p3961_p12 = pnand %p2981_p10, %p205_p11  ;;  %p3555_p1 = scmp.lt.s32.totalorder %s3854_s23, 2 }
  0x1a   : > { %s33_s11 = sadd.s32 1, %s3850_s22  ;;  %s5912_s0 = sld [smem:[#allocation21_spill]] }
  0x1b   : > { %s5908_s6 = scalar_select %p3961_p12, 1, 0 }
  0x1c   : > { %p3532_p13 = pneg %p3961_p12  ;;  %p3979_p4 = pnand %p3555_p1, %p3941_p5 }
  0x1d   : > { %p3984_p6 = scmp.ge.s32.totalorder %s33_s11, 2 }
  0x1e   : > { %p3973_p2 = pnand %p3532_p13, %p5883_p3 }
  0x1f   : > { %s5910_s10 = scalar_select %p3979_p4, 1, 0 }
  0x20   : > { %s3616_s15 = scalar_lea.hbm %s5912_s0, 512  ;;  %p5891_p11 = pneg %p3973_p2 }
  0x21   : > { %p3617_p10 = scmp.ne.s32.totalorder %s5912_s0, %s3616_s15  ;;  %p3623_p1 = scmp.lt.u32.totalorder %s3616_s15, %s5912_s0 }
  0x23   : > { %p3619_p5 = pnand %p5891_p11, %p3617_p10 }
  0x25   : > { %p3620_p13 = pneg %p3619_p5 }
  0x27   : > { %p3625_p0 = pnand %p3623_p1, %p3620_p13 }
  0x29   : > { %3628 = shalt.err (!%p3625_p0)
}
  0x2a   : > { %s3629_s7 = scalar_lea.vmem %s3965_s8, 512  ;;  %p3637_p7 = scmp.lt.s32.totalorder %s3965_s8, %s3965_s8 }
  0x2b   : > { %p3630_p3 = scmp.ne.s32.totalorder %s3965_s8, %s3629_s7  ;;  %p3638_p10 = scmp.lt.s32.totalorder %s3629_s7, %s3629_s7 }
  0x2d   : > { %p3632_p9 = pnand %p3630_p3, %p5891_p11  ;;  %p3639_p5 = por %p3638_p10, %p3637_p7 }
  0x2f   : > { %p3633_p8 = pneg %p3632_p9 }
  0x31   : > { %p3640_p12 = pnand %p3639_p5, %p3633_p8 }
  0x33   : > { %3643 = shalt.err (!%p3640_p12)
}
  0x34   : > { %s5892_s13 = smov 32   ;;  %s5893_s14 = smov 2  }
  0x35   : > { %3535 = dma.hbm_to_vmem [thread:$0]  (!%p3973_p2), %s5912_s0, 512, %s3965_s8, [#allocation3], %s5892_s13, %s5892_s13, %s5893_s14  }
  0x36   : > { %s248_s17 = sand.u32 1, %s3854_s23   ;;  %s5945_s11 = smov (%p3984_p6, %s33_s11), 0 }
  0x37   : > { %5913 = sst [smem:[#allocation19_spill]] %s5945_s11  ;;  %s250_s25 = sand.u32 1, %s3842_s20  }
  0x38   : > { %s92_s27 = ssub.s32 %s3850_s22, %s5945_s11  ;;  %s4026_s7 = sshll.u32 %s250_s25, 7 }
  0x39   : > { %p95_p3 = scmp.eq.s32.totalorder %s92_s27, 0  ;;  %s2986_s26 = sshll.u32 %s3850_s22, 7 }
  0x3a   : > { %s252_s30 = scalar_lea.vmem [#allocation7], %s4026_s7  ;;  %s5914_s5 = sadd.s32 1, %s3842_s20 }
  0x3b   : > { %s259_s18 = sshll.u32 %s252_s30, 4  ;;  %s5916_s2 = sld [smem:[#allocation22_spill]]  ;;  %s4042_s18 = int_to_ptr.vmem [resolvable:$true] %s259_s18 }
  0x3c   : > { %s4033_s4 = scalar_select %p95_p3, %s3842_s20, %s5914_s5  }
  0x3d   : > { %s4044_s16 = scalar_lea.sflag [#allocation3], %s248_s17  ;;  %p5895_p8 = pneg %p3979_p4 }
  0x3e   : > { %5915 = sst [smem:[#allocation20_spill]] %s4033_s4 }
  0x41   : > { %s4040_s12 = scalar_lea.hbm %s5916_s2, %s2986_s26  ;;  %s3649_s27 = scalar_lea.hbm %s5916_s2, 4096 }
  0x42   : > { %s3644_s25 = scalar_lea.hbm %s4040_s12, 2048  ;;  %p3650_p0 = scmp.lt.u32.totalorder %s4040_s12, %s5916_s2 }
  0x43   : > { %p3645_p7 = scmp.ne.s32.totalorder %s4040_s12, %s3644_s25  ;;  %p3651_p6 = scmp.lt.u32.totalorder %s3649_s27, %s3644_s25 }
  0x44   : > { %p3653_p1 = scmp.lt.u32.totalorder %s3644_s25, %s4040_s12 }
  0x45   : > { %p3647_p9 = pnand %p5895_p8, %p3645_p7  ;;  %p3652_p13 = por %p3651_p6, %p3650_p0 }
  0x47   : > { %p3648_p12 = pneg %p3647_p9  ;;  %p3654_p10 = por %p3653_p1, %p3652_p13 }
  0x49   : > { %p3655_p5 = pnand %p3654_p10, %p3648_p12 }
  0x4b   : > { %3658 = shalt.err (!%p3655_p5)
}
  0x4c   : > { %s3659_s17 = scalar_lea.vmem %s4042_s18, 2048  ;;  %s3859_s5 = smov [#allocation7]  }
  0x4d   : > { %p3660_p3 = scmp.ne.s32.totalorder %s4042_s18, %s3659_s17  ;;  %s3664_s30 = sshll.u32 %s3859_s5, 4  ;;  %s3665_s30 = int_to_ptr.vmem [resolvable:$false] %s3664_s30 }
  0x4e   : > { %s3666_s8 = scalar_lea.vmem %s3665_s30, 4096  ;;  %p3667_p11 = scmp.lt.s32.totalorder %s4042_s18, %s3665_s30 }
  0x4f   : > { %p3662_p7 = pnand %p3660_p3, %p5895_p8  ;;  %p3668_p0 = scmp.lt.s32.totalorder %s3666_s8, %s3659_s17 }
  0x51   : > { %p3663_p9 = pneg %p3662_p7  ;;  %p3669_p6 = por %p3668_p0, %p3667_p11 }
  0x53   : > { %p3670_p13 = pnand %p3669_p6, %p3663_p9 }
  0x55   : > { %3673 = shalt.err (!%p3670_p13)
}
  0x56   : > { %s3860_s25 = smov 256   ;;  %s3861_s27 = smov 128  }
  0x57   : > { %s3862_s15 = smov 8   ;;  %s3863_s5 = smov [#allocation5]  }
  0x58   : > { %3542 = dma.hbm_to_vmem [thread:$0]  (!%p3979_p4), %s4040_s12, 2048, %s4042_s18, %s4044_s16, %s3860_s25, %s3861_s27, %s3862_s15  }
  0x59   : > { %s234_s30 = sshll.u32 %s3863_s5, 4  ;;  %s4080_s13 = scalar_lea.hbm %s5880_s3, %s2986_s26  ;;  %s235_s30 = int_to_ptr.vmem [resolvable:$true] %s234_s30 }
  0x5a   : > { %s3674_s2 = scalar_lea.hbm %s5878_s1, 512  ;;  %p5917_p12 = pneg %p3973_p2 }
  0x5b   : > { %p3675_p11 = scmp.ne.s32.totalorder %s5878_s1, %s3674_s2  ;;  %p3681_p5 = scmp.lt.u32.totalorder %s3674_s2, %s5878_s1 }
  0x5d   : > { %p3677_p1 = pnand %p3675_p11, %p5917_p12 }
  0x5f   : > { %p3678_p10 = pneg %p3677_p1 }
  0x61   : > { %p3683_p3 = pnand %p3681_p5, %p3678_p10 }
  0x63   : > { %3686 = shalt.err (!%p3683_p3)
}
  0x64   : > { %s3687_s26 = scalar_lea.vmem %s235_s30, 512  ;;  %p5918_p9 = pmov %p5917_p12 }
  0x65   : > { %p3688_p7 = scmp.ne.s32.totalorder %s235_s30, %s3687_s26  ;;  %p3695_p13 = scmp.lt.s32.totalorder %s235_s30, %s235_s30 }
  0x66   : > { %p3696_p8 = scmp.lt.s32.totalorder %s3687_s26, %s3687_s26 }
  0x67   : > { %p3690_p0 = pnand %p3688_p7, %p5918_p9 }
  0x68   : > { %p3697_p4 = por %p3696_p8, %p3695_p13 }
  0x69   : > { %p3691_p6 = pneg %p3690_p0 }
  0x6b   : > { %p3698_p11 = pnand %p3697_p4, %p3691_p6 }
  0x6d   : > { %3701 = shalt.err (!%p3698_p11)
}
  0x6e   : > { %s5919_s0 = smov 2   ;;  %s5920_s4 = smov 32  }
  0x6f   : > { %3538 = dma.hbm_to_vmem [thread:$0]  (!%p3973_p2), %s5878_s1, 512, %s235_s30, [#allocation6], %s5920_s4, %s5920_s4, %s5919_s0  }
  0x70   : > { %s273_s14 = scalar_lea.vmem [#allocation8], %s4026_s7  ;;  %s3702_s17 = scalar_lea.hbm %s4080_s13, 2048 }
  0x71   : > { %s280_s5 = sshll.u32 %s273_s14, 4  ;;  %p3703_p4 = scmp.ne.s32.totalorder %s4080_s13, %s3702_s17  ;;  %s4106_s5 = int_to_ptr.vmem [resolvable:$true] %s280_s5 }
  0x72   : > { %p5921_p8 = scmp.ne.s32.totalorder %s5910_s10, 0  ;;  %s3707_s18 = scalar_lea.hbm %s5880_s3, 4096 }
  0x73   : > { %p3708_p5 = scmp.lt.u32.totalorder %s4080_s13, %s5880_s3  ;;  %p3709_p3 = scmp.lt.u32.totalorder %s3707_s18, %s3702_s17 }
  0x74   : > { %p5922_p12 = pneg %p5921_p8  ;;  %p3711_p7 = scmp.lt.u32.totalorder %s3702_s17, %s4080_s13 }
  0x75   : > { %p3710_p2 = por %p3709_p3, %p3708_p5 }
  0x76   : > { %p3705_p1 = pnand %p3703_p4, %p5922_p12 }
  0x77   : > { %p3712_p9 = por %p3711_p7, %p3710_p2 }
  0x78   : > { %p3706_p10 = pneg %p3705_p1 }
  0x7a   : > { %p3713_p0 = pnand %p3712_p9, %p3706_p10 }
  0x7c   : > { %3716 = shalt.err (!%p3713_p0)
}
  0x7d   : > { %s3717_s7 = scalar_lea.vmem %s4106_s5, 2048  ;;  %p5923_p13 = pmov %p5922_p12 }
  0x7e   : > { %p3718_p6 = scmp.ne.s32.totalorder %s4106_s5, %s3717_s7  ;;  %s3864_s30 = smov [#allocation8]  }
  0x7f   : > { %s3722_s0 = sshll.u32 %s3864_s30, 4  ;;  %s3723_s0 = int_to_ptr.vmem [resolvable:$false] %s3722_s0 }
  0x80   : > { %p3720_p11 = pnand %p3718_p6, %p5923_p13  ;;  %s3724_s4 = scalar_lea.vmem %s3723_s0, 4096 }
  0x81   : > { %p3725_p12 = scmp.lt.s32.totalorder %s4106_s5, %s3723_s0  ;;  %p3726_p1 = scmp.lt.s32.totalorder %s3724_s4, %s3717_s7 }
  0x82   : > { %p3721_p4 = pneg %p3720_p11 }
  0x83   : > { %p3727_p5 = por %p3726_p1, %p3725_p12 }
  0x85   : > { %p3728_p3 = pnand %p3727_p5, %p3721_p4 }
  0x87   : > { %3731 = shalt.err (!%p3728_p3)
}
  0x88   : > { %3545 = dma.hbm_to_vmem [thread:$0]  (!%p5921_p8), %s4080_s13, 2048, %s4106_s5, %s4044_s16, %s3860_s25, %s3861_s27, %s3862_s15  }
  0x89   : > { %p5924_p10 = scmp.ne.s32.totalorder %s5908_s6, 0 }
  0x8a   : > { %p5925_p2 = scmp.eq.s32.totalorder (!%p5924_p10), %s3930_s24, 0 }
  0x8b   : > { %292 = sbr.rel (%p5924_p10) target bundleno = 450 (0x1c2), region = 36 }
  0x92   : > { %3813 = dma.done.wait (%p5925_p2), [#allocation3], 512   ;;  %p5926_p7 = pmov %p5925_p2 }
  0x93   : > { %p5927_p9 = pmov %p5925_p2 }
  0x94   : > { %3815 = vsyncadd (%p5926_p7), [#allocation3], 4294966784 }
  0x95   : > { %3817 = dma.done.wait (%p5927_p9), [#allocation6], 512   ;;  %p5928_p0 = pmov %p5925_p2 }
  0x96   : > { %s302_s10 = sand.u32 1, %s3930_s24   ;;  %s4147_s13 = sand.u32 1, %s3838_s19  }
  0x97   : > { %3819 = vsyncadd (%p5928_p0), [#allocation6], 4294966784  ;;  %s2992_s6 = sshll.u32 %s4147_s13, 7  ;;  %s303_s16 = scalar_lea.sflag [#allocation3], %s302_s10 }
  0x98   : > { %s4150_s25 = scalar_lea.vmem [#allocation7], %s2992_s6  ;;  %p5929_p8 = scmp.ne.s32.totalorder %s5904_s28, 0 }
  0x9a   : > { %3821 = dma.done.wait (%p5929_p8), %s303_s16, 4096  }
  0x9b   : > { %3823 = vsyncadd (%p5929_p8), %s303_s16, 4294963200  ;;  %v4156_v0 = vld [vmem:[#allocation2] sm:$0x3]  ;;  %s4161_s24 = scalar_lea.vmem [#allocation8], %s2992_s6  ;;  %v3000_v12 = vld [vmem:[%s4150_s25 + $0x2] ss:$0 sm:$0xff] }
  0x9c   : > { %v4158_v1 = vld [vmem:[#allocation5] sm:$0x3]  ;;  %v3001_v13 = vld [vmem:[%s4161_s24 + $0x2] ss:$0 sm:$0xff]  ;;  %v3002_v14 = vld [vmem:[%s4150_s25 + $0x3] ss:$0 sm:$0xff]  ;;  %v4186_v17 = vmul.f32 %v3000_v12, %v4156_v0 }
  0x9d   : > { %v2996_v2 = vld [vmem:[%s4150_s25] ss:$0 sm:$0xff]  ;;  %v2998_v6 = vld [vmem:[%s4150_s25 + $0x1] ss:$0 sm:$0xff]  ;;  %v4189_v18 = vmul.f32 %v3001_v13, %v4158_v1  ;;  %v3003_v19 = vld [vmem:[%s4161_s24 + $0x3] ss:$0 sm:$0xff]  ;;  %v406_v24 = vmul.f32 %v3001_v13, %v4156_v0  ;;  %v407_v28 = vmul.f32 %v3000_v12, %v4158_v1  ;;  %v4207_v29 = vmul.f32 %v3002_v14, %v4156_v0 }
  0x9e   : > { %v2997_v3 = vld [vmem:[%s4161_s24] ss:$0 sm:$0xff]  ;;  %v4165_v4 = vmul.f32 %v2996_v2, %v4156_v0  ;;  %v371_v5 = vmul.f32 %v2996_v2, %v4158_v1  ;;  %v2999_v7 = vld [vmem:[%s4161_s24 + $0x1] ss:$0 sm:$0xff]  ;;  %v4175_v10 = vmul.f32 %v2998_v6, %v4156_v0  ;;  %v389_v16 = vmul.f32 %v2998_v6, %v4158_v1  ;;  %v3004_v20 = vld [vmem:[%s4150_s25 + $0x4] ss:$0 sm:$0xff] }
  0x9f   : > { %v4171_v8 = vmul.f32 %v2997_v3, %v4158_v1  ;;  %v370_v9 = vmul.f32 %v2997_v3, %v4156_v0  ;;  %v4178_v11 = vmul.f32 %v2999_v7, %v4158_v1  ;;  %v388_v15 = vmul.f32 %v2999_v7, %v4156_v0  ;;  %v3005_v25 = vld [vmem:[%s4161_s24 + $0x4] ss:$0 sm:$0xff]  ;;  %v3006_v30 = vld [vmem:[%s4150_s25 + $0x5] ss:$0 sm:$0xff]  ;;  %v3008_v40 = vld [vmem:[%s4150_s25 + $0x6] ss:$0 sm:$0xff] }
  0xa0   : > { %v404_v27 = vsub.f32 %v4186_v17, %v4189_v18  ;;  %v3007_v31 = vld [vmem:[%s4161_s24 + $0x5] ss:$0 sm:$0xff]  ;;  %v4212_v32 = vmul.f32 %v3003_v19, %v4158_v1  ;;  %v424_v33 = vmul.f32 %v3003_v19, %v4156_v0  ;;  %v425_v34 = vmul.f32 %v3002_v14, %v4158_v1  ;;  %v3009_v41 = vld [vmem:[%s4161_s24 + $0x6] ss:$0 sm:$0xff]  ;;  %v3010_v46 = vld [vmem:[%s4150_s25 + $0x7] ss:$0 sm:$0xff] }
  0xa1   : > { %v368_v21 = vsub.f32 %v4165_v4, %v4171_v8  ;;  %v4195_v22 = vadd.f32 %v371_v5, %v370_v9  ;;  %v386_v23 = vsub.f32 %v4175_v10, %v4178_v11  ;;  %v4201_v26 = vadd.f32 %v389_v16, %v388_v15  ;;  %v3011_v47 = vld [vmem:[%s4161_s24 + $0x7] ss:$0 sm:$0xff]  ;;  %v4246_v52 = vld [vmem:[#allocation2 + $0x2] sm:$0x3]  ;;  %v3014_v53 = vld [vmem:[%s4150_s25 + $0x8] ss:$0 sm:$0xff] }
  0xa2   : > { %v4217_v35 = vmul.f32 %v3004_v20, %v4156_v0  ;;  %v4219_v36 = vadd.f32 %v407_v28, %v406_v24  ;;  %v4222_v37 = vmul.f32 %v3005_v25, %v4158_v1  ;;  %v442_v38 = vmul.f32 %v3005_v25, %v4156_v0  ;;  %v4258_v58 = vld [vmem:[#allocation5 + $0x2] sm:$0x3]  ;;  %v3015_v59 = vld [vmem:[%s4161_s24 + $0x8] ss:$0 sm:$0xff]  ;;  %v3018_v2 = vld [vmem:[%s4150_s25 + $0x9] ss:$0 sm:$0xff] }
  0xa3   : > { %v443_v39 = vmul.f32 %v3004_v20, %v4158_v1  ;;  %v422_v42 = vsub.f32 %v4207_v29, %v4212_v32  ;;  %v4230_v43 = vadd.f32 %v425_v34, %v424_v33  ;;  %v4233_v44 = vmul.f32 %v3006_v30, %v4156_v0  ;;  %v3019_v3 = vld [vmem:[%s4161_s24 + $0x9] ss:$0 sm:$0xff]  ;;  %v3022_v12 = vld [vmem:[%s4150_s25 + $0xa] ss:$0 sm:$0xff]  ;;  %v3026_v25 = vld [vmem:[%s4150_s25 + $0xb] ss:$0 sm:$0xff] }
  0xa4   : > { %v4236_v45 = vmul.f32 %v3007_v31, %v4158_v1  ;;  %v440_v48 = vsub.f32 %v4217_v35, %v4222_v37  ;;  %v460_v50 = vmul.f32 %v3007_v31, %v4156_v0  ;;  %v461_v51 = vmul.f32 %v3006_v30, %v4158_v1  ;;  %v3023_v19 = vld [vmem:[%s4161_s24 + $0xa] ss:$0 sm:$0xff]  ;;  %v3027_v34 = vld [vmem:[%s4161_s24 + $0xb] ss:$0 sm:$0xff]  ;;  %v4364_v35 = vld [vmem:[#allocation5 + $0x4] sm:$0x3] }
  0xa5   : > { %v4242_v49 = vadd.f32 %v443_v39, %v442_v38  ;;  %v4252_v55 = vmul.f32 %v3008_v40, %v4156_v0  ;;  %v4255_v56 = vmul.f32 %v3009_v41, %v4158_v1  ;;  %v478_v57 = vmul.f32 %v3009_v41, %v4156_v0  ;;  %v3046_v37 = vld [vmem:[%s4150_s25 + $0x10] ss:$0 sm:$0xff]  ;;  %s2994_s28 = sshll.u32 %s4147_s13, 4  ;;  %s3514_s2 = sshll.u32 %s3846_s21, 8 }
  0xa6   : > { %v458_v54 = vsub.f32 %v4233_v44, %v4236_v45  ;;  %v4261_v60 = vadd.f32 %v461_v51, %v460_v50  ;;  %v479_v61 = vmul.f32 %v3008_v40, %v4158_v1  ;;  %v4265_v62 = vmul.f32 %v3010_v46, %v4156_v0  ;;  %s5724_s27 = scalar_lea.vmem [#allocation9], %s2994_s28  ;;  %s5734_s15 = scalar_lea.vmem [#allocation10], %s2994_s28 }
  0xa7   : > { %v4268_v63 = vmul.f32 %v3011_v47, %v4158_v1  ;;  %v476_v5 = vsub.f32 %v4252_v55, %v4255_v56  ;;  %v496_v6 = vmul.f32 %v3011_v47, %v4156_v0  ;;  %v497_v7 = vmul.f32 %v3010_v46, %v4158_v1  ;;  %s2800_s11 = sshll.u32 %s5724_s27, 4  ;;  %s2817_s14 = sshll.u32 %s5734_s15, 4  ;;  %s5785_s11 = int_to_ptr.vmem [resolvable:$true] %s2800_s11  ;;  %s5796_s14 = int_to_ptr.vmem [resolvable:$true] %s2817_s14 }
  0xa8   : > { %v512_v9 = vmul.f32 %v3014_v53, %v4246_v52  ;;  %v4278_v13 = vadd.f32 %v479_v61, %v478_v57  ;;  %v517_v15 = vmul.f32 %v3015_v59, %v4258_v58  ;;  %v520_v16 = vmul.f32 %v3015_v59, %v4246_v52  ;;  %v3031_v57 = vld [vmem:[%s4161_s24 + $0xc] ss:$0 sm:$0xff]  ;;  %s5930_s17 = sld [smem:[#allocation23_spill]]  ;;  %s5931_s12 = sld [smem:[#allocation24_spill]] }
  0xa9   : > { %v494_v14 = vsub.f32 %v4265_v62, %v4268_v63  ;;  %v4285_v20 = vadd.f32 %v497_v7, %v496_v6  ;;  %v521_v0 = vmul.f32 %v3014_v53, %v4258_v58  ;;  %v530_v1 = vmul.f32 %v3018_v2, %v4246_v52  ;;  %v3030_v53 = vld [vmem:[%s4150_s25 + $0xc] ss:$0 sm:$0xff]  ;;  %v3035_v7 = vld [vmem:[%s4161_s24 + $0xd] ss:$0 sm:$0xff]  ;;  %s2781_s7 = scalar_lea.sflag [#allocation4], %s4147_s13  ;;  %s3732_s30 = scalar_lea.vmem %s5785_s11, 256 }
  0xaa   : > { %v535_v24 = vmul.f32 %v3019_v3, %v4258_v58  ;;  %v518_v28 = vsub.f32 %v512_v9, %v517_v15  ;;  %v538_v30 = vmul.f32 %v3019_v3, %v4246_v52  ;;  %v539_v31 = vmul.f32 %v3018_v2, %v4258_v58  ;;  %p3733_p6 = scmp.ne.s32.totalorder %s5785_s11, %s3732_s30  ;;  %p5932_p13 = scmp.ne.s32.totalorder %s5905_s29, 0 }
  0xab   : > { %v548_v33 = vmul.f32 %v3022_v12, %v4246_v52  ;;  %v522_v38 = vadd.f32 %v521_v0, %v520_v16  ;;  %v553_v40 = vmul.f32 %v3023_v19, %v4258_v58  ;;  %v556_v41 = vmul.f32 %v3023_v19, %v4246_v52  ;;  %v3038_v19 = vld [vmem:[%s4150_s25 + $0xe] ss:$0 sm:$0xff]  ;;  %s3865_s0 = smov [#allocation9]  }
  0xac   : > { %v536_v39 = vsub.f32 %v530_v1, %v535_v24  ;;  %v4300_v46 = vadd.f32 %v518_v28, %v368_v21  ;;  %v540_v47 = vadd.f32 %v539_v31, %v538_v30  ;;  %v557_v50 = vmul.f32 %v3022_v12, %v4258_v58  ;;  %v3039_v0 = vld [vmem:[%s4161_s24 + $0xe] ss:$0 sm:$0xff]  ;;  %v3042_v30 = vld [vmem:[%s4150_s25 + $0xf] ss:$0 sm:$0xff]  ;;  %p3734_p11 = pnand %p3733_p6, %p5932_p13  ;;  %s3736_s4 = sshll.u32 %s3865_s0, 4  ;;  %s3737_s4 = int_to_ptr.vmem [resolvable:$false] %s3736_s4 }
  0xad   : > { %v566_v51 = vmul.f32 %v3026_v25, %v4246_v52  ;;  %v4307_v59 = vadd.f32 %v522_v38, %v4195_v22  ;;  %v554_v2 = vsub.f32 %v548_v33, %v553_v40  ;;  %v571_v4 = vmul.f32 %v3027_v34, %v4258_v58  ;;  %v3034_v22 = vld [vmem:[%s4150_s25 + $0xd] ss:$0 sm:$0xff]  ;;  %v3043_v31 = vld [vmem:[%s4161_s24 + $0xf] ss:$0 sm:$0xff]  ;;  %v4357_v33 = vld [vmem:[#allocation2 + $0x4] sm:$0x3]  ;;  %p3739_p12 = scmp.lt.s32.totalorder %s5785_s11, %s3737_s4 }
  0xae   : > { %v4312_v61 = vadd.f32 %v536_v39, %v386_v23  ;;  %v4316_v8 = vadd.f32 %v540_v47, %v4201_v26  ;;  %v558_v21 = vadd.f32 %v557_v50, %v556_v41  ;;  %v574_v3 = vmul.f32 %v3027_v34, %v4246_v52  ;;  %s5783_s9 = scalar_lea.hbm %s5930_s17, %s3514_s2  ;;  %s5794_s26 = scalar_lea.hbm %s5931_s12, %s3514_s2 }
  0xaf   : > { %v575_v6 = vmul.f32 %v3026_v25, %v4258_v58  ;;  %v4325_v10 = vadd.f32 %v554_v2, %v404_v27  ;;  %v572_v11 = vsub.f32 %v566_v51, %v571_v4  ;;  %v584_v23 = vmul.f32 %v3030_v53, %v4246_v52  ;;  %v3050_v4 = vld [vmem:[%s4150_s25 + $0x11] ss:$0 sm:$0xff]  ;;  %p3735_p4 = pneg %p3734_p11  ;;  %s3738_s10 = scalar_lea.vmem %s3737_s4, 512 }
  0xb0   : > { %v589_v9 = vmul.f32 %v3031_v57, %v4258_v58  ;;  %v4330_v26 = vadd.f32 %v558_v21, %v4219_v36  ;;  %v592_v15 = vmul.f32 %v3031_v57, %v4246_v52  ;;  %v593_v16 = vmul.f32 %v3030_v53, %v4258_v58  ;;  %v3051_v21 = vld [vmem:[%s4161_s24 + $0x11] ss:$0 sm:$0xff]  ;;  %p3740_p1 = scmp.lt.s32.totalorder %s3738_s10, %s3732_s30 }
  0xb1   : > { %v576_v12 = vadd.f32 %v575_v6, %v574_v3  ;;  %v4339_v17 = vadd.f32 %v572_v11, %v422_v42  ;;  %v602_v27 = vmul.f32 %v3034_v22, %v4246_v52  ;;  %v607_v1 = vmul.f32 %v3035_v7, %v4258_v58 }
  0xb2   : > { %v590_v18 = vsub.f32 %v584_v23, %v589_v9  ;;  %v594_v24 = vadd.f32 %v593_v16, %v592_v15  ;;  %v610_v25 = vmul.f32 %v3035_v7, %v4246_v52  ;;  %v611_v28 = vmul.f32 %v3034_v22, %v4258_v58  ;;  %v3054_v22 = vld [vmem:[%s4150_s25 + $0x12] ss:$0 sm:$0xff]  ;;  %v3058_v15 = vld [vmem:[%s4150_s25 + $0x13] ss:$0 sm:$0xff]  ;;  %p3741_p5 = por %p3740_p1, %p3739_p12 }
  0xb3   : > { %v4344_v36 = vadd.f32 %v576_v12, %v4230_v43  ;;  %v608_v32 = vsub.f32 %v602_v27, %v607_v1  ;;  %v620_v42 = vmul.f32 %v3038_v19, %v4246_v52  ;;  %v625_v43 = vmul.f32 %v3039_v0, %v4258_v58  ;;  %v3055_v7 = vld [vmem:[%s4161_s24 + $0x12] ss:$0 sm:$0xff]  ;;  %v3059_v16 = vld [vmem:[%s4161_s24 + $0x13] ss:$0 sm:$0xff]  ;;  %v3062_v1 = vld [vmem:[%s4150_s25 + $0x14] ss:$0 sm:$0xff] }
  0xb4   : > { %v4353_v29 = vadd.f32 %v590_v18, %v440_v48  ;;  %v4360_v34 = vadd.f32 %v594_v24, %v4242_v49  ;;  %v612_v38 = vadd.f32 %v611_v28, %v610_v25  ;;  %v628_v39 = vmul.f32 %v3039_v0, %v4246_v52  ;;  %v3047_v48 = vld [vmem:[%s4161_s24 + $0x10] ss:$0 sm:$0xff]  ;;  %v3063_v24 = vld [vmem:[%s4161_s24 + $0x14] ss:$0 sm:$0xff]  ;;  %p3742_p3 = pnand %p3741_p5, %p3735_p4 }
  0xb5   : > { %v629_v40 = vmul.f32 %v3038_v19, %v4258_v58  ;;  %v4371_v41 = vadd.f32 %v608_v32, %v458_v54  ;;  %v626_v47 = vsub.f32 %v620_v42, %v625_v43  ;;  %v638_v50 = vmul.f32 %v3042_v30, %v4246_v52  ;;  %v3066_v43 = vld [vmem:[%s4150_s25 + $0x15] ss:$0 sm:$0xff] }
  0xb6   : > { %v643_v49 = vmul.f32 %v3043_v31, %v4258_v58  ;;  %v4376_v51 = vadd.f32 %v612_v38, %v4261_v60  ;;  %v646_v57 = vmul.f32 %v3043_v31, %v4246_v52  ;;  %v647_v2 = vmul.f32 %v3042_v30, %v4258_v58  ;;  %v3067_v38 = vld [vmem:[%s4161_s24 + $0x15] ss:$0 sm:$0xff] }
  0xb7   : > { %v630_v53 = vadd.f32 %v629_v40, %v628_v39  ;;  %v4385_v44 = vadd.f32 %v626_v47, %v476_v5  ;;  %v662_v54 = vmul.f32 %v3046_v37, %v4357_v33  ;;  %v667_v3 = vmul.f32 %v3047_v48, %v4364_v35 }
  0xb8   : > { %v644_v45 = vsub.f32 %v638_v50, %v643_v49  ;;  %v648_v52 = vadd.f32 %v647_v2, %v646_v57  ;;  %v670_v58 = vmul.f32 %v3047_v48, %v4357_v33  ;;  %v671_v6 = vmul.f32 %v3046_v37, %v4364_v35  ;;  %v3070_v49 = vld [vmem:[%s4150_s25 + $0x16] ss:$0 sm:$0xff] }
  0xb9   : > { %v4390_v60 = vadd.f32 %v630_v53, %v4278_v13  ;;  %v668_v56 = vsub.f32 %v662_v54, %v667_v3  ;;  %v680_v5 = vmul.f32 %v3050_v4, %v4357_v33  ;;  %v685_v11 = vmul.f32 %v3051_v21, %v4364_v35  ;;  %v3071_v53 = vld [vmem:[%s4161_s24 + $0x16] ss:$0 sm:$0xff]  ;;  %v3074_v3 = vld [vmem:[%s4150_s25 + $0x17] ss:$0 sm:$0xff] }
  0xba   : > { %v4399_v55 = vadd.f32 %v644_v45, %v494_v14  ;;  %v4404_v13 = vadd.f32 %v648_v52, %v4285_v20  ;;  %v672_v23 = vadd.f32 %v671_v6, %v670_v58  ;;  %v688_v9 = vmul.f32 %v3051_v21, %v4357_v33  ;;  %v3075_v52 = vld [vmem:[%s4161_s24 + $0x17] ss:$0 sm:$0xff] }
  0xbb   : > { %v689_v12 = vmul.f32 %v3050_v4, %v4364_v35  ;;  %v4411_v62 = vadd.f32 %v668_v56, %v4300_v46  ;;  %v686_v63 = vsub.f32 %v680_v5, %v685_v11  ;;  %v698_v14 = vmul.f32 %v3054_v22, %v4357_v33 }
  0xbc   : > { %v703_v19 = vmul.f32 %v3055_v7, %v4364_v35  ;;  %v4416_v20 = vadd.f32 %v672_v23, %v4307_v59  ;;  %v706_v18 = vmul.f32 %v3055_v7, %v4357_v33  ;;  %v707_v27 = vmul.f32 %v3054_v22, %v4364_v35  ;;  %v4463_v7 = vld [vmem:[#allocation2 + $0x6] sm:$0x3] }
  0xbd   : > { %v690_v0 = vadd.f32 %v689_v12, %v688_v9  ;;  %v4423_v46 = vadd.f32 %v686_v63, %v4312_v61  ;;  %v716_v28 = vmul.f32 %v3058_v15, %v4357_v33  ;;  %v721_v30 = vmul.f32 %v3059_v16, %v4364_v35  ;;  %v4470_v23 = vld [vmem:[#allocation5 + $0x6] sm:$0x3]  ;;  %v3079_v9 = vld [vmem:[%s4161_s24 + $0x18] ss:$0 sm:$0xff] }
  0xbe   : > { %v704_v25 = vsub.f32 %v698_v14, %v703_v19  ;;  %v708_v31 = vadd.f32 %v707_v27, %v706_v18  ;;  %v724_v32 = vmul.f32 %v3059_v16, %v4357_v33  ;;  %v725_v42 = vmul.f32 %v3058_v15, %v4364_v35  ;;  %v3082_v18 = vld [vmem:[%s4150_s25 + $0x19] ss:$0 sm:$0xff] }
  0xbf   : > { %v4428_v59 = vadd.f32 %v690_v0, %v4316_v8  ;;  %v722_v39 = vsub.f32 %v716_v28, %v721_v30  ;;  %v734_v40 = vmul.f32 %v3062_v1, %v4357_v33  ;;  %v739_v37 = vmul.f32 %v3063_v24, %v4364_v35  ;;  %v3083_v27 = vld [vmem:[%s4161_s24 + $0x19] ss:$0 sm:$0xff]  ;;  %v3086_v30 = vld [vmem:[%s4150_s25 + $0x1a] ss:$0 sm:$0xff] }
  0xc0   : > { %v4435_v61 = vadd.f32 %v704_v25, %v4325_v10  ;;  %v4440_v8 = vadd.f32 %v708_v31, %v4330_v26  ;;  %v726_v48 = vadd.f32 %v725_v42, %v724_v32  ;;  %v742_v47 = vmul.f32 %v3063_v24, %v4357_v33  ;;  %v3087_v31 = vld [vmem:[%s4161_s24 + $0x1a] ss:$0 sm:$0xff] }
  0xc1   : > { %v743_v50 = vmul.f32 %v3062_v1, %v4364_v35  ;;  %v4447_v10 = vadd.f32 %v722_v39, %v4339_v17  ;;  %v740_v57 = vsub.f32 %v734_v40, %v739_v37  ;;  %v752_v2 = vmul.f32 %v3066_v43, %v4357_v33  ;;  %v3090_v37 = vld [vmem:[%s4150_s25 + $0x1b] ss:$0 sm:$0xff] }
  0xc2   : > { %v757_v4 = vmul.f32 %v3067_v38, %v4364_v35  ;;  %v4452_v21 = vadd.f32 %v726_v48, %v4344_v36  ;;  %v760_v45 = vmul.f32 %v3067_v38, %v4357_v33  ;;  %v761_v54 = vmul.f32 %v3066_v43, %v4364_v35  ;;  %v3091_v48 = vld [vmem:[%s4161_s24 + $0x1b] ss:$0 sm:$0xff] }
  0xc3   : > { %v744_v26 = vadd.f32 %v743_v50, %v742_v47  ;;  %v4459_v17 = vadd.f32 %v740_v57, %v4353_v29  ;;  %v770_v6 = vmul.f32 %v3070_v49, %v4357_v33  ;;  %v775_v22 = vmul.f32 %v3071_v53, %v4364_v35  ;;  %v3078_v29 = vld [vmem:[%s4150_s25 + $0x18] ss:$0 sm:$0xff] }
  0xc4   : > { %v758_v58 = vsub.f32 %v752_v2, %v757_v4  ;;  %v762_v56 = vadd.f32 %v761_v54, %v760_v45  ;;  %v778_v5 = vmul.f32 %v3071_v53, %v4357_v33  ;;  %v779_v11 = vmul.f32 %v3070_v49, %v4364_v35  ;;  %v3094_v4 = vld [vmem:[%s4150_s25 + $0x1c] ss:$0 sm:$0xff] }
  0xc5   : > { %v4466_v36 = vadd.f32 %v744_v26, %v4360_v34  ;;  %v776_v15 = vsub.f32 %v770_v6, %v775_v22  ;;  %v788_v16 = vmul.f32 %v3074_v3, %v4357_v33  ;;  %v793_v34 = vmul.f32 %v3075_v52, %v4364_v35  ;;  %v3095_v26 = vld [vmem:[%s4161_s24 + $0x1c] ss:$0 sm:$0xff]  ;;  %v3098_v22 = vld [vmem:[%s4150_s25 + $0x1d] ss:$0 sm:$0xff] }
  0xc6   : > { %v4475_v12 = vadd.f32 %v758_v58, %v4371_v41  ;;  %v4480_v63 = vadd.f32 %v762_v56, %v4376_v51  ;;  %v780_v14 = vadd.f32 %v779_v11, %v778_v5  ;;  %v796_v19 = vmul.f32 %v3075_v52, %v4357_v33  ;;  %v3099_v56 = vld [vmem:[%s4161_s24 + $0x1d] ss:$0 sm:$0xff] }
  0xc7   : > { %v797_v0 = vmul.f32 %v3074_v3, %v4364_v35  ;;  %v4487_v41 = vadd.f32 %v776_v15, %v4385_v44  ;;  %v794_v1 = vsub.f32 %v788_v16, %v793_v34  ;;  %v812_v24 = vmul.f32 %v3078_v29, %v4463_v7  ;;  %v3102_v34 = vld [vmem:[%s4150_s25 + $0x1e] ss:$0 sm:$0xff] }
  0xc8   : > { %v817_v25 = vmul.f32 %v3079_v9, %v4470_v23  ;;  %v4492_v51 = vadd.f32 %v780_v14, %v4390_v60  ;;  %v820_v33 = vmul.f32 %v3079_v9, %v4463_v7  ;;  %v821_v35 = vmul.f32 %v3078_v29, %v4470_v23  ;;  %v3103_v14 = vld [vmem:[%s4161_s24 + $0x1e] ss:$0 sm:$0xff] }
  0xc9   : > { %v798_v28 = vadd.f32 %v797_v0, %v796_v19  ;;  %v4499_v44 = vadd.f32 %v794_v1, %v4399_v55  ;;  %v830_v42 = vmul.f32 %v3082_v18, %v4463_v7  ;;  %v835_v43 = vmul.f32 %v3083_v27, %v4470_v23 }
  0xca   : > { %v818_v32 = vsub.f32 %v812_v24, %v817_v25  ;;  %v822_v38 = vadd.f32 %v821_v35, %v820_v33  ;;  %v838_v39 = vmul.f32 %v3083_v27, %v4463_v7  ;;  %v839_v40 = vmul.f32 %v3082_v18, %v4470_v23  ;;  %v3106_v25 = vld [vmem:[%s4150_s25 + $0x1f] ss:$0 sm:$0xff] }
  0xcb   : > { %v4504_v60 = vadd.f32 %v798_v28, %v4404_v13  ;;  %v836_v47 = vsub.f32 %v830_v42, %v835_v43  ;;  %v848_v50 = vmul.f32 %v3086_v30, %v4463_v7  ;;  %v853_v49 = vmul.f32 %v3087_v31, %v4470_v23  ;;  %v3107_v28 = vld [vmem:[%s4161_s24 + $0x1f] ss:$0 sm:$0xff] }
  0xcc   : > { %v4511_v55 = vadd.f32 %v818_v32, %v4411_v62  ;;  %v4516_v13 = vadd.f32 %v822_v38, %v4416_v20  ;;  %v840_v53 = vadd.f32 %v839_v40, %v838_v39  ;;  %v856_v57 = vmul.f32 %v3087_v31, %v4463_v7  ;;  %v4563_v31 = vld [vmem:[#allocation2 + $0x8] sm:$0x3]  ;;  %v3111_v39 = vld [vmem:[%s4161_s24 + $0x20] ss:$0 sm:$0xff] }
  0xcd   : > { %v857_v2 = vmul.f32 %v3086_v30, %v4470_v23  ;;  %v4523_v62 = vadd.f32 %v836_v47, %v4423_v46  ;;  %v854_v45 = vsub.f32 %v848_v50, %v853_v49  ;;  %v866_v54 = vmul.f32 %v3090_v37, %v4463_v7  ;;  %v4570_v38 = vld [vmem:[#allocation5 + $0x8] sm:$0x3] }
  0xce   : > { %v871_v3 = vmul.f32 %v3091_v48, %v4470_v23  ;;  %v4528_v20 = vadd.f32 %v840_v53, %v4428_v59  ;;  %v874_v58 = vmul.f32 %v3091_v48, %v4463_v7  ;;  %v875_v6 = vmul.f32 %v3090_v37, %v4470_v23 }
  0xcf   : > { %v858_v52 = vadd.f32 %v857_v2, %v856_v57  ;;  %v4535_v46 = vadd.f32 %v854_v45, %v4435_v61  ;;  %v884_v11 = vmul.f32 %v3094_v4, %v4463_v7  ;;  %v889_v29 = vmul.f32 %v3095_v26, %v4470_v23  ;;  %v3114_v57 = vld [vmem:[%s4150_s25 + $0x21] ss:$0 sm:$0xff] }
  0xd0   : > { %v872_v5 = vsub.f32 %v866_v54, %v871_v3  ;;  %v876_v9 = vadd.f32 %v875_v6, %v874_v58  ;;  %v892_v15 = vmul.f32 %v3095_v26, %v4463_v7  ;;  %v893_v16 = vmul.f32 %v3094_v4, %v4470_v23  ;;  %v3115_v2 = vld [vmem:[%s4161_s24 + $0x21] ss:$0 sm:$0xff]  ;;  %v3118_v3 = vld [vmem:[%s4150_s25 + $0x22] ss:$0 sm:$0xff] }
  0xd1   : > { %v4540_v59 = vadd.f32 %v858_v52, %v4440_v8  ;;  %v890_v19 = vsub.f32 %v884_v11, %v889_v29  ;;  %v902_v0 = vmul.f32 %v3098_v22, %v4463_v7  ;;  %v907_v18 = vmul.f32 %v3099_v56, %v4470_v23  ;;  %v3119_v52 = vld [vmem:[%s4161_s24 + $0x22] ss:$0 sm:$0xff]  ;;  %v3122_v29 = vld [vmem:[%s4150_s25 + $0x23] ss:$0 sm:$0xff] }
  0xd2   : > { %v4547_v61 = vadd.f32 %v872_v5, %v4447_v10  ;;  %v4552_v27 = vadd.f32 %v876_v9, %v4452_v21  ;;  %v894_v8 = vadd.f32 %v893_v16, %v892_v15  ;;  %v910_v1 = vmul.f32 %v3099_v56, %v4463_v7  ;;  %v3123_v9 = vld [vmem:[%s4161_s24 + $0x23] ss:$0 sm:$0xff] }
  0xd3   : > { %v911_v24 = vmul.f32 %v3098_v22, %v4470_v23  ;;  %v4559_v10 = vadd.f32 %v890_v19, %v4459_v17  ;;  %v908_v33 = vsub.f32 %v902_v0, %v907_v18  ;;  %v920_v35 = vmul.f32 %v3102_v34, %v4463_v7  ;;  %v3110_v17 = vld [vmem:[%s4150_s25 + $0x20] ss:$0 sm:$0xff]  ;;  %v3126_v18 = vld [vmem:[%s4150_s25 + $0x24] ss:$0 sm:$0xff] }
  0xd4   : > { %v925_v30 = vmul.f32 %v3103_v14, %v4470_v23  ;;  %v4566_v21 = vadd.f32 %v894_v8, %v4466_v36  ;;  %v928_v42 = vmul.f32 %v3103_v14, %v4463_v7  ;;  %v929_v43 = vmul.f32 %v3102_v34, %v4470_v23  ;;  %v3127_v8 = vld [vmem:[%s4161_s24 + $0x24] ss:$0 sm:$0xff] }
  0xd5   : > { %v912_v32 = vadd.f32 %v911_v24, %v910_v1  ;;  %v4575_v40 = vadd.f32 %v908_v33, %v4475_v12  ;;  %v938_v48 = vmul.f32 %v3106_v25, %v4463_v7  ;;  %v943_v36 = vmul.f32 %v3107_v28, %v4470_v23 }
  0xd6   : > { %v926_v37 = vsub.f32 %v920_v35, %v925_v30  ;;  %v930_v50 = vadd.f32 %v929_v43, %v928_v42  ;;  %v946_v49 = vmul.f32 %v3107_v28, %v4463_v7  ;;  %v947_v53 = vmul.f32 %v3106_v25, %v4470_v23  ;;  %v3130_v30 = vld [vmem:[%s4150_s25 + $0x25] ss:$0 sm:$0xff] }
  0xd7   : > { %v4580_v47 = vadd.f32 %v912_v32, %v4480_v63  ;;  %v944_v4 = vsub.f32 %v938_v48, %v943_v36  ;;  %v962_v26 = vmul.f32 %v3110_v17, %v4563_v31  ;;  %v967_v45 = vmul.f32 %v3111_v39, %v4570_v38  ;;  %v3131_v32 = vld [vmem:[%s4161_s24 + $0x25] ss:$0 sm:$0xff]  ;;  %v3134_v36 = vld [vmem:[%s4150_s25 + $0x26] ss:$0 sm:$0xff] }
  0xd8   : > { %v4587_v12 = vadd.f32 %v926_v37, %v4487_v41  ;;  %v4592_v63 = vadd.f32 %v930_v50, %v4492_v51  ;;  %v948_v54 = vadd.f32 %v947_v53, %v946_v49  ;;  %v970_v7 = vmul.f32 %v3111_v39, %v4563_v31  ;;  %v3135_v50 = vld [vmem:[%s4161_s24 + $0x26] ss:$0 sm:$0xff] }
  0xd9   : > { %v971_v23 = vmul.f32 %v3110_v17, %v4570_v38  ;;  %v4599_v41 = vadd.f32 %v944_v4, %v4499_v44  ;;  %v968_v58 = vsub.f32 %v962_v26, %v967_v45  ;;  %v980_v6 = vmul.f32 %v3114_v57, %v4563_v31  ;;  %v3138_v45 = vld [vmem:[%s4150_s25 + $0x27] ss:$0 sm:$0xff] }
  0xda   : > { %v985_v22 = vmul.f32 %v3115_v2, %v4570_v38  ;;  %v4604_v51 = vadd.f32 %v948_v54, %v4504_v60  ;;  %v988_v5 = vmul.f32 %v3115_v2, %v4563_v31  ;;  %v989_v11 = vmul.f32 %v3114_v57, %v4570_v38  ;;  %v3139_v54 = vld [vmem:[%s4161_s24 + $0x27] ss:$0 sm:$0xff] }
  0xdb   : > { %v972_v56 = vadd.f32 %v971_v23, %v970_v7  ;;  %v4611_v44 = vadd.f32 %v968_v58, %v4511_v55  ;;  %v998_v16 = vmul.f32 %v3118_v3, %v4563_v31  ;;  %v1003_v34 = vmul.f32 %v3119_v52, %v4570_v38 }
  0xdc   : > { %v986_v15 = vsub.f32 %v980_v6, %v985_v22  ;;  %v990_v14 = vadd.f32 %v989_v11, %v988_v5  ;;  %v1006_v19 = vmul.f32 %v3119_v52, %v4563_v31  ;;  %v1007_v0 = vmul.f32 %v3118_v3, %v4570_v38  ;;  %v4663_v52 = vld [vmem:[#allocation2 + $0xa] sm:$0x3]  ;;  %v3143_v5 = vld [vmem:[%s4161_s24 + $0x28] ss:$0 sm:$0xff] }
  0xdd   : > { %v4616_v60 = vadd.f32 %v972_v56, %v4516_v13  ;;  %v1004_v1 = vsub.f32 %v998_v16, %v1003_v34  ;;  %v1016_v24 = vmul.f32 %v3122_v29, %v4563_v31  ;;  %v1021_v25 = vmul.f32 %v3123_v9, %v4570_v38  ;;  %v4670_v56 = vld [vmem:[#allocation5 + $0xa] sm:$0x3] }
  0xde   : > { %v4623_v55 = vadd.f32 %v986_v15, %v4523_v62  ;;  %v4628_v13 = vadd.f32 %v990_v14, %v4528_v20  ;;  %v1008_v28 = vadd.f32 %v1007_v0, %v1006_v19  ;;  %v1024_v33 = vmul.f32 %v3123_v9, %v4563_v31  ;;  %v3146_v19 = vld [vmem:[%s4150_s25 + $0x29] ss:$0 sm:$0xff] }
  0xdf   : > { %v1025_v35 = vmul.f32 %v3122_v29, %v4570_v38  ;;  %v4635_v62 = vadd.f32 %v1004_v1, %v4535_v46  ;;  %v1022_v42 = vsub.f32 %v1016_v24, %v1021_v25  ;;  %v1034_v43 = vmul.f32 %v3126_v18, %v4563_v31  ;;  %v3147_v0 = vld [vmem:[%s4161_s24 + $0x29] ss:$0 sm:$0xff]  ;;  %v3150_v25 = vld [vmem:[%s4150_s25 + $0x2a] ss:$0 sm:$0xff] }
  0xe0   : > { %v1039_v17 = vmul.f32 %v3127_v8, %v4570_v38  ;;  %v4640_v20 = vadd.f32 %v1008_v28, %v4540_v59  ;;  %v1042_v37 = vmul.f32 %v3127_v8, %v4563_v31  ;;  %v1043_v48 = vmul.f32 %v3126_v18, %v4570_v38  ;;  %v3151_v28 = vld [vmem:[%s4161_s24 + $0x2a] ss:$0 sm:$0xff] }
  0xe1   : > { %v1026_v39 = vadd.f32 %v1025_v35, %v1024_v33  ;;  %v4647_v46 = vadd.f32 %v1022_v42, %v4547_v61  ;;  %v1052_v53 = vmul.f32 %v3130_v30, %v4563_v31  ;;  %v1057_v57 = vmul.f32 %v3131_v32, %v4570_v38 }
  0xe2   : > { %v1040_v49 = vsub.f32 %v1034_v43, %v1039_v17  ;;  %v1044_v59 = vadd.f32 %v1043_v48, %v1042_v37  ;;  %v1060_v4 = vmul.f32 %v3131_v32, %v4563_v31  ;;  %v1061_v26 = vmul.f32 %v3130_v30, %v4570_v38  ;;  %v3154_v17 = vld [vmem:[%s4150_s25 + $0x2b] ss:$0 sm:$0xff] }
  0xe3   : > { %v4652_v2 = vadd.f32 %v1026_v39, %v4552_v27  ;;  %v1058_v7 = vsub.f32 %v1052_v53, %v1057_v57  ;;  %v1070_v23 = vmul.f32 %v3134_v36, %v4563_v31  ;;  %v1075_v3 = vmul.f32 %v3135_v50, %v4570_v38  ;;  %v3155_v39 = vld [vmem:[%s4161_s24 + $0x2b] ss:$0 sm:$0xff]  ;;  %v3158_v57 = vld [vmem:[%s4150_s25 + $0x2c] ss:$0 sm:$0xff] }
  0xe4   : > { %v4659_v61 = vadd.f32 %v1040_v49, %v4559_v10  ;;  %v4666_v27 = vadd.f32 %v1044_v59, %v4566_v21  ;;  %v1062_v58 = vadd.f32 %v1061_v26, %v1060_v4  ;;  %v1078_v6 = vmul.f32 %v3135_v50, %v4563_v31  ;;  %v3142_v10 = vld [vmem:[%s4150_s25 + $0x28] ss:$0 sm:$0xff]  ;;  %v3159_v59 = vld [vmem:[%s4161_s24 + $0x2c] ss:$0 sm:$0xff] }
  0xe5   : > { %v1079_v22 = vmul.f32 %v3134_v36, %v4570_v38  ;;  %v4675_v11 = vadd.f32 %v1058_v7, %v4575_v40  ;;  %v1076_v29 = vsub.f32 %v1070_v23, %v1075_v3  ;;  %v1088_v9 = vmul.f32 %v3138_v45, %v4563_v31  ;;  %v3162_v3 = vld [vmem:[%s4150_s25 + $0x2d] ss:$0 sm:$0xff] }
  0xe6   : > { %v1093_v21 = vmul.f32 %v3139_v54, %v4570_v38  ;;  %v4680_v15 = vadd.f32 %v1062_v58, %v4580_v47  ;;  %v1096_v34 = vmul.f32 %v3139_v54, %v4563_v31  ;;  %v1097_v14 = vmul.f32 %v3138_v45, %v4570_v38  ;;  %v3163_v58 = vld [vmem:[%s4161_s24 + $0x2d] ss:$0 sm:$0xff] }
  0xe7   : > { %v1080_v16 = vadd.f32 %v1079_v22, %v1078_v6  ;;  %v4687_v40 = vadd.f32 %v1076_v29, %v4587_v12  ;;  %v1112_v8 = vmul.f32 %v3142_v10, %v4663_v52  ;;  %v1117_v1 = vmul.f32 %v3143_v5, %v4670_v56 }
  0xe8   : > { %v1094_v18 = vsub.f32 %v1088_v9, %v1093_v21  ;;  %v1098_v24 = vadd.f32 %v1097_v14, %v1096_v34  ;;  %v1120_v31 = vmul.f32 %v3143_v5, %v4663_v52  ;;  %v1121_v38 = vmul.f32 %v3142_v10, %v4670_v56  ;;  %v3166_v21 = vld [vmem:[%s4150_s25 + $0x2e] ss:$0 sm:$0xff] }
  0xe9   : > { %v4692_v47 = vadd.f32 %v1080_v16, %v4592_v63  ;;  %v1118_v33 = vsub.f32 %v1112_v8, %v1117_v1  ;;  %v1130_v35 = vmul.f32 %v3146_v19, %v4663_v52  ;;  %v1135_v30 = vmul.f32 %v3147_v0, %v4670_v56  ;;  %v3167_v16 = vld [vmem:[%s4161_s24 + $0x2e] ss:$0 sm:$0xff]  ;;  %v3170_v1 = vld [vmem:[%s4150_s25 + $0x2f] ss:$0 sm:$0xff] }
  0xea   : > { %v4699_v12 = vadd.f32 %v1094_v18, %v4599_v41  ;;  %v4704_v63 = vadd.f32 %v1098_v24, %v4604_v51  ;;  %v1122_v32 = vadd.f32 %v1121_v38, %v1120_v31  ;;  %v1138_v42 = vmul.f32 %v3147_v0, %v4663_v52  ;;  %v3171_v24 = vld [vmem:[%s4161_s24 + $0x2f] ss:$0 sm:$0xff] }
  0xeb   : > { %v1139_v43 = vmul.f32 %v3146_v19, %v4670_v56  ;;  %v4711_v41 = vadd.f32 %v1118_v33, %v4611_v44  ;;  %v1136_v37 = vsub.f32 %v1130_v35, %v1135_v30  ;;  %v1148_v48 = vmul.f32 %v3150_v25, %v4663_v52 }
  0xec   : > { %v1153_v36 = vmul.f32 %v3151_v28, %v4670_v56  ;;  %v4716_v51 = vadd.f32 %v1122_v32, %v4616_v60  ;;  %v1156_v49 = vmul.f32 %v3151_v28, %v4663_v52  ;;  %v1157_v53 = vmul.f32 %v3150_v25, %v4670_v56  ;;  %v4763_v28 = vld [vmem:[#allocation2 + $0xc] sm:$0x3] }
  0xed   : > { %v1140_v50 = vadd.f32 %v1139_v43, %v1138_v42  ;;  %v4723_v44 = vadd.f32 %v1136_v37, %v4623_v55  ;;  %v1166_v26 = vmul.f32 %v3154_v17, %v4663_v52  ;;  %v1171_v45 = vmul.f32 %v3155_v39, %v4670_v56  ;;  %v4770_v32 = vld [vmem:[#allocation5 + $0xc] sm:$0x3]  ;;  %v3175_v42 = vld [vmem:[%s4161_s24 + $0x30] ss:$0 sm:$0xff] }
  0xee   : > { %v1154_v4 = vsub.f32 %v1148_v48, %v1153_v36  ;;  %v1158_v54 = vadd.f32 %v1157_v53, %v1156_v49  ;;  %v1174_v7 = vmul.f32 %v3155_v39, %v4663_v52  ;;  %v1175_v23 = vmul.f32 %v3154_v17, %v4670_v56  ;;  %v3178_v49 = vld [vmem:[%s4150_s25 + $0x31] ss:$0 sm:$0xff] }
  0xef   : > { %v4728_v60 = vadd.f32 %v1140_v50, %v4628_v13  ;;  %v1172_v6 = vsub.f32 %v1166_v26, %v1171_v45  ;;  %v1184_v22 = vmul.f32 %v3158_v57, %v4663_v52  ;;  %v1189_v10 = vmul.f32 %v3159_v59, %v4670_v56  ;;  %v3179_v53 = vld [vmem:[%s4161_s24 + $0x31] ss:$0 sm:$0xff]  ;;  %v3182_v45 = vld [vmem:[%s4150_s25 + $0x32] ss:$0 sm:$0xff] }
  0xf0   : > { %v4735_v55 = vadd.f32 %v1154_v4, %v4635_v62  ;;  %v4740_v13 = vadd.f32 %v1158_v54, %v4640_v20  ;;  %v1176_v5 = vadd.f32 %v1175_v23, %v1174_v7  ;;  %v1192_v29 = vmul.f32 %v3159_v59, %v4663_v52  ;;  %v3183_v54 = vld [vmem:[%s4161_s24 + $0x32] ss:$0 sm:$0xff] }
  0xf1   : > { %v1193_v9 = vmul.f32 %v3158_v57, %v4670_v56  ;;  %v4747_v62 = vadd.f32 %v1172_v6, %v4647_v46  ;;  %v1190_v34 = vsub.f32 %v1184_v22, %v1189_v10  ;;  %v1202_v14 = vmul.f32 %v3162_v3, %v4663_v52  ;;  %v3186_v10 = vld [vmem:[%s4150_s25 + $0x33] ss:$0 sm:$0xff] }
  0xf2   : > { %v1207_v19 = vmul.f32 %v3163_v58, %v4670_v56  ;;  %v4752_v0 = vadd.f32 %v1176_v5, %v4652_v2  ;;  %v1210_v18 = vmul.f32 %v3163_v58, %v4663_v52  ;;  %v1211_v8 = vmul.f32 %v3162_v3, %v4670_v56  ;;  %v3187_v5 = vld [vmem:[%s4161_s24 + $0x33] ss:$0 sm:$0xff] }
  0xf3   : > { %v1194_v20 = vadd.f32 %v1193_v9, %v1192_v29  ;;  %v4759_v46 = vadd.f32 %v1190_v34, %v4659_v61  ;;  %v1220_v38 = vmul.f32 %v3166_v21, %v4663_v52  ;;  %v1225_v25 = vmul.f32 %v3167_v16, %v4670_v56  ;;  %v3174_v61 = vld [vmem:[%s4150_s25 + $0x30] ss:$0 sm:$0xff] }
  0xf4   : > { %v1208_v31 = vsub.f32 %v1202_v14, %v1207_v19  ;;  %v1212_v33 = vadd.f32 %v1211_v8, %v1210_v18  ;;  %v1228_v35 = vmul.f32 %v3167_v16, %v4663_v52  ;;  %v1229_v30 = vmul.f32 %v3166_v21, %v4670_v56  ;;  %v3190_v19 = vld [vmem:[%s4150_s25 + $0x34] ss:$0 sm:$0xff] }
  0xf5   : > { %v4766_v2 = vadd.f32 %v1194_v20, %v4666_v27  ;;  %v1226_v17 = vsub.f32 %v1220_v38, %v1225_v25  ;;  %v1238_v39 = vmul.f32 %v3170_v1, %v4663_v52  ;;  %v1243_v27 = vmul.f32 %v3171_v24, %v4670_v56  ;;  %v3191_v20 = vld [vmem:[%s4161_s24 + $0x34] ss:$0 sm:$0xff]  ;;  %v3194_v25 = vld [vmem:[%s4150_s25 + $0x35] ss:$0 sm:$0xff] }
  0xf6   : > { %v4775_v43 = vadd.f32 %v1208_v31, %v4675_v11  ;;  %v4780_v37 = vadd.f32 %v1212_v33, %v4680_v15  ;;  %v1230_v48 = vadd.f32 %v1229_v30, %v1228_v35  ;;  %v1246_v36 = vmul.f32 %v3171_v24, %v4663_v52  ;;  %v3195_v33 = vld [vmem:[%s4161_s24 + $0x35] ss:$0 sm:$0xff] }
  0xf7   : > { %v1247_v50 = vmul.f32 %v3170_v1, %v4670_v56  ;;  %v4787_v11 = vadd.f32 %v1226_v17, %v4687_v40  ;;  %v1244_v57 = vsub.f32 %v1238_v39, %v1243_v27  ;;  %v1262_v59 = vmul.f32 %v3174_v61, %v4763_v28  ;;  %v3198_v27 = vld [vmem:[%s4150_s25 + $0x36] ss:$0 sm:$0xff] }
  0xf8   : > { %v1267_v4 = vmul.f32 %v3175_v42, %v4770_v32  ;;  %v4792_v15 = vadd.f32 %v1230_v48, %v4692_v47  ;;  %v1270_v52 = vmul.f32 %v3175_v42, %v4763_v28  ;;  %v1271_v56 = vmul.f32 %v3174_v61, %v4770_v32  ;;  %v3199_v48 = vld [vmem:[%s4161_s24 + $0x36] ss:$0 sm:$0xff] }
  0xf9   : > { %v1248_v26 = vadd.f32 %v1247_v50, %v1246_v36  ;;  %v4799_v40 = vadd.f32 %v1244_v57, %v4699_v12  ;;  %v1280_v23 = vmul.f32 %v3178_v49, %v4763_v28  ;;  %v1285_v3 = vmul.f32 %v3179_v53, %v4770_v32 }
  0xfa   : > { %v1268_v7 = vsub.f32 %v1262_v59, %v1267_v4  ;;  %v1272_v58 = vadd.f32 %v1271_v56, %v1270_v52  ;;  %v1288_v6 = vmul.f32 %v3179_v53, %v4763_v28  ;;  %v1289_v22 = vmul.f32 %v3178_v49, %v4770_v32  ;;  %v3202_v4 = vld [vmem:[%s4150_s25 + $0x37] ss:$0 sm:$0xff] }
  0xfb   : > { %v4804_v47 = vadd.f32 %v1248_v26, %v4704_v63  ;;  %v1286_v29 = vsub.f32 %v1280_v23, %v1285_v3  ;;  %v1298_v9 = vmul.f32 %v3182_v45, %v4763_v28  ;;  %v1303_v21 = vmul.f32 %v3183_v54, %v4770_v32  ;;  %v3203_v26 = vld [vmem:[%s4161_s24 + $0x37] ss:$0 sm:$0xff] }
  0xfc   : > { %v4811_v12 = vadd.f32 %v1268_v7, %v4711_v41  ;;  %v4816_v63 = vadd.f32 %v1272_v58, %v4716_v51  ;;  %v1290_v16 = vadd.f32 %v1289_v22, %v1288_v6  ;;  %v1306_v34 = vmul.f32 %v3183_v54, %v4763_v28  ;;  %v4863_v54 = vld [vmem:[#allocation2 + $0xe] sm:$0x3]  ;;  %v3207_v6 = vld [vmem:[%s4161_s24 + $0x38] ss:$0 sm:$0xff] }
  0xfd   : > { %v1307_v14 = vmul.f32 %v3182_v45, %v4770_v32  ;;  %v4823_v41 = vadd.f32 %v1286_v29, %v4723_v44  ;;  %v1304_v18 = vsub.f32 %v1298_v9, %v1303_v21  ;;  %v1316_v8 = vmul.f32 %v3186_v10, %v4763_v28  ;;  %v4870_v58 = vld [vmem:[#allocation5 + $0xe] sm:$0x3] }
  0xfe   : > { %v1321_v1 = vmul.f32 %v3187_v5, %v4770_v32  ;;  %v4828_v51 = vadd.f32 %v1290_v16, %v4728_v60  ;;  %v1324_v31 = vmul.f32 %v3187_v5, %v4763_v28  ;;  %v1325_v38 = vmul.f32 %v3186_v10, %v4770_v32 }
  0xff   : > { %v1308_v24 = vadd.f32 %v1307_v14, %v1306_v34  ;;  %v4835_v44 = vadd.f32 %v1304_v18, %v4735_v55  ;;  %v1334_v30 = vmul.f32 %v3190_v19, %v4763_v28  ;;  %v1339_v61 = vmul.f32 %v3191_v20, %v4770_v32  ;;  %v3210_v34 = vld [vmem:[%s4150_s25 + $0x39] ss:$0 sm:$0xff] }
 0x100   : > { %v1322_v35 = vsub.f32 %v1316_v8, %v1321_v1  ;;  %v1326_v42 = vadd.f32 %v1325_v38, %v1324_v31  ;;  %v1342_v17 = vmul.f32 %v3191_v20, %v4763_v28  ;;  %v1343_v39 = vmul.f32 %v3190_v19, %v4770_v32  ;;  %v3211_v14 = vld [vmem:[%s4161_s24 + $0x39] ss:$0 sm:$0xff]  ;;  %v3214_v1 = vld [vmem:[%s4150_s25 + $0x3a] ss:$0 sm:$0xff] }
 0x101   : > { %v4840_v60 = vadd.f32 %v1308_v24, %v4740_v13  ;;  %v1340_v36 = vsub.f32 %v1334_v30, %v1339_v61  ;;  %v1352_v50 = vmul.f32 %v3194_v25, %v4763_v28  ;;  %v1357_v49 = vmul.f32 %v3195_v33, %v4770_v32  ;;  %v3215_v24 = vld [vmem:[%s4161_s24 + $0x3a] ss:$0 sm:$0xff]  ;;  %v3218_v61 = vld [vmem:[%s4150_s25 + $0x3b] ss:$0 sm:$0xff] }
 0x102   : > { %v4847_v55 = vadd.f32 %v1322_v35, %v4747_v62  ;;  %v4852_v53 = vadd.f32 %v1326_v42, %v4752_v0  ;;  %v1344_v13 = vadd.f32 %v1343_v39, %v1342_v17  ;;  %v1360_v57 = vmul.f32 %v3195_v33, %v4763_v28  ;;  %v3219_v42 = vld [vmem:[%s4161_s24 + $0x3b] ss:$0 sm:$0xff] }
 0x103   : > { %v1361_v59 = vmul.f32 %v3194_v25, %v4770_v32  ;;  %v4859_v62 = vadd.f32 %v1340_v36, %v4759_v46  ;;  %v1358_v52 = vsub.f32 %v1352_v50, %v1357_v49  ;;  %v1370_v56 = vmul.f32 %v3198_v27, %v4763_v28  ;;  %v3206_v46 = vld [vmem:[%s4150_s25 + $0x38] ss:$0 sm:$0xff]  ;;  %v3222_v49 = vld [vmem:[%s4150_s25 + $0x3c] ss:$0 sm:$0xff] }
 0x104   : > { %v1375_v45 = vmul.f32 %v3199_v48, %v4770_v32  ;;  %v4866_v0 = vadd.f32 %v1344_v13, %v4766_v2  ;;  %v1378_v23 = vmul.f32 %v3199_v48, %v4763_v28  ;;  %v1379_v3 = vmul.f32 %v3198_v27, %v4770_v32  ;;  %v3223_v13 = vld [vmem:[%s4161_s24 + $0x3c] ss:$0 sm:$0xff] }
 0x105   : > { %v1362_v7 = vadd.f32 %v1361_v59, %v1360_v57  ;;  %v4875_v22 = vadd.f32 %v1358_v52, %v4775_v43  ;;  %v1388_v5 = vmul.f32 %v3202_v4, %v4763_v28  ;;  %v1393_v2 = vmul.f32 %v3203_v26, %v4770_v32 }
 0x106   : > { %v1376_v10 = vsub.f32 %v1370_v56, %v1375_v45  ;;  %v1380_v9 = vadd.f32 %v1379_v3, %v1378_v23  ;;  %v1396_v21 = vmul.f32 %v3203_v26, %v4763_v28  ;;  %v1397_v16 = vmul.f32 %v3202_v4, %v4770_v32  ;;  %v3226_v45 = vld [vmem:[%s4150_s25 + $0x3d] ss:$0 sm:$0xff] }
 0x107   : > { %v4880_v29 = vadd.f32 %v1362_v7, %v4780_v37  ;;  %v1394_v19 = vsub.f32 %v1388_v5, %v1393_v2  ;;  %v1412_v20 = vmul.f32 %v3206_v46, %v4863_v54  ;;  %v1417_v18 = vmul.f32 %v3207_v6, %v4870_v58  ;;  %v3227_v7 = vld [vmem:[%s4161_s24 + $0x3d] ss:$0 sm:$0xff]  ;;  %v3230_v2 = vld [vmem:[%s4150_s25 + $0x3e] ss:$0 sm:$0xff] }
 0x108   : > { %v4887_v43 = vadd.f32 %v1376_v10, %v4787_v11  ;;  %v4892_v37 = vadd.f32 %v1380_v9, %v4792_v15  ;;  %v1398_v8 = vadd.f32 %v1397_v16, %v1396_v21  ;;  %v1420_v28 = vmul.f32 %v3207_v6, %v4863_v54  ;;  %v3231_v9 = vld [vmem:[%s4161_s24 + $0x3e] ss:$0 sm:$0xff] }
 0x109   : > { %v1421_v32 = vmul.f32 %v3206_v46, %v4870_v58  ;;  %v4899_v11 = vadd.f32 %v1394_v19, %v4799_v40  ;;  %v1418_v31 = vsub.f32 %v1412_v20, %v1417_v18  ;;  %v1430_v38 = vmul.f32 %v3210_v34, %v4863_v54  ;;  %v3234_v18 = vld [vmem:[%s4150_s25 + $0x3f] ss:$0 sm:$0xff] }
 0x10a   : > { %v1435_v25 = vmul.f32 %v3211_v14, %v4870_v58  ;;  %v4904_v15 = vadd.f32 %v1398_v8, %v4804_v47  ;;  %v1438_v35 = vmul.f32 %v3211_v14, %v4863_v54  ;;  %v1439_v30 = vmul.f32 %v3210_v34, %v4870_v58  ;;  %v3235_v8 = vld [vmem:[%s4161_s24 + $0x3f] ss:$0 sm:$0xff] }
 0x10b   : > { %v1422_v33 = vadd.f32 %v1421_v32, %v1420_v28  ;;  %v4911_v40 = vadd.f32 %v1418_v31, %v4811_v12  ;;  %v1448_v39 = vmul.f32 %v3214_v1, %v4863_v54  ;;  %v1453_v27 = vmul.f32 %v3215_v24, %v4870_v58 }
 0x10c   : > { %v1436_v17 = vsub.f32 %v1430_v38, %v1435_v25  ;;  %v1440_v48 = vadd.f32 %v1439_v30, %v1438_v35  ;;  %v1456_v36 = vmul.f32 %v3215_v24, %v4863_v54  ;;  %v1457_v50 = vmul.f32 %v3214_v1, %v4870_v58  ;;  %v4963_v24 = vld [vmem:[#allocation2 + $0x10] sm:$0x3]  ;;  %v3239_v35 = vld [vmem:[%s4161_s24 + $0x40] ss:$0 sm:$0xff] }
 0x10d   : > { %v4916_v47 = vadd.f32 %v1422_v33, %v4816_v63  ;;  %v1454_v57 = vsub.f32 %v1448_v39, %v1453_v27  ;;  %v1466_v59 = vmul.f32 %v3218_v61, %v4863_v54  ;;  %v1471_v4 = vmul.f32 %v3219_v42, %v4870_v58  ;;  %v4970_v33 = vld [vmem:[#allocation5 + $0x10] sm:$0x3] }
 0x10e   : > { %v4923_v12 = vadd.f32 %v1436_v17, %v4823_v41  ;;  %v4928_v63 = vadd.f32 %v1440_v48, %v4828_v51  ;;  %v1458_v26 = vadd.f32 %v1457_v50, %v1456_v36  ;;  %v1474_v52 = vmul.f32 %v3219_v42, %v4863_v54  ;;  %v3242_v36 = vld [vmem:[%s4150_s25 + $0x41] ss:$0 sm:$0xff] }
 0x10f   : > { %v1475_v56 = vmul.f32 %v3218_v61, %v4870_v58  ;;  %v4935_v41 = vadd.f32 %v1454_v57, %v4835_v44  ;;  %v1472_v23 = vsub.f32 %v1466_v59, %v1471_v4  ;;  %v1484_v3 = vmul.f32 %v3222_v49, %v4863_v54  ;;  %v3243_v50 = vld [vmem:[%s4161_s24 + $0x41] ss:$0 sm:$0xff]  ;;  %v3246_v4 = vld [vmem:[%s4150_s25 + $0x42] ss:$0 sm:$0xff] }
 0x110   : > { %v1489_v46 = vmul.f32 %v3223_v13, %v4870_v58  ;;  %v4940_v51 = vadd.f32 %v1458_v26, %v4840_v60  ;;  %v1492_v10 = vmul.f32 %v3223_v13, %v4863_v54  ;;  %v1493_v5 = vmul.f32 %v3222_v49, %v4870_v58  ;;  %v3247_v26 = vld [vmem:[%s4161_s24 + $0x42] ss:$0 sm:$0xff] }
 0x111   : > { %v1476_v6 = vadd.f32 %v1475_v56, %v1474_v52  ;;  %v4947_v44 = vadd.f32 %v1472_v23, %v4847_v55  ;;  %v1502_v16 = vmul.f32 %v3226_v45, %v4863_v54  ;;  %v1507_v34 = vmul.f32 %v3227_v7, %v4870_v58 }
 0x112   : > { %v1490_v21 = vsub.f32 %v1484_v3, %v1489_v46  ;;  %v1494_v60 = vadd.f32 %v1493_v5, %v1492_v10  ;;  %v1510_v19 = vmul.f32 %v3227_v7, %v4863_v54  ;;  %v1511_v20 = vmul.f32 %v3226_v45, %v4870_v58  ;;  %v3250_v46 = vld [vmem:[%s4150_s25 + $0x43] ss:$0 sm:$0xff] }
 0x113   : > { %v4952_v14 = vadd.f32 %v1476_v6, %v4852_v53  ;;  %v1508_v28 = vsub.f32 %v1502_v16, %v1507_v34  ;;  %v1520_v32 = vmul.f32 %v3230_v2, %v4863_v54  ;;  %v1525_v1 = vmul.f32 %v3231_v9, %v4870_v58  ;;  %v3251_v6 = vld [vmem:[%s4161_s24 + $0x43] ss:$0 sm:$0xff]  ;;  %v3254_v34 = vld [vmem:[%s4150_s25 + $0x44] ss:$0 sm:$0xff] }
 0x114   : > { %v4959_v55 = vadd.f32 %v1490_v21, %v4859_v62  ;;  %v4966_v53 = vadd.f32 %v1494_v60, %v4866_v0  ;;  %v1512_v31 = vadd.f32 %v1511_v20, %v1510_v19  ;;  %v1528_v38 = vmul.f32 %v3231_v9, %v4863_v54  ;;  %v3238_v62 = vld [vmem:[%s4150_s25 + $0x40] ss:$0 sm:$0xff]  ;;  %v3255_v60 = vld [vmem:[%s4161_s24 + $0x44] ss:$0 sm:$0xff] }
 0x115   : > { %v1529_v25 = vmul.f32 %v3230_v2, %v4870_v58  ;;  %v4975_v30 = vadd.f32 %v1508_v28, %v4875_v22  ;;  %v1526_v61 = vsub.f32 %v1520_v32, %v1525_v1  ;;  %v1538_v42 = vmul.f32 %v3234_v18, %v4863_v54  ;;  %v3258_v1 = vld [vmem:[%s4150_s25 + $0x45] ss:$0 sm:$0xff] }
 0x116   : > { %v1543_v0 = vmul.f32 %v3235_v8, %v4870_v58  ;;  %v4980_v17 = vadd.f32 %v1512_v31, %v4880_v29  ;;  %v1546_v27 = vmul.f32 %v3235_v8, %v4863_v54  ;;  %v1547_v48 = vmul.f32 %v3234_v18, %v4870_v58  ;;  %v3259_v31 = vld [vmem:[%s4161_s24 + $0x45] ss:$0 sm:$0xff] }
 0x117   : > { %v1530_v39 = vadd.f32 %v1529_v25, %v1528_v38  ;;  %v4987_v22 = vadd.f32 %v1526_v61, %v4887_v43  ;;  %v1562_v13 = vmul.f32 %v3238_v62, %v4963_v24  ;;  %v1567_v57 = vmul.f32 %v3239_v35, %v4970_v33 }
 0x118   : > { %v1544_v49 = vsub.f32 %v1538_v42, %v1543_v0  ;;  %v1548_v59 = vadd.f32 %v1547_v48, %v1546_v27  ;;  %v1570_v54 = vmul.f32 %v3239_v35, %v4963_v24  ;;  %v1571_v58 = vmul.f32 %v3238_v62, %v4970_v33  ;;  %v3262_v0 = vld [vmem:[%s4150_s25 + $0x46] ss:$0 sm:$0xff] }
 0x119   : > { %v4992_v29 = vadd.f32 %v1530_v39, %v4892_v37  ;;  %v1568_v52 = vsub.f32 %v1562_v13, %v1567_v57  ;;  %v1580_v56 = vmul.f32 %v3242_v36, %v4963_v24  ;;  %v1585_v45 = vmul.f32 %v3243_v50, %v4970_v33  ;;  %v3263_v39 = vld [vmem:[%s4161_s24 + $0x46] ss:$0 sm:$0xff]  ;;  %v3266_v57 = vld [vmem:[%s4150_s25 + $0x47] ss:$0 sm:$0xff] }
 0x11a   : > { %v4999_v43 = vadd.f32 %v1544_v49, %v4899_v11  ;;  %v5004_v37 = vadd.f32 %v1548_v59, %v4904_v15  ;;  %v1572_v7 = vadd.f32 %v1571_v58, %v1570_v54  ;;  %v1588_v23 = vmul.f32 %v3243_v50, %v4963_v24  ;;  %v3267_v59 = vld [vmem:[%s4161_s24 + $0x47] ss:$0 sm:$0xff] }
 0x11b   : > { %v1589_v3 = vmul.f32 %v3242_v36, %v4970_v33  ;;  %v5011_v11 = vadd.f32 %v1568_v52, %v4911_v40  ;;  %v1586_v10 = vsub.f32 %v1580_v56, %v1585_v45  ;;  %v1598_v5 = vmul.f32 %v3246_v4, %v4963_v24 }
 0x11c   : > { %v1603_v2 = vmul.f32 %v3247_v26, %v4970_v33  ;;  %v5016_v15 = vadd.f32 %v1572_v7, %v4916_v47  ;;  %v1606_v21 = vmul.f32 %v3247_v26, %v4963_v24  ;;  %v1607_v16 = vmul.f32 %v3246_v4, %v4970_v33  ;;  %v5063_v26 = vld [vmem:[#allocation2 + $0x12] sm:$0x3] }
 0x11d   : > { %v1590_v9 = vadd.f32 %v1589_v3, %v1588_v23  ;;  %v5023_v40 = vadd.f32 %v1586_v10, %v4923_v12  ;;  %v1616_v20 = vmul.f32 %v3250_v46, %v4963_v24  ;;  %v1621_v18 = vmul.f32 %v3251_v6, %v4970_v33  ;;  %v5070_v7 = vld [vmem:[#allocation5 + $0x12] sm:$0x3]  ;;  %v3271_v23 = vld [vmem:[%s4161_s24 + $0x48] ss:$0 sm:$0xff] }
 0x11e   : > { %v1604_v19 = vsub.f32 %v1598_v5, %v1603_v2  ;;  %v1608_v8 = vadd.f32 %v1607_v16, %v1606_v21  ;;  %v1624_v28 = vmul.f32 %v3251_v6, %v4963_v24  ;;  %v1625_v32 = vmul.f32 %v3250_v46, %v4970_v33  ;;  %v3274_v21 = vld [vmem:[%s4150_s25 + $0x49] ss:$0 sm:$0xff] }
 0x11f   : > { %v5028_v47 = vadd.f32 %v1590_v9, %v4928_v63  ;;  %v1622_v38 = vsub.f32 %v1616_v20, %v1621_v18  ;;  %v1634_v25 = vmul.f32 %v3254_v34, %v4963_v24  ;;  %v1639_v62 = vmul.f32 %v3255_v60, %v4970_v33  ;;  %v3275_v16 = vld [vmem:[%s4161_s24 + $0x49] ss:$0 sm:$0xff]  ;;  %v3278_v18 = vld [vmem:[%s4150_s25 + $0x4a] ss:$0 sm:$0xff] }
 0x120   : > { %v5035_v12 = vadd.f32 %v1604_v19, %v4935_v41  ;;  %v5040_v63 = vadd.f32 %v1608_v8, %v4940_v51  ;;  %v1626_v35 = vadd.f32 %v1625_v32, %v1624_v28  ;;  %v1642_v61 = vmul.f32 %v3255_v60, %v4963_v24  ;;  %v3279_v8 = vld [vmem:[%s4161_s24 + $0x4a] ss:$0 sm:$0xff] }
 0x121   : > { %v1643_v42 = vmul.f32 %v3254_v34, %v4970_v33  ;;  %v5047_v41 = vadd.f32 %v1622_v38, %v4947_v44  ;;  %v1640_v27 = vsub.f32 %v1634_v25, %v1639_v62  ;;  %v1652_v48 = vmul.f32 %v3258_v1, %v4963_v24  ;;  %v3282_v62 = vld [vmem:[%s4150_s25 + $0x4b] ss:$0 sm:$0xff] }
 0x122   : > { %v1657_v36 = vmul.f32 %v3259_v31, %v4970_v33  ;;  %v5052_v50 = vadd.f32 %v1626_v35, %v4952_v14  ;;  %v1660_v49 = vmul.f32 %v3259_v31, %v4963_v24  ;;  %v1661_v13 = vmul.f32 %v3258_v1, %v4970_v33  ;;  %v3283_v35 = vld [vmem:[%s4161_s24 + $0x4b] ss:$0 sm:$0xff] }
 0x123   : > { %v1644_v51 = vadd.f32 %v1643_v42, %v1642_v61  ;;  %v5059_v44 = vadd.f32 %v1640_v27, %v4959_v55  ;;  %v1670_v58 = vmul.f32 %v3262_v0, %v4963_v24  ;;  %v1675_v4 = vmul.f32 %v3263_v39, %v4970_v33  ;;  %v3270_v55 = vld [vmem:[%s4150_s25 + $0x48] ss:$0 sm:$0xff] }
 0x124   : > { %v1658_v54 = vsub.f32 %v1652_v48, %v1657_v36  ;;  %v1662_v52 = vadd.f32 %v1661_v13, %v1660_v49  ;;  %v1678_v56 = vmul.f32 %v3263_v39, %v4963_v24  ;;  %v1679_v45 = vmul.f32 %v3262_v0, %v4970_v33  ;;  %v3286_v36 = vld [vmem:[%s4150_s25 + $0x4c] ss:$0 sm:$0xff] }
 0x125   : > { %v5066_v14 = vadd.f32 %v1644_v51, %v4966_v53  ;;  %v1676_v46 = vsub.f32 %v1670_v58, %v1675_v4  ;;  %v1688_v6 = vmul.f32 %v3266_v57, %v4963_v24  ;;  %v1693_v53 = vmul.f32 %v3267_v59, %v4970_v33  ;;  %v3287_v51 = vld [vmem:[%s4161_s24 + $0x4c] ss:$0 sm:$0xff]  ;;  %v3290_v4 = vld [vmem:[%s4150_s25 + $0x4d] ss:$0 sm:$0xff] }
 0x126   : > { %v5075_v3 = vadd.f32 %v1658_v54, %v4975_v30  ;;  %v5080_v10 = vadd.f32 %v1662_v52, %v4980_v17  ;;  %v1680_v5 = vadd.f32 %v1679_v45, %v1678_v56  ;;  %v1696_v2 = vmul.f32 %v3267_v59, %v4963_v24  ;;  %v3291_v52 = vld [vmem:[%s4161_s24 + $0x4d] ss:$0 sm:$0xff] }
 0x127   : > { %v1697_v9 = vmul.f32 %v3266_v57, %v4970_v33  ;;  %v5087_v30 = vadd.f32 %v1676_v46, %v4987_v22  ;;  %v1694_v34 = vsub.f32 %v1688_v6, %v1693_v53  ;;  %v1712_v60 = vmul.f32 %v3270_v55, %v5063_v26  ;;  %v3294_v53 = vld [vmem:[%s4150_s25 + $0x4e] ss:$0 sm:$0xff] }
 0x128   : > { %v1717_v19 = vmul.f32 %v3271_v23, %v5070_v7  ;;  %v5092_v17 = vadd.f32 %v1680_v5, %v4992_v29  ;;  %v1720_v24 = vmul.f32 %v3271_v23, %v5063_v26  ;;  %v1721_v33 = vmul.f32 %v3270_v55, %v5070_v7  ;;  %v3295_v5 = vld [vmem:[%s4161_s24 + $0x4e] ss:$0 sm:$0xff] }
 0x129   : > { %v1698_v20 = vadd.f32 %v1697_v9, %v1696_v2  ;;  %v5099_v22 = vadd.f32 %v1694_v34, %v4999_v43  ;;  %v1730_v32 = vmul.f32 %v3274_v21, %v5063_v26  ;;  %v1735_v1 = vmul.f32 %v3275_v16, %v5070_v7 }
 0x12a   : > { %v1718_v28 = vsub.f32 %v1712_v60, %v1717_v19  ;;  %v1722_v31 = vadd.f32 %v1721_v33, %v1720_v24  ;;  %v1738_v38 = vmul.f32 %v3275_v16, %v5063_v26  ;;  %v1739_v25 = vmul.f32 %v3274_v21, %v5070_v7  ;;  %v3298_v19 = vld [vmem:[%s4150_s25 + $0x4f] ss:$0 sm:$0xff] }
 0x12b   : > { %v5104_v29 = vadd.f32 %v1698_v20, %v5004_v37  ;;  %v1736_v61 = vsub.f32 %v1730_v32, %v1735_v1  ;;  %v1748_v42 = vmul.f32 %v3278_v18, %v5063_v26  ;;  %v1753_v0 = vmul.f32 %v3279_v8, %v5070_v7  ;;  %v3299_v20 = vld [vmem:[%s4161_s24 + $0x4f] ss:$0 sm:$0xff] }
 0x12c   : > { %v5111_v43 = vadd.f32 %v1718_v28, %v5011_v11  ;;  %v5116_v37 = vadd.f32 %v1722_v31, %v5016_v15  ;;  %v1740_v39 = vadd.f32 %v1739_v25, %v1738_v38  ;;  %v1756_v27 = vmul.f32 %v3279_v8, %v5063_v26  ;;  %v5163_v8 = vld [vmem:[#allocation2 + $0x14] sm:$0x3]  ;;  %v3303_v38 = vld [vmem:[%s4161_s24 + $0x50] ss:$0 sm:$0xff] }
 0x12d   : > { %v1757_v48 = vmul.f32 %v3278_v18, %v5070_v7  ;;  %v5123_v11 = vadd.f32 %v1736_v61, %v5023_v40  ;;  %v1754_v49 = vsub.f32 %v1748_v42, %v1753_v0  ;;  %v1766_v13 = vmul.f32 %v3282_v62, %v5063_v26  ;;  %v5170_v31 = vld [vmem:[#allocation5 + $0x14] sm:$0x3] }
 0x12e   : > { %v1771_v57 = vmul.f32 %v3283_v35, %v5070_v7  ;;  %v5128_v15 = vadd.f32 %v1740_v39, %v5028_v47  ;;  %v1774_v54 = vmul.f32 %v3283_v35, %v5063_v26  ;;  %v1775_v58 = vmul.f32 %v3282_v62, %v5070_v7 }
 0x12f   : > { %v1758_v59 = vadd.f32 %v1757_v48, %v1756_v27  ;;  %v5135_v40 = vadd.f32 %v1754_v49, %v5035_v12  ;;  %v1784_v45 = vmul.f32 %v3286_v36, %v5063_v26  ;;  %v1789_v55 = vmul.f32 %v3287_v51, %v5070_v7  ;;  %v3306_v27 = vld [vmem:[%s4150_s25 + $0x51] ss:$0 sm:$0xff] }
 0x130   : > { %v1772_v56 = vsub.f32 %v1766_v13, %v1771_v57  ;;  %v1776_v23 = vadd.f32 %v1775_v58, %v1774_v54  ;;  %v1792_v46 = vmul.f32 %v3287_v51, %v5063_v26  ;;  %v1793_v6 = vmul.f32 %v3286_v36, %v5070_v7  ;;  %v3307_v48 = vld [vmem:[%s4161_s24 + $0x51] ss:$0 sm:$0xff]  ;;  %v3310_v57 = vld [vmem:[%s4150_s25 + $0x52] ss:$0 sm:$0xff] }
 0x131   : > { %v5140_v47 = vadd.f32 %v1758_v59, %v5040_v63  ;;  %v1790_v2 = vsub.f32 %v1784_v45, %v1789_v55  ;;  %v1802_v9 = vmul.f32 %v3290_v4, %v5063_v26  ;;  %v1807_v21 = vmul.f32 %v3291_v52, %v5070_v7  ;;  %v3311_v59 = vld [vmem:[%s4161_s24 + $0x52] ss:$0 sm:$0xff]  ;;  %v3314_v55 = vld [vmem:[%s4150_s25 + $0x53] ss:$0 sm:$0xff] }
 0x132   : > { %v5147_v12 = vadd.f32 %v1772_v56, %v5047_v41  ;;  %v5152_v16 = vadd.f32 %v1776_v23, %v5052_v50  ;;  %v1794_v63 = vadd.f32 %v1793_v6, %v1792_v46  ;;  %v1810_v34 = vmul.f32 %v3291_v52, %v5063_v26  ;;  %v3315_v23 = vld [vmem:[%s4161_s24 + $0x53] ss:$0 sm:$0xff] }
 0x133   : > { %v1811_v60 = vmul.f32 %v3290_v4, %v5070_v7  ;;  %v5159_v41 = vadd.f32 %v1790_v2, %v5059_v44  ;;  %v1808_v24 = vsub.f32 %v1802_v9, %v1807_v21  ;;  %v1820_v33 = vmul.f32 %v3294_v53, %v5063_v26  ;;  %v3302_v44 = vld [vmem:[%s4150_s25 + $0x50] ss:$0 sm:$0xff]  ;;  %v3318_v21 = vld [vmem:[%s4150_s25 + $0x54] ss:$0 sm:$0xff] }
 0x134   : > { %v1825_v18 = vmul.f32 %v3295_v5, %v5070_v7  ;;  %v5166_v50 = vadd.f32 %v1794_v63, %v5066_v14  ;;  %v1828_v32 = vmul.f32 %v3295_v5, %v5063_v26  ;;  %v1829_v1 = vmul.f32 %v3294_v53, %v5070_v7  ;;  %v3319_v63 = vld [vmem:[%s4161_s24 + $0x54] ss:$0 sm:$0xff] }
 0x135   : > { %v1812_v28 = vadd.f32 %v1811_v60, %v1810_v34  ;;  %v5175_v25 = vadd.f32 %v1808_v24, %v5075_v3  ;;  %v1838_v35 = vmul.f32 %v3298_v19, %v5063_v26  ;;  %v1843_v14 = vmul.f32 %v3299_v20, %v5070_v7 }
 0x136   : > { %v1826_v62 = vsub.f32 %v1820_v33, %v1825_v18  ;;  %v1830_v42 = vadd.f32 %v1829_v1, %v1828_v32  ;;  %v1846_v0 = vmul.f32 %v3299_v20, %v5063_v26  ;;  %v1847_v39 = vmul.f32 %v3298_v19, %v5070_v7  ;;  %v3322_v18 = vld [vmem:[%s4150_s25 + $0x55] ss:$0 sm:$0xff] }
 0x137   : > { %v5180_v61 = vadd.f32 %v1812_v28, %v5080_v10  ;;  %v1844_v36 = vsub.f32 %v1838_v35, %v1843_v14  ;;  %v1862_v51 = vmul.f32 %v3302_v44, %v5163_v8  ;;  %v1867_v49 = vmul.f32 %v3303_v38, %v5170_v31  ;;  %v3323_v28 = vld [vmem:[%s4161_s24 + $0x55] ss:$0 sm:$0xff]  ;;  %v3326_v14 = vld [vmem:[%s4150_s25 + $0x56] ss:$0 sm:$0xff] }
 0x138   : > { %v5187_v3 = vadd.f32 %v1826_v62, %v5087_v30  ;;  %v5192_v10 = vadd.f32 %v1830_v42, %v5092_v17  ;;  %v1848_v13 = vadd.f32 %v1847_v39, %v1846_v0  ;;  %v1870_v26 = vmul.f32 %v3303_v38, %v5163_v8  ;;  %v3327_v42 = vld [vmem:[%s4161_s24 + $0x56] ss:$0 sm:$0xff] }
 0x139   : > { %v1871_v7 = vmul.f32 %v3302_v44, %v5170_v31  ;;  %v5199_v30 = vadd.f32 %v1844_v36, %v5099_v22  ;;  %v1868_v54 = vsub.f32 %v1862_v51, %v1867_v49  ;;  %v1880_v58 = vmul.f32 %v3306_v27, %v5163_v8  ;;  %v3330_v49 = vld [vmem:[%s4150_s25 + $0x57] ss:$0 sm:$0xff] }
 0x13a   : > { %v1885_v4 = vmul.f32 %v3307_v48, %v5170_v31  ;;  %v5204_v17 = vadd.f32 %v1848_v13, %v5104_v29  ;;  %v1888_v56 = vmul.f32 %v3307_v48, %v5163_v8  ;;  %v1889_v45 = vmul.f32 %v3306_v27, %v5170_v31  ;;  %v3331_v13 = vld [vmem:[%s4161_s24 + $0x57] ss:$0 sm:$0xff] }
 0x13b   : > { %v1872_v52 = vadd.f32 %v1871_v7, %v1870_v26  ;;  %v5211_v22 = vadd.f32 %v1868_v54, %v5111_v43  ;;  %v1898_v6 = vmul.f32 %v3310_v57, %v5163_v8  ;;  %v1903_v53 = vmul.f32 %v3311_v59, %v5170_v31 }
 0x13c   : > { %v1886_v46 = vsub.f32 %v1880_v58, %v1885_v4  ;;  %v1890_v5 = vadd.f32 %v1889_v45, %v1888_v56  ;;  %v1906_v2 = vmul.f32 %v3311_v59, %v5163_v8  ;;  %v1907_v9 = vmul.f32 %v3310_v57, %v5170_v31  ;;  %v5263_v59 = vld [vmem:[#allocation2 + $0x16] sm:$0x3]  ;;  %v3335_v56 = vld [vmem:[%s4161_s24 + $0x58] ss:$0 sm:$0xff] }
 0x13d   : > { %v5216_v29 = vadd.f32 %v1872_v52, %v5116_v37  ;;  %v1904_v34 = vsub.f32 %v1898_v6, %v1903_v53  ;;  %v1916_v60 = vmul.f32 %v3314_v55, %v5163_v8  ;;  %v1921_v19 = vmul.f32 %v3315_v23, %v5170_v31  ;;  %v5270_v52 = vld [vmem:[#allocation5 + $0x16] sm:$0x3] }
 0x13e   : > { %v5223_v43 = vadd.f32 %v1886_v46, %v5123_v11  ;;  %v5228_v37 = vadd.f32 %v1890_v5, %v5128_v15  ;;  %v1908_v20 = vadd.f32 %v1907_v9, %v1906_v2  ;;  %v1924_v24 = vmul.f32 %v3315_v23, %v5163_v8  ;;  %v3338_v2 = vld [vmem:[%s4150_s25 + $0x59] ss:$0 sm:$0xff] }
 0x13f   : > { %v1925_v33 = vmul.f32 %v3314_v55, %v5170_v31  ;;  %v5235_v11 = vadd.f32 %v1904_v34, %v5135_v40  ;;  %v1922_v32 = vsub.f32 %v1916_v60, %v1921_v19  ;;  %v1934_v1 = vmul.f32 %v3318_v21, %v5163_v8  ;;  %v3339_v9 = vld [vmem:[%s4161_s24 + $0x59] ss:$0 sm:$0xff]  ;;  %v3342_v19 = vld [vmem:[%s4150_s25 + $0x5a] ss:$0 sm:$0xff] }
 0x140   : > { %v1939_v44 = vmul.f32 %v3319_v63, %v5170_v31  ;;  %v5240_v15 = vadd.f32 %v1908_v20, %v5140_v47  ;;  %v1942_v62 = vmul.f32 %v3319_v63, %v5163_v8  ;;  %v1943_v35 = vmul.f32 %v3318_v21, %v5170_v31  ;;  %v3343_v20 = vld [vmem:[%s4161_s24 + $0x5a] ss:$0 sm:$0xff] }
 0x141   : > { %v1926_v38 = vadd.f32 %v1925_v33, %v1924_v24  ;;  %v5247_v40 = vadd.f32 %v1922_v32, %v5147_v12  ;;  %v1952_v39 = vmul.f32 %v3322_v18, %v5163_v8  ;;  %v1957_v27 = vmul.f32 %v3323_v28, %v5170_v31 }
 0x142   : > { %v1940_v0 = vsub.f32 %v1934_v1, %v1939_v44  ;;  %v1944_v47 = vadd.f32 %v1943_v35, %v1942_v62  ;;  %v1960_v36 = vmul.f32 %v3323_v28, %v5163_v8  ;;  %v1961_v51 = vmul.f32 %v3322_v18, %v5170_v31  ;;  %v3346_v44 = vld [vmem:[%s4150_s25 + $0x5b] ss:$0 sm:$0xff] }
 0x143   : > { %v5252_v48 = vadd.f32 %v1926_v38, %v5152_v16  ;;  %v1958_v26 = vsub.f32 %v1952_v39, %v1957_v27  ;;  %v1970_v7 = vmul.f32 %v3326_v14, %v5163_v8  ;;  %v1975_v57 = vmul.f32 %v3327_v42, %v5170_v31  ;;  %v3347_v38 = vld [vmem:[%s4161_s24 + $0x5b] ss:$0 sm:$0xff]  ;;  %v3350_v27 = vld [vmem:[%s4150_s25 + $0x5c] ss:$0 sm:$0xff] }
 0x144   : > { %v5259_v12 = vadd.f32 %v1940_v0, %v5159_v41  ;;  %v5266_v16 = vadd.f32 %v1944_v47, %v5166_v50  ;;  %v1962_v54 = vadd.f32 %v1961_v51, %v1960_v36  ;;  %v1978_v58 = vmul.f32 %v3327_v42, %v5163_v8  ;;  %v3334_v41 = vld [vmem:[%s4150_s25 + $0x58] ss:$0 sm:$0xff]  ;;  %v3351_v47 = vld [vmem:[%s4161_s24 + $0x5c] ss:$0 sm:$0xff] }
 0x145   : > { %v1979_v4 = vmul.f32 %v3326_v14, %v5170_v31  ;;  %v5275_v45 = vadd.f32 %v1958_v26, %v5175_v25  ;;  %v1976_v55 = vsub.f32 %v1970_v7, %v1975_v57  ;;  %v1988_v23 = vmul.f32 %v3330_v49, %v5163_v8  ;;  %v3354_v57 = vld [vmem:[%s4150_s25 + $0x5d] ss:$0 sm:$0xff] }
 0x146   : > { %v1993_v50 = vmul.f32 %v3331_v13, %v5170_v31  ;;  %v5280_v46 = vadd.f32 %v1962_v54, %v5180_v61  ;;  %v1996_v53 = vmul.f32 %v3331_v13, %v5163_v8  ;;  %v1997_v5 = vmul.f32 %v3330_v49, %v5170_v31  ;;  %v3355_v54 = vld [vmem:[%s4161_s24 + $0x5d] ss:$0 sm:$0xff] }
 0x147   : > { %v1980_v6 = vadd.f32 %v1979_v4, %v1978_v58  ;;  %v5287_v25 = vadd.f32 %v1976_v55, %v5187_v3  ;;  %v2012_v63 = vmul.f32 %v3334_v41, %v5263_v59  ;;  %v2017_v34 = vmul.f32 %v3335_v56, %v5270_v52 }
 0x148   : > { %v1994_v21 = vsub.f32 %v1988_v23, %v1993_v50  ;;  %v1998_v60 = vadd.f32 %v1997_v5, %v1996_v53  ;;  %v2020_v8 = vmul.f32 %v3335_v56, %v5263_v59  ;;  %v2021_v31 = vmul.f32 %v3334_v41, %v5270_v52  ;;  %v3358_v50 = vld [vmem:[%s4150_s25 + $0x5e] ss:$0 sm:$0xff] }
 0x149   : > { %v5292_v61 = vadd.f32 %v1980_v6, %v5192_v10  ;;  %v2018_v24 = vsub.f32 %v2012_v63, %v2017_v34  ;;  %v2030_v33 = vmul.f32 %v3338_v2, %v5263_v59  ;;  %v2035_v18 = vmul.f32 %v3339_v9, %v5270_v52  ;;  %v3359_v6 = vld [vmem:[%s4161_s24 + $0x5e] ss:$0 sm:$0xff]  ;;  %v3362_v34 = vld [vmem:[%s4150_s25 + $0x5f] ss:$0 sm:$0xff] }
 0x14a   : > { %v5299_v3 = vadd.f32 %v1994_v21, %v5199_v30  ;;  %v5304_v10 = vadd.f32 %v1998_v60, %v5204_v17  ;;  %v2022_v28 = vadd.f32 %v2021_v31, %v2020_v8  ;;  %v2038_v32 = vmul.f32 %v3339_v9, %v5263_v59  ;;  %v3363_v60 = vld [vmem:[%s4161_s24 + $0x5f] ss:$0 sm:$0xff] }
 0x14b   : > { %v2039_v1 = vmul.f32 %v3338_v2, %v5270_v52  ;;  %v5311_v30 = vadd.f32 %v2018_v24, %v5211_v22  ;;  %v2036_v62 = vsub.f32 %v2030_v33, %v2035_v18  ;;  %v2048_v35 = vmul.f32 %v3342_v19, %v5263_v59 }
 0x14c   : > { %v2053_v14 = vmul.f32 %v3343_v20, %v5270_v52  ;;  %v5316_v17 = vadd.f32 %v2022_v28, %v5216_v29  ;;  %v2056_v0 = vmul.f32 %v3343_v20, %v5263_v59  ;;  %v2057_v39 = vmul.f32 %v3342_v19, %v5270_v52  ;;  %v5363_v20 = vld [vmem:[#allocation2 + $0x18] sm:$0x3] }
 0x14d   : > { %v2040_v42 = vadd.f32 %v2039_v1, %v2038_v32  ;;  %v5323_v22 = vadd.f32 %v2036_v62, %v5223_v43  ;;  %v2066_v51 = vmul.f32 %v3346_v44, %v5263_v59  ;;  %v2071_v49 = vmul.f32 %v3347_v38, %v5270_v52  ;;  %v5370_v28 = vld [vmem:[#allocation5 + $0x18] sm:$0x3]  ;;  %v3367_v32 = vld [vmem:[%s4161_s24 + $0x60] ss:$0 sm:$0xff] }
 0x14e   : > { %v2054_v36 = vsub.f32 %v2048_v35, %v2053_v14  ;;  %v2058_v13 = vadd.f32 %v2057_v39, %v2056_v0  ;;  %v2074_v26 = vmul.f32 %v3347_v38, %v5263_v59  ;;  %v2075_v7 = vmul.f32 %v3346_v44, %v5270_v52  ;;  %v3370_v0 = vld [vmem:[%s4150_s25 + $0x61] ss:$0 sm:$0xff] }
 0x14f   : > { %v5328_v29 = vadd.f32 %v2040_v42, %v5228_v37  ;;  %v2072_v58 = vsub.f32 %v2066_v51, %v2071_v49  ;;  %v2084_v4 = vmul.f32 %v3350_v27, %v5263_v59  ;;  %v2089_v41 = vmul.f32 %v3351_v47, %v5270_v52  ;;  %v3371_v39 = vld [vmem:[%s4161_s24 + $0x61] ss:$0 sm:$0xff]  ;;  %v3374_v49 = vld [vmem:[%s4150_s25 + $0x62] ss:$0 sm:$0xff] }
 0x150   : > { %v5335_v43 = vadd.f32 %v2054_v36, %v5235_v11  ;;  %v5340_v37 = vadd.f32 %v2058_v13, %v5240_v15  ;;  %v2076_v56 = vadd.f32 %v2075_v7, %v2074_v26  ;;  %v2092_v55 = vmul.f32 %v3351_v47, %v5263_v59  ;;  %v3375_v13 = vld [vmem:[%s4161_s24 + $0x62] ss:$0 sm:$0xff] }
 0x151   : > { %v2093_v23 = vmul.f32 %v3350_v27, %v5270_v52  ;;  %v5347_v11 = vadd.f32 %v2072_v58, %v5247_v40  ;;  %v2090_v53 = vsub.f32 %v2084_v4, %v2089_v41  ;;  %v2102_v5 = vmul.f32 %v3354_v57, %v5263_v59  ;;  %v3378_v41 = vld [vmem:[%s4150_s25 + $0x63] ss:$0 sm:$0xff] }
 0x152   : > { %v2107_v2 = vmul.f32 %v3355_v54, %v5270_v52  ;;  %v5352_v9 = vadd.f32 %v2076_v56, %v5252_v48  ;;  %v2110_v21 = vmul.f32 %v3355_v54, %v5263_v59  ;;  %v2111_v63 = vmul.f32 %v3354_v57, %v5270_v52  ;;  %v3379_v56 = vld [vmem:[%s4161_s24 + $0x63] ss:$0 sm:$0xff] }
 0x153   : > { %v2094_v15 = vadd.f32 %v2093_v23, %v2092_v55  ;;  %v5359_v40 = vadd.f32 %v2090_v53, %v5259_v12  ;;  %v2120_v31 = vmul.f32 %v3358_v50, %v5263_v59  ;;  %v2125_v19 = vmul.f32 %v3359_v6, %v5270_v52  ;;  %v3366_v12 = vld [vmem:[%s4150_s25 + $0x60] ss:$0 sm:$0xff] }
 0x154   : > { %v2108_v8 = vsub.f32 %v2102_v5, %v2107_v2  ;;  %v2112_v24 = vadd.f32 %v2111_v63, %v2110_v21  ;;  %v2128_v33 = vmul.f32 %v3359_v6, %v5263_v59  ;;  %v2129_v18 = vmul.f32 %v3358_v50, %v5270_v52  ;;  %v3382_v2 = vld [vmem:[%s4150_s25 + $0x64] ss:$0 sm:$0xff] }
 0x155   : > { %v5366_v48 = vadd.f32 %v2094_v15, %v5266_v16  ;;  %v2126_v44 = vsub.f32 %v2120_v31, %v2125_v19  ;;  %v2138_v38 = vmul.f32 %v3362_v34, %v5263_v59  ;;  %v2143_v16 = vmul.f32 %v3363_v60, %v5270_v52  ;;  %v3383_v15 = vld [vmem:[%s4161_s24 + $0x64] ss:$0 sm:$0xff]  ;;  %v3386_v19 = vld [vmem:[%s4150_s25 + $0x65] ss:$0 sm:$0xff] }
 0x156   : > { %v5375_v1 = vadd.f32 %v2108_v8, %v5275_v45  ;;  %v5380_v62 = vadd.f32 %v2112_v24, %v5280_v46  ;;  %v2130_v35 = vadd.f32 %v2129_v18, %v2128_v33  ;;  %v2146_v14 = vmul.f32 %v3363_v60, %v5263_v59  ;;  %v3387_v24 = vld [vmem:[%s4161_s24 + $0x65] ss:$0 sm:$0xff] }
 0x157   : > { %v2147_v42 = vmul.f32 %v3362_v34, %v5270_v52  ;;  %v5387_v45 = vadd.f32 %v2126_v44, %v5287_v25  ;;  %v2144_v27 = vsub.f32 %v2138_v38, %v2143_v16  ;;  %v2162_v47 = vmul.f32 %v3366_v12, %v5363_v20  ;;  %v3390_v16 = vld [vmem:[%s4150_s25 + $0x66] ss:$0 sm:$0xff] }
 0x158   : > { %v2167_v36 = vmul.f32 %v3367_v32, %v5370_v28  ;;  %v5392_v46 = vadd.f32 %v2130_v35, %v5292_v61  ;;  %v2170_v59 = vmul.f32 %v3367_v32, %v5363_v20  ;;  %v2171_v52 = vmul.f32 %v3366_v12, %v5370_v28  ;;  %v3391_v35 = vld [vmem:[%s4161_s24 + $0x66] ss:$0 sm:$0xff] }
 0x159   : > { %v2148_v51 = vadd.f32 %v2147_v42, %v2146_v14  ;;  %v5399_v25 = vadd.f32 %v2144_v27, %v5299_v3  ;;  %v2180_v7 = vmul.f32 %v3370_v0, %v5363_v20  ;;  %v2185_v57 = vmul.f32 %v3371_v39, %v5370_v28 }
 0x15a   : > { %v2168_v26 = vsub.f32 %v2162_v47, %v2167_v36  ;;  %v2172_v54 = vadd.f32 %v2171_v52, %v2170_v59  ;;  %v2188_v58 = vmul.f32 %v3371_v39, %v5363_v20  ;;  %v2189_v4 = vmul.f32 %v3370_v0, %v5370_v28  ;;  %v3394_v36 = vld [vmem:[%s4150_s25 + $0x67] ss:$0 sm:$0xff] }
 0x15b   : > { %v5404_v61 = vadd.f32 %v2148_v51, %v5304_v10  ;;  %v2186_v55 = vsub.f32 %v2180_v7, %v2185_v57  ;;  %v2198_v23 = vmul.f32 %v3374_v49, %v5363_v20  ;;  %v2203_v50 = vmul.f32 %v3375_v13, %v5370_v28  ;;  %v3395_v51 = vld [vmem:[%s4161_s24 + $0x67] ss:$0 sm:$0xff] }
 0x15c   : > { %v5411_v3 = vadd.f32 %v2168_v26, %v5311_v30  ;;  %v5416_v10 = vadd.f32 %v2172_v54, %v5316_v17  ;;  %v2190_v6 = vadd.f32 %v2189_v4, %v2188_v58  ;;  %v2206_v53 = vmul.f32 %v3375_v13, %v5363_v20  ;;  %v5463_v13 = vld [vmem:[#allocation2 + $0x1a] sm:$0x3]  ;;  %v3399_v58 = vld [vmem:[%s4161_s24 + $0x68] ss:$0 sm:$0xff] }
 0x15d   : > { %v2207_v5 = vmul.f32 %v3374_v49, %v5370_v28  ;;  %v5423_v30 = vadd.f32 %v2186_v55, %v5323_v22  ;;  %v2204_v21 = vsub.f32 %v2198_v23, %v2203_v50  ;;  %v2216_v63 = vmul.f32 %v3378_v41, %v5363_v20  ;;  %v5470_v54 = vld [vmem:[#allocation5 + $0x1a] sm:$0x3] }
 0x15e   : > { %v2221_v34 = vmul.f32 %v3379_v56, %v5370_v28  ;;  %v5428_v17 = vadd.f32 %v2190_v6, %v5328_v29  ;;  %v2224_v8 = vmul.f32 %v3379_v56, %v5363_v20  ;;  %v2225_v31 = vmul.f32 %v3378_v41, %v5370_v28 }
 0x15f   : > { %v2208_v60 = vadd.f32 %v2207_v5, %v2206_v53  ;;  %v5435_v22 = vadd.f32 %v2204_v21, %v5335_v43  ;;  %v2234_v18 = vmul.f32 %v3382_v2, %v5363_v20  ;;  %v2239_v12 = vmul.f32 %v3383_v15, %v5370_v28  ;;  %v3402_v53 = vld [vmem:[%s4150_s25 + $0x69] ss:$0 sm:$0xff] }
 0x160   : > { %v2222_v33 = vsub.f32 %v2216_v63, %v2221_v34  ;;  %v2226_v32 = vadd.f32 %v2225_v31, %v2224_v8  ;;  %v2242_v44 = vmul.f32 %v3383_v15, %v5363_v20  ;;  %v2243_v38 = vmul.f32 %v3382_v2, %v5370_v28  ;;  %v3403_v5 = vld [vmem:[%s4161_s24 + $0x69] ss:$0 sm:$0xff]  ;;  %v3406_v34 = vld [vmem:[%s4150_s25 + $0x6a] ss:$0 sm:$0xff] }
 0x161   : > { %v5440_v29 = vadd.f32 %v2208_v60, %v5340_v37  ;;  %v2240_v14 = vsub.f32 %v2234_v18, %v2239_v12  ;;  %v2252_v42 = vmul.f32 %v3386_v19, %v5363_v20  ;;  %v2257_v0 = vmul.f32 %v3387_v24, %v5370_v28  ;;  %v3407_v60 = vld [vmem:[%s4161_s24 + $0x6a] ss:$0 sm:$0xff]  ;;  %v3410_v12 = vld [vmem:[%s4150_s25 + $0x6b] ss:$0 sm:$0xff] }
 0x162   : > { %v5447_v43 = vadd.f32 %v2222_v33, %v5347_v11  ;;  %v5452_v39 = vadd.f32 %v2226_v32, %v5352_v9  ;;  %v2244_v37 = vadd.f32 %v2243_v38, %v2242_v44  ;;  %v2260_v27 = vmul.f32 %v3387_v24, %v5363_v20  ;;  %v3411_v32 = vld [vmem:[%s4161_s24 + $0x6b] ss:$0 sm:$0xff] }
 0x163   : > { %v2261_v47 = vmul.f32 %v3386_v19, %v5370_v28  ;;  %v5459_v11 = vadd.f32 %v2240_v14, %v5359_v40  ;;  %v2258_v59 = vsub.f32 %v2252_v42, %v2257_v0  ;;  %v2270_v52 = vmul.f32 %v3390_v16, %v5363_v20  ;;  %v3398_v40 = vld [vmem:[%s4150_s25 + $0x68] ss:$0 sm:$0xff]  ;;  %v3414_v0 = vld [vmem:[%s4150_s25 + $0x6c] ss:$0 sm:$0xff] }
 0x164   : > { %v2275_v49 = vmul.f32 %v3391_v35, %v5370_v28  ;;  %v5466_v9 = vadd.f32 %v2244_v37, %v5366_v48  ;;  %v2278_v7 = vmul.f32 %v3391_v35, %v5363_v20  ;;  %v2279_v57 = vmul.f32 %v3390_v16, %v5370_v28  ;;  %v3415_v37 = vld [vmem:[%s4161_s24 + $0x6c] ss:$0 sm:$0xff] }
 0x165   : > { %v2262_v26 = vadd.f32 %v2261_v47, %v2260_v27  ;;  %v5475_v4 = vadd.f32 %v2258_v59, %v5375_v1  ;;  %v2288_v56 = vmul.f32 %v3394_v36, %v5363_v20  ;;  %v2293_v48 = vmul.f32 %v3395_v51, %v5370_v28 }
 0x166   : > { %v2276_v41 = vsub.f32 %v2270_v52, %v2275_v49  ;;  %v2280_v23 = vadd.f32 %v2279_v57, %v2278_v7  ;;  %v2296_v50 = vmul.f32 %v3395_v51, %v5363_v20  ;;  %v2297_v6 = vmul.f32 %v3394_v36, %v5370_v28  ;;  %v3418_v49 = vld [vmem:[%s4150_s25 + $0x6d] ss:$0 sm:$0xff] }
 0x167   : > { %v5480_v55 = vadd.f32 %v2262_v26, %v5380_v62  ;;  %v2294_v2 = vsub.f32 %v2288_v56, %v2293_v48  ;;  %v2312_v15 = vmul.f32 %v3398_v40, %v5463_v13  ;;  %v2317_v21 = vmul.f32 %v3399_v58, %v5470_v54  ;;  %v3419_v26 = vld [vmem:[%s4161_s24 + $0x6d] ss:$0 sm:$0xff]  ;;  %v3422_v48 = vld [vmem:[%s4150_s25 + $0x6e] ss:$0 sm:$0xff] }
 0x168   : > { %v5487_v1 = vadd.f32 %v2276_v41, %v5387_v45  ;;  %v5492_v62 = vadd.f32 %v2280_v23, %v5392_v46  ;;  %v2298_v63 = vadd.f32 %v2297_v6, %v2296_v50  ;;  %v2320_v20 = vmul.f32 %v3399_v58, %v5463_v13  ;;  %v3423_v23 = vld [vmem:[%s4161_s24 + $0x6e] ss:$0 sm:$0xff] }
 0x169   : > { %v2321_v28 = vmul.f32 %v3398_v40, %v5470_v54  ;;  %v5499_v45 = vadd.f32 %v2294_v2, %v5399_v25  ;;  %v2318_v8 = vsub.f32 %v2312_v15, %v2317_v21  ;;  %v2330_v31 = vmul.f32 %v3402_v53, %v5463_v13  ;;  %v3426_v21 = vld [vmem:[%s4150_s25 + $0x6f] ss:$0 sm:$0xff] }
 0x16a   : > { %v2335_v19 = vmul.f32 %v3403_v5, %v5470_v54  ;;  %v5504_v46 = vadd.f32 %v2298_v63, %v5404_v61  ;;  %v2338_v33 = vmul.f32 %v3403_v5, %v5463_v13  ;;  %v2339_v18 = vmul.f32 %v3402_v53, %v5470_v54  ;;  %v3427_v63 = vld [vmem:[%s4161_s24 + $0x6f] ss:$0 sm:$0xff] }
 0x16b   : > { %v2322_v24 = vadd.f32 %v2321_v28, %v2320_v20  ;;  %v5511_v25 = vadd.f32 %v2318_v8, %v5411_v3  ;;  %v2348_v38 = vmul.f32 %v3406_v34, %v5463_v13  ;;  %v2353_v16 = vmul.f32 %v3407_v60, %v5470_v54 }
 0x16c   : > { %v2336_v44 = vsub.f32 %v2330_v31, %v2335_v19  ;;  %v2340_v35 = vadd.f32 %v2339_v18, %v2338_v33  ;;  %v2356_v14 = vmul.f32 %v3407_v60, %v5463_v13  ;;  %v2357_v42 = vmul.f32 %v3406_v34, %v5470_v54  ;;  %v5563_v60 = vld [vmem:[#allocation2 + $0x1c] sm:$0x3]  ;;  %v3431_v33 = vld [vmem:[%s4161_s24 + $0x70] ss:$0 sm:$0xff] }
 0x16d   : > { %v5516_v61 = vadd.f32 %v2322_v24, %v5416_v10  ;;  %v2354_v27 = vsub.f32 %v2348_v38, %v2353_v16  ;;  %v2366_v47 = vmul.f32 %v3410_v12, %v5463_v13  ;;  %v2371_v36 = vmul.f32 %v3411_v32, %v5470_v54  ;;  %v5570_v24 = vld [vmem:[#allocation5 + $0x1c] sm:$0x3] }
 0x16e   : > { %v5523_v3 = vadd.f32 %v2336_v44, %v5423_v30  ;;  %v5528_v10 = vadd.f32 %v2340_v35, %v5428_v17  ;;  %v2358_v51 = vadd.f32 %v2357_v42, %v2356_v14  ;;  %v2374_v59 = vmul.f32 %v3411_v32, %v5463_v13  ;;  %v3434_v14 = vld [vmem:[%s4150_s25 + $0x71] ss:$0 sm:$0xff] }
 0x16f   : > { %v2375_v52 = vmul.f32 %v3410_v12, %v5470_v54  ;;  %v5535_v30 = vadd.f32 %v2354_v27, %v5435_v22  ;;  %v2372_v7 = vsub.f32 %v2366_v47, %v2371_v36  ;;  %v2384_v57 = vmul.f32 %v3414_v0, %v5463_v13  ;;  %v3435_v42 = vld [vmem:[%s4161_s24 + $0x71] ss:$0 sm:$0xff]  ;;  %v3438_v36 = vld [vmem:[%s4150_s25 + $0x72] ss:$0 sm:$0xff] }
 0x170   : > { %v2389_v40 = vmul.f32 %v3415_v37, %v5470_v54  ;;  %v5540_v17 = vadd.f32 %v2358_v51, %v5440_v29  ;;  %v2392_v41 = vmul.f32 %v3415_v37, %v5463_v13  ;;  %v2393_v56 = vmul.f32 %v3414_v0, %v5470_v54  ;;  %v3439_v51 = vld [vmem:[%s4161_s24 + $0x72] ss:$0 sm:$0xff] }
 0x171   : > { %v2376_v58 = vadd.f32 %v2375_v52, %v2374_v59  ;;  %v5547_v22 = vadd.f32 %v2372_v7, %v5447_v43  ;;  %v2402_v6 = vmul.f32 %v3418_v49, %v5463_v13  ;;  %v2407_v53 = vmul.f32 %v3419_v26, %v5470_v54 }
 0x172   : > { %v2390_v50 = vsub.f32 %v2384_v57, %v2389_v40  ;;  %v2394_v29 = vadd.f32 %v2393_v56, %v2392_v41  ;;  %v2410_v2 = vmul.f32 %v3419_v26, %v5463_v13  ;;  %v2411_v15 = vmul.f32 %v3418_v49, %v5470_v54  ;;  %v3442_v40 = vld [vmem:[%s4150_s25 + $0x73] ss:$0 sm:$0xff] }
 0x173   : > { %v5552_v5 = vadd.f32 %v2376_v58, %v5452_v39  ;;  %v2408_v20 = vsub.f32 %v2402_v6, %v2407_v53  ;;  %v2420_v28 = vmul.f32 %v3422_v48, %v5463_v13  ;;  %v2425_v34 = vmul.f32 %v3423_v23, %v5470_v54  ;;  %v3443_v58 = vld [vmem:[%s4161_s24 + $0x73] ss:$0 sm:$0xff]  ;;  %v3446_v53 = vld [vmem:[%s4150_s25 + $0x74] ss:$0 sm:$0xff] }
 0x174   : > { %v5559_v43 = vadd.f32 %v2390_v50, %v5459_v11  ;;  %v5566_v39 = vadd.f32 %v2394_v29, %v5466_v9  ;;  %v2412_v8 = vadd.f32 %v2411_v15, %v2410_v2  ;;  %v2428_v31 = vmul.f32 %v3423_v23, %v5463_v13  ;;  %v3430_v11 = vld [vmem:[%s4150_s25 + $0x70] ss:$0 sm:$0xff]  ;;  %v3447_v29 = vld [vmem:[%s4161_s24 + $0x74] ss:$0 sm:$0xff] }
 0x175   : > { %v2429_v19 = vmul.f32 %v3422_v48, %v5470_v54  ;;  %v5575_v18 = vadd.f32 %v2408_v20, %v5475_v4  ;;  %v2426_v12 = vsub.f32 %v2420_v28, %v2425_v34  ;;  %v2438_v32 = vmul.f32 %v3426_v21, %v5463_v13  ;;  %v3450_v34 = vld [vmem:[%s4150_s25 + $0x75] ss:$0 sm:$0xff] }
 0x176   : > { %v2443_v9 = vmul.f32 %v3427_v63, %v5470_v54  ;;  %v5580_v44 = vadd.f32 %v2412_v8, %v5480_v55  ;;  %v2446_v16 = vmul.f32 %v3427_v63, %v5463_v13  ;;  %v2447_v35 = vmul.f32 %v3426_v21, %v5470_v54  ;;  %v3451_v8 = vld [vmem:[%s4161_s24 + $0x75] ss:$0 sm:$0xff] }
 0x177   : > { %v2430_v38 = vadd.f32 %v2429_v19, %v2428_v31  ;;  %v5587_v4 = vadd.f32 %v2426_v12, %v5487_v1  ;;  %v2462_v37 = vmul.f32 %v3430_v11, %v5563_v60  ;;  %v2467_v27 = vmul.f32 %v3431_v33, %v5570_v24 }
 0x178   : > { %v2444_v0 = vsub.f32 %v2438_v32, %v2443_v9  ;;  %v2448_v47 = vadd.f32 %v2447_v35, %v2446_v16  ;;  %v2470_v13 = vmul.f32 %v3431_v33, %v5563_v60  ;;  %v2471_v54 = vmul.f32 %v3430_v11, %v5570_v24  ;;  %v3454_v9 = vld [vmem:[%s4150_s25 + $0x76] ss:$0 sm:$0xff] }
 0x179   : > { %v5592_v55 = vadd.f32 %v2430_v38, %v5492_v62  ;;  %v2468_v59 = vsub.f32 %v2462_v37, %v2467_v27  ;;  %v2480_v52 = vmul.f32 %v3434_v14, %v5563_v60  ;;  %v2485_v49 = vmul.f32 %v3435_v42, %v5570_v24  ;;  %v3455_v38 = vld [vmem:[%s4161_s24 + $0x76] ss:$0 sm:$0xff]  ;;  %v3458_v27 = vld [vmem:[%s4150_s25 + $0x77] ss:$0 sm:$0xff] }
 0x17a   : > { %v5599_v1 = vadd.f32 %v2444_v0, %v5499_v45  ;;  %v5604_v62 = vadd.f32 %v2448_v47, %v5504_v46  ;;  %v2472_v26 = vadd.f32 %v2471_v54, %v2470_v13  ;;  %v2488_v7 = vmul.f32 %v3435_v42, %v5563_v60  ;;  %v3459_v47 = vld [vmem:[%s4161_s24 + $0x77] ss:$0 sm:$0xff] }
 0x17b   : > { %v2489_v57 = vmul.f32 %v3434_v14, %v5570_v24  ;;  %v5611_v45 = vadd.f32 %v2468_v59, %v5511_v25  ;;  %v2486_v41 = vsub.f32 %v2480_v52, %v2485_v49  ;;  %v2498_v56 = vmul.f32 %v3438_v36, %v5563_v60 }
 0x17c   : > { %v2503_v48 = vmul.f32 %v3439_v51, %v5570_v24  ;;  %v5616_v46 = vadd.f32 %v2472_v26, %v5516_v61  ;;  %v2506_v50 = vmul.f32 %v3439_v51, %v5563_v60  ;;  %v2507_v6 = vmul.f32 %v3438_v36, %v5570_v24  ;;  %v5663_v51 = vld [vmem:[#allocation2 + $0x1e] sm:$0x3]  ;;  %v3462_v26 = vld [vmem:[%s4150_s25 + $0x78] ss:$0 sm:$0xff] }
 0x17d   : > { %v2490_v23 = vadd.f32 %v2489_v57, %v2488_v7  ;;  %v5623_v25 = vadd.f32 %v2486_v41, %v5523_v3  ;;  %v2516_v15 = vmul.f32 %v3442_v40, %v5563_v60  ;;  %v2521_v21 = vmul.f32 %v3443_v58, %v5570_v24  ;;  %v3463_v7 = vld [vmem:[%s4161_s24 + $0x78] ss:$0 sm:$0xff] }
 0x17e   : > { %v2504_v2 = vsub.f32 %v2498_v56, %v2503_v48  ;;  %v2508_v63 = vadd.f32 %v2507_v6, %v2506_v50  ;;  %v2524_v20 = vmul.f32 %v3443_v58, %v5563_v60  ;;  %v2525_v28 = vmul.f32 %v3442_v40, %v5570_v24  ;;  %v3466_v50 = vld [vmem:[%s4150_s25 + $0x79] ss:$0 sm:$0xff] }
 0x17f   : > { %v5628_v61 = vadd.f32 %v2490_v23, %v5528_v10  ;;  %v2522_v31 = vsub.f32 %v2516_v15, %v2521_v21  ;;  %v2534_v19 = vmul.f32 %v3446_v53, %v5563_v60  ;;  %v2539_v11 = vmul.f32 %v3447_v29, %v5570_v24  ;;  %v3467_v6 = vld [vmem:[%s4161_s24 + $0x79] ss:$0 sm:$0xff]  ;;  %v3470_v21 = vld [vmem:[%s4150_s25 + $0x7a] ss:$0 sm:$0xff] }
 0x180   : > { %v5635_v3 = vadd.f32 %v2504_v2, %v5535_v30  ;;  %v5640_v10 = vadd.f32 %v2508_v63, %v5540_v17  ;;  %v2526_v33 = vadd.f32 %v2525_v28, %v2524_v20  ;;  %v2542_v12 = vmul.f32 %v3447_v29, %v5563_v60  ;;  %v3471_v63 = vld [vmem:[%s4161_s24 + $0x7a] ss:$0 sm:$0xff] }
 0x181   : > { %v2543_v32 = vmul.f32 %v3446_v53, %v5570_v24  ;;  %v5647_v30 = vadd.f32 %v2522_v31, %v5547_v22  ;;  %v2540_v16 = vsub.f32 %v2534_v19, %v2539_v11  ;;  %v2552_v35 = vmul.f32 %v3450_v34, %v5563_v60  ;;  %v3474_v11 = vld [vmem:[%s4150_s25 + $0x7b] ss:$0 sm:$0xff] }
 0x182   : > { %v2557_v14 = vmul.f32 %v3451_v8, %v5570_v24  ;;  %v5652_v42 = vadd.f32 %v2526_v33, %v5552_v5  ;;  %v2560_v0 = vmul.f32 %v3451_v8, %v5563_v60  ;;  %v2561_v37 = vmul.f32 %v3450_v34, %v5570_v24  ;;  %v3475_v33 = vld [vmem:[%s4161_s24 + $0x7b] ss:$0 sm:$0xff] }
 0x183   : > { %v2544_v17 = vadd.f32 %v2543_v32, %v2542_v12  ;;  %v5659_v22 = vadd.f32 %v2540_v16, %v5559_v43  ;;  %v2570_v54 = vmul.f32 %v3454_v9, %v5563_v60  ;;  %v2575_v36 = vmul.f32 %v3455_v38, %v5570_v24  ;;  %v5670_v43 = vld [vmem:[#allocation5 + $0x1e] sm:$0x3] }
 0x184   : > { %v2558_v13 = vsub.f32 %v2552_v35, %v2557_v14  ;;  %v2562_v59 = vadd.f32 %v2561_v37, %v2560_v0  ;;  %v2578_v52 = vmul.f32 %v3455_v38, %v5563_v60  ;;  %v2579_v49 = vmul.f32 %v3454_v9, %v5570_v24  ;;  %v3478_v14 = vld [vmem:[%s4150_s25 + $0x7c] ss:$0 sm:$0xff] }
 0x185   : > { %v5666_v5 = vadd.f32 %v2544_v17, %v5566_v39  ;;  %v2576_v40 = vsub.f32 %v2570_v54, %v2575_v36  ;;  %v2588_v58 = vmul.f32 %v3458_v27, %v5563_v60  ;;  %v2593_v39 = vmul.f32 %v3459_v47, %v5570_v24  ;;  %v3479_v17 = vld [vmem:[%s4161_s24 + $0x7c] ss:$0 sm:$0xff]  ;;  %v3482_v54 = vld [vmem:[%s4150_s25 + $0x7d] ss:$0 sm:$0xff] }
 0x186   : > { %v5675_v57 = vadd.f32 %v2558_v13, %v5575_v18  ;;  %v5680_v41 = vadd.f32 %v2562_v59, %v5580_v44  ;;  %v2580_v56 = vadd.f32 %v2579_v49, %v2578_v52  ;;  %v2596_v48 = vmul.f32 %v3459_v47, %v5563_v60  ;;  %v3483_v36 = vld [vmem:[%s4161_s24 + $0x7d] ss:$0 sm:$0xff] }
 0x187   : > { %v2597_v23 = vmul.f32 %v3458_v27, %v5570_v24  ;;  %v5688_v18 = vadd.f32 %v2576_v40, %v5587_v4  ;;  %v2594_v53 = vsub.f32 %v2588_v58, %v2593_v39  ;;  %v2612_v29 = vmul.f32 %v3462_v26, %v5663_v51  ;;  %v3486_v39 = vld [vmem:[%s4150_s25 + $0x7e] ss:$0 sm:$0xff] }
 0x188   : > { %v2617_v2 = vmul.f32 %v3463_v7, %v5670_v43  ;;  %v5693_v44 = vadd.f32 %v2580_v56, %v5592_v55  ;;  %v2620_v60 = vmul.f32 %v3463_v7, %v5663_v51  ;;  %v2621_v24 = vmul.f32 %v3462_v26, %v5670_v43  ;;  %v3487_v56 = vld [vmem:[%s4161_s24 + $0x7e] ss:$0 sm:$0xff] }
 0x189   : > { %v2598_v15 = vadd.f32 %v2597_v23, %v2596_v48  ;;  %v5700_v4 = vadd.f32 %v2594_v53, %v5599_v1  ;;  %v2630_v28 = vmul.f32 %v3466_v50, %v5663_v51  ;;  %v2635_v34 = vmul.f32 %v3467_v6, %v5670_v43 }
 0x18a   : > { %v2618_v20 = vsub.f32 %v2612_v29, %v2617_v2  ;;  %v2622_v8 = vadd.f32 %v2621_v24, %v2620_v60  ;;  %v2638_v31 = vmul.f32 %v3467_v6, %v5663_v51  ;;  %v2639_v19 = vmul.f32 %v3466_v50, %v5670_v43  ;;  %v3490_v2 = vld [vmem:[%s4150_s25 + $0x7f] ss:$0 sm:$0xff] }
 0x18b   : > { %v5705_v55 = vadd.f32 %v2598_v15, %v5604_v62  ;;  %v2636_v12 = vsub.f32 %v2630_v28, %v2635_v34  ;;  %v2648_v32 = vmul.f32 %v3470_v21, %v5663_v51  ;;  %v2653_v9 = vmul.f32 %v3471_v63, %v5670_v43  ;;  %v3491_v15 = vld [vmem:[%s4161_s24 + $0x7f] ss:$0 sm:$0xff] }
 0x18c   : > { %v2619_v1 = vadd.f32 %v2618_v20, %v5611_v45  ;;  %v2623_v38 = vadd.f32 %v2622_v8, %v5616_v46  ;;  %v2640_v62 = vadd.f32 %v2639_v19, %v2638_v31  ;;  %v2656_v16 = vmul.f32 %v3471_v63, %v5663_v51 }
 0x18d   : > { %v2657_v35 = vmul.f32 %v3470_v21, %v5670_v43  ;;  %v2637_v0 = vadd.f32 %v2636_v12, %v5623_v25  ;;  %v2654_v45 = vsub.f32 %v2648_v32, %v2653_v9  ;;  %v2666_v37 = vmul.f32 %v3474_v11, %v5663_v51 }
 0x18e   : > { %v2671_v27 = vmul.f32 %v3475_v33, %v5670_v43  ;;  %2750 = vst [vmem:[%s5724_s27] sm:$0x3] %v2619_v1  ;;  %v2641_v46 = vadd.f32 %v2640_v62, %v5628_v61  ;;  %v2674_v13 = vmul.f32 %v3475_v33, %v5663_v51  ;;  %v2675_v25 = vmul.f32 %v3474_v11, %v5670_v43 }
 0x18f   : > { %v2658_v47 = vadd.f32 %v2657_v35, %v2656_v16  ;;  %2751 = vst [vmem:[%s5734_s15] sm:$0x3] %v2623_v38  ;;  %v2655_v59 = vadd.f32 %v2654_v45, %v5635_v3  ;;  %v2684_v61 = vmul.f32 %v3478_v14, %v5663_v51  ;;  %v2689_v49 = vmul.f32 %v3479_v17, %v5670_v43 }
 0x190   : > { %v2672_v52 = vsub.f32 %v2666_v37, %v2671_v27  ;;  %3492 = vst [vmem:[%s5724_s27 + $0x2] sm:$0x3] %v2637_v0  ;;  %v2676_v7 = vadd.f32 %v2675_v25, %v2674_v13  ;;  %v2692_v40 = vmul.f32 %v3479_v17, %v5663_v51  ;;  %v2693_v58 = vmul.f32 %v3478_v14, %v5670_v43 }
 0x191   : > { %v2659_v26 = vadd.f32 %v2658_v47, %v5640_v10  ;;  %3493 = vst [vmem:[%s5734_s15 + $0x2] sm:$0x3] %v2641_v46  ;;  %v2690_v48 = vsub.f32 %v2684_v61, %v2689_v49  ;;  %v2702_v23 = vmul.f32 %v3482_v54, %v5663_v51  ;;  %v2707_v50 = vmul.f32 %v3483_v36, %v5670_v43 }
 0x192   : > { %v2673_v3 = vadd.f32 %v2672_v52, %v5647_v30  ;;  %3494 = vst [vmem:[%s5724_s27 + $0x4] sm:$0x3] %v2655_v59  ;;  %v2677_v10 = vadd.f32 %v2676_v7, %v5652_v42  ;;  %v2694_v6 = vadd.f32 %v2693_v58, %v2692_v40  ;;  %v2710_v53 = vmul.f32 %v3483_v36, %v5663_v51 }
 0x193   : > { %v2711_v29 = vmul.f32 %v3482_v54, %v5670_v43  ;;  %3495 = vst [vmem:[%s5734_s15 + $0x4] sm:$0x3] %v2659_v26  ;;  %v2691_v30 = vadd.f32 %v2690_v48, %v5659_v22  ;;  %v2708_v60 = vsub.f32 %v2702_v23, %v2707_v50  ;;  %v2720_v24 = vmul.f32 %v3486_v39, %v5663_v51 }
 0x194   : > { %v2725_v21 = vmul.f32 %v3487_v56, %v5670_v43  ;;  %3496 = vst [vmem:[%s5724_s27 + $0x6] sm:$0x3] %v2673_v3  ;;  %v2695_v42 = vadd.f32 %v2694_v6, %v5666_v5  ;;  %v2728_v20 = vmul.f32 %v3487_v56, %v5663_v51  ;;  %v2729_v28 = vmul.f32 %v3486_v39, %v5670_v43 }
 0x195   : > { %v2712_v63 = vadd.f32 %v2711_v29, %v2710_v53  ;;  %3497 = vst [vmem:[%s5734_s15 + $0x6] sm:$0x3] %v2677_v10  ;;  %v2709_v22 = vadd.f32 %v2708_v60, %v5675_v57  ;;  %v2738_v8 = vmul.f32 %v3490_v2, %v5663_v51  ;;  %v2743_v31 = vmul.f32 %v3491_v15, %v5670_v43 }
 0x196   : > { %v2726_v34 = vsub.f32 %v2720_v24, %v2725_v21  ;;  %3498 = vst [vmem:[%s5724_s27 + $0x8] sm:$0x3] %v2691_v30  ;;  %v2730_v19 = vadd.f32 %v2729_v28, %v2728_v20  ;;  %v2746_v11 = vmul.f32 %v3491_v15, %v5663_v51  ;;  %v2747_v33 = vmul.f32 %v3490_v2, %v5670_v43 }
 0x197   : > { %v2713_v5 = vadd.f32 %v2712_v63, %v5680_v41  ;;  %3499 = vst [vmem:[%s5734_s15 + $0x8] sm:$0x3] %v2695_v42  ;;  %v2744_v1 = vsub.f32 %v2738_v8, %v2743_v31  ;;  %3500 = vst [vmem:[%s5724_s27 + $0xa] sm:$0x3] %v2709_v22 }
 0x198   : > { %v2727_v57 = vadd.f32 %v2726_v34, %v5688_v18  ;;  %v2731_v12 = vadd.f32 %v2730_v19, %v5693_v44  ;;  %v2748_v32 = vadd.f32 %v2747_v33, %v2746_v11 }
 0x199   : > { %3501 = vst [vmem:[%s5734_s15 + $0xa] sm:$0x3] %v2713_v5  ;;  %v2745_v51 = vadd.f32 %v2744_v1, %v5700_v4 }
 0x19a   : > { %3502 = vst [vmem:[%s5724_s27 + $0xc] sm:$0x3] %v2727_v57  ;;  %v2749_v43 = vadd.f32 %v2748_v32, %v5705_v55  ;;  %3503 = vst [vmem:[%s5734_s15 + $0xc] sm:$0x3] %v2731_v12 }
 0x19b   : > { %3504 = vst [vmem:[%s5724_s27 + $0xe] sm:$0x3] %v2745_v51 }
 0x19c   : > { %3505 = vst [vmem:[%s5734_s15 + $0xe] sm:$0x3] %v2749_v43 }
 0x19d   : > { %3745 = shalt.err (!%p3742_p3)
}
 0x19e   : > { %s3746_s6 = scalar_lea.hbm %s5783_s9, 256  ;;  %s3750_s24 = scalar_lea.hbm %s5930_s17, 512 }
 0x19f   : > { %p3747_p10 = scmp.ne.s32.totalorder %s5783_s9, %s3746_s6  ;;  %p3751_p9 = scmp.lt.u32.totalorder %s5783_s9, %s5930_s17 }
 0x1a0   : > { %p3752_p0 = scmp.lt.u32.totalorder %s3750_s24, %s3746_s6  ;;  %p3754_p6 = scmp.lt.u32.totalorder %s3746_s6, %s5783_s9 }
 0x1a1   : > { %p3748_p2 = pnand %p3747_p10, %p5932_p13 }
 0x1a2   : > { %p3753_p8 = por %p3752_p0, %p3751_p9 }
 0x1a3   : > { %p3749_p7 = pneg %p3748_p2 }
 0x1a4   : > { %p3755_p11 = por %p3754_p6, %p3753_p8 }
 0x1a6   : > { %p3756_p4 = pnand %p3755_p11, %p3749_p7 }
 0x1a8   : > { %3759 = shalt.err (!%p3756_p4)
}
 0x1a9   : > { %s3866_s15 = smov 32   ;;  %s3867_s2 = smov 2  }
 0x1aa   : > { %3528 = dma.vmem_to_hbm [thread:$0]  (%p5932_p13), %s5785_s11, 256, %s5783_s9, %s2781_s7, %s3866_s15, %s3866_s15, %s3867_s2  }
 0x1ab   : > { %s2786_s21 = scalar_lea.sflag [#allocation11], %s4147_s13  ;;  %s3760_s5 = scalar_lea.vmem %s5796_s14, 256 }
 0x1ac   : > { %p3761_p12 = scmp.ne.s32.totalorder %s5796_s14, %s3760_s5  ;;  %s3868_s8 = smov [#allocation10]  }
 0x1ad   : > { %s3764_s18 = sshll.u32 %s3868_s8, 4  ;;  %s3765_s18 = int_to_ptr.vmem [resolvable:$false] %s3764_s18 }
 0x1ae   : > { %p3762_p1 = pnand %p3761_p12, %p5932_p13  ;;  %s3766_s30 = scalar_lea.vmem %s3765_s18, 512 }
 0x1af   : > { %p3767_p3 = scmp.lt.s32.totalorder %s5796_s14, %s3765_s18  ;;  %p3768_p10 = scmp.lt.s32.totalorder %s3766_s30, %s3760_s5 }
 0x1b0   : > { %p3763_p5 = pneg %p3762_p1 }
 0x1b1   : > { %p3769_p2 = por %p3768_p10, %p3767_p3 }
 0x1b3   : > { %p3770_p7 = pnand %p3769_p2, %p3763_p5 }
 0x1b5   : > { %3773 = shalt.err (!%p3770_p7)
}
 0x1b6   : > { %s3774_s11 = scalar_lea.hbm %s5794_s26, 256  ;;  %s3778_s0 = scalar_lea.hbm %s5931_s12, 512 }
 0x1b7   : > { %p3775_p9 = scmp.ne.s32.totalorder %s5794_s26, %s3774_s11  ;;  %p3779_p6 = scmp.lt.u32.totalorder %s5794_s26, %s5931_s12 }
 0x1b8   : > { %p3780_p11 = scmp.lt.u32.totalorder %s3778_s0, %s3774_s11  ;;  %p3782_p12 = scmp.lt.u32.totalorder %s3774_s11, %s5794_s26 }
 0x1b9   : > { %p3776_p0 = pnand %p3775_p9, %p5932_p13 }
 0x1ba   : > { %p3781_p4 = por %p3780_p11, %p3779_p6 }
 0x1bb   : > { %p3777_p8 = pneg %p3776_p0 }
 0x1bc   : > { %p3783_p1 = por %p3782_p12, %p3781_p4 }
 0x1be   : > { %p3784_p5 = pnand %p3783_p1, %p3777_p8 }
 0x1c0   : > { %3787 = shalt.err (!%p3784_p5)
}
 0x1c1   : > { %3529 = dma.vmem_to_hbm [thread:$0]  (%p5932_p13), %s5796_s14, 256, %s5794_s26, %s2786_s21, %s3866_s15, %s3866_s15, %s3867_s2  }
 0x1c2 PF: > { %s5933_s6 = sld [smem:[#allocation17_spill]]  ;;  %s5934_s16 = sld [smem:[#allocation18_spill]] }
 0x1c3   : > { %p5936_p10 = scmp.ge.s32.totalorder %s3854_s23, 2 }
 0x1c8   : > { %s2832_s25 = sand.u32 1, %s5933_s6   ;;  %p5935_p3 = scmp.ne.s32.totalorder %s5934_s16, 0 }
 0x1c9   : > { %s2833_s24 = scalar_lea.sflag [#allocation4], %s2832_s25 }
 0x1ca   : > { %p3547_p2 = pnand %p5936_p10, %p5935_p3 }
 0x1cc   : > { %3825 = dma.done.wait (!%p3547_p2), %s2833_s24, 256  }
 0x1cd   : > { %3827 = vsyncadd (!%p3547_p2), %s2833_s24, 4294967040  ;;  %s2842_s29 = scalar_lea.sflag [#allocation11], %s2832_s25 }
 0x1ce   : > { %3829 = dma.done.wait (!%p3547_p2), %s2842_s29, 256  }
 0x1cf   : > { %3831 = vsyncadd (!%p3547_p2), %s2842_s29, 4294967040  ;;  %s24_s23 = sadd.s32 1, %s3854_s23   ;;  %s5937_s13 = sld [smem:[#allocation20_spill]] }
 0x1d0   : > { %p21_p7 = scmp.ge.s32.totalorder %s24_s23, 4   ;;  %s5938_s14 = sld [smem:[#allocation19_spill]] }
 0x1d1   : > { %s5939_s18 = smov %s3838_s19  ;;  %s5940_s19 = smov %s3842_s20 }
 0x1d2   : > { %s5942_s21 = smov %s3850_s22  ;;  %23 = sbr.rel (!%p21_p7) target bundleno = 13 (0xd), region = 192 }
 0x1d5   : > { %s5941_s20 = smov %s5937_s13 }
 0x1d6   : > { %s5943_s22 = smov %s5938_s14 }
 0x1d9   :  { %2847 = vsyncpa [#allocation3], 1 }
 0x1da   :  { %2849 = vsyncpa [#allocation3 + $0x1], 1 }
 0x1db   :  { %2850 = vsyncpa [#allocation6], 1 }
 0x1dc   :  { %2851 = vsyncpa [#allocation4], 1 }
 0x1dd   :  { %2853 = vsyncpa [#allocation4 + $0x1], 1 }
 0x1de   :  { %2854 = vsyncpa [#allocation11], 1 }
 0x1df   :  { %2856 = vsyncpa [#allocation11 + $0x1], 1 }

</bundles_post_ra>
